<compile_context>
chip_gen: v6e
topology: v6e:2x2x1
jax: 0.10.0
libtpu: 0.0.40
codegen_flags: <defaults>
</compile_context>

<pallas_src>
import functools

import jax
import jax.numpy as jnp
from jax.experimental import pallas as pl
from jax.experimental.pallas import tpu as pltpu


# ----------------------------------------------------------------------- size helpers
def _round_up(x, m):
    return ((x + m - 1) // m) * m


def _encoder_sizes(H, W):
    H1, W1 = (H - 3) // 2 + 1, (W - 3) // 2 + 1      # conv1, stride 2
    H2, W2 = H1 - 2, W1 - 2                          # conv2, stride 1
    H3, W3 = (H2 - 3) // 2 + 1, (W2 - 3) // 2 + 1    # conv3, stride 2
    P1 = H1 * W1                                     # conv1 rows on the flat W1-wide grid
    P2 = H2 * W1                                     # conv2 rows on the flat W1-wide grid
    pad_rows = _round_up(max(P1, P2 + 2 * W1 + 2), 8)
    return dict(H1=H1, W1=W1, H2=H2, W2=W2, H3=H3, W3=W3,
                P1=P1, P2=P2, pad_rows=pad_rows, HW3=H3 * W3)


# ----------------------------------------------------------- host-side patch building
def _im2col_stride2(x):
    """x: (N, H, W, C) -> (N, Ho*Wo, 9*C) patches for a 3x3 / stride-2 / valid conv."""
    N, H, W, C = x.shape
    Ho, Wo = (H - 3) // 2 + 1, (W - 3) // 2 + 1
    cols = []
    for kh in range(3):
        for kw in range(3):
            cols.append(x[:, kh:kh + 2 * (Ho - 1) + 1:2, kw:kw + 2 * (Wo - 1) + 1:2, :])
    return jnp.concatenate(cols, axis=-1).reshape(N, Ho * Wo, 9 * C)


def _build_patches(imgs, sz):
    """Zero-padded conv1 im2col: rows padded P1 -> pad_rows (in-kernel conv1 store is a
    full sublane-aligned write, every conv2 tap slab is finite -> no scratch zeroing) and
    K padded 9*Cin -> 128 (full-lane patch DMA / MXU feed)."""
    pat = _im2col_stride2(imgs)                                   # (N, P1, 9*Cin)
    N, P1, K = pat.shape
    assert K <= 128, "9 * Cin must fit the 128-lane conv1 K padding"
    pat = jnp.pad(pat, ((0, 0), (0, sz["pad_rows"] - P1), (0, 128 - K)))
    return pat.astype(jnp.bfloat16)                               # (N, pad_rows, 128)


def _build_conv3_select(sz):
    """(9, HW3, P2) 0/1 tap-gather matrices for the stride-2 conv3 on the flat conv2 map
    (applied per tap AFTER projecting h2 to 4 channels -> tiny matmuls)."""
    mats = []
    for kh in range(3):
        for kw in range(3):
            idx = [(2 * oh + kh) * sz["W1"] + (2 * ow + kw)
                   for oh in range(sz["H3"]) for ow in range(sz["W3"])]
            mats.append(jax.nn.one_hot(jnp.asarray(idx, jnp.int32), sz["P2"],
                                       dtype=jnp.float32))
    return jnp.stack(mats).astype(jnp.bfloat16)


# ---------------------------------------------- affine_grid / bilinear warp (plain JAX)
def _affine_grid(theta, H, W):
    # F.affine_grid, align_corners=False: coord_i = (2*i + 1)/size - 1
    xs = (2.0 * jnp.arange(W, dtype=jnp.float32) + 1.0) / W - 1.0
    ys = (2.0 * jnp.arange(H, dtype=jnp.float32) + 1.0) / H - 1.0
    gx = jnp.broadcast_to(xs[None, :], (H, W))
    gy = jnp.broadcast_to(ys[:, None], (H, W))
    base = jnp.stack([gx, gy, jnp.ones((H, W), jnp.float32)], axis=-1)      # (H,W,3)
    return jnp.einsum("bij,hwj->bhwi", theta, base)                          # (N,H,W,2)


def _build_warp_matrices(theta, H, W):
    """Per-image (H*W, H*W) matrix equivalent to F.grid_sample(bilinear, zeros,
    align_corners=False) on the affine grid; applied as a matmul inside the kernel."""
    grid = _affine_grid(theta, H, W)
    ix = ((grid[..., 0] + 1.0) * W - 1.0) / 2.0
    iy = ((grid[..., 1] + 1.0) * H - 1.0) / 2.0
    ix0, iy0 = jnp.floor(ix), jnp.floor(iy)
    ix1, iy1 = ix0 + 1.0, iy0 + 1.0
    wx1, wy1 = ix - ix0, iy - iy0
    wx0, wy0 = 1.0 - wx1, 1.0 - wy1

    def corner(iyf, ixf, w):
        valid = ((ixf >= 0) & (ixf <= W - 1) & (iyf >= 0) & (iyf <= H - 1))
        idx = (jnp.clip(iyf, 0, H - 1).astype(jnp.int32) * W
               + jnp.clip(ixf, 0, W - 1).astype(jnp.int32))
        return jax.nn.one_hot(idx, H * W, dtype=jnp.float32) * (
            w * valid.astype(jnp.float32))[..., None]

    m = (corner(iy0, ix0, wy0 * wx0) + corner(iy0, ix1, wy0 * wx1)
         + corner(iy1, ix0, wy1 * wx0) + corner(iy1, ix1, wy1 * wx1))
    return m.reshape(theta.shape[0], H * W, H * W)


# ------------------------------------------------------------- fused encoder kernel
def _encoder_kernel(patches_ref, w1_ref, w2p_ref, w2s_ref, w3_ref, b_ref, s3_ref,
                    warp_ref, out_ref, h1_ref, *, w1o, p2, pad_rows, n_img):
    bf = jnp.bfloat16
    b1 = b_ref[0, :, 0:128]
    b2 = b_ref[0, :, 128:192]
    b3 = b_ref[0, :, 192:196]
    # conv1 (stride 2): ONE bf16 MXU matmul over the stacked, pre-padded im2col patches
    # of all n_img images; full, sublane-aligned store into the flat conv1 scratch
    # (pad rows become relu(b1): finite and never selected by valid outputs).
    h1 = jnp.dot(patches_ref[0], w1_ref[0], preferred_element_type=jnp.float32)
    h1_ref[...] = jnp.maximum(h1 + b1, 0.0)
    offs = [(t // 3) * w1o + (t % 3) for t in range(9)]
    for g in range(n_img):
        base = g * pad_rows
        # conv2 (stride 1): 4 paired K=256 dots + 1 K=128 dot over contiguous slabs of
        # the W1-wide flat conv1 map (taps 2q / 2q+1 stacked along lanes).
        acc2 = jnp.dot(h1_ref[base + offs[8]:base + offs[8] + p2, :].astype(bf),
                       w2s_ref[0], preferred_element_type=jnp.float32)
        for q in range(4):
            oa, ob = offs[2 * q], offs[2 * q + 1]
            slab = jnp.concatenate(
                [h1_ref[base + oa:base + oa + p2, :],
                 h1_ref[base + ob:base + ob + p2, :]], axis=-1).astype(bf)
            acc2 = acc2 + jnp.dot(slab, w2p_ref[0, q],
                                  preferred_element_type=jnp.float32)
        h2 = jnp.maximum(acc2 + b2, 0.0).astype(bf)                      # (P2, 64)
        # conv3 (stride 2), reassociated: project to 4 channels first, then gather the
        # strided taps with tiny 0/1 selection matmuls (s3_t @ q_t).
        acc3 = None
        for t in range(9):
            qt = jnp.dot(h2, w3_ref[0, t], preferred_element_type=jnp.float32)
            c = jnp.dot(s3_ref[t], qt.astype(bf), preferred_element_type=jnp.float32)
            acc3 = c if acc3 is None else acc3 + c
        h3 = jnp.maximum(acc3 + b3, 0.0).astype(bf)                      # (HW3, 4)
        # bilinear grid_sample (identity warp for ego) folded into a (HW3, HW3) matmul
        out_ref[g] = jnp.dot(warp_ref[0, g], h3,
                             preferred_element_type=jnp.float32).astype(out_ref.dtype)


def encoder_apply(params, patches, warp, s3, batch, n_img, sz):
    num_steps = patches.shape[0]
    hw3, p2, pad_rows = sz["HW3"], sz["P2"], sz["pad_rows"]
    boundary = batch // n_img        # steps < boundary are ego images (weight set 0)

    def sel(i):                      # flips once -> weight blocks re-DMA'd only once
        return (i >= boundary).astype(jnp.int32)

    kern = functools.partial(_encoder_kernel, w1o=sz["W1"], p2=p2,
                             pad_rows=pad_rows, n_img=n_img)
    return pl.pallas_call(
        kern,
        out_shape=jax.ShapeDtypeStruct((num_steps * n_img, hw3, 4), jnp.bfloat16),
        grid=(num_steps,),
        in_specs=[
            pl.BlockSpec((1, n_img * pad_rows, 128), lambda i: (i, 0, 0)),
            pl.BlockSpec((1, 128, 128), lambda i: (sel(i), 0, 0)),
            pl.BlockSpec((1, 4, 256, 64), lambda i: (sel(i), 0, 0, 0)),
            pl.BlockSpec((1, 128, 64), lambda i: (sel(i), 0, 0)),
            pl.BlockSpec((1, 9, 64, 4), lambda i: (sel(i), 0, 0, 0)),
            pl.BlockSpec((1, 1, 256), lambda i: (sel(i), 0, 0)),
            pl.BlockSpec((9, hw3, p2), lambda i: (0, 0, 0)),
            pl.BlockSpec((1, n_img, hw3, hw3), lambda i: (i, 0, 0, 0)),
        ],
        out_specs=pl.BlockSpec((n_img, hw3, 4), lambda i: (i, 0, 0)),
        scratch_shapes=[pltpu.VMEM((n_img * pad_rows, 128), jnp.float32)],
        compiler_params=pltpu.CompilerParams(dimension_semantics=("parallel",)),
    )(patches, params["enc_w1"], params["enc_w2p"], params["enc_w2s"],
      params["enc_w3"], params["enc_b"], s3, warp)


# ------------------------------------------- fused GCN x3 + pool + meta MLP + fc head
def _head_layout(feat_dim, hidden):
    """Static offsets of the packed head weight / bias slabs."""
    assert 3 * hidden + 107 <= 256, "bias-slab packing assumes hidden <= 49"
    r_fc1 = _round_up(feat_dim, 8)
    r_fc2 = _round_up(r_fc1 + hidden + 8, 8)
    r_fc3 = r_fc2 + 256
    return dict(fd=feat_dim, h=hidden, r_fc1=r_fc1, r_fc2=r_fc2, r_fc3=r_fc3,
                rows=_round_up(r_fc3 + 64, 8),
                b_m1=3 * hidden, b_m2=3 * hidden + 16,
                b_f2=3 * hidden + 24, b_f3=3 * hidden + 88, w_m1=3 * hidden + 91)


def _head_kernel(feat_ref, sp_ref, w_ref, b_ref, o_ref, *, batch, agents, L):
    # 4-clique + self loops + normalize=True => every edge weight = 1/agents and every
    # node max-aggregates over all `agents` agents of its sample (documented assumption).
    # After gcn1 every agent of a sample is identical, so gcn2/gcn3/global_max_pool
    # collapse to per-sample math (values identical to the torch code).
    bf = jnp.bfloat16
    fd, h = L["fd"], L["h"]
    norm = 1.0 / float(agents)
    hf = jnp.dot(feat_ref[...], w_ref[0:fd, 0:h], preferred_element_type=jnp.float32)
    agg = hf[0:batch]
    for a in range(1, agents):
        agg = jnp.maximum(agg, hf[a * batch:(a + 1) * batch])
    z = jnp.maximum(norm * agg + b_ref[1:2, 0:h], 0.0)
    z = jnp.maximum(
        norm * jnp.dot(z.astype(bf), w_ref[0:h, h:2 * h],
                       preferred_element_type=jnp.float32) + b_ref[1:2, h:2 * h], 0.0)
    g = (norm * jnp.dot(z.astype(bf), w_ref[0:h, 2 * h:3 * h],
                        preferred_element_type=jnp.float32) + b_ref[1:2, 2 * h:3 * h])
    # speed meta-MLP (fc1_meta has K=1 -> broadcasted multiply)
    m = jnp.maximum(sp_ref[...] * b_ref[1:2, L["w_m1"]:L["w_m1"] + 16]
                    + b_ref[1:2, L["b_m1"]:L["b_m1"] + 16], 0.0)
    m = jnp.maximum(jnp.dot(m.astype(bf), w_ref[0:16, 3 * h:3 * h + 8],
                            preferred_element_type=jnp.float32)
                    + b_ref[1:2, L["b_m2"]:L["b_m2"] + 8], 0.0)
    # fc1 on concat([g, m]) == g @ W1[:h] + m @ W1[h:]
    hh = jnp.maximum(
        jnp.dot(g.astype(bf), w_ref[L["r_fc1"]:L["r_fc1"] + h, :],
                preferred_element_type=jnp.float32)
        + jnp.dot(m.astype(bf), w_ref[L["r_fc1"] + h:L["r_fc1"] + h + 8, :],
                  preferred_element_type=jnp.float32)
        + b_ref[0:1, :], 0.0)
    hh = jnp.maximum(jnp.dot(hh.astype(bf), w_ref[L["r_fc2"]:L["r_fc2"] + 256, 0:64],
                             preferred_element_type=jnp.float32)
                     + b_ref[1:2, L["b_f2"]:L["b_f2"] + 64], 0.0)
    o_ref[...] = (jnp.dot(hh.astype(bf), w_ref[L["r_fc3"]:L["r_fc3"] + 64, 0:3],
                          preferred_element_type=jnp.float32)
                  + b_ref[1:2, L["b_f3"]:L["b_f3"] + 3])


def head_apply(params, feats, speed, batch, agents):
    L = _head_layout(params["feat_dim"], params["hidden"])
    kern = functools.partial(_head_kernel, batch=batch, agents=agents, L=L)
    n, fd = feats.shape
    wshape, bshape = params["head_w"].shape, params["head_b"].shape
    return pl.pallas_call(
        kern,
        out_shape=jax.ShapeDtypeStruct((batch, 3), jnp.float32),
        grid=(1,),
        in_specs=[
            pl.BlockSpec((n, fd), lambda i: (0, 0)),
            pl.BlockSpec((batch, 1), lambda i: (0, 0)),
            pl.BlockSpec(wshape, lambda i: (0, 0)),
            pl.BlockSpec(bshape, lambda i: (0, 0)),
        ],
        out_specs=pl.BlockSpec((batch, 3), lambda i: (0, 0)),
        compiler_params=pltpu.CompilerParams(dimension_semantics=("arbitrary",)),
    )(feats, speed, params["head_w"], params["head_b"])


# ----------------------------------------------------------------------- full forward
def v2vnet_forward(params, ego_lidar, ego_speed, other_lidar, other_transform):
    B, Cin, H, W = ego_lidar.shape
    n_other = other_lidar.shape[1]
    sz = _encoder_sizes(H, W)
    hw3 = sz["HW3"]
    n_img = 2 if B % 2 == 0 else 1      # images per grid step (balanced across 2 TCs)

    # --- image stack: [ego rows, then others agent-major] (= torch.cat row order) ----
    ego_x = jnp.transpose(ego_lidar, (0, 2, 3, 1))                             # (B,H,W,C)
    oth = jnp.swapaxes(other_lidar, 0, 1).reshape(n_other * B, Cin, H, W)
    oth_x = jnp.transpose(oth, (0, 2, 3, 1))                                   # (3B,H,W,C)
    imgs = jnp.concatenate([ego_x, oth_x], axis=0)                             # (4B,H,W,C)
    patches = _build_patches(imgs, sz)                                         # (4B,pad,128)
    n_total = patches.shape[0]
    num_steps = n_total // n_img
    patches = patches.reshape(num_steps, n_img * sz["pad_rows"], 128)

    # --- per-image bilinear warp matrices (identity for ego) -------------------------
    indice = jnp.array([0, 1, 3], dtype=jnp.int32)
    theta = jnp.swapaxes(other_transform, 0, 1)[:, :, :2, :][..., indice]      # (3,B,2,3)
    theta = theta.reshape(n_other * B, 2, 3)
    warp_oth = _build_warp_matrices(theta, sz["H3"], sz["W3"])                 # (3B,36,36)
    warp_ego = jnp.tile(jnp.eye(hw3, dtype=jnp.float32)[None], (B, 1, 1))
    warp = jnp.concatenate([warp_ego, warp_oth], axis=0).astype(jnp.bfloat16)
    warp = warp.reshape(num_steps, n_img, hw3, hw3)

    s3 = _build_conv3_select(sz)                                               # constant

    feats = encoder_apply(params, patches, warp, s3, B, n_img, sz)             # (4B,36,4)
    feats = feats.reshape(n_total, hw3 * 4)                                    # NHWC flatten

    speed = ego_speed[:, None].astype(jnp.float32)
    pred = head_apply(params, feats, speed, B, n_other + 1)                    # (B,3)
    return pred[:, 0], pred[:, 1], pred[:, 2]


# ------------------------------------------------------------------------------- init
def _init_linear(key, fin, fout):
    kw, kb = jax.random.split(key)
    scale = 1.0 / jnp.sqrt(jnp.float32(fin))
    w = jax.random.normal(kw, (fin, fout), jnp.float32) * scale
    b = jax.random.normal(kb, (fout,), jnp.float32) * scale
    return w, b


def _init_encoder(key, cin):
    ks = jax.random.split(key, 3)
    ws, bs = [], []
    for k, (ci, co) in zip(ks, [(cin, 128), (128, 64), (64, 4)]):
        kw, kb = jax.random.split(k)
        scale = 1.0 / jnp.sqrt(jnp.float32(9 * ci))
        ws.append(jax.random.normal(kw, (3, 3, ci, co), jnp.float32) * scale)
        bs.append(jax.random.normal(kb, (co,), jnp.float32) * scale)
    return ws, bs


def _pack_encoder_set(ws, bs, cin):
    """Kernel-friendly layouts: conv1 (9*Cin,128) K-padded to 128; conv2 taps paired
    into K=256 slabs + a single K=128 tap; conv3 tap-major; biases in one 256-wide row."""
    w1 = ws[0].reshape(9 * cin, 128)
    w1 = jnp.pad(w1, ((0, 128 - 9 * cin), (0, 0)))
    w2 = ws[1].reshape(9, 128, 64)
    w2p = jnp.stack([jnp.concatenate([w2[2 * p], w2[2 * p + 1]], axis=0)
                     for p in range(4)])                            # (4,256,64)
    w2s = w2[8]                                                     # (128,64)
    w3 = ws[2].reshape(9, 64, 4)
    b = jnp.zeros((1, 256), jnp.float32)
    b = b.at[0, 0:128].set(bs[0]).at[0, 128:192].set(bs[1]).at[0, 192:196].set(bs[2])
    return w1, w2p, w2s, w3, b


def init_params(key, cin, hw3, num_hidden):
    feat_dim = 4 * hw3
    h = num_hidden
    ks = jax.random.split(key, 10)
    we, be = _init_encoder(ks[0], cin)     # ego encoder
    wo, bo = _init_encoder(ks[1], cin)     # other-agent encoder
    e = _pack_encoder_set(we, be, cin)
    o = _pack_encoder_set(wo, bo, cin)
    p = {
        "enc_w1": jnp.stack([e[0], o[0]]).astype(jnp.bfloat16),    # (2,128,128)
        "enc_w2p": jnp.stack([e[1], o[1]]).astype(jnp.bfloat16),   # (2,4,256,64)
        "enc_w2s": jnp.stack([e[2], o[2]]).astype(jnp.bfloat16),   # (2,128,64)
        "enc_w3": jnp.stack([e[3], o[3]]).astype(jnp.bfloat16),    # (2,9,64,4)
        "enc_b": jnp.stack([e[4], o[4]]),                          # (2,1,256) f32
    }
    # ---- head weights packed into ONE bf16 weight slab + ONE f32 bias slab ----------
    L = _head_layout(feat_dim, h)
    gcn1_w, gcn1_b = _init_linear(ks[2], feat_dim, h)
    # gcn1_w is defined in the PyTorch NCHW-flatten row order (c*HW + hw); permute its
    # rows once so it directly consumes the NHWC (hw*4 + c) flatten the encoder emits.
    j = jnp.arange(feat_dim)
    gcn1_w = gcn1_w[(j % 4) * hw3 + (j // 4)]
    gcn2_w, gcn2_b = _init_linear(ks[3], h, h)
    gcn3_w, gcn3_b = _init_linear(ks[4], h, h)
    w1_meta, b1_meta = _init_linear(ks[5], 1, 16)
    w2_meta, b2_meta = _init_linear(ks[6], 16, 8)
    fc1_w, fc1_b = _init_linear(ks[7], h + 8, 256)
    fc2_w, fc2_b = _init_linear(ks[8], 256, 64)
    fc3_w, fc3_b = _init_linear(ks[9], 64, 3)
    W = jnp.zeros((L["rows"], 256), jnp.float32)
    W = W.at[0:feat_dim, 0:h].set(gcn1_w)
    W = W.at[0:h, h:2 * h].set(gcn2_w)
    W = W.at[0:h, 2 * h:3 * h].set(gcn3_w)
    W = W.at[0:16, 3 * h:3 * h + 8].set(w2_meta)
    W = W.at[L["r_fc1"]:L["r_fc1"] + h + 8, :].set(fc1_w)
    W = W.at[L["r_fc2"]:L["r_fc2"] + 256, 0:64].set(fc2_w)
    W = W.at[L["r_fc3"]:L["r_fc3"] + 64, 0:3].set(fc3_w)
    Bv = jnp.zeros((8, 256), jnp.float32)
    Bv = Bv.at[0, :].set(fc1_b)
    Bv = Bv.at[1, 0:h].set(gcn1_b).at[1, h:2 * h].set(gcn2_b).at[1, 2 * h:3 * h].set(gcn3_b)
    Bv = Bv.at[1, L["b_m1"]:L["b_m1"] + 16].set(b1_meta)
    Bv = Bv.at[1, L["b_m2"]:L["b_m2"] + 8].set(b2_meta)
    Bv = Bv.at[1, L["b_f2"]:L["b_f2"] + 64].set(fc2_b)
    Bv = Bv.at[1, L["b_f3"]:L["b_f3"] + 3].set(fc3_b)
    Bv = Bv.at[1, L["w_m1"]:L["w_m1"] + 16].set(w1_meta[0])
    p["head_w"] = W.astype(jnp.bfloat16)
    p["head_b"] = Bv
    p["hidden"] = num_hidden
    p["feat_dim"] = feat_dim
    return p


# ------------------------------------------------------------------------------- main
if __name__ == "__main__":
    # config: frame_stack=1 -> 10 input channels, num_hidden=32, max_num_neighbors=4
    B, C_in, H, W = 2, 10, 31, 31
    n_other = 3            # ego + 3 others = 4 agents per sample
    num_hidden = 32

    sz = _encoder_sizes(H, W)          # 31 -> 15 -> 13 -> 6 ; feat_dim = 4*6*6 = 144
    key = jax.random.PRNGKey(0)
    kp, k1, k2, k3, k4 = jax.random.split(key, 5)
    params = init_params(kp, C_in, sz["HW3"], num_hidden)

    ego_lidar = jax.random.normal(k1, (B, C_in, H, W), jnp.float32)
    ego_speed = jax.random.uniform(k2, (B,), jnp.float32) * 10.0
    other_lidar = jax.random.normal(k3, (B, n_other, C_in, H, W), jnp.float32)
    other_transform = (jnp.tile(jnp.eye(4, dtype=jnp.float32)[None, None],
                                (B, n_other, 1, 1))
                       + 0.05 * jax.random.normal(k4, (B, n_other, 4, 4), jnp.float32))

    fwd = jax.jit(functools.partial(v2vnet_forward, params))
    throttle, brake, steer = fwd(ego_lidar, ego_speed, other_lidar, other_transform)
    jax.block_until_ready((throttle, brake, steer))
    assert throttle.shape == (B,) and brake.shape == (B,) and steer.shape == (B,)
    print("KERNEL_OK")
</pallas_src>

<mosaic_0001>
module attributes {stable_mosaic.version = 11 : i64} {
  func.func @_head_kernel(%arg0: i32, %arg1: memref<8x144xbf16, #tpu.memory_space<vmem>>, %arg2: memref<2x1xf32, #tpu.memory_space<vmem>>, %arg3: memref<504x256xbf16, #tpu.memory_space<vmem>>, %arg4: memref<8x256xf32, #tpu.memory_space<vmem>>, %arg5: memref<2x3xf32, #tpu.memory_space<vmem>>) attributes {dimension_semantics = [#tpu.dimension_semantics<arbitrary>], iteration_bounds = array<i64: 1>, scalar_prefetch = 0 : i64, scratch_operands = 0 : i64, tpu.core_type = #tpu.core_type<tc>, window_params = [{pipeline_mode = #tpu.pipeline_mode<synchronous>, transform_indices = @transform_0, window_bounds = array<i64: 8, 144>}, {pipeline_mode = #tpu.pipeline_mode<synchronous>, transform_indices = @transform_1, window_bounds = array<i64: 2, 1>}, {pipeline_mode = #tpu.pipeline_mode<synchronous>, transform_indices = @transform_2, window_bounds = array<i64: 504, 256>}, {pipeline_mode = #tpu.pipeline_mode<synchronous>, transform_indices = @transform_3, window_bounds = array<i64: 8, 256>}, {pipeline_mode = #tpu.pipeline_mode<synchronous>, transform_indices = @transform_4, window_bounds = array<i64: 2, 3>}]} {
    %c0 = arith.constant 0 : index
    %c0_0 = arith.constant 0 : index
    %0 = vector.load %arg1[%c0, %c0_0] : memref<8x144xbf16, #tpu.memory_space<vmem>>, vector<8x144xbf16>
    %c0_1 = arith.constant 0 : index
    %c0_2 = arith.constant 0 : index
    %1 = vector.load %arg3[%c0_1, %c0_2] : memref<504x256xbf16, #tpu.memory_space<vmem>>, vector<144x32xbf16>
    %cst = arith.constant dense<0.000000e+00> : vector<8x32xf32>
    %2 = tpu.matmul %0, %1, %cst {dimension_numbers = #tpu.dot_dimension_numbers<[1], [0], [0], [1], [0, 0, 1, 1], [], []>} : vector<8x144xbf16>, vector<144x32xbf16>, vector<8x32xf32> -> vector<8x32xf32>
    %3 = vector.extract_strided_slice %2 {offsets = [0, 0], sizes = [2, 32], strides = [1, 1]} : vector<8x32xf32> to vector<2x32xf32>
    %4 = vector.extract_strided_slice %2 {offsets = [2, 0], sizes = [2, 32], strides = [1, 1]} : vector<8x32xf32> to vector<2x32xf32>
    %5 = arith.maximumf %3, %4 : vector<2x32xf32>
    %6 = vector.extract_strided_slice %2 {offsets = [4, 0], sizes = [2, 32], strides = [1, 1]} : vector<8x32xf32> to vector<2x32xf32>
    %7 = arith.maximumf %5, %6 : vector<2x32xf32>
    %8 = vector.extract_strided_slice %2 {offsets = [6, 0], sizes = [2, 32], strides = [1, 1]} : vector<8x32xf32> to vector<2x32xf32>
    %9 = arith.maximumf %7, %8 : vector<2x32xf32>
    %cst_3 = arith.constant 2.500000e-01 : f32
    %10 = vector.broadcast %cst_3 : f32 to vector<2x32xf32>
    %11 = arith.mulf %10, %9 : vector<2x32xf32>
    %c1 = arith.constant 1 : index
    %c0_4 = arith.constant 0 : index
    %12 = vector.load %arg4[%c1, %c0_4] : memref<8x256xf32, #tpu.memory_space<vmem>>, vector<1x32xf32>
    %13 = vector.broadcast %12 : vector<1x32xf32> to vector<2x32xf32>
    %14 = arith.addf %11, %13 : vector<2x32xf32>
    %cst_5 = arith.constant 0.000000e+00 : f32
    %15 = vector.broadcast %cst_5 : f32 to vector<2x32xf32>
    %16 = arith.maximumf %14, %15 : vector<2x32xf32>
    %17 = arith.truncf %16 : vector<2x32xf32> to vector<2x32xbf16>
    %c0_6 = arith.constant 0 : index
    %c32 = arith.constant 32 : index
    %18 = vector.load %arg3[%c0_6, %c32] : memref<504x256xbf16, #tpu.memory_space<vmem>>, vector<32x32xbf16>
    %cst_7 = arith.constant dense<0.000000e+00> : vector<2x32xf32>
    %19 = tpu.matmul %17, %18, %cst_7 {dimension_numbers = #tpu.dot_dimension_numbers<[1], [0], [0], [1], [0, 0, 1, 1], [], []>} : vector<2x32xbf16>, vector<32x32xbf16>, vector<2x32xf32> -> vector<2x32xf32>
    %cst_8 = arith.constant 2.500000e-01 : f32
    %20 = vector.broadcast %cst_8 : f32 to vector<2x32xf32>
    %21 = arith.mulf %20, %19 : vector<2x32xf32>
    %c1_9 = arith.constant 1 : index
    %c32_10 = arith.constant 32 : index
    %22 = vector.load %arg4[%c1_9, %c32_10] : memref<8x256xf32, #tpu.memory_space<vmem>>, vector<1x32xf32>
    %23 = vector.broadcast %22 : vector<1x32xf32> to vector<2x32xf32>
    %24 = arith.addf %21, %23 : vector<2x32xf32>
    %cst_11 = arith.constant 0.000000e+00 : f32
    %25 = vector.broadcast %cst_11 : f32 to vector<2x32xf32>
    %26 = arith.maximumf %24, %25 : vector<2x32xf32>
    %27 = arith.truncf %26 : vector<2x32xf32> to vector<2x32xbf16>
    %c0_12 = arith.constant 0 : index
    %c64 = arith.constant 64 : index
    %28 = vector.load %arg3[%c0_12, %c64] : memref<504x256xbf16, #tpu.memory_space<vmem>>, vector<32x32xbf16>
    %cst_13 = arith.constant dense<0.000000e+00> : vector<2x32xf32>
    %29 = tpu.matmul %27, %28, %cst_13 {dimension_numbers = #tpu.dot_dimension_numbers<[1], [0], [0], [1], [0, 0, 1, 1], [], []>} : vector<2x32xbf16>, vector<32x32xbf16>, vector<2x32xf32> -> vector<2x32xf32>
    %cst_14 = arith.constant 2.500000e-01 : f32
    %30 = vector.broadcast %cst_14 : f32 to vector<2x32xf32>
    %31 = arith.mulf %30, %29 : vector<2x32xf32>
    %c1_15 = arith.constant 1 : index
    %c64_16 = arith.constant 64 : index
    %32 = vector.load %arg4[%c1_15, %c64_16] : memref<8x256xf32, #tpu.memory_space<vmem>>, vector<1x32xf32>
    %33 = vector.broadcast %32 : vector<1x32xf32> to vector<2x32xf32>
    %34 = arith.addf %31, %33 : vector<2x32xf32>
    %c0_17 = arith.constant 0 : index
    %c0_18 = arith.constant 0 : index
    %35 = vector.load %arg2[%c0_17, %c0_18] : memref<2x1xf32, #tpu.memory_space<vmem>>, vector<2x1xf32>
    %c1_19 = arith.constant 1 : index
    %c187 = arith.constant 187 : index
    %36 = vector.load %arg4[%c1_19, %c187] : memref<8x256xf32, #tpu.memory_space<vmem>>, vector<1x16xf32>
    %37 = vector.broadcast %35 : vector<2x1xf32> to vector<2x16xf32>
    %38 = vector.broadcast %36 : vector<1x16xf32> to vector<2x16xf32>
    %39 = arith.mulf %37, %38 : vector<2x16xf32>
    %c1_20 = arith.constant 1 : index
    %c96 = arith.constant 96 : index
    %40 = vector.load %arg4[%c1_20, %c96] : memref<8x256xf32, #tpu.memory_space<vmem>>, vector<1x16xf32>
    %41 = vector.broadcast %40 : vector<1x16xf32> to vector<2x16xf32>
    %42 = arith.addf %39, %41 : vector<2x16xf32>
    %cst_21 = arith.constant 0.000000e+00 : f32
    %43 = vector.broadcast %cst_21 : f32 to vector<2x16xf32>
    %44 = arith.maximumf %42, %43 : vector<2x16xf32>
    %45 = arith.truncf %44 : vector<2x16xf32> to vector<2x16xbf16>
    %c0_22 = arith.constant 0 : index
    %c96_23 = arith.constant 96 : index
    %46 = vector.load %arg3[%c0_22, %c96_23] : memref<504x256xbf16, #tpu.memory_space<vmem>>, vector<16x8xbf16>
    %cst_24 = arith.constant dense<0.000000e+00> : vector<2x8xf32>
    %47 = tpu.matmul %45, %46, %cst_24 {dimension_numbers = #tpu.dot_dimension_numbers<[1], [0], [0], [1], [0, 0, 1, 1], [], []>} : vector<2x16xbf16>, vector<16x8xbf16>, vector<2x8xf32> -> vector<2x8xf32>
    %c1_25 = arith.constant 1 : index
    %c112 = arith.constant 112 : index
    %48 = vector.load %arg4[%c1_25, %c112] : memref<8x256xf32, #tpu.memory_space<vmem>>, vector<1x8xf32>
    %49 = vector.broadcast %48 : vector<1x8xf32> to vector<2x8xf32>
    %50 = arith.addf %47, %49 : vector<2x8xf32>
    %cst_26 = arith.constant 0.000000e+00 : f32
    %51 = vector.broadcast %cst_26 : f32 to vector<2x8xf32>
    %52 = arith.maximumf %50, %51 : vector<2x8xf32>
    %53 = arith.truncf %34 : vector<2x32xf32> to vector<2x32xbf16>
    %c144 = arith.constant 144 : index
    %c0_27 = arith.constant 0 : index
    %54 = vector.load %arg3[%c144, %c0_27] : memref<504x256xbf16, #tpu.memory_space<vmem>>, vector<32x256xbf16>
    %cst_28 = arith.constant dense<0.000000e+00> : vector<2x256xf32>
    %55 = tpu.matmul %53, %54, %cst_28 {dimension_numbers = #tpu.dot_dimension_numbers<[1], [0], [0], [1], [0, 0, 1, 1], [], []>} : vector<2x32xbf16>, vector<32x256xbf16>, vector<2x256xf32> -> vector<2x256xf32>
    %56 = arith.truncf %52 : vector<2x8xf32> to vector<2x8xbf16>
    %c176 = arith.constant 176 : index
    %c0_29 = arith.constant 0 : index
    %57 = vector.load %arg3[%c176, %c0_29] : memref<504x256xbf16, #tpu.memory_space<vmem>>, vector<8x256xbf16>
    %cst_30 = arith.constant dense<0.000000e+00> : vector<2x256xf32>
    %58 = tpu.matmul %56, %57, %cst_30 {dimension_numbers = #tpu.dot_dimension_numbers<[1], [0], [0], [1], [0, 0, 1, 1], [], []>} : vector<2x8xbf16>, vector<8x256xbf16>, vector<2x256xf32> -> vector<2x256xf32>
    %59 = arith.addf %55, %58 : vector<2x256xf32>
    %c0_31 = arith.constant 0 : index
    %c0_32 = arith.constant 0 : index
    %60 = vector.load %arg4[%c0_31, %c0_32] : memref<8x256xf32, #tpu.memory_space<vmem>>, vector<1x256xf32>
    %61 = vector.broadcast %60 : vector<1x256xf32> to vector<2x256xf32>
    %62 = arith.addf %59, %61 : vector<2x256xf32>
    %cst_33 = arith.constant 0.000000e+00 : f32
    %63 = vector.broadcast %cst_33 : f32 to vector<2x256xf32>
    %64 = arith.maximumf %62, %63 : vector<2x256xf32>
    %65 = arith.truncf %64 : vector<2x256xf32> to vector<2x256xbf16>
    %c184 = arith.constant 184 : index
    %c0_34 = arith.constant 0 : index
    %66 = vector.load %arg3[%c184, %c0_34] : memref<504x256xbf16, #tpu.memory_space<vmem>>, vector<256x64xbf16>
    %cst_35 = arith.constant dense<0.000000e+00> : vector<2x64xf32>
    %67 = tpu.matmul %65, %66, %cst_35 {dimension_numbers = #tpu.dot_dimension_numbers<[1], [0], [0], [1], [0, 0, 1, 1], [], []>} : vector<2x256xbf16>, vector<256x64xbf16>, vector<2x64xf32> -> vector<2x64xf32>
    %c1_36 = arith.constant 1 : index
    %c120 = arith.constant 120 : index
    %68 = vector.load %arg4[%c1_36, %c120] : memref<8x256xf32, #tpu.memory_space<vmem>>, vector<1x64xf32>
    %69 = vector.broadcast %68 : vector<1x64xf32> to vector<2x64xf32>
    %70 = arith.addf %67, %69 : vector<2x64xf32>
    %cst_37 = arith.constant 0.000000e+00 : f32
    %71 = vector.broadcast %cst_37 : f32 to vector<2x64xf32>
    %72 = arith.maximumf %70, %71 : vector<2x64xf32>
    %73 = arith.truncf %72 : vector<2x64xf32> to vector<2x64xbf16>
    %c440 = arith.constant 440 : index
    %c0_38 = arith.constant 0 : index
    %74 = vector.load %arg3[%c440, %c0_38] : memref<504x256xbf16, #tpu.memory_space<vmem>>, vector<64x3xbf16>
    %cst_39 = arith.constant dense<0.000000e+00> : vector<2x3xf32>
    %75 = tpu.matmul %73, %74, %cst_39 {dimension_numbers = #tpu.dot_dimension_numbers<[1], [0], [0], [1], [0, 0, 1, 1], [], []>} : vector<2x64xbf16>, vector<64x3xbf16>, vector<2x3xf32> -> vector<2x3xf32>
    %c1_40 = arith.constant 1 : index
    %c184_41 = arith.constant 184 : index
    %76 = vector.load %arg4[%c1_40, %c184_41] : memref<8x256xf32, #tpu.memory_space<vmem>>, vector<1x3xf32>
    %77 = vector.broadcast %76 : vector<1x3xf32> to vector<2x3xf32>
    %78 = arith.addf %75, %77 : vector<2x3xf32>
    %c0_42 = arith.constant 0 : index
    %c0_43 = arith.constant 0 : index
    %79 = vector.load %arg5[%c0_42, %c0_43] : memref<2x3xf32, #tpu.memory_space<vmem>>, vector<2x3xf32>
    tpu.vector_store %arg5[%c0_42, %c0_43], %78 {strides = array<i32>} : memref<2x3xf32, #tpu.memory_space<vmem>>, vector<2x3xf32>,
    return
  }
  func.func @transform_0(%arg0: i32) -> (i32, i32) {
    %c0_i32 = arith.constant 0 : i32
    %c0_i32_0 = arith.constant 0 : i32
    %c0_i32_1 = arith.constant 0 : i32
    return %c0_i32, %c0_i32_0 : i32, i32
  }
  func.func @transform_1(%arg0: i32) -> (i32, i32) {
    %c0_i32 = arith.constant 0 : i32
    %c0_i32_0 = arith.constant 0 : i32
    %c0_i32_1 = arith.constant 0 : i32
    return %c0_i32, %c0_i32_0 : i32, i32
  }
  func.func @transform_2(%arg0: i32) -> (i32, i32) {
    %c0_i32 = arith.constant 0 : i32
    %c0_i32_0 = arith.constant 0 : i32
    %c0_i32_1 = arith.constant 0 : i32
    return %c0_i32, %c0_i32_0 : i32, i32
  }
  func.func @transform_3(%arg0: i32) -> (i32, i32) {
    %c0_i32 = arith.constant 0 : i32
    %c0_i32_0 = arith.constant 0 : i32
    %c0_i32_1 = arith.constant 0 : i32
    return %c0_i32, %c0_i32_0 : i32, i32
  }
  func.func @transform_4(%arg0: i32) -> (i32, i32) {
    %c0_i32 = arith.constant 0 : i32
    %c0_i32_0 = arith.constant 0 : i32
    %c0_i32_1 = arith.constant 0 : i32
    return %c0_i32, %c0_i32_0 : i32, i32
  }
}

module attributes {stable_mosaic.version = 11 : i64} {
  func.func @_encoder_kernel(%arg0: i32, %arg1: memref<1x464x128xbf16, #tpu.memory_space<vmem>>, %arg2: memref<1x128x128xbf16, #tpu.memory_space<vmem>>, %arg3: memref<1x4x256x64xbf16, #tpu.memory_space<vmem>>, %arg4: memref<1x128x64xbf16, #tpu.memory_space<vmem>>, %arg5: memref<1x9x64x4xbf16, #tpu.memory_space<vmem>>, %arg6: memref<1x1x256xf32, #tpu.memory_space<vmem>>, %arg7: memref<9x36x195xbf16, #tpu.memory_space<vmem>>, %arg8: memref<1x2x36x36xbf16, #tpu.memory_space<vmem>>, %arg9: memref<2x36x4xbf16, #tpu.memory_space<vmem>>, %arg10: memref<464x128xf32, #tpu.memory_space<vmem>>) attributes {dimension_semantics = [#tpu.dimension_semantics<parallel>], iteration_bounds = array<i64: 4>, scalar_prefetch = 0 : i64, scratch_operands = 1 : i64, tpu.core_type = #tpu.core_type<tc>, window_params = [{transform_indices = @transform_0, window_bounds = array<i64: 1, 464, 128>}, {transform_indices = @transform_1, window_bounds = array<i64: 1, 128, 128>}, {transform_indices = @transform_2, window_bounds = array<i64: 1, 4, 256, 64>}, {transform_indices = @transform_3, window_bounds = array<i64: 1, 128, 64>}, {transform_indices = @transform_4, window_bounds = array<i64: 1, 9, 64, 4>}, {transform_indices = @transform_5, window_bounds = array<i64: 1, 1, 256>}, {pipeline_mode = #tpu.pipeline_mode<synchronous>, transform_indices = @transform_6, window_bounds = array<i64: 9, 36, 195>}, {transform_indices = @transform_7, window_bounds = array<i64: 1, 2, 36, 36>}, {transform_indices = @transform_8, window_bounds = array<i64: 2, 36, 4>}]} {
    %c0 = arith.constant 0 : index
    %c0_0 = arith.constant 0 : index
    %c0_1 = arith.constant 0 : index
    %0 = vector.load %arg6[%c0, %c0_0, %c0_1] : memref<1x1x256xf32, #tpu.memory_space<vmem>>, vector<1x1x128xf32>
    %1 = vector.shape_cast %0 : vector<1x1x128xf32> to vector<1x128xf32>
    %c0_2 = arith.constant 0 : index
    %c0_3 = arith.constant 0 : index
    %c128 = arith.constant 128 : index
    %2 = vector.load %arg6[%c0_2, %c0_3, %c128] : memref<1x1x256xf32, #tpu.memory_space<vmem>>, vector<1x1x64xf32>
    %3 = vector.shape_cast %2 : vector<1x1x64xf32> to vector<1x64xf32>
    %c0_4 = arith.constant 0 : index
    %c0_5 = arith.constant 0 : index
    %c192 = arith.constant 192 : index
    %4 = vector.load %arg6[%c0_4, %c0_5, %c192] : memref<1x1x256xf32, #tpu.memory_space<vmem>>, vector<1x1x4xf32>
    %5 = vector.shape_cast %4 : vector<1x1x4xf32> to vector<1x4xf32>
    %c0_6 = arith.constant 0 : index
    %c0_7 = arith.constant 0 : index
    %c0_8 = arith.constant 0 : index
    %6 = vector.load %arg1[%c0_6, %c0_7, %c0_8] : memref<1x464x128xbf16, #tpu.memory_space<vmem>>, vector<1x464x128xbf16>
    %7 = vector.shape_cast %6 : vector<1x464x128xbf16> to vector<464x128xbf16>
    %c0_9 = arith.constant 0 : index
    %c0_10 = arith.constant 0 : index
    %c0_11 = arith.constant 0 : index
    %8 = vector.load %arg2[%c0_9, %c0_10, %c0_11] : memref<1x128x128xbf16, #tpu.memory_space<vmem>>, vector<1x128x128xbf16>
    %9 = vector.shape_cast %8 : vector<1x128x128xbf16> to vector<128x128xbf16>
    %cst = arith.constant dense<0.000000e+00> : vector<464x128xf32>
    %10 = tpu.matmul %7, %9, %cst {dimension_numbers = #tpu.dot_dimension_numbers<[1], [0], [0], [1], [0, 0, 1, 1], [], []>} : vector<464x128xbf16>, vector<128x128xbf16>, vector<464x128xf32> -> vector<464x128xf32>
    %11 = vector.broadcast %1 : vector<1x128xf32> to vector<464x128xf32>
    %12 = arith.addf %10, %11 : vector<464x128xf32>
    %cst_12 = arith.constant 0.000000e+00 : f32
    %13 = vector.broadcast %cst_12 : f32 to vector<464x128xf32>
    %14 = arith.maximumf %12, %13 : vector<464x128xf32>
    %c0_13 = arith.constant 0 : index
    %c0_14 = arith.constant 0 : index
    %15 = vector.load %arg10[%c0_13, %c0_14] : memref<464x128xf32, #tpu.memory_space<vmem>>, vector<464x128xf32>
    tpu.vector_store %arg10[%c0_13, %c0_14], %14 {strides = array<i32>} : memref<464x128xf32, #tpu.memory_space<vmem>>, vector<464x128xf32>,
    %c32 = arith.constant 32 : index
    %c0_15 = arith.constant 0 : index
    %16 = vector.load %arg10[%c32, %c0_15] : memref<464x128xf32, #tpu.memory_space<vmem>>, vector<195x128xf32>
    %17 = arith.truncf %16 : vector<195x128xf32> to vector<195x128xbf16>
    %c0_16 = arith.constant 0 : index
    %c0_17 = arith.constant 0 : index
    %c0_18 = arith.constant 0 : index
    %18 = vector.load %arg4[%c0_16, %c0_17, %c0_18] : memref<1x128x64xbf16, #tpu.memory_space<vmem>>, vector<1x128x64xbf16>
    %19 = vector.shape_cast %18 : vector<1x128x64xbf16> to vector<128x64xbf16>
    %cst_19 = arith.constant dense<0.000000e+00> : vector<195x64xf32>
    %20 = tpu.matmul %17, %19, %cst_19 {dimension_numbers = #tpu.dot_dimension_numbers<[1], [0], [0], [1], [0, 0, 1, 1], [], []>} : vector<195x128xbf16>, vector<128x64xbf16>, vector<195x64xf32> -> vector<195x64xf32>
    %c0_20 = arith.constant 0 : index
    %c0_21 = arith.constant 0 : index
    %21 = vector.load %arg10[%c0_20, %c0_21] : memref<464x128xf32, #tpu.memory_space<vmem>>, vector<195x128xf32>
    %c1 = arith.constant 1 : index
    %c0_22 = arith.constant 0 : index
    %22 = vector.load %arg10[%c1, %c0_22] : memref<464x128xf32, #tpu.memory_space<vmem>>, vector<195x128xf32>
    %23 = tpu.concatenate %21, %22 in 1 : vector<195x128xf32>, vector<195x128xf32> -> vector<195x256xf32>
    %24 = arith.truncf %23 : vector<195x256xf32> to vector<195x256xbf16>
    %c0_23 = arith.constant 0 : index
    %c0_24 = arith.constant 0 : index
    %c0_25 = arith.constant 0 : index
    %c0_26 = arith.constant 0 : index
    %25 = vector.load %arg3[%c0_23, %c0_24, %c0_25, %c0_26] : memref<1x4x256x64xbf16, #tpu.memory_space<vmem>>, vector<1x1x256x64xbf16>
    %26 = vector.shape_cast %25 : vector<1x1x256x64xbf16> to vector<256x64xbf16>
    %cst_27 = arith.constant dense<0.000000e+00> : vector<195x64xf32>
    %27 = tpu.matmul %24, %26, %cst_27 {dimension_numbers = #tpu.dot_dimension_numbers<[1], [0], [0], [1], [0, 0, 1, 1], [], []>} : vector<195x256xbf16>, vector<256x64xbf16>, vector<195x64xf32> -> vector<195x64xf32>
    %28 = arith.addf %20, %27 : vector<195x64xf32>
    %c2 = arith.constant 2 : index
    %c0_28 = arith.constant 0 : index
    %29 = vector.load %arg10[%c2, %c0_28] : memref<464x128xf32, #tpu.memory_space<vmem>>, vector<195x128xf32>
    %c15 = arith.constant 15 : index
    %c0_29 = arith.constant 0 : index
    %30 = vector.load %arg10[%c15, %c0_29] : memref<464x128xf32, #tpu.memory_space<vmem>>, vector<195x128xf32>
    %31 = tpu.concatenate %29, %30 in 1 : vector<195x128xf32>, vector<195x128xf32> -> vector<195x256xf32>
    %32 = arith.truncf %31 : vector<195x256xf32> to vector<195x256xbf16>
    %c0_30 = arith.constant 0 : index
    %c1_31 = arith.constant 1 : index
    %c0_32 = arith.constant 0 : index
    %c0_33 = arith.constant 0 : index
    %33 = vector.load %arg3[%c0_30, %c1_31, %c0_32, %c0_33] : memref<1x4x256x64xbf16, #tpu.memory_space<vmem>>, vector<1x1x256x64xbf16>
    %34 = vector.shape_cast %33 : vector<1x1x256x64xbf16> to vector<256x64xbf16>
    %cst_34 = arith.constant dense<0.000000e+00> : vector<195x64xf32>
    %35 = tpu.matmul %32, %34, %cst_34 {dimension_numbers = #tpu.dot_dimension_numbers<[1], [0], [0], [1], [0, 0, 1, 1], [], []>} : vector<195x256xbf16>, vector<256x64xbf16>, vector<195x64xf32> -> vector<195x64xf32>
    %36 = arith.addf %28, %35 : vector<195x64xf32>
    %c16 = arith.constant 16 : index
    %c0_35 = arith.constant 0 : index
    %37 = vector.load %arg10[%c16, %c0_35] : memref<464x128xf32, #tpu.memory_space<vmem>>, vector<195x128xf32>
    %c17 = arith.constant 17 : index
    %c0_36 = arith.constant 0 : index
    %38 = vector.load %arg10[%c17, %c0_36] : memref<464x128xf32, #tpu.memory_space<vmem>>, vector<195x128xf32>
    %39 = tpu.concatenate %37, %38 in 1 : vector<195x128xf32>, vector<195x128xf32> -> vector<195x256xf32>
    %40 = arith.truncf %39 : vector<195x256xf32> to vector<195x256xbf16>
    %c0_37 = arith.constant 0 : index
    %c2_38 = arith.constant 2 : index
    %c0_39 = arith.constant 0 : index
    %c0_40 = arith.constant 0 : index
    %41 = vector.load %arg3[%c0_37, %c2_38, %c0_39, %c0_40] : memref<1x4x256x64xbf16, #tpu.memory_space<vmem>>, vector<1x1x256x64xbf16>
    %42 = vector.shape_cast %41 : vector<1x1x256x64xbf16> to vector<256x64xbf16>
    %cst_41 = arith.constant dense<0.000000e+00> : vector<195x64xf32>
    %43 = tpu.matmul %40, %42, %cst_41 {dimension_numbers = #tpu.dot_dimension_numbers<[1], [0], [0], [1], [0, 0, 1, 1], [], []>} : vector<195x256xbf16>, vector<256x64xbf16>, vector<195x64xf32> -> vector<195x64xf32>
    %44 = arith.addf %36, %43 : vector<195x64xf32>
    %c30 = arith.constant 30 : index
    %c0_42 = arith.constant 0 : index
    %45 = vector.load %arg10[%c30, %c0_42] : memref<464x128xf32, #tpu.memory_space<vmem>>, vector<195x128xf32>
    %c31 = arith.constant 31 : index
    %c0_43 = arith.constant 0 : index
    %46 = vector.load %arg10[%c31, %c0_43] : memref<464x128xf32, #tpu.memory_space<vmem>>, vector<195x128xf32>
    %47 = tpu.concatenate %45, %46 in 1 : vector<195x128xf32>, vector<195x128xf32> -> vector<195x256xf32>
    %48 = arith.truncf %47 : vector<195x256xf32> to vector<195x256xbf16>
    %c0_44 = arith.constant 0 : index
    %c3 = arith.constant 3 : index
    %c0_45 = arith.constant 0 : index
    %c0_46 = arith.constant 0 : index
    %49 = vector.load %arg3[%c0_44, %c3, %c0_45, %c0_46] : memref<1x4x256x64xbf16, #tpu.memory_space<vmem>>, vector<1x1x256x64xbf16>
    %50 = vector.shape_cast %49 : vector<1x1x256x64xbf16> to vector<256x64xbf16>
    %cst_47 = arith.constant dense<0.000000e+00> : vector<195x64xf32>
    %51 = tpu.matmul %48, %50, %cst_47 {dimension_numbers = #tpu.dot_dimension_numbers<[1], [0], [0], [1], [0, 0, 1, 1], [], []>} : vector<195x256xbf16>, vector<256x64xbf16>, vector<195x64xf32> -> vector<195x64xf32>
    %52 = arith.addf %44, %51 : vector<195x64xf32>
    %53 = vector.broadcast %3 : vector<1x64xf32> to vector<195x64xf32>
    %54 = arith.addf %52, %53 : vector<195x64xf32>
    %cst_48 = arith.constant 0.000000e+00 : f32
    %55 = vector.broadcast %cst_48 : f32 to vector<195x64xf32>
    %56 = arith.maximumf %54, %55 : vector<195x64xf32>
    %57 = arith.truncf %56 : vector<195x64xf32> to vector<195x64xbf16>
    %c0_49 = arith.constant 0 : index
    %c0_50 = arith.constant 0 : index
    %c0_51 = arith.constant 0 : index
    %c0_52 = arith.constant 0 : index
    %58 = vector.load %arg5[%c0_49, %c0_50, %c0_51, %c0_52] : memref<1x9x64x4xbf16, #tpu.memory_space<vmem>>, vector<1x1x64x4xbf16>
    %59 = vector.shape_cast %58 : vector<1x1x64x4xbf16> to vector<64x4xbf16>
    %cst_53 = arith.constant dense<0.000000e+00> : vector<195x4xf32>
    %60 = tpu.matmul %57, %59, %cst_53 {dimension_numbers = #tpu.dot_dimension_numbers<[1], [0], [0], [1], [0, 0, 1, 1], [], []>} : vector<195x64xbf16>, vector<64x4xbf16>, vector<195x4xf32> -> vector<195x4xf32>
    %c0_54 = arith.constant 0 : index
    %c0_55 = arith.constant 0 : index
    %c0_56 = arith.constant 0 : index
    %61 = vector.load %arg7[%c0_54, %c0_55, %c0_56] : memref<9x36x195xbf16, #tpu.memory_space<vmem>>, vector<1x36x195xbf16>
    %62 = vector.shape_cast %61 : vector<1x36x195xbf16> to vector<36x195xbf16>
    %63 = arith.truncf %60 : vector<195x4xf32> to vector<195x4xbf16>
    %cst_57 = arith.constant dense<0.000000e+00> : vector<36x4xf32>
    %64 = tpu.matmul %62, %63, %cst_57 {dimension_numbers = #tpu.dot_dimension_numbers<[1], [0], [0], [1], [0, 0, 1, 1], [], []>} : vector<36x195xbf16>, vector<195x4xbf16>, vector<36x4xf32> -> vector<36x4xf32>
    %c0_58 = arith.constant 0 : index
    %c1_59 = arith.constant 1 : index
    %c0_60 = arith.constant 0 : index
    %c0_61 = arith.constant 0 : index
    %65 = vector.load %arg5[%c0_58, %c1_59, %c0_60, %c0_61] : memref<1x9x64x4xbf16, #tpu.memory_space<vmem>>, vector<1x1x64x4xbf16>
    %66 = vector.shape_cast %65 : vector<1x1x64x4xbf16> to vector<64x4xbf16>
    %cst_62 = arith.constant dense<0.000000e+00> : vector<195x4xf32>
    %67 = tpu.matmul %57, %66, %cst_62 {dimension_numbers = #tpu.dot_dimension_numbers<[1], [0], [0], [1], [0, 0, 1, 1], [], []>} : vector<195x64xbf16>, vector<64x4xbf16>, vector<195x4xf32> -> vector<195x4xf32>
    %c1_63 = arith.constant 1 : index
    %c0_64 = arith.constant 0 : index
    %c0_65 = arith.constant 0 : index
    %68 = vector.load %arg7[%c1_63, %c0_64, %c0_65] : memref<9x36x195xbf16, #tpu.memory_space<vmem>>, vector<1x36x195xbf16>
    %69 = vector.shape_cast %68 : vector<1x36x195xbf16> to vector<36x195xbf16>
    %70 = arith.truncf %67 : vector<195x4xf32> to vector<195x4xbf16>
    %cst_66 = arith.constant dense<0.000000e+00> : vector<36x4xf32>
    %71 = tpu.matmul %69, %70, %cst_66 {dimension_numbers = #tpu.dot_dimension_numbers<[1], [0], [0], [1], [0, 0, 1, 1], [], []>} : vector<36x195xbf16>, vector<195x4xbf16>, vector<36x4xf32> -> vector<36x4xf32>
    %72 = arith.addf %64, %71 : vector<36x4xf32>
    %c0_67 = arith.constant 0 : index
    %c2_68 = arith.constant 2 : index
    %c0_69 = arith.constant 0 : index
    %c0_70 = arith.constant 0 : index
    %73 = vector.load %arg5[%c0_67, %c2_68, %c0_69, %c0_70] : memref<1x9x64x4xbf16, #tpu.memory_space<vmem>>, vector<1x1x64x4xbf16>
    %74 = vector.shape_cast %73 : vector<1x1x64x4xbf16> to vector<64x4xbf16>
    %cst_71 = arith.constant dense<0.000000e+00> : vector<195x4xf32>
    %75 = tpu.matmul %57, %74, %cst_71 {dimension_numbers = #tpu.dot_dimension_numbers<[1], [0], [0], [1], [0, 0, 1, 1], [], []>} : vector<195x64xbf16>, vector<64x4xbf16>, vector<195x4xf32> -> vector<195x4xf32>
    %c2_72 = arith.constant 2 : index
    %c0_73 = arith.constant 0 : index
    %c0_74 = arith.constant 0 : index
    %76 = vector.load %arg7[%c2_72, %c0_73, %c0_74] : memref<9x36x195xbf16, #tpu.memory_space<vmem>>, vector<1x36x195xbf16>
    %77 = vector.shape_cast %76 : vector<1x36x195xbf16> to vector<36x195xbf16>
    %78 = arith.truncf %75 : vector<195x4xf32> to vector<195x4xbf16>
    %cst_75 = arith.constant dense<0.000000e+00> : vector<36x4xf32>
    %79 = tpu.matmul %77, %78, %cst_75 {dimension_numbers = #tpu.dot_dimension_numbers<[1], [0], [0], [1], [0, 0, 1, 1], [], []>} : vector<36x195xbf16>, vector<195x4xbf16>, vector<36x4xf32> -> vector<36x4xf32>
    %80 = arith.addf %72, %79 : vector<36x4xf32>
    %c0_76 = arith.constant 0 : index
    %c3_77 = arith.constant 3 : index
    %c0_78 = arith.constant 0 : index
    %c0_79 = arith.constant 0 : index
    %81 = vector.load %arg5[%c0_76, %c3_77, %c0_78, %c0_79] : memref<1x9x64x4xbf16, #tpu.memory_space<vmem>>, vector<1x1x64x4xbf16>
    %82 = vector.shape_cast %81 : vector<1x1x64x4xbf16> to vector<64x4xbf16>
    %cst_80 = arith.constant dense<0.000000e+00> : vector<195x4xf32>
    %83 = tpu.matmul %57, %82, %cst_80 {dimension_numbers = #tpu.dot_dimension_numbers<[1], [0], [0], [1], [0, 0, 1, 1], [], []>} : vector<195x64xbf16>, vector<64x4xbf16>, vector<195x4xf32> -> vector<195x4xf32>
    %c3_81 = arith.constant 3 : index
    %c0_82 = arith.constant 0 : index
    %c0_83 = arith.constant 0 : index
    %84 = vector.load %arg7[%c3_81, %c0_82, %c0_83] : memref<9x36x195xbf16, #tpu.memory_space<vmem>>, vector<1x36x195xbf16>
    %85 = vector.shape_cast %84 : vector<1x36x195xbf16> to vector<36x195xbf16>
    %86 = arith.truncf %83 : vector<195x4xf32> to vector<195x4xbf16>
    %cst_84 = arith.constant dense<0.000000e+00> : vector<36x4xf32>
    %87 = tpu.matmul %85, %86, %cst_84 {dimension_numbers = #tpu.dot_dimension_numbers<[1], [0], [0], [1], [0, 0, 1, 1], [], []>} : vector<36x195xbf16>, vector<195x4xbf16>, vector<36x4xf32> -> vector<36x4xf32>
    %88 = arith.addf %80, %87 : vector<36x4xf32>
    %c0_85 = arith.constant 0 : index
    %c4 = arith.constant 4 : index
    %c0_86 = arith.constant 0 : index
    %c0_87 = arith.constant 0 : index
    %89 = vector.load %arg5[%c0_85, %c4, %c0_86, %c0_87] : memref<1x9x64x4xbf16, #tpu.memory_space<vmem>>, vector<1x1x64x4xbf16>
    %90 = vector.shape_cast %89 : vector<1x1x64x4xbf16> to vector<64x4xbf16>
    %cst_88 = arith.constant dense<0.000000e+00> : vector<195x4xf32>
    %91 = tpu.matmul %57, %90, %cst_88 {dimension_numbers = #tpu.dot_dimension_numbers<[1], [0], [0], [1], [0, 0, 1, 1], [], []>} : vector<195x64xbf16>, vector<64x4xbf16>, vector<195x4xf32> -> vector<195x4xf32>
    %c4_89 = arith.constant 4 : index
    %c0_90 = arith.constant 0 : index
    %c0_91 = arith.constant 0 : index
    %92 = vector.load %arg7[%c4_89, %c0_90, %c0_91] : memref<9x36x195xbf16, #tpu.memory_space<vmem>>, vector<1x36x195xbf16>
    %93 = vector.shape_cast %92 : vector<1x36x195xbf16> to vector<36x195xbf16>
    %94 = arith.truncf %91 : vector<195x4xf32> to vector<195x4xbf16>
    %cst_92 = arith.constant dense<0.000000e+00> : vector<36x4xf32>
    %95 = tpu.matmul %93, %94, %cst_92 {dimension_numbers = #tpu.dot_dimension_numbers<[1], [0], [0], [1], [0, 0, 1, 1], [], []>} : vector<36x195xbf16>, vector<195x4xbf16>, vector<36x4xf32> -> vector<36x4xf32>
    %96 = arith.addf %88, %95 : vector<36x4xf32>
    %c0_93 = arith.constant 0 : index
    %c5 = arith.constant 5 : index
    %c0_94 = arith.constant 0 : index
    %c0_95 = arith.constant 0 : index
    %97 = vector.load %arg5[%c0_93, %c5, %c0_94, %c0_95] : memref<1x9x64x4xbf16, #tpu.memory_space<vmem>>, vector<1x1x64x4xbf16>
    %98 = vector.shape_cast %97 : vector<1x1x64x4xbf16> to vector<64x4xbf16>
    %cst_96 = arith.constant dense<0.000000e+00> : vector<195x4xf32>
    %99 = tpu.matmul %57, %98, %cst_96 {dimension_numbers = #tpu.dot_dimension_numbers<[1], [0], [0], [1], [0, 0, 1, 1], [], []>} : vector<195x64xbf16>, vector<64x4xbf16>, vector<195x4xf32> -> vector<195x4xf32>
    %c5_97 = arith.constant 5 : index
    %c0_98 = arith.constant 0 : index
    %c0_99 = arith.constant 0 : index
    %100 = vector.load %arg7[%c5_97, %c0_98, %c0_99] : memref<9x36x195xbf16, #tpu.memory_space<vmem>>, vector<1x36x195xbf16>
    %101 = vector.shape_cast %100 : vector<1x36x195xbf16> to vector<36x195xbf16>
    %102 = arith.truncf %99 : vector<195x4xf32> to vector<195x4xbf16>
    %cst_100 = arith.constant dense<0.000000e+00> : vector<36x4xf32>
    %103 = tpu.matmul %101, %102, %cst_100 {dimension_numbers = #tpu.dot_dimension_numbers<[1], [0], [0], [1], [0, 0, 1, 1], [], []>} : vector<36x195xbf16>, vector<195x4xbf16>, vector<36x4xf32> -> vector<36x4xf32>
    %104 = arith.addf %96, %103 : vector<36x4xf32>
    %c0_101 = arith.constant 0 : index
    %c6 = arith.constant 6 : index
    %c0_102 = arith.constant 0 : index
    %c0_103 = arith.constant 0 : index
    %105 = vector.load %arg5[%c0_101, %c6, %c0_102, %c0_103] : memref<1x9x64x4xbf16, #tpu.memory_space<vmem>>, vector<1x1x64x4xbf16>
    %106 = vector.shape_cast %105 : vector<1x1x64x4xbf16> to vector<64x4xbf16>
    %cst_104 = arith.constant dense<0.000000e+00> : vector<195x4xf32>
    %107 = tpu.matmul %57, %106, %cst_104 {dimension_numbers = #tpu.dot_dimension_numbers<[1], [0], [0], [1], [0, 0, 1, 1], [], []>} : vector<195x64xbf16>, vector<64x4xbf16>, vector<195x4xf32> -> vector<195x4xf32>
    %c6_105 = arith.constant 6 : index
    %c0_106 = arith.constant 0 : index
    %c0_107 = arith.constant 0 : index
    %108 = vector.load %arg7[%c6_105, %c0_106, %c0_107] : memref<9x36x195xbf16, #tpu.memory_space<vmem>>, vector<1x36x195xbf16>
    %109 = vector.shape_cast %108 : vector<1x36x195xbf16> to vector<36x195xbf16>
    %110 = arith.truncf %107 : vector<195x4xf32> to vector<195x4xbf16>
    %cst_108 = arith.constant dense<0.000000e+00> : vector<36x4xf32>
    %111 = tpu.matmul %109, %110, %cst_108 {dimension_numbers = #tpu.dot_dimension_numbers<[1], [0], [0], [1], [0, 0, 1, 1], [], []>} : vector<36x195xbf16>, vector<195x4xbf16>, vector<36x4xf32> -> vector<36x4xf32>
    %112 = arith.addf %104, %111 : vector<36x4xf32>
    %c0_109 = arith.constant 0 : index
    %c7 = arith.constant 7 : index
    %c0_110 = arith.constant 0 : index
    %c0_111 = arith.constant 0 : index
    %113 = vector.load %arg5[%c0_109, %c7, %c0_110, %c0_111] : memref<1x9x64x4xbf16, #tpu.memory_space<vmem>>, vector<1x1x64x4xbf16>
    %114 = vector.shape_cast %113 : vector<1x1x64x4xbf16> to vector<64x4xbf16>
    %cst_112 = arith.constant dense<0.000000e+00> : vector<195x4xf32>
    %115 = tpu.matmul %57, %114, %cst_112 {dimension_numbers = #tpu.dot_dimension_numbers<[1], [0], [0], [1], [0, 0, 1, 1], [], []>} : vector<195x64xbf16>, vector<64x4xbf16>, vector<195x4xf32> -> vector<195x4xf32>
    %c7_113 = arith.constant 7 : index
    %c0_114 = arith.constant 0 : index
    %c0_115 = arith.constant 0 : index
    %116 = vector.load %arg7[%c7_113, %c0_114, %c0_115] : memref<9x36x195xbf16, #tpu.memory_space<vmem>>, vector<1x36x195xbf16>
    %117 = vector.shape_cast %116 : vector<1x36x195xbf16> to vector<36x195xbf16>
    %118 = arith.truncf %115 : vector<195x4xf32> to vector<195x4xbf16>
    %cst_116 = arith.constant dense<0.000000e+00> : vector<36x4xf32>
    %119 = tpu.matmul %117, %118, %cst_116 {dimension_numbers = #tpu.dot_dimension_numbers<[1], [0], [0], [1], [0, 0, 1, 1], [], []>} : vector<36x195xbf16>, vector<195x4xbf16>, vector<36x4xf32> -> vector<36x4xf32>
    %120 = arith.addf %112, %119 : vector<36x4xf32>
    %c0_117 = arith.constant 0 : index
    %c8 = arith.constant 8 : index
    %c0_118 = arith.constant 0 : index
    %c0_119 = arith.constant 0 : index
    %121 = vector.load %arg5[%c0_117, %c8, %c0_118, %c0_119] : memref<1x9x64x4xbf16, #tpu.memory_space<vmem>>, vector<1x1x64x4xbf16>
    %122 = vector.shape_cast %121 : vector<1x1x64x4xbf16> to vector<64x4xbf16>
    %cst_120 = arith.constant dense<0.000000e+00> : vector<195x4xf32>
    %123 = tpu.matmul %57, %122, %cst_120 {dimension_numbers = #tpu.dot_dimension_numbers<[1], [0], [0], [1], [0, 0, 1, 1], [], []>} : vector<195x64xbf16>, vector<64x4xbf16>, vector<195x4xf32> -> vector<195x4xf32>
    %c8_121 = arith.constant 8 : index
    %c0_122 = arith.constant 0 : index
    %c0_123 = arith.constant 0 : index
    %124 = vector.load %arg7[%c8_121, %c0_122, %c0_123] : memref<9x36x195xbf16, #tpu.memory_space<vmem>>, vector<1x36x195xbf16>
    %125 = vector.shape_cast %124 : vector<1x36x195xbf16> to vector<36x195xbf16>
    %126 = arith.truncf %123 : vector<195x4xf32> to vector<195x4xbf16>
    %cst_124 = arith.constant dense<0.000000e+00> : vector<36x4xf32>
    %127 = tpu.matmul %125, %126, %cst_124 {dimension_numbers = #tpu.dot_dimension_numbers<[1], [0], [0], [1], [0, 0, 1, 1], [], []>} : vector<36x195xbf16>, vector<195x4xbf16>, vector<36x4xf32> -> vector<36x4xf32>
    %128 = arith.addf %120, %127 : vector<36x4xf32>
    %129 = vector.broadcast %5 : vector<1x4xf32> to vector<36x4xf32>
    %130 = arith.addf %128, %129 : vector<36x4xf32>
    %cst_125 = arith.constant 0.000000e+00 : f32
    %131 = vector.broadcast %cst_125 : f32 to vector<36x4xf32>
    %132 = arith.maximumf %130, %131 : vector<36x4xf32>
    %133 = arith.truncf %132 : vector<36x4xf32> to vector<36x4xbf16>
    %c0_126 = arith.constant 0 : index
    %c0_127 = arith.constant 0 : index
    %c0_128 = arith.constant 0 : index
    %c0_129 = arith.constant 0 : index
    %134 = vector.load %arg8[%c0_126, %c0_127, %c0_128, %c0_129] : memref<1x2x36x36xbf16, #tpu.memory_space<vmem>>, vector<1x1x36x36xbf16>
    %135 = vector.shape_cast %134 : vector<1x1x36x36xbf16> to vector<36x36xbf16>
    %cst_130 = arith.constant dense<0.000000e+00> : vector<36x4xf32>
    %136 = tpu.matmul %135, %133, %cst_130 {dimension_numbers = #tpu.dot_dimension_numbers<[1], [0], [0], [1], [0, 0, 1, 1], [], []>} : vector<36x36xbf16>, vector<36x4xbf16>, vector<36x4xf32> -> vector<36x4xf32>
    %137 = arith.truncf %136 : vector<36x4xf32> to vector<36x4xbf16>
    %c0_131 = arith.constant 0 : index
    %c0_132 = arith.constant 0 : index
    %c0_133 = arith.constant 0 : index
    %138 = vector.load %arg9[%c0_131, %c0_132, %c0_133] : memref<2x36x4xbf16, #tpu.memory_space<vmem>>, vector<1x36x4xbf16>
    %139 = vector.shape_cast %138 : vector<1x36x4xbf16> to vector<36x4xbf16>
    %140 = vector.shape_cast %137 : vector<36x4xbf16> to vector<1x36x4xbf16>
    tpu.vector_store %arg9[%c0_131, %c0_132, %c0_133], %140 {strides = array<i32>} : memref<2x36x4xbf16, #tpu.memory_space<vmem>>, vector<1x36x4xbf16>,
    %c264 = arith.constant 264 : index
    %c0_134 = arith.constant 0 : index
    %141 = vector.load %arg10[%c264, %c0_134] : memref<464x128xf32, #tpu.memory_space<vmem>>, vector<195x128xf32>
    %142 = arith.truncf %141 : vector<195x128xf32> to vector<195x128xbf16>
    %c0_135 = arith.constant 0 : index
    %c0_136 = arith.constant 0 : index
    %c0_137 = arith.constant 0 : index
    %143 = vector.load %arg4[%c0_135, %c0_136, %c0_137] : memref<1x128x64xbf16, #tpu.memory_space<vmem>>, vector<1x128x64xbf16>
    %144 = vector.shape_cast %143 : vector<1x128x64xbf16> to vector<128x64xbf16>
    %cst_138 = arith.constant dense<0.000000e+00> : vector<195x64xf32>
    %145 = tpu.matmul %142, %144, %cst_138 {dimension_numbers = #tpu.dot_dimension_numbers<[1], [0], [0], [1], [0, 0, 1, 1], [], []>} : vector<195x128xbf16>, vector<128x64xbf16>, vector<195x64xf32> -> vector<195x64xf32>
    %c232 = arith.constant 232 : index
    %c0_139 = arith.constant 0 : index
    %146 = vector.load %arg10[%c232, %c0_139] : memref<464x128xf32, #tpu.memory_space<vmem>>, vector<195x128xf32>
    %c233 = arith.constant 233 : index
    %c0_140 = arith.constant 0 : index
    %147 = vector.load %arg10[%c233, %c0_140] : memref<464x128xf32, #tpu.memory_space<vmem>>, vector<195x128xf32>
    %148 = tpu.concatenate %146, %147 in 1 : vector<195x128xf32>, vector<195x128xf32> -> vector<195x256xf32>
    %149 = arith.truncf %148 : vector<195x256xf32> to vector<195x256xbf16>
    %c0_141 = arith.constant 0 : index
    %c0_142 = arith.constant 0 : index
    %c0_143 = arith.constant 0 : index
    %c0_144 = arith.constant 0 : index
    %150 = vector.load %arg3[%c0_141, %c0_142, %c0_143, %c0_144] : memref<1x4x256x64xbf16, #tpu.memory_space<vmem>>, vector<1x1x256x64xbf16>
    %151 = vector.shape_cast %150 : vector<1x1x256x64xbf16> to vector<256x64xbf16>
    %cst_145 = arith.constant dense<0.000000e+00> : vector<195x64xf32>
    %152 = tpu.matmul %149, %151, %cst_145 {dimension_numbers = #tpu.dot_dimension_numbers<[1], [0], [0], [1], [0, 0, 1, 1], [], []>} : vector<195x256xbf16>, vector<256x64xbf16>, vector<195x64xf32> -> vector<195x64xf32>
    %153 = arith.addf %145, %152 : vector<195x64xf32>
    %c234 = arith.constant 234 : index
    %c0_146 = arith.constant 0 : index
    %154 = vector.load %arg10[%c234, %c0_146] : memref<464x128xf32, #tpu.memory_space<vmem>>, vector<195x128xf32>
    %c247 = arith.constant 247 : index
    %c0_147 = arith.constant 0 : index
    %155 = vector.load %arg10[%c247, %c0_147] : memref<464x128xf32, #tpu.memory_space<vmem>>, vector<195x128xf32>
    %156 = tpu.concatenate %154, %155 in 1 : vector<195x128xf32>, vector<195x128xf32> -> vector<195x256xf32>
    %157 = arith.truncf %156 : vector<195x256xf32> to vector<195x256xbf16>
    %c0_148 = arith.constant 0 : index
    %c1_149 = arith.constant 1 : index
    %c0_150 = arith.constant 0 : index
    %c0_151 = arith.constant 0 : index
    %158 = vector.load %arg3[%c0_148, %c1_149, %c0_150, %c0_151] : memref<1x4x256x64xbf16, #tpu.memory_space<vmem>>, vector<1x1x256x64xbf16>
    %159 = vector.shape_cast %158 : vector<1x1x256x64xbf16> to vector<256x64xbf16>
    %cst_152 = arith.constant dense<0.000000e+00> : vector<195x64xf32>
    %160 = tpu.matmul %157, %159, %cst_152 {dimension_numbers = #tpu.dot_dimension_numbers<[1], [0], [0], [1], [0, 0, 1, 1], [], []>} : vector<195x256xbf16>, vector<256x64xbf16>, vector<195x64xf32> -> vector<195x64xf32>
    %161 = arith.addf %153, %160 : vector<195x64xf32>
    %c248 = arith.constant 248 : index
    %c0_153 = arith.constant 0 : index
    %162 = vector.load %arg10[%c248, %c0_153] : memref<464x128xf32, #tpu.memory_space<vmem>>, vector<195x128xf32>
    %c249 = arith.constant 249 : index
    %c0_154 = arith.constant 0 : index
    %163 = vector.load %arg10[%c249, %c0_154] : memref<464x128xf32, #tpu.memory_space<vmem>>, vector<195x128xf32>
    %164 = tpu.concatenate %162, %163 in 1 : vector<195x128xf32>, vector<195x128xf32> -> vector<195x256xf32>
    %165 = arith.truncf %164 : vector<195x256xf32> to vector<195x256xbf16>
    %c0_155 = arith.constant 0 : index
    %c2_156 = arith.constant 2 : index
    %c0_157 = arith.constant 0 : index
    %c0_158 = arith.constant 0 : index
    %166 = vector.load %arg3[%c0_155, %c2_156, %c0_157, %c0_158] : memref<1x4x256x64xbf16, #tpu.memory_space<vmem>>, vector<1x1x256x64xbf16>
    %167 = vector.shape_cast %166 : vector<1x1x256x64xbf16> to vector<256x64xbf16>
    %cst_159 = arith.constant dense<0.000000e+00> : vector<195x64xf32>
    %168 = tpu.matmul %165, %167, %cst_159 {dimension_numbers = #tpu.dot_dimension_numbers<[1], [0], [0], [1], [0, 0, 1, 1], [], []>} : vector<195x256xbf16>, vector<256x64xbf16>, vector<195x64xf32> -> vector<195x64xf32>
    %169 = arith.addf %161, %168 : vector<195x64xf32>
    %c262 = arith.constant 262 : index
    %c0_160 = arith.constant 0 : index
    %170 = vector.load %arg10[%c262, %c0_160] : memref<464x128xf32, #tpu.memory_space<vmem>>, vector<195x128xf32>
    %c263 = arith.constant 263 : index
    %c0_161 = arith.constant 0 : index
    %171 = vector.load %arg10[%c263, %c0_161] : memref<464x128xf32, #tpu.memory_space<vmem>>, vector<195x128xf32>
    %172 = tpu.concatenate %170, %171 in 1 : vector<195x128xf32>, vector<195x128xf32> -> vector<195x256xf32>
    %173 = arith.truncf %172 : vector<195x256xf32> to vector<195x256xbf16>
    %c0_162 = arith.constant 0 : index
    %c3_163 = arith.constant 3 : index
    %c0_164 = arith.constant 0 : index
    %c0_165 = arith.constant 0 : index
    %174 = vector.load %arg3[%c0_162, %c3_163, %c0_164, %c0_165] : memref<1x4x256x64xbf16, #tpu.memory_space<vmem>>, vector<1x1x256x64xbf16>
    %175 = vector.shape_cast %174 : vector<1x1x256x64xbf16> to vector<256x64xbf16>
    %cst_166 = arith.constant dense<0.000000e+00> : vector<195x64xf32>
    %176 = tpu.matmul %173, %175, %cst_166 {dimension_numbers = #tpu.dot_dimension_numbers<[1], [0], [0], [1], [0, 0, 1, 1], [], []>} : vector<195x256xbf16>, vector<256x64xbf16>, vector<195x64xf32> -> vector<195x64xf32>
    %177 = arith.addf %169, %176 : vector<195x64xf32>
    %178 = vector.broadcast %3 : vector<1x64xf32> to vector<195x64xf32>
    %179 = arith.addf %177, %178 : vector<195x64xf32>
    %cst_167 = arith.constant 0.000000e+00 : f32
    %180 = vector.broadcast %cst_167 : f32 to vector<195x64xf32>
    %181 = arith.maximumf %179, %180 : vector<195x64xf32>
    %182 = arith.truncf %181 : vector<195x64xf32> to vector<195x64xbf16>
    %c0_168 = arith.constant 0 : index
    %c0_169 = arith.constant 0 : index
    %c0_170 = arith.constant 0 : index
    %c0_171 = arith.constant 0 : index
    %183 = vector.load %arg5[%c0_168, %c0_169, %c0_170, %c0_171] : memref<1x9x64x4xbf16, #tpu.memory_space<vmem>>, vector<1x1x64x4xbf16>
    %184 = vector.shape_cast %183 : vector<1x1x64x4xbf16> to vector<64x4xbf16>
    %cst_172 = arith.constant dense<0.000000e+00> : vector<195x4xf32>
    %185 = tpu.matmul %182, %184, %cst_172 {dimension_numbers = #tpu.dot_dimension_numbers<[1], [0], [0], [1], [0, 0, 1, 1], [], []>} : vector<195x64xbf16>, vector<64x4xbf16>, vector<195x4xf32> -> vector<195x4xf32>
    %c0_173 = arith.constant 0 : index
    %c0_174 = arith.constant 0 : index
    %c0_175 = arith.constant 0 : index
    %186 = vector.load %arg7[%c0_173, %c0_174, %c0_175] : memref<9x36x195xbf16, #tpu.memory_space<vmem>>, vector<1x36x195xbf16>
    %187 = vector.shape_cast %186 : vector<1x36x195xbf16> to vector<36x195xbf16>
    %188 = arith.truncf %185 : vector<195x4xf32> to vector<195x4xbf16>
    %cst_176 = arith.constant dense<0.000000e+00> : vector<36x4xf32>
    %189 = tpu.matmul %187, %188, %cst_176 {dimension_numbers = #tpu.dot_dimension_numbers<[1], [0], [0], [1], [0, 0, 1, 1], [], []>} : vector<36x195xbf16>, vector<195x4xbf16>, vector<36x4xf32> -> vector<36x4xf32>
    %c0_177 = arith.constant 0 : index
    %c1_178 = arith.constant 1 : index
    %c0_179 = arith.constant 0 : index
    %c0_180 = arith.constant 0 : index
    %190 = vector.load %arg5[%c0_177, %c1_178, %c0_179, %c0_180] : memref<1x9x64x4xbf16, #tpu.memory_space<vmem>>, vector<1x1x64x4xbf16>
    %191 = vector.shape_cast %190 : vector<1x1x64x4xbf16> to vector<64x4xbf16>
    %cst_181 = arith.constant dense<0.000000e+00> : vector<195x4xf32>
    %192 = tpu.matmul %182, %191, %cst_181 {dimension_numbers = #tpu.dot_dimension_numbers<[1], [0], [0], [1], [0, 0, 1, 1], [], []>} : vector<195x64xbf16>, vector<64x4xbf16>, vector<195x4xf32> -> vector<195x4xf32>
    %c1_182 = arith.constant 1 : index
    %c0_183 = arith.constant 0 : index
    %c0_184 = arith.constant 0 : index
    %193 = vector.load %arg7[%c1_182, %c0_183, %c0_184] : memref<9x36x195xbf16, #tpu.memory_space<vmem>>, vector<1x36x195xbf16>
    %194 = vector.shape_cast %193 : vector<1x36x195xbf16> to vector<36x195xbf16>
    %195 = arith.truncf %192 : vector<195x4xf32> to vector<195x4xbf16>
    %cst_185 = arith.constant dense<0.000000e+00> : vector<36x4xf32>
    %196 = tpu.matmul %194, %195, %cst_185 {dimension_numbers = #tpu.dot_dimension_numbers<[1], [0], [0], [1], [0, 0, 1, 1], [], []>} : vector<36x195xbf16>, vector<195x4xbf16>, vector<36x4xf32> -> vector<36x4xf32>
    %197 = arith.addf %189, %196 : vector<36x4xf32>
    %c0_186 = arith.constant 0 : index
    %c2_187 = arith.constant 2 : index
    %c0_188 = arith.constant 0 : index
    %c0_189 = arith.constant 0 : index
    %198 = vector.load %arg5[%c0_186, %c2_187, %c0_188, %c0_189] : memref<1x9x64x4xbf16, #tpu.memory_space<vmem>>, vector<1x1x64x4xbf16>
    %199 = vector.shape_cast %198 : vector<1x1x64x4xbf16> to vector<64x4xbf16>
    %cst_190 = arith.constant dense<0.000000e+00> : vector<195x4xf32>
    %200 = tpu.matmul %182, %199, %cst_190 {dimension_numbers = #tpu.dot_dimension_numbers<[1], [0], [0], [1], [0, 0, 1, 1], [], []>} : vector<195x64xbf16>, vector<64x4xbf16>, vector<195x4xf32> -> vector<195x4xf32>
    %c2_191 = arith.constant 2 : index
    %c0_192 = arith.constant 0 : index
    %c0_193 = arith.constant 0 : index
    %201 = vector.load %arg7[%c2_191, %c0_192, %c0_193] : memref<9x36x195xbf16, #tpu.memory_space<vmem>>, vector<1x36x195xbf16>
    %202 = vector.shape_cast %201 : vector<1x36x195xbf16> to vector<36x195xbf16>
    %203 = arith.truncf %200 : vector<195x4xf32> to vector<195x4xbf16>
    %cst_194 = arith.constant dense<0.000000e+00> : vector<36x4xf32>
    %204 = tpu.matmul %202, %203, %cst_194 {dimension_numbers = #tpu.dot_dimension_numbers<[1], [0], [0], [1], [0, 0, 1, 1], [], []>} : vector<36x195xbf16>, vector<195x4xbf16>, vector<36x4xf32> -> vector<36x4xf32>
    %205 = arith.addf %197, %204 : vector<36x4xf32>
    %c0_195 = arith.constant 0 : index
    %c3_196 = arith.constant 3 : index
    %c0_197 = arith.constant 0 : index
    %c0_198 = arith.constant 0 : index
    %206 = vector.load %arg5[%c0_195, %c3_196, %c0_197, %c0_198] : memref<1x9x64x4xbf16, #tpu.memory_space<vmem>>, vector<1x1x64x4xbf16>
    %207 = vector.shape_cast %206 : vector<1x1x64x4xbf16> to vector<64x4xbf16>
    %cst_199 = arith.constant dense<0.000000e+00> : vector<195x4xf32>
    %208 = tpu.matmul %182, %207, %cst_199 {dimension_numbers = #tpu.dot_dimension_numbers<[1], [0], [0], [1], [0, 0, 1, 1], [], []>} : vector<195x64xbf16>, vector<64x4xbf16>, vector<195x4xf32> -> vector<195x4xf32>
    %c3_200 = arith.constant 3 : index
    %c0_201 = arith.constant 0 : index
    %c0_202 = arith.constant 0 : index
    %209 = vector.load %arg7[%c3_200, %c0_201, %c0_202] : memref<9x36x195xbf16, #tpu.memory_space<vmem>>, vector<1x36x195xbf16>
    %210 = vector.shape_cast %209 : vector<1x36x195xbf16> to vector<36x195xbf16>
    %211 = arith.truncf %208 : vector<195x4xf32> to vector<195x4xbf16>
    %cst_203 = arith.constant dense<0.000000e+00> : vector<36x4xf32>
    %212 = tpu.matmul %210, %211, %cst_203 {dimension_numbers = #tpu.dot_dimension_numbers<[1], [0], [0], [1], [0, 0, 1, 1], [], []>} : vector<36x195xbf16>, vector<195x4xbf16>, vector<36x4xf32> -> vector<36x4xf32>
    %213 = arith.addf %205, %212 : vector<36x4xf32>
    %c0_204 = arith.constant 0 : index
    %c4_205 = arith.constant 4 : index
    %c0_206 = arith.constant 0 : index
    %c0_207 = arith.constant 0 : index
    %214 = vector.load %arg5[%c0_204, %c4_205, %c0_206, %c0_207] : memref<1x9x64x4xbf16, #tpu.memory_space<vmem>>, vector<1x1x64x4xbf16>
    %215 = vector.shape_cast %214 : vector<1x1x64x4xbf16> to vector<64x4xbf16>
    %cst_208 = arith.constant dense<0.000000e+00> : vector<195x4xf32>
    %216 = tpu.matmul %182, %215, %cst_208 {dimension_numbers = #tpu.dot_dimension_numbers<[1], [0], [0], [1], [0, 0, 1, 1], [], []>} : vector<195x64xbf16>, vector<64x4xbf16>, vector<195x4xf32> -> vector<195x4xf32>
    %c4_209 = arith.constant 4 : index
    %c0_210 = arith.constant 0 : index
    %c0_211 = arith.constant 0 : index
    %217 = vector.load %arg7[%c4_209, %c0_210, %c0_211] : memref<9x36x195xbf16, #tpu.memory_space<vmem>>, vector<1x36x195xbf16>
    %218 = vector.shape_cast %217 : vector<1x36x195xbf16> to vector<36x195xbf16>
    %219 = arith.truncf %216 : vector<195x4xf32> to vector<195x4xbf16>
    %cst_212 = arith.constant dense<0.000000e+00> : vector<36x4xf32>
    %220 = tpu.matmul %218, %219, %cst_212 {dimension_numbers = #tpu.dot_dimension_numbers<[1], [0], [0], [1], [0, 0, 1, 1], [], []>} : vector<36x195xbf16>, vector<195x4xbf16>, vector<36x4xf32> -> vector<36x4xf32>
    %221 = arith.addf %213, %220 : vector<36x4xf32>
    %c0_213 = arith.constant 0 : index
    %c5_214 = arith.constant 5 : index
    %c0_215 = arith.constant 0 : index
    %c0_216 = arith.constant 0 : index
    %222 = vector.load %arg5[%c0_213, %c5_214, %c0_215, %c0_216] : memref<1x9x64x4xbf16, #tpu.memory_space<vmem>>, vector<1x1x64x4xbf16>
    %223 = vector.shape_cast %222 : vector<1x1x64x4xbf16> to vector<64x4xbf16>
    %cst_217 = arith.constant dense<0.000000e+00> : vector<195x4xf32>
    %224 = tpu.matmul %182, %223, %cst_217 {dimension_numbers = #tpu.dot_dimension_numbers<[1], [0], [0], [1], [0, 0, 1, 1], [], []>} : vector<195x64xbf16>, vector<64x4xbf16>, vector<195x4xf32> -> vector<195x4xf32>
    %c5_218 = arith.constant 5 : index
    %c0_219 = arith.constant 0 : index
    %c0_220 = arith.constant 0 : index
    %225 = vector.load %arg7[%c5_218, %c0_219, %c0_220] : memref<9x36x195xbf16, #tpu.memory_space<vmem>>, vector<1x36x195xbf16>
    %226 = vector.shape_cast %225 : vector<1x36x195xbf16> to vector<36x195xbf16>
    %227 = arith.truncf %224 : vector<195x4xf32> to vector<195x4xbf16>
    %cst_221 = arith.constant dense<0.000000e+00> : vector<36x4xf32>
    %228 = tpu.matmul %226, %227, %cst_221 {dimension_numbers = #tpu.dot_dimension_numbers<[1], [0], [0], [1], [0, 0, 1, 1], [], []>} : vector<36x195xbf16>, vector<195x4xbf16>, vector<36x4xf32> -> vector<36x4xf32>
    %229 = arith.addf %221, %228 : vector<36x4xf32>
    %c0_222 = arith.constant 0 : index
    %c6_223 = arith.constant 6 : index
    %c0_224 = arith.constant 0 : index
    %c0_225 = arith.constant 0 : index
    %230 = vector.load %arg5[%c0_222, %c6_223, %c0_224, %c0_225] : memref<1x9x64x4xbf16, #tpu.memory_space<vmem>>, vector<1x1x64x4xbf16>
    %231 = vector.shape_cast %230 : vector<1x1x64x4xbf16> to vector<64x4xbf16>
    %cst_226 = arith.constant dense<0.000000e+00> : vector<195x4xf32>
    %232 = tpu.matmul %182, %231, %cst_226 {dimension_numbers = #tpu.dot_dimension_numbers<[1], [0], [0], [1], [0, 0, 1, 1], [], []>} : vector<195x64xbf16>, vector<64x4xbf16>, vector<195x4xf32> -> vector<195x4xf32>
    %c6_227 = arith.constant 6 : index
    %c0_228 = arith.constant 0 : index
    %c0_229 = arith.constant 0 : index
    %233 = vector.load %arg7[%c6_227, %c0_228, %c0_229] : memref<9x36x195xbf16, #tpu.memory_space<vmem>>, vector<1x36x195xbf16>
    %234 = vector.shape_cast %233 : vector<1x36x195xbf16> to vector<36x195xbf16>
    %235 = arith.truncf %232 : vector<195x4xf32> to vector<195x4xbf16>
    %cst_230 = arith.constant dense<0.000000e+00> : vector<36x4xf32>
    %236 = tpu.matmul %234, %235, %cst_230 {dimension_numbers = #tpu.dot_dimension_numbers<[1], [0], [0], [1], [0, 0, 1, 1], [], []>} : vector<36x195xbf16>, vector<195x4xbf16>, vector<36x4xf32> -> vector<36x4xf32>
    %237 = arith.addf %229, %236 : vector<36x4xf32>
    %c0_231 = arith.constant 0 : index
    %c7_232 = arith.constant 7 : index
    %c0_233 = arith.constant 0 : index
    %c0_234 = arith.constant 0 : index
    %238 = vector.load %arg5[%c0_231, %c7_232, %c0_233, %c0_234] : memref<1x9x64x4xbf16, #tpu.memory_space<vmem>>, vector<1x1x64x4xbf16>
    %239 = vector.shape_cast %238 : vector<1x1x64x4xbf16> to vector<64x4xbf16>
    %cst_235 = arith.constant dense<0.000000e+00> : vector<195x4xf32>
    %240 = tpu.matmul %182, %239, %cst_235 {dimension_numbers = #tpu.dot_dimension_numbers<[1], [0], [0], [1], [0, 0, 1, 1], [], []>} : vector<195x64xbf16>, vector<64x4xbf16>, vector<195x4xf32> -> vector<195x4xf32>
    %c7_236 = arith.constant 7 : index
    %c0_237 = arith.constant 0 : index
    %c0_238 = arith.constant 0 : index
    %241 = vector.load %arg7[%c7_236, %c0_237, %c0_238] : memref<9x36x195xbf16, #tpu.memory_space<vmem>>, vector<1x36x195xbf16>
    %242 = vector.shape_cast %241 : vector<1x36x195xbf16> to vector<36x195xbf16>
    %243 = arith.truncf %240 : vector<195x4xf32> to vector<195x4xbf16>
    %cst_239 = arith.constant dense<0.000000e+00> : vector<36x4xf32>
    %244 = tpu.matmul %242, %243, %cst_239 {dimension_numbers = #tpu.dot_dimension_numbers<[1], [0], [0], [1], [0, 0, 1, 1], [], []>} : vector<36x195xbf16>, vector<195x4xbf16>, vector<36x4xf32> -> vector<36x4xf32>
    %245 = arith.addf %237, %244 : vector<36x4xf32>
    %c0_240 = arith.constant 0 : index
    %c8_241 = arith.constant 8 : index
    %c0_242 = arith.constant 0 : index
    %c0_243 = arith.constant 0 : index
    %246 = vector.load %arg5[%c0_240, %c8_241, %c0_242, %c0_243] : memref<1x9x64x4xbf16, #tpu.memory_space<vmem>>, vector<1x1x64x4xbf16>
    %247 = vector.shape_cast %246 : vector<1x1x64x4xbf16> to vector<64x4xbf16>
    %cst_244 = arith.constant dense<0.000000e+00> : vector<195x4xf32>
    %248 = tpu.matmul %182, %247, %cst_244 {dimension_numbers = #tpu.dot_dimension_numbers<[1], [0], [0], [1], [0, 0, 1, 1], [], []>} : vector<195x64xbf16>, vector<64x4xbf16>, vector<195x4xf32> -> vector<195x4xf32>
    %c8_245 = arith.constant 8 : index
    %c0_246 = arith.constant 0 : index
    %c0_247 = arith.constant 0 : index
    %249 = vector.load %arg7[%c8_245, %c0_246, %c0_247] : memref<9x36x195xbf16, #tpu.memory_space<vmem>>, vector<1x36x195xbf16>
    %250 = vector.shape_cast %249 : vector<1x36x195xbf16> to vector<36x195xbf16>
    %251 = arith.truncf %248 : vector<195x4xf32> to vector<195x4xbf16>
    %cst_248 = arith.constant dense<0.000000e+00> : vector<36x4xf32>
    %252 = tpu.matmul %250, %251, %cst_248 {dimension_numbers = #tpu.dot_dimension_numbers<[1], [0], [0], [1], [0, 0, 1, 1], [], []>} : vector<36x195xbf16>, vector<195x4xbf16>, vector<36x4xf32> -> vector<36x4xf32>
    %253 = arith.addf %245, %252 : vector<36x4xf32>
    %254 = vector.broadcast %5 : vector<1x4xf32> to vector<36x4xf32>
    %255 = arith.addf %253, %254 : vector<36x4xf32>
    %cst_249 = arith.constant 0.000000e+00 : f32
    %256 = vector.broadcast %cst_249 : f32 to vector<36x4xf32>
    %257 = arith.maximumf %255, %256 : vector<36x4xf32>
    %258 = arith.truncf %257 : vector<36x4xf32> to vector<36x4xbf16>
    %c0_250 = arith.constant 0 : index
    %c1_251 = arith.constant 1 : index
    %c0_252 = arith.constant 0 : index
    %c0_253 = arith.constant 0 : index
    %259 = vector.load %arg8[%c0_250, %c1_251, %c0_252, %c0_253] : memref<1x2x36x36xbf16, #tpu.memory_space<vmem>>, vector<1x1x36x36xbf16>
    %260 = vector.shape_cast %259 : vector<1x1x36x36xbf16> to vector<36x36xbf16>
    %cst_254 = arith.constant dense<0.000000e+00> : vector<36x4xf32>
    %261 = tpu.matmul %260, %258, %cst_254 {dimension_numbers = #tpu.dot_dimension_numbers<[1], [0], [0], [1], [0, 0, 1, 1], [], []>} : vector<36x36xbf16>, vector<36x4xbf16>, vector<36x4xf32> -> vector<36x4xf32>
    %262 = arith.truncf %261 : vector<36x4xf32> to vector<36x4xbf16>
    %c1_255 = arith.constant 1 : index
    %c0_256 = arith.constant 0 : index
    %c0_257 = arith.constant 0 : index
    %263 = vector.load %arg9[%c1_255, %c0_256, %c0_257] : memref<2x36x4xbf16, #tpu.memory_space<vmem>>, vector<1x36x4xbf16>
    %264 = vector.shape_cast %263 : vector<1x36x4xbf16> to vector<36x4xbf16>
    %265 = vector.shape_cast %262 : vector<36x4xbf16> to vector<1x36x4xbf16>
    tpu.vector_store %arg9[%c1_255, %c0_256, %c0_257], %265 {strides = array<i32>} : memref<2x36x4xbf16, #tpu.memory_space<vmem>>, vector<1x36x4xbf16>,
    return
  }
  func.func @transform_0(%arg0: i32) -> (i32, i32, i32) {
    %c0_i32 = arith.constant 0 : i32
    %c0_i32_0 = arith.constant 0 : i32
    %c0_i32_1 = arith.constant 0 : i32
    return %arg0, %c0_i32, %c0_i32_0 : i32, i32, i32
  }
  func.func @transform_1(%arg0: i32) -> (i32, i32, i32) {
    %c1_i32 = arith.constant 1 : i32
    %0 = arith.cmpi sge, %arg0, %c1_i32 : i32
    %1 = arith.extui %0 : i1 to i32
    %c0_i32 = arith.constant 0 : i32
    %c0_i32_0 = arith.constant 0 : i32
    %c0_i32_1 = arith.constant 0 : i32
    return %1, %c0_i32, %c0_i32_0 : i32, i32, i32
  }
  func.func @transform_2(%arg0: i32) -> (i32, i32, i32, i32) {
    %c1_i32 = arith.constant 1 : i32
    %0 = arith.cmpi sge, %arg0, %c1_i32 : i32
    %1 = arith.extui %0 : i1 to i32
    %c0_i32 = arith.constant 0 : i32
    %c0_i32_0 = arith.constant 0 : i32
    %c0_i32_1 = arith.constant 0 : i32
    %c0_i32_2 = arith.constant 0 : i32
    return %1, %c0_i32, %c0_i32_0, %c0_i32_1 : i32, i32, i32, i32
  }
  func.func @transform_3(%arg0: i32) -> (i32, i32, i32) {
    %c1_i32 = arith.constant 1 : i32
    %0 = arith.cmpi sge, %arg0, %c1_i32 : i32
    %1 = arith.extui %0 : i1 to i32
    %c0_i32 = arith.constant 0 : i32
    %c0_i32_0 = arith.constant 0 : i32
    %c0_i32_1 = arith.constant 0 : i32
    return %1, %c0_i32, %c0_i32_0 : i32, i32, i32
  }
  func.func @transform_4(%arg0: i32) -> (i32, i32, i32, i32) {
    %c1_i32 = arith.constant 1 : i32
    %0 = arith.cmpi sge, %arg0, %c1_i32 : i32
    %1 = arith.extui %0 : i1 to i32
    %c0_i32 = arith.constant 0 : i32
    %c0_i32_0 = arith.constant 0 : i32
    %c0_i32_1 = arith.constant 0 : i32
    %c0_i32_2 = arith.constant 0 : i32
    return %1, %c0_i32, %c0_i32_0, %c0_i32_1 : i32, i32, i32, i32
  }
  func.func @transform_5(%arg0: i32) -> (i32, i32, i32) {
    %c1_i32 = arith.constant 1 : i32
    %0 = arith.cmpi sge, %arg0, %c1_i32 : i32
    %1 = arith.extui %0 : i1 to i32
    %c0_i32 = arith.constant 0 : i32
    %c0_i32_0 = arith.constant 0 : i32
    %c0_i32_1 = arith.constant 0 : i32
    return %1, %c0_i32, %c0_i32_0 : i32, i32, i32
  }
  func.func @transform_6(%arg0: i32) -> (i32, i32, i32) {
    %c0_i32 = arith.constant 0 : i32
    %c0_i32_0 = arith.constant 0 : i32
    %c0_i32_1 = arith.constant 0 : i32
    %c0_i32_2 = arith.constant 0 : i32
    return %c0_i32, %c0_i32_0, %c0_i32_1 : i32, i32, i32
  }
  func.func @transform_7(%arg0: i32) -> (i32, i32, i32, i32) {
    %c0_i32 = arith.constant 0 : i32
    %c0_i32_0 = arith.constant 0 : i32
    %c0_i32_1 = arith.constant 0 : i32
    %c0_i32_2 = arith.constant 0 : i32
    return %arg0, %c0_i32, %c0_i32_0, %c0_i32_1 : i32, i32, i32, i32
  }
  func.func @transform_8(%arg0: i32) -> (i32, i32, i32) {
    %c0_i32 = arith.constant 0 : i32
    %c0_i32_0 = arith.constant 0 : i32
    %c0_i32_1 = arith.constant 0 : i32
    return %arg0, %c0_i32, %c0_i32_0 : i32, i32, i32
  }
}

</mosaic_0001>

<bundles_post_ra>
// kernel: v2vnet_forward.3
= control target key start
LH: loop header
LB: loop body
LE: loop exit
PB: predicated region body
PF: predicated region fallthrough
CT: control target
= control target key end

     0   :  { %v938_v0 = vmov 0   ;;  %vm97_vm0 = vcmask 130048   ;;  %v941_v17 = vmov 0.0   ;;  %vm942_vm1 = vmmov 0   ;;  %s943_s19 = smov 64   ;;  %s944_s20 = smov 32   ;;  %s1153_s2 = inlined_call_operand.vmem [shape: bf16[504,256], index: 2, kind: input, shape index: {}]   ;;  %s1154_s0 = inlined_call_operand.vmem [shape: bf16[8,144], index: 0, kind: input, shape index: {}]   ;;  %s1155_s1 = inlined_call_operand.vmem [shape: f32[2,1], index: 1, kind: input, shape index: {}]   ;;  %s1156_s3 = inlined_call_operand.vmem [shape: f32[8,256], index: 3, kind: input, shape index: {}]   ;;  %s1157_s4 = inlined_call_operand.vmem [shape: f32[2,3], index: 4, kind: output, shape index: {}]  }
   0x1   :  { %101 = vmatprep.subr.bf16.mxu0 %v938_v0  ;;  %v896_v1 = vld [vmem:[%s1153_s2 + $0x70] ss:$8 sps:$4 sm:$0xff]   ;;  %894 = vset.pattern.permute.xlu1 %v938_v0  ;;  %v897_v2 = vld [vmem:[%s1153_s2 + $0x60] ss:$8 sps:$4 sm:$0xff]   ;;  %s945_s23 = smov 69   ;;  %vm176_vm2 = vcmask 261120  }
   0x2   :  { %895 = vset.pattern.permute.xlu0 %v938_v0  ;;  %102 = vmatpush1.bf16.msra.mxu0 %v896_v1  ;;  %v898_v3 = vld [vmem:[%s1153_s2 + $0x50] ss:$8 sps:$4 sm:$0xff]   ;;  %v899_v4 = vld [vmem:[%s1153_s2 + $0x40] ss:$8 sps:$4 sm:$0xff]   ;;  %s946_s24 = smov 16   ;;  %vm372_vm3 = vcmask 1043456  }
   0x3   :  { %103 = vmatprep.subr.bf16.mxu0 %v938_v0  ;;  %v18_v5 = vld [vmem:[%s1154_s0] sm:$0xff]  ;;  %v907_v7 = vld [vmem:[%s1153_s2 + $0x10] ss:$8 sps:$4 sm:$0xff]   ;;  %s939_s0 = smov 96   ;;  %849 = vmatprep.subr.bf16.mxu1 %v941_v17  ;;  %v1043_v21 = vld [vmem:[%s1156_s3 + $0x9] ss:$0 sm:$0xff] }
   0x4   :  { %v767_v6 = vcombine.high %v18_v5, %v18_v5  ;;  %v908_v8 = vld [vmem:[%s1153_s2] ss:$8 sps:$4 sm:$0xff]   ;;  %v900_v10 = vld [vmem:[%s1153_s2 + $0x30] ss:$8 sps:$4 sm:$0xff]   ;;  %172 = vrot.lane.b32.xlu0 %v907_v7, %s939_s0  ;;  %v766_v16 = vcombine.low %v18_v5, %v18_v5  ;;  %853 = vmatprep.mubr.msk.bf16.mxu1 %vm942_vm1, %v941_v17  ;;  %v914_v59 = vld [vmem:[%s1153_s2 + $0xa4] ss:$8 sps:$4 sm:$0xff]  }
   0x5   :  { %v282_v9 = vld [vmem:[%s1155_s1] sm:$0x3]  ;;  %s940_s1 = smov 91   ;;  %v902_v13 = vld [vmem:[%s1153_s2 + $0x10] ss:$8 sps:$4 sm:$0xff]   ;;  %vm368_vm4 = vcmask 64512  }
   0x6   :  { %104 = vmatpush1.bf16.msra.mxu0 %v897_v2  ;;  %777 = vmatprep.mubr.msk.bf16.mxu0 %vm97_vm0, %v767_v6  ;;  %v1011_v11 = vld [vmem:[%s1156_s3 + $0x1] ss:$0 sm:$0xff]  ;;  %v362_v55 = vld [vmem:[%s1153_s2 + $0xb0] sm:$0xff]  ;;  %s947_s13 = smov 8   ;;  %s948_s21 = smov 72   ;;  %vm716_vm5 = vcmask 523264  }
   0x7   :  { %105 = vmatprep.subr.bf16.mxu0 %v938_v0  ;;  %286 = vperm.xlu1 %894, %v282_v9   ;;  %v901_v12 = vld [vmem:[%s1153_s2 + $0x20] ss:$8 sps:$4 sm:$0xff]   ;;  %v785_v56 = vcombine.high %v362_v55, %v362_v55  ;;  %v784_v57 = vcombine.low %v362_v55, %v362_v55  ;;  %vm760_vm6 = vcmask 17408  }
   0x8   :  { %170 = vrot.lane.b32.xlu0 %v908_v8, %s939_s0  ;;  %v903_v14 = vld [vmem:[%s1153_s2] ss:$8 sps:$4 sm:$0xff]  }
   0x9   :  { %v904_v15 = vld [vmem:[%s1153_s2 + $0x80] ss:$8 sps:$4 sm:$0xff]   ;;  %v374_v58 = vsel %vm372_vm3, %v784_v57, 0 }
   0xa   :  { %106 = vmatpush1.bf16.msra.mxu0 %v898_v3  ;;  %v909_v18 = vld [vmem:[%s1153_s2] ss:$8 sps:$4 sm:$0xff]  }
   0xb   :  { %107 = vmatprep.subr.bf16.mxu0 %v938_v0  ;;  %290 = vrot.lane.b32.xlu1 %v1011_v11, %s940_s1  ;;  %v918_v60 = vld [vmem:[%s1153_s2 + $0x1a8] ss:$8 sps:$4 sm:$0xff]   ;;  %v920_v62 = vld [vmem:[%s1153_s2 + $0x198] ss:$8 sps:$4 sm:$0xff]  }
   0xc   :  { %230 = vrot.lane.b32.xlu0 %v907_v7, %s943_s19  ;;  %v919_v61 = vld [vmem:[%s1153_s2 + $0x128] ss:$8 sps:$4 sm:$0xff]   ;;  %v921_v63 = vld [vmem:[%s1153_s2 + $0x118] ss:$8 sps:$4 sm:$0xff]  }
   0xd   :  { %v922_v1 = vld [vmem:[%s1153_s2 + $0x188] ss:$8 sps:$4 sm:$0xff]   ;;  %v935_v57 = vld [vmem:[%s1153_s2 + $0x1d8] ss:$8 sps:$4 sm:$0xff]  }
   0xe   :  { %108 = vmatpush1.bf16.msra.mxu0 %v899_v4  ;;  %v923_v2 = vld [vmem:[%s1153_s2 + $0x108] ss:$8 sps:$4 sm:$0xff]  }
   0xf   :  { %109 = vmatprep.subr.bf16.mxu0 %v938_v0  ;;  %222 = vrot.lane.b32.xlu1 %v1011_v11, %s939_s0 }
  0x10   :  { %228 = vrot.lane.b32.xlu0 %v908_v8, %s943_s19 }
  0x12   :  { %110 = vmatpush1.bf16.msra.mxu0 %v900_v10 }
  0x13   :  { %111 = vmatprep.subr.bf16.mxu0 %v938_v0  ;;  %306 = vrot.lane.b32.xlu1 %v909_v18, %s944_s20  ;;  %v917_v18 = vld [vmem:[%s1153_s2 + $0x94] ss:$8 sps:$4 sm:$0xff]  }
  0x16   :  { %112 = vmatpush1.bf16.msra.mxu0 %v901_v12 }
  0x17   :  { %113 = vmatprep.subr.bf16.mxu0 %v938_v0  ;;  %309 = vrot.lane.b32.xlu1 %v1011_v11, %s946_s24 }
  0x1a   :  { %114 = vmatpush1.bf16.msra.mxu0 %v902_v13 }
  0x1b   :  { %115 = vmatprep.subr.bf16.mxu0 %v938_v0  ;;  %633 = vrot.lane.b32.xlu1 %v1011_v11, %s947_s13 }
  0x1e   :  { %116 = vmatpush1.bf16.msra.mxu0 %v903_v14  ;;  %v912_v14 = vld [vmem:[%s1153_s2 + $0xa0] ss:$8 sps:$4 sm:$0xff]  }
  0x1f   :  { %131 = vmatprep.subr.bf16.mxu0 %v938_v0  ;;  %713 = vrot.lane.b32.xlu1 %v1043_v21, %s948_s21 }
  0x22   :  { %132 = vmatpush2.bf16.msra.mxu0 %v904_v15 }
  0x23   :  { %822 = vmatprep.subr.bf16.mxu0 %v918_v60 }
  0x25   :  { %134 = vmatmul.mubr.bf16.vlgmr.msra.gmra.mxu0 %v766_v16 }
  0x26   :  { %823 = vmatpush3.bf16.msra.mxu0 %v919_v61 }
  0x27   :  { %824 = vmatprep.subr.bf16.mxu0 %v920_v62 }
  0x2a   :  { %825 = vmatpush3.bf16.msra.mxu0 %v921_v63 }
  0x2b   :  { %826 = vmatprep.subr.bf16.mxu0 %v922_v1 }
  0x2e   :  { %827 = vmatpush3.bf16.msra.mxu0 %v923_v2 }
  0x76   :  { %v173_v19 = vpop.permute.xlu0 %172 }
  0x77   :  { %850 = vmatpush3.bf16.msra.mxu1 %v173_v19 }
  0x78   :  { %851 = vmatprep.subr.bf16.mxu1 %v941_v17 }
  0x7a   :  { %v171_v20 = vpop.permute.xlu0 %170 }
  0x7b   :  { %852 = vmatpush3.bf16.msra.mxu1 %v171_v20 }
  0x7c   :  { %857 = vmatprep.subr.bf16.mxu1 %v941_v17 }
  0x7e   :  { %v231_v42 = vpop.permute.xlu0 %230 }
  0x82   :  { %v287_v22 = vpop.permute.xlu1 %286  ;;  %v229_v43 = vpop.permute.xlu0 %228 }
  0x83   :  { %v289_v23 = vmul.f32 %v287_v22, %v1043_v21  ;;  %v915_v22 = vld [vmem:[%s1153_s2 + $0x90] ss:$8 sps:$4 sm:$0xff]  }
  0x86   :  { %v291_v24 = vpop.permute.xlu1 %290 }
  0x87   :  { %v293_v25 = vadd.f32 %v291_v24, %v289_v23 }
  0x89   :  { %v294_v26 = vmax.f32 %v293_v25, 0.0  ;;  %v924_v25 = vld [vmem:[%s1153_s2 + $0x178] ss:$8 sps:$4 sm:$0xff]  }
  0x8a   :  { %v223_v45 = vpop.permute.xlu1 %222  ;;  %828 = vmatprep.subr.bf16.mxu0 %v924_v25 }
  0x8b   :  { %v295_v27 = vpack.c.bf16 %v294_v26, %v294_v26  ;;  %v925_v26 = vld [vmem:[%s1153_s2 + $0xf8] ss:$8 sps:$4 sm:$0xff]  }
  0x8c   :  { %829 = vmatpush3.bf16.msra.mxu0 %v925_v26 }
  0x8d   :  { %299 = vrot.lane.b32.xlu0 %v295_v27, %s945_s23  ;;  %v927_v27 = vld [vmem:[%s1153_s2 + $0xe8] ss:$8 sps:$4 sm:$0xff]  }
  0x8e   :  { %v307_v53 = vpop.permute.xlu1 %306 }
  0x91   :  { %278 = vrot.lane.b32.xlu0 %v1011_v11, %s943_s19 }
  0x92   :  { %v310_v7 = vpop.permute.xlu1 %309 }
  0x95   :  { %635 = vrot.lane.b32.xlu0 %v1043_v21, %s947_s13 }
  0x96   :  { %v634_v61 = vpop.permute.xlu1 %633 }
  0xe5   :  { %v135_v28 = vpop.f32.mrf.mxu0 }
  0xe6   :  { %v142_v29 = vrot.slane %v135_v28, 2  ;;  %v145_v32 = vrot.slane %v135_v28, 4  ;;  %v148_v35 = vrot.slane %v135_v28, 6 }
  0xe7   :  { %v137_v30 = vpop.f32.mrf.mxu0 }
  0xe8   :  { %v144_v31 = vmax.f32 %v135_v28, %v142_v29  ;;  %v928_v28 = vld [vmem:[%s1153_s2 + $0x158] ss:$8 sps:$4 sm:$0xff]   ;;  %v930_v30 = vld [vmem:[%s1153_s2 + $0x148] ss:$8 sps:$4 sm:$0xff]  }
  0xe9   :  { %v138_v33 = vpop.f32.mrf.mxu0  ;;  %v929_v29 = vld [vmem:[%s1153_s2 + $0xd8] ss:$8 sps:$4 sm:$0xff]  }
  0xea   :  { %v147_v34 = vmax.f32 %v144_v31, %v145_v32  ;;  %v931_v31 = vld [vmem:[%s1153_s2 + $0xc8] ss:$8 sps:$4 sm:$0xff]   ;;  %v932_v32 = vld [vmem:[%s1153_s2 + $0x138] ss:$8 sps:$4 sm:$0xff]  }
  0xeb   :  { %v139_v36 = vpop.f32.mrf.mxu0  ;;  %v933_v33 = vld [vmem:[%s1153_s2 + $0xb8] ss:$8 sps:$4 sm:$0xff]  }
  0xec   :  { %v150_v37 = vmax.f32 %v147_v34, %v148_v35  ;;  %v934_v34 = vld [vmem:[%s1153_s2 + $0x1e8] ss:$8 sps:$4 sm:$0xff]   ;;  %v486_v35 = vlaneseq }
  0xee   :  { %v151_v38 = vmul.f32 0.25, %v150_v37  ;;  %v487_v36 = vshrl.u32 %v486_v35, 7 }
  0xf0   :  { %v153_v39 = vadd.f32 %v1011_v11, %v151_v38 }
  0xf2   :  { %v154_v40 = vmax.f32 %v153_v39, 0.0  ;;  %v488_v39 = vsub.s32 0, %v487_v36 }
  0xf4   :  { %v155_v41 = vpack.c.bf16 %v154_v40, %v154_v40 }
  0xf6   :  { %854 = vmatmul.mubr.msk.bf16.vlgmr.msra.gmra.mxu1 %vm176_vm2, %v155_v41  ;;  %v484_v41 = vld [vmem:[%s1156_s3] ss:$8 sm:$0x3] }
  0xf7   :  { %858 = vmatpush3.bf16.msra.mxu1 %v231_v42  ;;  %861 = vmatprep.mubr.msk.bf16.mxu1 %vm942_vm1, %v941_v17  ;;  %v492_v42 = vsub.s32 1, %v487_v36 }
  0xf8   :  { %859 = vmatprep.subr.bf16.mxu1 %v941_v17 }
  0xfb   :  { %860 = vmatpush3.bf16.msra.mxu1 %v229_v43 }
  0xfc   :  { %865 = vmatprep.subr.bf16.mxu1 %v941_v17 }
  0xff   :  { %v300_v54 = vpop.permute.xlu0 %299 }
 0x103   :  { %v279_v19 = vpop.permute.xlu0 %278 }
 0x107   :  { %v636_v60 = vpop.permute.xlu0 %635 }
 0x108   :  { %v637_v1 = vsel %vm368_vm4, %v634_v61, %v636_v60 }
 0x1b6   :  { %v214_v44 = vpop.f32.mrf.mxu1 }
 0x1b7   :  { %v220_v46 = vmul.f32 0.25, %v214_v44  ;;  %v489_v44 = vrot.slane %v484_v41, %v488_v39 }
 0x1b8   :  { %v855_v47 = vpop.f32.mrf.mxu1 }
 0x1b9   :  { %v225_v48 = vadd.f32 %v223_v45, %v220_v46  ;;  %v493_v46 = vrot.slane %v484_v41, %v492_v42 }
 0x1ba   :  { %v217_v49 = vpop.f32.mrf.mxu1 }
 0x1bb   :  { %v226_v50 = vmax.f32 %v225_v48, 0.0 }
 0x1bc   :  { %v856_v51 = vpop.f32.mrf.mxu1 }
 0x1bd   :  { %v227_v52 = vpack.c.bf16 %v226_v50, %v226_v50 }
 0x1bf   :  { %862 = vmatmul.mubr.msk.bf16.vlgmr.msra.gmra.mxu1 %vm176_vm2, %v227_v52 }
 0x1c0   :  { %866 = vmatpush3.bf16.msra.mxu1 %v307_v53  ;;  %867 = vmatprep.mubr.msk.bf16.mxu1 %vm942_vm1, %v941_v17 }
 0x1c1   :  { %786 = vmatprep.subr.msk.bf16.mxu1 %vm372_vm3, %v785_v56 }
 0x1c7   :  { %868 = vmatmul.mubr.msk.bf16.vlgmr.msra.gmra.mxu1 %vm97_vm0, %v300_v54 }
 0x1c8   :  { %411 = vmatprep.mubr.bf16.mxu1 %v938_v0  ;;  %394 = vmatpush1.bf16.msra.mxu1 %v374_v58  ;;  %v936_v58 = vld [vmem:[%s1153_s2 + $0x1c8] ss:$8 sps:$4 sm:$0xff]  }
 0x1c9   :  { %455 = vmatprep.subr.bf16.mxu1 %v914_v59  ;;  %v937_v59 = vld [vmem:[%s1153_s2 + $0x1b8] ss:$8 sps:$4 sm:$0xff]  }
 0x27f   :  { %v271_v3 = vpop.f32.mrf.mxu1 }
 0x280   :  { %v277_v15 = vmul.f32 0.25, %v271_v3 }
 0x281   :  { %v863_v4 = vpop.f32.mrf.mxu1 }
 0x282   :  { %v281_v23 = vadd.f32 %v279_v19, %v277_v15 }
 0x283   :  { %v274_v5 = vpop.f32.mrf.mxu1 }
 0x284   :  { %v356_v24 = vpack.c.bf16 %v281_v23, %v281_v23 }
 0x285   :  { %v864_v6 = vpop.f32.mrf.mxu1 }
 0x287   :  { %v349_v8 = vpop.f32.mrf.mxu1 }
 0x288   :  { %v350_v9 = vadd.f32 %v349_v8, %v310_v7  ;;  %v714_v7 = vpop.permute.xlu1 %713 }
 0x289   :  { %v869_v10 = vpop.f32.mrf.mxu1 }
 0x28a   :  { %v355_v12 = vmax.f32 %v350_v9, 0.0 }
 0x28b   :  { %v352_v13 = vpop.f32.mrf.mxu1 }
 0x28c   :  { %v361_v16 = vpack.c.bf16 %v355_v12, %v355_v12 }
 0x28d   :  { %v870_v20 = vpop.f32.mrf.mxu1 }
 0x28e   :  { %787 = vmatmul.mubr.msk.bf16.vlgmr.msra.gmra.mxu1 %vm368_vm4, %v361_v16 }
 0x28f   :  { %456 = vmatpush1.bf16.msra.mxu1 %v912_v14  ;;  %475 = vmatprep.mubr.bf16.mxu1 %v938_v0  ;;  %v926_v0 = vld [vmem:[%s1153_s2 + $0x168] ss:$8 sps:$4 sm:$0xff]  }
 0x290   :  { %457 = vmatprep.subr.bf16.mxu1 %v917_v18  ;;  %830 = vmatprep.subr.bf16.mxu0 %v926_v0 }
 0x291   :  { %831 = vmatpush3.bf16.msra.mxu0 %v927_v27 }
 0x292   :  { %832 = vmatprep.subr.bf16.mxu0 %v928_v28 }
 0x293   :  { %458 = vmatpush1.bf16.msra.mxu1 %v915_v22 }
 0x294   :  { %871 = vmatprep.subr.bf16.mxu1 %v941_v17 }
 0x295   :  { %833 = vmatpush3.bf16.msra.mxu0 %v929_v29 }
 0x296   :  { %792 = vmatmul.mubr.msk.bf16.vlgmr.msra.gmra.mxu1 %vm176_vm2, %v356_v24  ;;  %834 = vmatprep.subr.bf16.mxu0 %v930_v30 }
 0x297   :  { %879 = vmatprep.mubr.msk.bf16.mxu1 %vm942_vm1, %v941_v17  ;;  %872 = vmatpush3.bf16.msra.mxu1 %v934_v34 }
 0x298   :  { %873 = vmatprep.subr.bf16.mxu1 %v941_v17 }
 0x299   :  { %835 = vmatpush3.bf16.msra.mxu0 %v931_v31 }
 0x29a   :  { %836 = vmatprep.subr.bf16.mxu0 %v932_v32 }
 0x29b   :  { %874 = vmatpush3.bf16.msra.mxu1 %v935_v57 }
 0x29c   :  { %875 = vmatprep.subr.bf16.mxu1 %v941_v17 }
 0x29d   :  { %837 = vmatpush3.bf16.msra.mxu0 %v933_v33 }
 0x29f   :  { %876 = vmatpush3.bf16.msra.mxu1 %v936_v58 }
 0x2a0   :  { %877 = vmatprep.subr.bf16.mxu1 %v941_v17 }
 0x2a3   :  { %878 = vmatpush3.bf16.msra.mxu1 %v937_v59 }
 0x34e   :  { %v413_v37 = vpop.f32.mrf.mxu1 }
 0x350   :  { %v415_v38 = vpop.f32.mrf.mxu1 }
 0x352   :  { %v417_v40 = vpop.f32.mrf.mxu1 }
 0x354   :  { %v418_v43 = vpop.f32.mrf.mxu1 }
 0x356   :  { %v477_v45 = vpop.f32.mrf.mxu1 }
 0x357   :  { %v478_v11 = vadd.f32 %v477_v45, %v413_v37 }
 0x358   :  { %v479_v47 = vpop.f32.mrf.mxu1 }
 0x359   :  { %v496_v48 = vadd.f32 %v489_v44, %v478_v11  ;;  %v480_v49 = vadd.f32 %v479_v47, %v415_v38 }
 0x35a   :  { %v481_v50 = vpop.f32.mrf.mxu1 }
 0x35b   :  { %v497_v51 = vadd.f32 %v493_v46, %v480_v49  ;;  %v498_v52 = vmax.f32 %v496_v48, 0.0 }
 0x35c   :  { %v482_v53 = vpop.f32.mrf.mxu1 }
 0x35d   :  { %v499_v54 = vmax.f32 %v497_v51, 0.0  ;;  %v500_v56 = vpack.c.bf16 %v498_v52, %v498_v52 }
 0x35f   :  { %v501_v55 = vpack.c.bf16 %v499_v54, %v499_v54 }
 0x361   :  { %671 = vmatprep.mubr.bf16.mxu0 %v501_v55 }
 0x362   :  { %672 = vmatmul.mubr.bf16.vlgmr.msra.gmra.mxu0 %v500_v56 }
 0x422   :  { %v838_v62 = vpop.f32.mrf.mxu0 }
 0x424   :  { %v839_v63 = vpop.f32.mrf.mxu0 }
 0x425   :  { %v840_v2 = vadd.f32 %v839_v63, %v838_v62 }
 0x426   :  { %v841_v3 = vpop.f32.mrf.mxu0 }
 0x427   :  { %v674_v4 = vadd.f32 %v840_v2, %v637_v1 }
 0x428   :  { %v842_v5 = vpop.f32.mrf.mxu0 }
 0x429   :  { %v679_v6 = vmax.f32 %v674_v4, 0.0 }
 0x42b   :  { %v680_v17 = vpack.c.bf16 %v679_v6, %v679_v6 }
 0x42d   :  { %880 = vmatmul.mubr.msk.bf16.vlgmr.msra.gmra.mxu1 %vm716_vm5, %v680_v17 }
 0x4ed   :  { %v754_v8 = vpop.f32.mrf.mxu1 }
 0x4ee   :  { %v755_v9 = vadd.f32 %v754_v8, %v714_v7 }
 0x4ef   :  { %v881_v10 = vpop.f32.mrf.mxu1 }
 0x4f0   :  { %761 = vst.msk [vmem:[%s1157_s4] sm:$0x3] %vm760_vm6, %v755_v9 }
 0x4f1   :  { %v757_v21 = vpop.f32.mrf.mxu1 }
 0x4f3   :  { %v882_v12 = vpop.f32.mrf.mxu1 }

// kernel: v2vnet_forward.2
= control target key start
LH: loop header
LB: loop body
LE: loop exit
PB: predicated region body
PF: predicated region fallthrough
CT: control target
= control target key end

     0   :  { %s14294_s27 = smov 0   ;;  %s18171_s0 = inlined_call_operand.vmem [shape: bf16[4,464,128], index: 0, kind: input, shape index: {}]   ;;  %s18172_s1 = inlined_call_operand.vmem [shape: bf16[2,128,128], index: 1, kind: input, shape index: {}]   ;;  %s18173_s2 = inlined_call_operand.vmem [shape: bf16[2,4,256,64], index: 2, kind: input, shape index: {}]   ;;  %s18174_s3 = inlined_call_operand.vmem [shape: bf16[2,128,64], index: 3, kind: input, shape index: {}]   ;;  %s18175_s4 = inlined_call_operand.vmem [shape: bf16[2,9,64,4], index: 4, kind: input, shape index: {}]   ;;  %s18176_s5 = inlined_call_operand.vmem [shape: f32[2,1,256], index: 5, kind: input, shape index: {}]   ;;  %s18177_s6 = inlined_call_operand.vmem [shape: bf16[9,36,195], index: 6, kind: input, shape index: {}]   ;;  %s18178_s7 = inlined_call_operand.vmem [shape: bf16[4,2,36,36], index: 7, kind: input, shape index: {}]   ;;  %s18179_s8 = inlined_call_operand.vmem [shape: bf16[8,36,4], index: 8, kind: output, shape index: {}]  }
   0x1 LB: > { %s14300_s28 = sadd.s32 4294967295, %s14242_s27   ;;  %p10169_p0 = scmp.ge.s32.totalorder %s14242_s27, 1  ;;  %s14242_s27 = sphi %s14294_s27, %s18_s27  }
   0x2   : > { %p361_p1 = scmp.lt.s32.totalorder %s14242_s27, 5 }
   0x4   : > { %p362_p2 = pnand %p10169_p0, %p361_p1 }
   0x6   : > { %365 = sbr.rel (%p362_p2) target bundleno = 7059 (0x1b93), region = 52 }
   0xb   : > { %p440_p3 = scmp.ge.s32.totalorder %s14300_s28, 1  ;;  %p435_p4 = scmp.lt.s32.totalorder %s14300_s28, 3  ;;  %v18180_v0 = vmov 0.0   ;;  %vm14245_vm0 = vmmov 0   ;;  %vm2929_vm1 = vcmask 523264   ;;  %vm3335_vm2 = vcmask 547840  }
   0xc   : > { %12429 = vmatprep.subr.bf16.mxu0 %v18180_v0  ;;  %12445 = vmatprep.mubr.msk.bf16.mxu0 %vm14245_vm0, %v18180_v0  ;;  %vm3345_vm3 = vcmask 1040384   ;;  %vm3346_vm4 = vcmask 1041408   ;;  %s14248_s19 = smov 64   ;;  %vm5529_vm5 = vcmask 293888   ;;  %vm5619_vm6 = vcmask 27648  }
   0xd   : > { %s441_s29 = scalar_select %p440_p3, 1, 0  ;;  %vm5624_vm7 = vcmask 25600  }
   0xe   : > { %s14310_s30 = scalar_select %p435_p4, %s14300_s28, 3 }
   0xf   : > { %p442_p5 = scmp.lt.s32.totalorder %s441_s29, 1 }
  0x10   : > { %s13813_s9 = smul.u32 232, %s14310_s30 }
  0x11   : > { %s18342_s29 = smov (!%p442_p5, %s441_s29), 1 }
  0x12   : > { %s14318_s12 = scalar_lea.vmem %s18171_s0, %s13813_s9  ;;  %s11267_s13 = sshll.u32 %s18342_s29, 6 }
  0x13   : > { %s446_s16 = scalar_lea.vmem %s18172_s1, %s11267_s13  ;;  %s11268_s17 = sshll.u32 %s18342_s29, 9  ;;  %v13838_v9 = vld [vmem:[%s14318_s12] sm:$0xff]   ;;  %v13839_v10 = vld [vmem:[%s14318_s12 + $0x8] sm:$0xff]   ;;  %v13840_v11 = vld [vmem:[%s14318_s12 + $0x10] sm:$0xff]  }
  0x14   : > { %v13830_v1 = vld [vmem:[%s446_s16 + $0x38] sm:$0xff]   ;;  %v13831_v2 = vld [vmem:[%s446_s16 + $0x30] sm:$0xff]   ;;  %v13832_v3 = vld [vmem:[%s446_s16 + $0x28] sm:$0xff]   ;;  %s14336_s20 = scalar_lea.vmem %s18173_s2, %s11268_s17  ;;  %s14354_s23 = scalar_lea.vmem %s18174_s3, %s11267_s13 }
  0x15   : > { %12430 = vmatpush3.bf16.msra.mxu0 %v13830_v1  ;;  %v13833_v4 = vld [vmem:[%s446_s16 + $0x20] sm:$0xff]   ;;  %v13834_v5 = vld [vmem:[%s446_s16 + $0x18] sm:$0xff]   ;;  %v13835_v6 = vld [vmem:[%s446_s16 + $0x10] sm:$0xff]   ;;  %s13814_s24 = smul.u32 288, %s18342_s29  ;;  %s10178_s10 = sshll.u32 %s18342_s29, 1 }
  0x16   : > { %12431 = vmatprep.subr.bf16.mxu0 %v18180_v0  ;;  %v13836_v7 = vld [vmem:[%s446_s16 + $0x8] sm:$0xff]   ;;  %v13837_v8 = vld [vmem:[%s446_s16] sm:$0xff]   ;;  %v13841_v12 = vld [vmem:[%s14318_s12 + $0x18] sm:$0xff]   ;;  %s14462_s14 = scalar_lea.vmem %s18176_s5, %s10178_s10  ;;  %s13815_s29 = smul.u32 40, %s14310_s30 }
  0x17   : > { %v13842_v13 = vld [vmem:[%s14318_s12 + $0x20] sm:$0xff]   ;;  %v13843_v14 = vld [vmem:[%s14318_s12 + $0x28] sm:$0xff]   ;;  %v13844_v15 = vld [vmem:[%s14318_s12 + $0x30] sm:$0xff]   ;;  %s14369_s9 = scalar_lea.vmem %s18175_s4, %s13814_s24  ;;  %s10180_s30 = sshll.u32 %s14300_s28, 1 }
  0x18   : > { %v13845_v16 = vld [vmem:[%s14318_s12 + $0x38] sm:$0xff]   ;;  %v13864_v19 = vld [vmem:[%s14336_s20 + $0x70] sm:$0xff]   ;;  %v13846_v21 = vld [vmem:[%s14318_s12 + $0x40] sm:$0xff]   ;;  %s16491_s16 = scalar_lea.vmem %s18178_s7, %s13815_s29  ;;  %p490_p6 = scmp.lt.s32.totalorder %s10180_s30, 7 }
  0x19   : > { %12432 = vmatpush3.bf16.msra.mxu0 %v13831_v2  ;;  %v13862_v17 = vld [vmem:[%s14336_s20 + $0x78] sm:$0xff]   ;;  %v13865_v20 = vld [vmem:[%s14336_s20 + $0x30] sm:$0xff]   ;;  %v13867_v22 = vld [vmem:[%s14336_s20 + $0x68] sm:$0xff]  }
  0x1a   : > { %12433 = vmatprep.subr.bf16.mxu0 %v18180_v0  ;;  %v13863_v18 = vld [vmem:[%s14336_s20 + $0x38] sm:$0xff]   ;;  %11317 = vmatprep.subr.bf16.mxu1 %v13862_v17  ;;  %v13868_v23 = vld [vmem:[%s14336_s20 + $0x28] sm:$0xff]   ;;  %v13869_v25 = vld [vmem:[%s14336_s20 + $0x60] sm:$0xff]   ;;  %s18344_s30 = smov (!%p490_p6, %s10180_s30), 7 }
  0x1b   : > { %11318 = vmatpush3.bf16.msra.mxu1 %v13863_v18  ;;  %v13847_v24 = vld [vmem:[%s14318_s12 + $0x48] sm:$0xff]   ;;  %v13870_v26 = vld [vmem:[%s14336_s20 + $0x20] sm:$0xff]   ;;  %v13872_v27 = vld [vmem:[%s14336_s20 + $0x58] sm:$0xff]  }
  0x1c   : > { %11319 = vmatprep.subr.bf16.mxu1 %v13864_v19  ;;  %v13873_v28 = vld [vmem:[%s14336_s20 + $0x178] sm:$0xff]   ;;  %v13848_v31 = vld [vmem:[%s14318_s12 + $0x50] sm:$0xff]   ;;  %v13881_v36 = vld [vmem:[%s14336_s20 + $0x48] sm:$0xff]  }
  0x1d   : > { %12434 = vmatpush3.bf16.msra.mxu0 %v13832_v3  ;;  %v13874_v29 = vld [vmem:[%s14336_s20 + $0x18] sm:$0xff]   ;;  %v13876_v32 = vld [vmem:[%s14336_s20 + $0x50] sm:$0xff]   ;;  %v13882_v37 = vld [vmem:[%s14336_s20 + $0x168] sm:$0xff]  }
  0x1e   : > { %12435 = vmatprep.subr.bf16.mxu0 %v18180_v0  ;;  %v13875_v30 = vld [vmem:[%s14336_s20 + $0x138] sm:$0xff]   ;;  %v13877_v33 = vld [vmem:[%s14336_s20 + $0x170] sm:$0xff]   ;;  %v13883_v38 = vld [vmem:[%s14336_s20 + $0x8] sm:$0xff]  }
  0x1f   : > { %11320 = vmatpush3.bf16.msra.mxu1 %v13865_v20  ;;  %v13878_v34 = vld [vmem:[%s14336_s20 + $0x10] sm:$0xff]   ;;  %v13884_v39 = vld [vmem:[%s14336_s20 + $0x128] sm:$0xff]   ;;  %v13849_v40 = vld [vmem:[%s14318_s12 + $0x58] sm:$0xff]  }
  0x20   : > { %11321 = vmatprep.subr.bf16.mxu1 %v13867_v22  ;;  %v13879_v35 = vld [vmem:[%s14336_s20 + $0x130] sm:$0xff]   ;;  %v13885_v41 = vld [vmem:[%s14336_s20 + $0x40] sm:$0xff]   ;;  %v13890_v45 = vld [vmem:[%s14336_s20 + $0x158] sm:$0xff]  }
  0x21   : > { %12436 = vmatpush3.bf16.msra.mxu0 %v13833_v4  ;;  %v13886_v42 = vld [vmem:[%s14336_s20 + $0x160] sm:$0xff]   ;;  %v13891_v46 = vld [vmem:[%s14336_s20 + $0x118] sm:$0xff]   ;;  %v13892_v48 = vld [vmem:[%s14336_s20 + $0x150] sm:$0xff]  }
  0x22   : > { %12437 = vmatprep.subr.bf16.mxu0 %v18180_v0  ;;  %v13887_v43 = vld [vmem:[%s14336_s20] sm:$0xff]   ;;  %v13893_v49 = vld [vmem:[%s14336_s20 + $0x110] sm:$0xff]   ;;  %v13895_v50 = vld [vmem:[%s14336_s20 + $0x148] sm:$0xff]  }
  0x23   : > { %11322 = vmatpush3.bf16.msra.mxu1 %v13868_v23  ;;  %v13888_v44 = vld [vmem:[%s14336_s20 + $0x120] sm:$0xff]   ;;  %v13896_v51 = vld [vmem:[%s14336_s20 + $0x108] sm:$0xff]   ;;  %v13852_v55 = vld [vmem:[%s14318_s12 + $0x70] sm:$0xff]  }
  0x24   : > { %11323 = vmatprep.subr.bf16.mxu1 %v13869_v25  ;;  %v13850_v47 = vld [vmem:[%s14318_s12 + $0x60] sm:$0xff]   ;;  %v13851_v52 = vld [vmem:[%s14318_s12 + $0x68] sm:$0xff]   ;;  %v13853_v56 = vld [vmem:[%s14318_s12 + $0x78] sm:$0xff]  }
  0x25   : > { %12438 = vmatpush3.bf16.msra.mxu0 %v13834_v5  ;;  %v13897_v53 = vld [vmem:[%s14336_s20 + $0x140] sm:$0xff]   ;;  %v13855_v58 = vld [vmem:[%s14318_s12 + $0x88] sm:$0xff]   ;;  %v13856_v59 = vld [vmem:[%s14318_s12 + $0x90] sm:$0xff]  }
  0x26   : > { %12439 = vmatprep.subr.bf16.mxu0 %v18180_v0  ;;  %v13898_v54 = vld [vmem:[%s14336_s20 + $0x100] sm:$0xff]   ;;  %v13857_v60 = vld [vmem:[%s14318_s12 + $0x98] sm:$0xff]   ;;  %v13859_v62 = vld [vmem:[%s14318_s12 + $0xa8] sm:$0xff]  }
  0x27   : > { %11324 = vmatpush3.bf16.msra.mxu1 %v13870_v26  ;;  %v13854_v57 = vld [vmem:[%s14318_s12 + $0x80] sm:$0xff]   ;;  %v13860_v63 = vld [vmem:[%s14318_s12 + $0xb0] sm:$0xff]   ;;  %v13861_v1 = vld [vmem:[%s14318_s12 + $0xb8] sm:$0xff]  }
  0x28   : > { %11325 = vmatprep.subr.bf16.mxu1 %v13872_v27  ;;  %v13858_v61 = vld [vmem:[%s14318_s12 + $0xa0] sm:$0xff]   ;;  %v13880_v18 = vld [vmem:[%s14318_s12 + $0xd0] sm:$0xff]  }
  0x29   : > { %12440 = vmatpush3.bf16.msra.mxu0 %v13835_v6  ;;  %v13866_v2 = vld [vmem:[%s14318_s12 + $0xc0] sm:$0xff]  }
  0x2a   : > { %12441 = vmatprep.subr.bf16.mxu0 %v18180_v0  ;;  %v14466_v3 = vld [vmem:[%s14462_s14] ss:$0 sm:$0xff] }
  0x2b   : > { %11326 = vmatpush3.bf16.msra.mxu1 %v13874_v29  ;;  %v13889_v29 = vld [vmem:[%s14318_s12 + $0xd8] sm:$0xff]  }
  0x2c   : > { %11327 = vmatprep.subr.bf16.mxu1 %v13876_v32  ;;  %v13899_v32 = vld [vmem:[%s14354_s23 + $0x38] sm:$0xff]  }
  0x2d   : > { %12442 = vmatpush3.bf16.msra.mxu0 %v13836_v7 }
  0x2e   : > { %12443 = vmatprep.subr.bf16.mxu0 %v18180_v0 }
  0x2f   : > { %11328 = vmatpush3.bf16.msra.mxu1 %v13878_v34 }
  0x30   : > { %11329 = vmatprep.subr.bf16.mxu1 %v13881_v36 }
  0x31   : > { %12444 = vmatpush3.bf16.msra.mxu0 %v13837_v8 }
  0x32   : > { %11526 = vmatprep.subr.bf16.mxu0 %v13873_v28 }
  0x33   : > { %11330 = vmatpush3.bf16.msra.mxu1 %v13883_v38  ;;  %v13900_v38 = vld [vmem:[%s14354_s23 + $0x30] sm:$0xff]  }
  0x34   : > { %12446 = vmatmul.mubr.bf16.vlgmr.msra.gmra.mxu0 %v13838_v9  ;;  %11331 = vmatprep.subr.bf16.mxu1 %v13885_v41  ;;  %v13871_v9 = vld [vmem:[%s14318_s12 + $0xc8] sm:$0xff]  }
  0x35   : > { %12449 = vmatprep.mubr.msk.bf16.mxu0 %vm14245_vm0, %v18180_v0  ;;  %11527 = vmatpush3.bf16.msra.mxu0 %v13875_v30 }
  0x36   : > { %11528 = vmatprep.subr.bf16.mxu0 %v13877_v33 }
  0x37   : > { %11332 = vmatpush3.bf16.msra.mxu1 %v13887_v43 }
  0x38   : > { %12561 = vmatprep.subr.bf16.mxu1 %v18180_v0 }
  0x39   : > { %11529 = vmatpush3.bf16.msra.mxu0 %v13879_v35 }
  0x3a   : > { %11530 = vmatprep.subr.bf16.mxu0 %v13882_v37 }
  0x3c   : > { %12450 = vmatmul.mubr.bf16.gmra.mxu0 %v13839_v10 }
  0x3d   : > { %12453 = vmatprep.mubr.msk.bf16.mxu0 %vm14245_vm0, %v18180_v0  ;;  %11531 = vmatpush3.bf16.msra.mxu0 %v13884_v39 }
  0x3e   : > { %11532 = vmatprep.subr.bf16.mxu0 %v13886_v42 }
  0x41   : > { %11533 = vmatpush3.bf16.msra.mxu0 %v13888_v44  ;;  %v13894_v44 = vld [vmem:[%s14318_s12 + $0xe0] sm:$0xff]  }
  0x42   : > { %11534 = vmatprep.subr.bf16.mxu0 %v13890_v45 }
  0x44   : > { %12454 = vmatmul.mubr.bf16.gmra.mxu0 %v13840_v11 }
  0x45   : > { %12457 = vmatprep.mubr.msk.bf16.mxu0 %vm14245_vm0, %v18180_v0  ;;  %11535 = vmatpush3.bf16.msra.mxu0 %v13891_v46 }
  0x46   : > { %11536 = vmatprep.subr.bf16.mxu0 %v13892_v48 }
  0x49   : > { %11537 = vmatpush3.bf16.msra.mxu0 %v13893_v49 }
  0x4a   : > { %11538 = vmatprep.subr.bf16.mxu0 %v13895_v50 }
  0x4c   : > { %12458 = vmatmul.mubr.bf16.gmra.mxu0 %v13841_v12 }
  0x4d   : > { %12461 = vmatprep.mubr.msk.bf16.mxu0 %vm14245_vm0, %v18180_v0  ;;  %11539 = vmatpush3.bf16.msra.mxu0 %v13896_v51 }
  0x4e   : > { %11540 = vmatprep.subr.bf16.mxu0 %v13897_v53  ;;  %v13902_v53 = vld [vmem:[%s14354_s23 + $0x20] sm:$0xff]  }
  0x51   : > { %11541 = vmatpush3.bf16.msra.mxu0 %v13898_v54 }
  0x52   : > { %12629 = vmatprep.subr.bf16.mxu0 %v18180_v0 }
  0x54   : > { %12462 = vmatmul.mubr.bf16.gmra.mxu0 %v13842_v13 }
  0x55   : > { %12465 = vmatprep.mubr.msk.bf16.mxu0 %vm14245_vm0, %v18180_v0 }
  0x5c   : > { %12466 = vmatmul.mubr.bf16.gmra.mxu0 %v13843_v14 }
  0x5d   : > { %12469 = vmatprep.mubr.msk.bf16.mxu0 %vm14245_vm0, %v18180_v0 }
  0x64   : > { %12470 = vmatmul.mubr.bf16.gmra.mxu0 %v13844_v15 }
  0x65   : > { %12473 = vmatprep.mubr.msk.bf16.mxu0 %vm14245_vm0, %v18180_v0 }
  0x6c   : > { %12474 = vmatmul.mubr.bf16.gmra.mxu0 %v13845_v16 }
  0x6d   : > { %12477 = vmatprep.mubr.msk.bf16.mxu0 %vm14245_vm0, %v18180_v0 }
  0x74   : > { %12478 = vmatmul.mubr.bf16.gmra.mxu0 %v13846_v21 }
  0x75   : > { %12481 = vmatprep.mubr.msk.bf16.mxu0 %vm14245_vm0, %v18180_v0 }
  0x7c   : > { %12482 = vmatmul.mubr.bf16.gmra.mxu0 %v13847_v24 }
  0x7d   : > { %12485 = vmatprep.mubr.msk.bf16.mxu0 %vm14245_vm0, %v18180_v0 }
  0x84   : > { %12486 = vmatmul.mubr.bf16.gmra.mxu0 %v13848_v31 }
  0x85   : > { %12489 = vmatprep.mubr.msk.bf16.mxu0 %vm14245_vm0, %v18180_v0 }
  0x8c   : > { %12490 = vmatmul.mubr.bf16.gmra.mxu0 %v13849_v40 }
  0x8d   : > { %12493 = vmatprep.mubr.msk.bf16.mxu0 %vm14245_vm0, %v18180_v0 }
  0x94   : > { %12494 = vmatmul.mubr.bf16.gmra.mxu0 %v13850_v47  ;;  %v13901_v47 = vld [vmem:[%s14354_s23 + $0x28] sm:$0xff]  }
  0x95   : > { %12497 = vmatprep.mubr.msk.bf16.mxu0 %vm14245_vm0, %v18180_v0 }
  0x9c   : > { %12498 = vmatmul.mubr.bf16.gmra.mxu0 %v13851_v52 }
  0x9d   : > { %12501 = vmatprep.mubr.msk.bf16.mxu0 %vm14245_vm0, %v18180_v0 }
  0xa4   : > { %12502 = vmatmul.mubr.bf16.gmra.mxu0 %v13852_v55 }
  0xa5   : > { %12505 = vmatprep.mubr.msk.bf16.mxu0 %vm14245_vm0, %v18180_v0 }
  0xac   : > { %12506 = vmatmul.mubr.bf16.gmra.mxu0 %v13853_v56 }
  0xad   : > { %12509 = vmatprep.mubr.msk.bf16.mxu0 %vm14245_vm0, %v18180_v0 }
  0xb4   : > { %12510 = vmatmul.mubr.bf16.gmra.mxu0 %v13854_v57 }
  0xb5   : > { %12513 = vmatprep.mubr.msk.bf16.mxu0 %vm14245_vm0, %v18180_v0 }
  0xbc   : > { %12514 = vmatmul.mubr.bf16.gmra.mxu0 %v13855_v58 }
  0xbd   : > { %12517 = vmatprep.mubr.msk.bf16.mxu0 %vm14245_vm0, %v18180_v0 }
  0xc4   : > { %12518 = vmatmul.mubr.bf16.gmra.mxu0 %v13856_v59 }
  0xc5   : > { %12521 = vmatprep.mubr.msk.bf16.mxu0 %vm14245_vm0, %v18180_v0 }
  0xcc   : > { %12522 = vmatmul.mubr.bf16.gmra.mxu0 %v13857_v60 }
  0xcd   : > { %12525 = vmatprep.mubr.msk.bf16.mxu0 %vm14245_vm0, %v18180_v0 }
  0xd4   : > { %12526 = vmatmul.mubr.bf16.gmra.mxu0 %v13858_v61  ;;  %v13903_v61 = vld [vmem:[%s14354_s23 + $0x18] sm:$0xff]  }
  0xd5   : > { %12529 = vmatprep.mubr.msk.bf16.mxu0 %vm14245_vm0, %v18180_v0 }
  0xdc   : > { %12530 = vmatmul.mubr.bf16.gmra.mxu0 %v13859_v62 }
  0xdd   : > { %12533 = vmatprep.mubr.msk.bf16.mxu0 %vm14245_vm0, %v18180_v0 }
  0xe4   : > { %12534 = vmatmul.mubr.bf16.gmra.mxu0 %v13860_v63 }
  0xe5   : > { %12537 = vmatprep.mubr.msk.bf16.mxu0 %vm14245_vm0, %v18180_v0 }
  0xec   : > { %12538 = vmatmul.mubr.bf16.gmra.mxu0 %v13861_v1 }
  0xed   : > { %12541 = vmatprep.mubr.msk.bf16.mxu0 %vm14245_vm0, %v18180_v0 }
  0xf4   : > { %v835_v4 = vpop.f32.mrf.mxu0  ;;  %12542 = vmatmul.mubr.bf16.gmra.mxu0 %v13866_v2 }
  0xf5   : > { %v836_v5 = vadd.f32 %v14466_v3, %v835_v4  ;;  %12545 = vmatprep.mubr.msk.bf16.mxu0 %vm14245_vm0, %v18180_v0 }
  0xf6   : > { %v12447_v6 = vpop.f32.mrf.mxu0 }
  0xf7   : > { %v1066_v7 = vmax.f32 %v836_v5, 0.0  ;;  %v13904_v5 = vld [vmem:[%s14354_s23 + $0x10] sm:$0xff]  }
  0xf8   : > { %v838_v8 = vpop.f32.mrf.mxu0 }
  0xf9   : > { %1124 = vst [vmem:[#allocation2] sm:$0xff] %v1066_v7  ;;  %v839_v10 = vadd.f32 %v14466_v3, %v838_v8 }
  0xfa   : > { %v12448_v11 = vpop.f32.mrf.mxu0 }
  0xfb   : > { %v1067_v12 = vmax.f32 %v839_v10, 0.0 }
  0xfc   : > { %v843_v13 = vpop.f32.mrf.mxu0  ;;  %12546 = vmatmul.mubr.bf16.gmra.mxu0 %v13871_v9 }
  0xfd   : > { %1125 = vst [vmem:[#allocation2 + $0x8] sm:$0xff] %v1067_v12  ;;  %v844_v14 = vadd.f32 %v14466_v3, %v843_v13  ;;  %12549 = vmatprep.mubr.msk.bf16.mxu0 %vm14245_vm0, %v18180_v0  ;;  %v1266_v34 = vpack.c.bf16 %v1067_v12, %v1066_v7  ;;  %v13905_v13 = vld [vmem:[%s14354_s23 + $0x8] sm:$0xff]  }
  0xfe   : > { %v12451_v15 = vpop.f32.mrf.mxu0 }
  0xff   : > { %v1068_v16 = vmax.f32 %v844_v14, 0.0 }
 0x100   : > { %v846_v17 = vpop.f32.mrf.mxu0 }
 0x101   : > { %1126 = vst [vmem:[#allocation2 + $0x10] sm:$0xff] %v1068_v16  ;;  %v847_v19 = vadd.f32 %v14466_v3, %v846_v17 }
 0x102   : > { %v12452_v20 = vpop.f32.mrf.mxu0 }
 0x103   : > { %v1069_v21 = vmax.f32 %v847_v19, 0.0  ;;  %v13906_v19 = vld [vmem:[%s14354_s23] sm:$0xff]  }
 0x104   : > { %v851_v22 = vpop.f32.mrf.mxu0  ;;  %12550 = vmatmul.mubr.bf16.gmra.mxu0 %v13880_v18  ;;  %v1241_v27 = vld [vmem:[#allocation2 + $0x1] sm:$0xff] }
 0x105   : > { %1127 = vst [vmem:[#allocation2 + $0x18] sm:$0xff] %v1069_v21  ;;  %v852_v23 = vadd.f32 %v14466_v3, %v851_v22  ;;  %12553 = vmatprep.mubr.msk.bf16.mxu0 %vm14245_vm0, %v18180_v0  ;;  %v1268_v49 = vpack.c.bf16 %v1069_v21, %v1068_v16  ;;  %v13907_v21 = vld [vmem:[%s14336_s20 + $0xf8] sm:$0xff]  }
 0x106   : > { %v12455_v24 = vpop.f32.mrf.mxu0 }
 0x107   : > { %v1070_v25 = vmax.f32 %v852_v23, 0.0 }
 0x108   : > { %v854_v26 = vpop.f32.mrf.mxu0  ;;  %v1242_v28 = vld [vmem:[#allocation2 + $0x9] sm:$0xff] }
 0x109   : > { %1128 = vst [vmem:[#allocation2 + $0x20] sm:$0xff] %v1070_v25  ;;  %v855_v30 = vadd.f32 %v14466_v3, %v854_v26  ;;  %v1267_v31 = vpack.c.bf16 %v1242_v28, %v1241_v27 }
 0x10a   : > { %v12456_v33 = vpop.f32.mrf.mxu0 }
 0x10b   : > { %v1071_v35 = vmax.f32 %v855_v30, 0.0  ;;  %1442 = vmatprep.mubr.bf16.mxu1 %v1267_v31 }
 0x10c   : > { %v859_v36 = vpop.f32.mrf.mxu0  ;;  %12554 = vmatmul.mubr.bf16.gmra.mxu0 %v13889_v29  ;;  %1443 = vmatmul.mubr.bf16.vlgmr.msra.gmra.mxu1 %v1266_v34  ;;  %v1243_v42 = vld [vmem:[#allocation2 + $0x11] sm:$0xff] }
 0x10d   : > { %1129 = vst [vmem:[#allocation2 + $0x28] sm:$0xff] %v1071_v35  ;;  %v14485_v37 = vadd.f32 %v14466_v3, %v859_v36  ;;  %12557 = vmatprep.mubr.msk.bf16.mxu0 %vm14245_vm0, %v18180_v0  ;;  %12562 = vmatpush3.bf16.msra.mxu1 %v13899_v32  ;;  %v14504_v63 = vpack.c.bf16 %v1071_v35, %v1070_v25 }
 0x10e   : > { %v12459_v39 = vpop.f32.mrf.mxu0  ;;  %12563 = vmatprep.subr.bf16.mxu1 %v18180_v0 }
 0x10f   : > { %v1072_v40 = vmax.f32 %v14485_v37, 0.0 }
 0x110   : > { %v862_v41 = vpop.f32.mrf.mxu0  ;;  %v1244_v43 = vld [vmem:[#allocation2 + $0x19] sm:$0xff] }
 0x111   : > { %1130 = vst [vmem:[#allocation2 + $0x30] sm:$0xff] %v1072_v40  ;;  %v863_v45 = vadd.f32 %v14466_v3, %v862_v41  ;;  %v1269_v46 = vpack.c.bf16 %v1244_v43, %v1243_v42  ;;  %12564 = vmatpush3.bf16.msra.mxu1 %v13900_v38 }
 0x112   : > { %v12460_v48 = vpop.f32.mrf.mxu0  ;;  %12565 = vmatprep.subr.bf16.mxu1 %v18180_v0 }
 0x113   : > { %v1073_v50 = vmax.f32 %v863_v45, 0.0  ;;  %1450 = vmatprep.mubr.bf16.mxu1 %v1269_v46 }
 0x114   : > { %v867_v51 = vpop.f32.mrf.mxu0  ;;  %12558 = vmatmul.mubr.bf16.gmra.mxu0 %v13894_v44  ;;  %1451 = vmatmul.mubr.bf16.gmra.mxu1 %v1268_v49  ;;  %v1245_v57 = vld [vmem:[#allocation2 + $0x21] sm:$0xff] }
 0x115   : > { %1131 = vst [vmem:[#allocation2 + $0x38] sm:$0xff] %v1073_v50  ;;  %v14497_v52 = vadd.f32 %v14466_v3, %v867_v51  ;;  %2333 = vmatprep.mubr.bf16.mxu0 %v1269_v46  ;;  %12566 = vmatpush3.bf16.msra.mxu1 %v13901_v47  ;;  %v14513_v15 = vpack.c.bf16 %v1073_v50, %v1072_v40 }
 0x116   : > { %v12463_v54 = vpop.f32.mrf.mxu0  ;;  %12567 = vmatprep.subr.bf16.mxu1 %v18180_v0 }
 0x117   : > { %v1074_v55 = vmax.f32 %v14497_v52, 0.0 }
 0x118   : > { %v870_v56 = vpop.f32.mrf.mxu0  ;;  %v1246_v58 = vld [vmem:[#allocation2 + $0x29] sm:$0xff] }
 0x119   : > { %1132 = vst [vmem:[#allocation2 + $0x40] sm:$0xff] %v1074_v55  ;;  %v871_v59 = vadd.f32 %v14466_v3, %v870_v56  ;;  %v1270_v60 = vpack.c.bf16 %v1246_v58, %v1245_v57  ;;  %12568 = vmatpush3.bf16.msra.mxu1 %v13902_v53 }
 0x11a   : > { %v12464_v62 = vpop.f32.mrf.mxu0  ;;  %12569 = vmatprep.subr.bf16.mxu1 %v18180_v0 }
 0x11b   : > { %v1075_v1 = vmax.f32 %v871_v59, 0.0  ;;  %1458 = vmatprep.mubr.bf16.mxu1 %v1270_v60 }
 0x11c   : > { %v875_v2 = vpop.f32.mrf.mxu0  ;;  %1459 = vmatmul.mubr.bf16.gmra.mxu1 %v14504_v63  ;;  %2334 = vmatmul.mubr.bf16.vlgmr.msra.gmra.mxu0 %v1268_v49  ;;  %v1247_v9 = vld [vmem:[#allocation2 + $0x31] sm:$0xff] }
 0x11d   : > { %1133 = vst [vmem:[#allocation2 + $0x48] sm:$0xff] %v1075_v1  ;;  %v876_v4 = vadd.f32 %v14466_v3, %v875_v2  ;;  %2341 = vmatprep.mubr.bf16.mxu0 %v1270_v60  ;;  %12570 = vmatpush3.bf16.msra.mxu1 %v13903_v61  ;;  %v14523_v29 = vpack.c.bf16 %v1075_v1, %v1074_v55 }
 0x11e   : > { %v12467_v6 = vpop.f32.mrf.mxu0  ;;  %12571 = vmatprep.subr.bf16.mxu1 %v18180_v0 }
 0x11f   : > { %v1076_v7 = vmax.f32 %v876_v4, 0.0 }
 0x120   : > { %v878_v8 = vpop.f32.mrf.mxu0  ;;  %v1248_v10 = vld [vmem:[#allocation2 + $0x39] sm:$0xff] }
 0x121   : > { %1134 = vst [vmem:[#allocation2 + $0x50] sm:$0xff] %v1076_v7  ;;  %v879_v11 = vadd.f32 %v14466_v3, %v878_v8  ;;  %v1271_v12 = vpack.c.bf16 %v1248_v10, %v1247_v9  ;;  %12572 = vmatpush3.bf16.msra.mxu1 %v13904_v5 }
 0x122   : > { %v12468_v14 = vpop.f32.mrf.mxu0  ;;  %12573 = vmatprep.subr.bf16.mxu1 %v18180_v0 }
 0x123   : > { %v1077_v16 = vmax.f32 %v879_v11, 0.0  ;;  %1466 = vmatprep.mubr.bf16.mxu1 %v1271_v12 }
 0x124   : > { %v883_v17 = vpop.f32.mrf.mxu0  ;;  %1467 = vmatmul.mubr.bf16.gmra.mxu1 %v14513_v15  ;;  %2342 = vmatmul.mubr.bf16.gmra.mxu0 %v14504_v63  ;;  %v1249_v24 = vld [vmem:[#allocation2 + $0x41] sm:$0xff] }
 0x125   : > { %1135 = vst [vmem:[#allocation2 + $0x58] sm:$0xff] %v1077_v16  ;;  %v884_v18 = vadd.f32 %v14466_v3, %v883_v17  ;;  %2349 = vmatprep.mubr.bf16.mxu0 %v1271_v12  ;;  %12574 = vmatpush3.bf16.msra.mxu1 %v13905_v13  ;;  %v14529_v41 = vpack.c.bf16 %v1077_v16, %v1076_v7 }
 0x126   : > { %v12471_v20 = vpop.f32.mrf.mxu0  ;;  %12575 = vmatprep.subr.bf16.mxu1 %v18180_v0 }
 0x127   : > { %v1078_v22 = vmax.f32 %v884_v18, 0.0 }
 0x128   : > { %v886_v23 = vpop.f32.mrf.mxu0  ;;  %v1250_v25 = vld [vmem:[#allocation2 + $0x49] sm:$0xff] }
 0x129   : > { %1136 = vst [vmem:[#allocation2 + $0x60] sm:$0xff] %v1078_v22  ;;  %v887_v26 = vadd.f32 %v14466_v3, %v886_v23  ;;  %v1272_v27 = vpack.c.bf16 %v1250_v25, %v1249_v24  ;;  %12576 = vmatpush3.bf16.msra.mxu1 %v13906_v19 }
 0x12a   : > { %v12472_v28 = vpop.f32.mrf.mxu0  ;;  %11432 = vmatprep.subr.bf16.mxu1 %v13907_v21 }
 0x12b   : > { %v1079_v30 = vmax.f32 %v887_v26, 0.0  ;;  %1474 = vmatprep.mubr.bf16.mxu1 %v1272_v27 }
 0x12c   : > { %v891_v31 = vpop.f32.mrf.mxu0  ;;  %1475 = vmatmul.mubr.bf16.gmra.mxu1 %v14523_v29  ;;  %2350 = vmatmul.mubr.bf16.gmra.mxu0 %v14513_v15  ;;  %v1251_v36 = vld [vmem:[#allocation2 + $0x51] sm:$0xff] }
 0x12d   : > { %1137 = vst [vmem:[#allocation2 + $0x68] sm:$0xff] %v1079_v30  ;;  %v892_v32 = vadd.f32 %v14466_v3, %v891_v31  ;;  %2357 = vmatprep.mubr.bf16.mxu0 %v1272_v27  ;;  %v14535_v53 = vpack.c.bf16 %v1079_v30, %v1078_v22 }
 0x12e   : > { %v12475_v33 = vpop.f32.mrf.mxu0 }
 0x12f   : > { %v1080_v34 = vmax.f32 %v892_v32, 0.0 }
 0x130   : > { %v894_v35 = vpop.f32.mrf.mxu0  ;;  %v1252_v37 = vld [vmem:[#allocation2 + $0x59] sm:$0xff] }
 0x131   : > { %1138 = vst [vmem:[#allocation2 + $0x70] sm:$0xff] %v1080_v34  ;;  %v895_v38 = vadd.f32 %v14466_v3, %v894_v35  ;;  %v1273_v39 = vpack.c.bf16 %v1252_v37, %v1251_v36 }
 0x132   : > { %v12476_v40 = vpop.f32.mrf.mxu0 }
 0x133   : > { %v1081_v42 = vmax.f32 %v895_v38, 0.0  ;;  %1482 = vmatprep.mubr.bf16.mxu1 %v1273_v39 }
 0x134   : > { %v899_v43 = vpop.f32.mrf.mxu0  ;;  %1483 = vmatmul.mubr.bf16.gmra.mxu1 %v14529_v41  ;;  %2358 = vmatmul.mubr.bf16.gmra.mxu0 %v14523_v29  ;;  %v1253_v48 = vld [vmem:[#allocation2 + $0x61] sm:$0xff] }
 0x135   : > { %1139 = vst [vmem:[#allocation2 + $0x78] sm:$0xff] %v1081_v42  ;;  %v900_v44 = vadd.f32 %v14466_v3, %v899_v43  ;;  %2365 = vmatprep.mubr.bf16.mxu0 %v1273_v39  ;;  %v14541_v4 = vpack.c.bf16 %v1081_v42, %v1080_v34 }
 0x136   : > { %v12479_v45 = vpop.f32.mrf.mxu0 }
 0x137   : > { %v1082_v46 = vmax.f32 %v900_v44, 0.0 }
 0x138   : > { %v902_v47 = vpop.f32.mrf.mxu0  ;;  %v1254_v49 = vld [vmem:[#allocation2 + $0x69] sm:$0xff] }
 0x139   : > { %1140 = vst [vmem:[#allocation2 + $0x80] sm:$0xff] %v1082_v46  ;;  %v903_v50 = vadd.f32 %v14466_v3, %v902_v47  ;;  %v1274_v51 = vpack.c.bf16 %v1254_v49, %v1253_v48 }
 0x13a   : > { %v12480_v52 = vpop.f32.mrf.mxu0 }
 0x13b   : > { %v1083_v54 = vmax.f32 %v903_v50, 0.0  ;;  %1490 = vmatprep.mubr.bf16.mxu1 %v1274_v51 }
 0x13c   : > { %v907_v55 = vpop.f32.mrf.mxu0  ;;  %1491 = vmatmul.mubr.bf16.gmra.mxu1 %v14535_v53  ;;  %2366 = vmatmul.mubr.bf16.gmra.mxu0 %v14529_v41  ;;  %v1255_v60 = vld [vmem:[#allocation2 + $0x71] sm:$0xff] }
 0x13d   : > { %1141 = vst [vmem:[#allocation2 + $0x88] sm:$0xff] %v1083_v54  ;;  %v908_v56 = vadd.f32 %v14466_v3, %v907_v55  ;;  %2373 = vmatprep.mubr.bf16.mxu0 %v1274_v51  ;;  %v14547_v17 = vpack.c.bf16 %v1083_v54, %v1082_v46 }
 0x13e   : > { %v12483_v57 = vpop.f32.mrf.mxu0 }
 0x13f   : > { %v1084_v58 = vmax.f32 %v908_v56, 0.0 }
 0x140   : > { %v910_v59 = vpop.f32.mrf.mxu0  ;;  %v1256_v61 = vld [vmem:[#allocation2 + $0x79] sm:$0xff] }
 0x141   : > { %1142 = vst [vmem:[#allocation2 + $0x90] sm:$0xff] %v1084_v58  ;;  %v911_v62 = vadd.f32 %v14466_v3, %v910_v59  ;;  %v1275_v1 = vpack.c.bf16 %v1256_v61, %v1255_v60 }
 0x142   : > { %v12484_v2 = vpop.f32.mrf.mxu0 }
 0x143   : > { %v1085_v5 = vmax.f32 %v911_v62, 0.0  ;;  %1498 = vmatprep.mubr.bf16.mxu1 %v1275_v1 }
 0x144   : > { %v915_v6 = vpop.f32.mrf.mxu0  ;;  %1499 = vmatmul.mubr.bf16.gmra.mxu1 %v14541_v4  ;;  %2374 = vmatmul.mubr.bf16.gmra.mxu0 %v14535_v53  ;;  %v1257_v11 = vld [vmem:[#allocation2 + $0x81] sm:$0xff] }
 0x145   : > { %1143 = vst [vmem:[#allocation2 + $0x98] sm:$0xff] %v1085_v5  ;;  %v916_v7 = vadd.f32 %v14466_v3, %v915_v6  ;;  %2381 = vmatprep.mubr.bf16.mxu0 %v1275_v1  ;;  %v14553_v30 = vpack.c.bf16 %v1085_v5, %v1084_v58 }
 0x146   : > { %v12487_v8 = vpop.f32.mrf.mxu0 }
 0x147   : > { %v1086_v9 = vmax.f32 %v916_v7, 0.0 }
 0x148   : > { %v918_v10 = vpop.f32.mrf.mxu0  ;;  %v1258_v12 = vld [vmem:[#allocation2 + $0x89] sm:$0xff] }
 0x149   : > { %1144 = vst [vmem:[#allocation2 + $0xa0] sm:$0xff] %v1086_v9  ;;  %v919_v13 = vadd.f32 %v14466_v3, %v918_v10  ;;  %v1276_v14 = vpack.c.bf16 %v1258_v12, %v1257_v11 }
 0x14a   : > { %v12488_v16 = vpop.f32.mrf.mxu0 }
 0x14b   : > { %v1087_v18 = vmax.f32 %v919_v13, 0.0  ;;  %1506 = vmatprep.mubr.bf16.mxu1 %v1276_v14 }
 0x14c   : > { %v923_v19 = vpop.f32.mrf.mxu0  ;;  %1507 = vmatmul.mubr.bf16.gmra.mxu1 %v14547_v17  ;;  %2382 = vmatmul.mubr.bf16.gmra.mxu0 %v14541_v4  ;;  %v1259_v24 = vld [vmem:[#allocation2 + $0x91] sm:$0xff] }
 0x14d   : > { %1145 = vst [vmem:[#allocation2 + $0xa8] sm:$0xff] %v1087_v18  ;;  %v924_v20 = vadd.f32 %v14466_v3, %v923_v19  ;;  %2389 = vmatprep.mubr.bf16.mxu0 %v1276_v14  ;;  %v14564_v43 = vpack.c.bf16 %v1087_v18, %v1086_v9 }
 0x14e   : > { %v12491_v21 = vpop.f32.mrf.mxu0 }
 0x14f   : > { %v1088_v22 = vmax.f32 %v924_v20, 0.0 }
 0x150   : > { %v926_v23 = vpop.f32.mrf.mxu0  ;;  %v1260_v25 = vld [vmem:[#allocation2 + $0x99] sm:$0xff] }
 0x151   : > { %1146 = vst [vmem:[#allocation2 + $0xb0] sm:$0xff] %v1088_v22  ;;  %v927_v26 = vadd.f32 %v14466_v3, %v926_v23  ;;  %v1277_v27 = vpack.c.bf16 %v1260_v25, %v1259_v24  ;;  %v13908_v23 = vld [vmem:[%s14336_s20 + $0xb8] sm:$0xff]  }
 0x152   : > { %v12492_v28 = vpop.f32.mrf.mxu0 }
 0x153   : > { %v1089_v31 = vmax.f32 %v927_v26, 0.0  ;;  %1514 = vmatprep.mubr.bf16.mxu1 %v1277_v27  ;;  %v13909_v26 = vld [vmem:[%s14336_s20 + $0xf0] sm:$0xff]  }
 0x154   : > { %v931_v32 = vpop.f32.mrf.mxu0  ;;  %1515 = vmatmul.mubr.bf16.gmra.mxu1 %v14553_v30  ;;  %2390 = vmatmul.mubr.bf16.gmra.mxu0 %v14547_v17  ;;  %v1261_v37 = vld [vmem:[#allocation2 + $0xa1] sm:$0xff] }
 0x155   : > { %1147 = vst [vmem:[#allocation2 + $0xb8] sm:$0xff] %v1089_v31  ;;  %v14558_v33 = vadd.f32 %v14466_v3, %v931_v32  ;;  %2397 = vmatprep.mubr.bf16.mxu0 %v1277_v27  ;;  %v14570_v57 = vpack.c.bf16 %v1089_v31, %v1088_v22 }
 0x156   : > { %v12495_v34 = vpop.f32.mrf.mxu0 }
 0x157   : > { %v1090_v35 = vmax.f32 %v14558_v33, 0.0  ;;  %v13910_v33 = vld [vmem:[%s14336_s20 + $0xb0] sm:$0xff]  }
 0x158   : > { %v934_v36 = vpop.f32.mrf.mxu0  ;;  %v1262_v38 = vld [vmem:[#allocation2 + $0xa9] sm:$0xff] }
 0x159   : > { %1148 = vst [vmem:[#allocation2 + $0xc0] sm:$0xff] %v1090_v35  ;;  %v935_v39 = vadd.f32 %v14466_v3, %v934_v36  ;;  %v1278_v40 = vpack.c.bf16 %v1262_v38, %v1261_v37  ;;  %v13911_v36 = vld [vmem:[%s14336_s20 + $0xe8] sm:$0xff]  }
 0x15a   : > { %v12496_v42 = vpop.f32.mrf.mxu0 }
 0x15b   : > { %v1091_v44 = vmax.f32 %v935_v39, 0.0  ;;  %1522 = vmatprep.mubr.bf16.mxu1 %v1278_v40 }
 0x15c   : > { %v939_v45 = vpop.f32.mrf.mxu0  ;;  %1523 = vmatmul.mubr.bf16.gmra.mxu1 %v14564_v43  ;;  %2398 = vmatmul.mubr.bf16.gmra.mxu0 %v14553_v30  ;;  %v1263_v50 = vld [vmem:[#allocation2 + $0xb1] sm:$0xff] }
 0x15d   : > { %1149 = vst [vmem:[#allocation2 + $0xc8] sm:$0xff] %v1091_v44  ;;  %v940_v46 = vadd.f32 %v14466_v3, %v939_v45  ;;  %2405 = vmatprep.mubr.bf16.mxu0 %v1278_v40  ;;  %v14586_v25 = vpack.c.bf16 %v1091_v44, %v1090_v35  ;;  %v13912_v40 = vld [vmem:[%s14336_s20 + $0xa8] sm:$0xff]   ;;  %v13913_v44 = vld [vmem:[%s14336_s20 + $0xe0] sm:$0xff]  }
 0x15e   : > { %v12499_v47 = vpop.f32.mrf.mxu0 }
 0x15f   : > { %v1092_v48 = vmax.f32 %v940_v46, 0.0 }
 0x160   : > { %v942_v49 = vpop.f32.mrf.mxu0  ;;  %v1264_v51 = vld [vmem:[#allocation2 + $0xb9] sm:$0xff]  ;;  %v1265_v52 = vld [vmem:[#allocation2 + $0xc1] sm:$0x7] }
 0x161   : > { %1150 = vst [vmem:[#allocation2 + $0xd0] sm:$0xff] %v1092_v48  ;;  %v943_v54 = vadd.f32 %v14466_v3, %v942_v49  ;;  %v1279_v55 = vpack.c.bf16 %v1264_v51, %v1263_v50  ;;  %v1281_v59 = vpack.c.bf16 %v1265_v52, %v1265_v52  ;;  %v1240_v5 = vld [vmem:[#allocation2 + $0xc0] sm:$0x7]  ;;  %v13915_v50 = vld [vmem:[%s14336_s20 + $0xd8] sm:$0xff]  }
 0x162   : > { %v12500_v56 = vpop.f32.mrf.mxu0  ;;  %v1280_v10 = vpack.c.bf16 %v1240_v5, %v1240_v5 }
 0x163   : > { %v1093_v58 = vmax.f32 %v943_v54, 0.0  ;;  %1530 = vmatprep.mubr.bf16.mxu1 %v1279_v55  ;;  %v13916_v54 = vld [vmem:[%s14336_s20 + $0x98] sm:$0xff]   ;;  %v13917_v56 = vld [vmem:[%s14336_s20 + $0xd0] sm:$0xff]  }
 0x164   : > { %v947_v60 = vpop.f32.mrf.mxu0  ;;  %1531 = vmatmul.mubr.bf16.gmra.mxu1 %v14570_v57  ;;  %2406 = vmatmul.mubr.bf16.gmra.mxu0 %v14564_v43  ;;  %v2143_v11 = vld [vmem:[#allocation2 + $0xc1] sm:$0xff] }
 0x165   : > { %1151 = vst [vmem:[#allocation2 + $0xd8] sm:$0xff] %v1093_v58  ;;  %v948_v61 = vadd.f32 %v14466_v3, %v947_v60  ;;  %1538 = vmatprep.mubr.bf16.mxu1 %v1281_v59  ;;  %2413 = vmatprep.mubr.bf16.mxu0 %v1279_v55  ;;  %v14575_v62 = vpack.c.bf16 %v1093_v58, %v1092_v48  ;;  %v13914_v48 = vld [vmem:[%s14336_s20 + $0xa0] sm:$0xff]  }
 0x166   : > { %v12503_v1 = vpop.f32.mrf.mxu0 }
 0x167   : > { %v1094_v2 = vmax.f32 %v948_v61, 0.0  ;;  %v13918_v61 = vld [vmem:[%s14336_s20 + $0x90] sm:$0xff]  }
 0x168   : > { %v950_v6 = vpop.f32.mrf.mxu0  ;;  %v2144_v7 = vld [vmem:[#allocation2 + $0xc9] sm:$0xff]  ;;  %v2145_v20 = vld [vmem:[#allocation2 + $0xd1] sm:$0x7] }
 0x169   : > { %1152 = vst [vmem:[#allocation2 + $0xe0] sm:$0xff] %v1094_v2  ;;  %v951_v8 = vadd.f32 %v14466_v3, %v950_v6  ;;  %v2169_v13 = vpack.c.bf16 %v2144_v7, %v2143_v11  ;;  %v2171_v27 = vpack.c.bf16 %v2145_v20, %v2145_v20  ;;  %v2120_v34 = vld [vmem:[#allocation2 + $0xd0] sm:$0x7]  ;;  %v13919_v2 = vld [vmem:[%s14336_s20 + $0xc8] sm:$0xff]  }
 0x16a   : > { %v12504_v9 = vpop.f32.mrf.mxu0 }
 0x16b   : > { %v1095_v12 = vmax.f32 %v951_v8, 0.0  ;;  %v13921_v9 = vld [vmem:[%s14336_s20 + $0xc0] sm:$0xff]  }
 0x16c   : > { %v955_v14 = vpop.f32.mrf.mxu0  ;;  %1539 = vmatmul.mubr.bf16.gmra.mxu1 %v1280_v10  ;;  %2414 = vmatmul.mubr.bf16.gmra.mxu0 %v14570_v57 }
 0x16d   : > { %1153 = vst [vmem:[#allocation2 + $0xe8] sm:$0xff] %v1095_v12  ;;  %v956_v16 = vadd.f32 %v14466_v3, %v955_v14  ;;  %2421 = vmatprep.mubr.bf16.mxu0 %v2169_v13  ;;  %12577 = vmatprep.mubr.msk.bf16.mxu1 %vm14245_vm0, %v18180_v0  ;;  %v13922_v13 = vld [vmem:[%s14336_s20 + $0x80] sm:$0xff]  }
 0x16e   : > { %v12507_v18 = vpop.f32.mrf.mxu0 }
 0x16f   : > { %v1096_v19 = vmax.f32 %v956_v16, 0.0  ;;  %v13923_v16 = vld [vmem:[%s14336_s20 + $0x1f8] sm:$0xff]  }
 0x170   : > { %v958_v21 = vpop.f32.mrf.mxu0 }
 0x171   : > { %1154 = vst [vmem:[#allocation2 + $0xf0] sm:$0xff] %v1096_v19  ;;  %v959_v22 = vadd.f32 %v14466_v3, %v958_v21 }
 0x172   : > { %v12508_v24 = vpop.f32.mrf.mxu0 }
 0x173   : > { %v1097_v28 = vmax.f32 %v959_v22, 0.0 }
 0x174   : > { %v963_v31 = vpop.f32.mrf.mxu0  ;;  %12578 = vmatmul.mubr.bf16.vlgmr.msra.gmra.mxu1 %v14504_v63  ;;  %2422 = vmatmul.mubr.bf16.gmra.mxu0 %v14586_v25  ;;  %v2170_v63 = vpack.c.bf16 %v2120_v34, %v2120_v34 }
 0x175   : > { %1155 = vst [vmem:[#allocation2 + $0xf8] sm:$0xff] %v1097_v28  ;;  %v964_v32 = vadd.f32 %v14466_v3, %v963_v31  ;;  %12581 = vmatprep.mubr.msk.bf16.mxu1 %vm14245_vm0, %v18180_v0  ;;  %11433 = vmatpush3.bf16.msra.mxu1 %v13908_v23 }
 0x176   : > { %v12511_v35 = vpop.f32.mrf.mxu0  ;;  %11434 = vmatprep.subr.bf16.mxu1 %v13909_v26  ;;  %2429 = vmatprep.mubr.bf16.mxu0 %v2171_v27 }
 0x177   : > { %v1098_v37 = vmax.f32 %v964_v32, 0.0 }
 0x178   : > { %v966_v38 = vpop.f32.mrf.mxu0 }
 0x179   : > { %1156 = vst [vmem:[#allocation2 + $0x100] sm:$0xff] %v1098_v37  ;;  %v967_v39 = vadd.f32 %v14466_v3, %v966_v38  ;;  %11435 = vmatpush3.bf16.msra.mxu1 %v13910_v33 }
 0x17a   : > { %v12512_v42 = vpop.f32.mrf.mxu0  ;;  %11436 = vmatprep.subr.bf16.mxu1 %v13911_v36 }
 0x17b   : > { %v1099_v45 = vmax.f32 %v967_v39, 0.0 }
 0x17c   : > { %v971_v46 = vpop.f32.mrf.mxu0  ;;  %12582 = vmatmul.mubr.bf16.gmra.mxu1 %v14513_v15  ;;  %2430 = vmatmul.mubr.bf16.gmra.mxu0 %v2170_v63 }
 0x17d   : > { %1157 = vst [vmem:[#allocation2 + $0x108] sm:$0xff] %v1099_v45  ;;  %v972_v47 = vadd.f32 %v14466_v3, %v971_v46  ;;  %12585 = vmatprep.mubr.msk.bf16.mxu1 %vm14245_vm0, %v18180_v0  ;;  %11437 = vmatpush3.bf16.msra.mxu1 %v13912_v40 }
 0x17e   : > { %v12515_v49 = vpop.f32.mrf.mxu0  ;;  %11438 = vmatprep.subr.bf16.mxu1 %v13913_v44  ;;  %12637 = vmatprep.mubr.msk.bf16.mxu0 %vm14245_vm0, %v18180_v0 }
 0x17f   : > { %v1100_v51 = vmax.f32 %v972_v47, 0.0 }
 0x180   : > { %v974_v15 = vpop.f32.mrf.mxu0 }
 0x181   : > { %1158 = vst [vmem:[#allocation2 + $0x110] sm:$0xff] %v1100_v51  ;;  %v975_v52 = vadd.f32 %v14466_v3, %v974_v15  ;;  %11439 = vmatpush3.bf16.msra.mxu1 %v13914_v48 }
 0x182   : > { %v12516_v55 = vpop.f32.mrf.mxu0  ;;  %11440 = vmatprep.subr.bf16.mxu1 %v13915_v50 }
 0x183   : > { %v1101_v58 = vmax.f32 %v975_v52, 0.0 }
 0x184   : > { %v979_v59 = vpop.f32.mrf.mxu0  ;;  %12586 = vmatmul.mubr.bf16.gmra.mxu1 %v14523_v29  ;;  %v13920_v29 = vld [vmem:[%s14336_s20 + $0x88] sm:$0xff]  }
 0x185   : > { %1159 = vst [vmem:[#allocation2 + $0x118] sm:$0xff] %v1101_v58  ;;  %v980_v60 = vadd.f32 %v14466_v3, %v979_v59  ;;  %12589 = vmatprep.mubr.msk.bf16.mxu1 %vm14245_vm0, %v18180_v0  ;;  %11441 = vmatpush3.bf16.msra.mxu1 %v13916_v54 }
 0x186   : > { %v12519_v1 = vpop.f32.mrf.mxu0  ;;  %11442 = vmatprep.subr.bf16.mxu1 %v13917_v56 }
 0x187   : > { %v1102_v5 = vmax.f32 %v980_v60, 0.0 }
 0x188   : > { %v982_v6 = vpop.f32.mrf.mxu0 }
 0x189   : > { %1160 = vst [vmem:[#allocation2 + $0x120] sm:$0xff] %v1102_v5  ;;  %v983_v7 = vadd.f32 %v14466_v3, %v982_v6  ;;  %11443 = vmatpush3.bf16.msra.mxu1 %v13918_v61 }
 0x18a   : > { %v12520_v8 = vpop.f32.mrf.mxu0  ;;  %11444 = vmatprep.subr.bf16.mxu1 %v13919_v2 }
 0x18b   : > { %v1103_v10 = vmax.f32 %v983_v7, 0.0 }
 0x18c   : > { %v987_v11 = vpop.f32.mrf.mxu0  ;;  %12590 = vmatmul.mubr.bf16.gmra.mxu1 %v14529_v41 }
 0x18d   : > { %1161 = vst [vmem:[#allocation2 + $0x128] sm:$0xff] %v1103_v10  ;;  %v988_v12 = vadd.f32 %v14466_v3, %v987_v11  ;;  %12593 = vmatprep.mubr.msk.bf16.mxu1 %vm14245_vm0, %v18180_v0  ;;  %11445 = vmatpush3.bf16.msra.mxu1 %v13920_v29 }
 0x18e   : > { %v12523_v14 = vpop.f32.mrf.mxu0  ;;  %11446 = vmatprep.subr.bf16.mxu1 %v13921_v9 }
 0x18f   : > { %v1104_v18 = vmax.f32 %v988_v12, 0.0 }
 0x190   : > { %v990_v19 = vpop.f32.mrf.mxu0 }
 0x191   : > { %1162 = vst [vmem:[#allocation2 + $0x130] sm:$0xff] %v1104_v18  ;;  %v991_v20 = vadd.f32 %v14466_v3, %v990_v19  ;;  %11447 = vmatpush3.bf16.msra.mxu1 %v13922_v13 }
 0x192   : > { %v12524_v21 = vpop.f32.mrf.mxu0  ;;  %11620 = vmatprep.subr.bf16.mxu1 %v13923_v16 }
 0x193   : > { %v1105_v41 = vmax.f32 %v991_v20, 0.0  ;;  %v1206_v21 = vld [vmem:[#allocation2 + $0xe0] sm:$0x7] }
 0x194   : > { %v995_v22 = vpop.f32.mrf.mxu0  ;;  %12594 = vmatmul.mubr.bf16.gmra.mxu1 %v14535_v53 }
 0x195   : > { %1163 = vst [vmem:[#allocation2 + $0x138] sm:$0xff] %v1105_v41  ;;  %v996_v23 = vadd.f32 %v14466_v3, %v995_v22  ;;  %12597 = vmatprep.mubr.msk.bf16.mxu1 %vm14245_vm0, %v18180_v0 }
 0x196   : > { %v12527_v24 = vpop.f32.mrf.mxu0 }
 0x197   : > { %v1106_v26 = vmax.f32 %v996_v23, 0.0 }
 0x198   : > { %v998_v27 = vpop.f32.mrf.mxu0 }
 0x199   : > { %1164 = vst [vmem:[#allocation2 + $0x140] sm:$0xff] %v1106_v26  ;;  %v999_v28 = vadd.f32 %v14466_v3, %v998_v27 }
 0x19a   : > { %v12528_v31 = vpop.f32.mrf.mxu0 }
 0x19b   : > { %v1107_v32 = vmax.f32 %v999_v28, 0.0  ;;  %v1219_v28 = vpack.c.bf16 %v1206_v21, %v1206_v21  ;;  %v1756_v31 = vld [vmem:[#allocation2 + $0x17] sm:$0xff] }
 0x19c   : > { %v1003_v33 = vpop.f32.mrf.mxu0  ;;  %12598 = vmatmul.mubr.bf16.gmra.mxu1 %v14541_v4 }
 0x19d   : > { %1165 = vst [vmem:[#allocation2 + $0x148] sm:$0xff] %v1107_v32  ;;  %v1004_v53 = vadd.f32 %v14466_v3, %v1003_v33  ;;  %12601 = vmatprep.mubr.msk.bf16.mxu1 %vm14245_vm0, %v18180_v0 }
 0x19e   : > { %v12531_v34 = vpop.f32.mrf.mxu0 }
 0x19f   : > { %v1108_v35 = vmax.f32 %v1004_v53, 0.0  ;;  %v1755_v53 = vld [vmem:[#allocation2 + $0xf] sm:$0xff] }
 0x1a0   : > { %v1006_v36 = vpop.f32.mrf.mxu0 }
 0x1a1   : > { %1166 = vst [vmem:[#allocation2 + $0x150] sm:$0xff] %v1108_v35  ;;  %v1007_v37 = vadd.f32 %v14466_v3, %v1006_v36  ;;  %v1781_v36 = vpack.c.bf16 %v1756_v31, %v1755_v53 }
 0x1a2   : > { %v12532_v38 = vpop.f32.mrf.mxu0 }
 0x1a3   : > { %v1109_v63 = vmax.f32 %v1007_v37, 0.0 }
 0x1a4   : > { %v1011_v39 = vpop.f32.mrf.mxu0  ;;  %12602 = vmatmul.mubr.bf16.gmra.mxu1 %v14547_v17 }
 0x1a5   : > { %1167 = vst [vmem:[#allocation2 + $0x158] sm:$0xff] %v1109_v63  ;;  %v1012_v4 = vadd.f32 %v14466_v3, %v1011_v39  ;;  %12605 = vmatprep.mubr.msk.bf16.mxu1 %vm14245_vm0, %v18180_v0 }
 0x1a6   : > { %v12535_v40 = vpop.f32.mrf.mxu0 }
 0x1a7   : > { %v1110_v42 = vmax.f32 %v1012_v4, 0.0 }
 0x1a8   : > { %v1014_v44 = vpop.f32.mrf.mxu0 }
 0x1a9   : > { %1168 = vst [vmem:[#allocation2 + $0x160] sm:$0xff] %v1110_v42  ;;  %v1015_v45 = vadd.f32 %v14466_v3, %v1014_v44  ;;  %v1731_v44 = vld [vmem:[#allocation2 + $0xa] sm:$0xff] }
 0x1aa   : > { %v12536_v46 = vpop.f32.mrf.mxu0 }
 0x1ab   : > { %v1111_v47 = vmax.f32 %v1015_v45, 0.0 }
 0x1ac   : > { %v1019_v48 = vpop.f32.mrf.mxu0  ;;  %12606 = vmatmul.mubr.bf16.gmra.mxu1 %v14553_v30 }
 0x1ad   : > { %1169 = vst [vmem:[#allocation2 + $0x168] sm:$0xff] %v1111_v47  ;;  %v1020_v17 = vadd.f32 %v14466_v3, %v1019_v48  ;;  %12609 = vmatprep.mubr.msk.bf16.mxu1 %vm14245_vm0, %v18180_v0  ;;  %v1758_v47 = vld [vmem:[#allocation2 + $0x27] sm:$0xff]  ;;  %v14233_v48 = vld [vmem:[%s14462_s14] ss:$0 sm:$0xff] }
 0x1ae   : > { %v12539_v49 = vpop.f32.mrf.mxu0 }
 0x1af   : > { %v1112_v50 = vmax.f32 %v1020_v17, 0.0  ;;  %v1730_v49 = vld [vmem:[#allocation2 + $0x2] sm:$0xff] }
 0x1b0   : > { %v1022_v51 = vpop.f32.mrf.mxu0 }
 0x1b1   : > { %1170 = vst [vmem:[#allocation2 + $0x170] sm:$0xff] %v1112_v50  ;;  %v1023_v15 = vadd.f32 %v14466_v3, %v1022_v51  ;;  %v13924_v50 = vld [vmem:[%s14336_s20 + $0x1b8] sm:$0xff]  }
 0x1b2   : > { %v12540_v52 = vpop.f32.mrf.mxu0 }
 0x1b3   : > { %v1113_v54 = vmax.f32 %v1023_v15, 0.0  ;;  %v1757_v52 = vld [vmem:[#allocation2 + $0x1f] sm:$0xff] }
 0x1b4   : > { %v1027_v55 = vpop.f32.mrf.mxu0  ;;  %12610 = vmatmul.mubr.bf16.gmra.mxu1 %v14564_v43 }
 0x1b5   : > { %1171 = vst [vmem:[#allocation2 + $0x178] sm:$0xff] %v1113_v54  ;;  %v1028_v30 = vadd.f32 %v14466_v3, %v1027_v55  ;;  %12613 = vmatprep.mubr.msk.bf16.mxu1 %vm14245_vm0, %v18180_v0  ;;  %v13925_v54 = vld [vmem:[%s14336_s20 + $0x1f0] sm:$0xff]  }
 0x1b6   : > { %v12543_v56 = vpop.f32.mrf.mxu0 }
 0x1b7   : > { %v1114_v58 = vmax.f32 %v1028_v30, 0.0  ;;  %v14678_v56 = vpack.c.bf16 %v1758_v47, %v1757_v52  ;;  %v13935_v47 = vld [vmem:[%s14336_s20 + $0x1c8] sm:$0xff]  }
 0x1b8   : > { %v1030_v59 = vpop.f32.mrf.mxu0  ;;  %v13936_v52 = vld [vmem:[%s14336_s20 + $0x188] sm:$0xff]  }
 0x1b9   : > { %1172 = vst [vmem:[#allocation2 + $0x180] sm:$0xff] %v1114_v58  ;;  %v1031_v60 = vadd.f32 %v14466_v3, %v1030_v59 }
 0x1ba   : > { %v12544_v61 = vpop.f32.mrf.mxu0 }
 0x1bb   : > { %v1115_v1 = vmax.f32 %v1031_v60, 0.0  ;;  %v13926_v60 = vld [vmem:[%s14336_s20 + $0x1b0] sm:$0xff]  }
 0x1bc   : > { %v1035_v2 = vpop.f32.mrf.mxu0  ;;  %12614 = vmatmul.mubr.bf16.gmra.mxu1 %v14570_v57 }
 0x1bd   : > { %1173 = vst [vmem:[#allocation2 + $0x188] sm:$0xff] %v1115_v1  ;;  %v1036_v43 = vadd.f32 %v14466_v3, %v1035_v2  ;;  %12617 = vmatprep.mubr.msk.bf16.mxu1 %vm14245_vm0, %v18180_v0  ;;  %v13927_v2 = vld [vmem:[%s14336_s20 + $0x1e8] sm:$0xff]  }
 0x1be   : > { %v12547_v5 = vpop.f32.mrf.mxu0 }
 0x1bf   : > { %v1116_v6 = vmax.f32 %v1036_v43, 0.0 }
 0x1c0   : > { %v1038_v7 = vpop.f32.mrf.mxu0 }
 0x1c1   : > { %1174 = vst [vmem:[#allocation2 + $0x190] sm:$0xff] %v1116_v6  ;;  %v1039_v29 = vadd.f32 %v14466_v3, %v1038_v7  ;;  %v1733_v6 = vld [vmem:[#allocation2 + $0x1a] sm:$0xff] }
 0x1c2   : > { %v12548_v8 = vpop.f32.mrf.mxu0 }
 0x1c3   : > { %v1117_v9 = vmax.f32 %v1039_v29, 0.0  ;;  %v1760_v8 = vld [vmem:[#allocation2 + $0x37] sm:$0xff] }
 0x1c4   : > { %v1043_v10 = vpop.f32.mrf.mxu0  ;;  %12618 = vmatmul.mubr.bf16.gmra.mxu1 %v14586_v25 }
 0x1c5   : > { %1175 = vst [vmem:[#allocation2 + $0x198] sm:$0xff] %v1117_v9  ;;  %v1044_v57 = vadd.f32 %v14466_v3, %v1043_v10  ;;  %12621 = vmatprep.mubr.msk.bf16.mxu1 %vm14245_vm0, %v18180_v0  ;;  %v1732_v9 = vld [vmem:[#allocation2 + $0x12] sm:$0xff]  ;;  %v13928_v10 = vld [vmem:[%s14336_s20 + $0x1a8] sm:$0xff]  }
 0x1c6   : > { %v12551_v11 = vpop.f32.mrf.mxu0 }
 0x1c7   : > { %v1118_v12 = vmax.f32 %v1044_v57, 0.0 }
 0x1c8   : > { %v1046_v13 = vpop.f32.mrf.mxu0 }
 0x1c9   : > { %1176 = vst [vmem:[#allocation2 + $0x1a0] sm:$0xff] %v1118_v12  ;;  %v1047_v14 = vadd.f32 %v14466_v3, %v1046_v13  ;;  %v1782_v12 = vpack.c.bf16 %v1733_v6, %v1732_v9  ;;  %v1759_v13 = vld [vmem:[#allocation2 + $0x2f] sm:$0xff] }
 0x1ca   : > { %v12552_v16 = vpop.f32.mrf.mxu0 }
 0x1cb   : > { %v1119_v18 = vmax.f32 %v1047_v14, 0.0  ;;  %v13929_v14 = vld [vmem:[%s14336_s20 + $0x1e0] sm:$0xff]  }
 0x1cc   : > { %v1051_v19 = vpop.f32.mrf.mxu0  ;;  %v11333_v20 = vpop.f32.mrf.mxu1  ;;  %12622 = vmatmul.mubr.bf16.gmra.mxu1 %v14575_v62 }
 0x1cd   : > { %1177 = vst [vmem:[#allocation2 + $0x1a8] sm:$0xff] %v1119_v18  ;;  %v1052_v25 = vadd.f32 %v14466_v3, %v1051_v19  ;;  %12625 = vmatprep.mubr.msk.bf16.mxu1 %vm14245_vm0, %v18180_v0  ;;  %v14695_v18 = vpack.c.bf16 %v1760_v8, %v1759_v13 }
 0x1ce   : > { %v12555_v41 = vpop.f32.mrf.mxu0  ;;  %v11334_v22 = vpop.f32.mrf.mxu1 }
 0x1cf   : > { %v1120_v23 = vmax.f32 %v1052_v25, 0.0  ;;  %v14665_v24 = vadd.f32 %v11334_v22, %v11333_v20  ;;  %v13930_v25 = vld [vmem:[%s14336_s20 + $0x1a0] sm:$0xff]   ;;  %v13931_v22 = vld [vmem:[%s14336_s20 + $0x1d8] sm:$0xff]  }
 0x1d0   : > { %v1054_v26 = vpop.f32.mrf.mxu0  ;;  %v11336_v27 = vpop.f32.mrf.mxu1 }
 0x1d1   : > { %1178 = vst [vmem:[#allocation2 + $0x1b0] sm:$0xff] %v1120_v23  ;;  %v1055_v32 = vadd.f32 %v14466_v3, %v1054_v26 }
 0x1d2   : > { %v12556_v62 = vpop.f32.mrf.mxu0  ;;  %v11337_v33 = vpop.f32.mrf.mxu1 }
 0x1d3   : > { %v1121_v34 = vmax.f32 %v1055_v32, 0.0  ;;  %v14668_v35 = vadd.f32 %v11337_v33, %v11336_v27  ;;  %v1735_v27 = vld [vmem:[#allocation2 + $0x2a] sm:$0xff]  ;;  %v1734_v62 = vld [vmem:[#allocation2 + $0x22] sm:$0xff]  ;;  %v13932_v33 = vld [vmem:[%s14336_s20 + $0x198] sm:$0xff]  }
 0x1d4   : > { %v1059_v37 = vpop.f32.mrf.mxu0  ;;  %v11339_v38 = vpop.f32.mrf.mxu1  ;;  %12626 = vmatmul.mubr.bf16.gmra.mxu1 %v1219_v28  ;;  %v1762_v32 = vld [vmem:[#allocation2 + $0x47] sm:$0xff] }
 0x1d5   : > { %1179 = vst [vmem:[#allocation2 + $0x1b8] sm:$0xff] %v1121_v34  ;;  %v1060_v63 = vadd.f32 %v14466_v3, %v1059_v37  ;;  %1967 = vmatprep.mubr.bf16.mxu1 %v1781_v36  ;;  %v1780_v3 = vpack.c.bf16 %v1731_v44, %v1730_v49  ;;  %v1784_v36 = vpack.c.bf16 %v1735_v27, %v1734_v62  ;;  %v1761_v37 = vld [vmem:[#allocation2 + $0x3f] sm:$0xff]  ;;  %v13934_v44 = vld [vmem:[%s14336_s20 + $0x190] sm:$0xff]  }
 0x1d6   : > { %v12559_v39 = vpop.f32.mrf.mxu0  ;;  %v11340_v4 = vpop.f32.mrf.mxu1  ;;  %v1737_v49 = vld [vmem:[#allocation2 + $0x3a] sm:$0xff] }
 0x1d7   : > { %v1122_v40 = vmax.f32 %v1060_v63, 0.0  ;;  %v14671_v42 = vadd.f32 %v11340_v4, %v11339_v38  ;;  %v13933_v38 = vld [vmem:[%s14336_s20 + $0x1d0] sm:$0xff]   ;;  %v14712_v39 = vpack.c.bf16 %v1762_v32, %v1761_v37 }
 0x1d8   : > { %v1062_v45 = vpop.f32.mrf.mxu0  ;;  %v11342_v46 = vpop.f32.mrf.mxu1 }
 0x1d9   : > { %1180 = vst [vmem:[#allocation2 + $0x1c0] sm:$0xff] %v1122_v40  ;;  %v1063_v17 = vadd.f32 %v14233_v48, %v1062_v45 }
 0x1da   : > { %v12560_v51 = vpop.f32.mrf.mxu0  ;;  %v11343_v15 = vpop.f32.mrf.mxu1 }
 0x1db   : > { %v1123_v55 = vmax.f32 %v1063_v17, 0.0  ;;  %v14676_v30 = vadd.f32 %v11343_v15, %v11342_v46  ;;  %v1764_v15 = vld [vmem:[#allocation2 + $0x57] sm:$0xff] }
 0x1dc   : > { %v11345_v58 = vpop.f32.mrf.mxu1  ;;  %1968 = vmatmul.mubr.bf16.vlgmr.msra.gmra.mxu1 %v1780_v3  ;;  %v11542_v59 = vpop.f32.mrf.mxu0  ;;  %v1736_v3 = vld [vmem:[#allocation2 + $0x32] sm:$0xff] }
 0x1dd   : > { %1181 = vst [vmem:[#allocation2 + $0x1c8] sm:$0xff] %v1123_v55  ;;  %1975 = vmatprep.mubr.bf16.mxu1 %v14678_v56  ;;  %11621 = vmatpush3.bf16.msra.mxu1 %v13924_v50 }
 0x1de   : > { %v11346_v61 = vpop.f32.mrf.mxu1  ;;  %v11543_v1 = vpop.f32.mrf.mxu0  ;;  %11622 = vmatprep.subr.bf16.mxu1 %v13925_v54 }
 0x1df   : > { %v14683_v43 = vadd.f32 %v11346_v61, %v11345_v58  ;;  %v14685_v5 = vadd.f32 %v11543_v1, %v11542_v59  ;;  %v1786_v58 = vpack.c.bf16 %v1737_v49, %v1736_v3  ;;  %v1763_v59 = vld [vmem:[#allocation2 + $0x4f] sm:$0xff] }
 0x1e0   : > { %v11348_v7 = vpop.f32.mrf.mxu1  ;;  %v14687_v29 = vpop.f32.mrf.mxu0  ;;  %v14729_v1 = vpack.c.bf16 %v1764_v15, %v1763_v59 }
 0x1e1   : > { %11623 = vmatpush3.bf16.msra.mxu1 %v13926_v60  ;;  %v13937_v60 = vld [vmem:[%s14336_s20 + $0x1c0] sm:$0xff]  }
 0x1e2   : > { %v11349_v57 = vpop.f32.mrf.mxu1  ;;  %v14690_v11 = vpop.f32.mrf.mxu0  ;;  %11624 = vmatprep.subr.bf16.mxu1 %v13927_v2 }
 0x1e3   : > { %v14693_v16 = vadd.f32 %v11349_v57, %v11348_v7  ;;  %v13938_v7 = vld [vmem:[%s14336_s20 + $0x180] sm:$0xff]  }
 0x1e4   : > { %v11351_v19 = vpop.f32.mrf.mxu1  ;;  %1976 = vmatmul.mubr.bf16.gmra.mxu1 %v1782_v12  ;;  %v11548_v20 = vpop.f32.mrf.mxu0  ;;  %v1739_v12 = vld [vmem:[#allocation2 + $0x4a] sm:$0xff] }
 0x1e5   : > { %1983 = vmatprep.mubr.bf16.mxu1 %v14695_v18  ;;  %11625 = vmatpush3.bf16.msra.mxu1 %v13928_v10 }
 0x1e6   : > { %v11352_v21 = vpop.f32.mrf.mxu1  ;;  %v11549_v41 = vpop.f32.mrf.mxu0  ;;  %11626 = vmatprep.subr.bf16.mxu1 %v13929_v14 }
 0x1e7   : > { %v14700_v23 = vadd.f32 %v11352_v21, %v11351_v19  ;;  %v14702_v26 = vadd.f32 %v11549_v41, %v11548_v20  ;;  %v1766_v19 = vld [vmem:[#allocation2 + $0x67] sm:$0xff] }
 0x1e8   : > { %v11354_v28 = vpop.f32.mrf.mxu1  ;;  %v14704_v31 = vpop.f32.mrf.mxu0  ;;  %v1738_v20 = vld [vmem:[#allocation2 + $0x42] sm:$0xff] }
 0x1e9   : > { %11627 = vmatpush3.bf16.msra.mxu1 %v13930_v25  ;;  %v1788_v41 = vpack.c.bf16 %v1739_v12, %v1738_v20  ;;  %v1742_v12 = vld [vmem:[#allocation2 + $0x62] sm:$0xff] }
 0x1ea   : > { %v11355_v53 = vpop.f32.mrf.mxu1  ;;  %v14707_v34 = vpop.f32.mrf.mxu0  ;;  %11628 = vmatprep.subr.bf16.mxu1 %v13931_v22  ;;  %v1765_v22 = vld [vmem:[#allocation2 + $0x5f] sm:$0xff] }
 0x1eb   : > { %v14710_v63 = vadd.f32 %v11355_v53, %v11354_v28  ;;  %v14744_v28 = vpack.c.bf16 %v1766_v19, %v1765_v22 }
 0x1ec   : > { %v11357_v4 = vpop.f32.mrf.mxu1  ;;  %1984 = vmatmul.mubr.bf16.gmra.mxu1 %v1784_v36  ;;  %v11554_v40 = vpop.f32.mrf.mxu0 }
 0x1ed   : > { %1991 = vmatprep.mubr.bf16.mxu1 %v14712_v39  ;;  %11629 = vmatpush3.bf16.msra.mxu1 %v13932_v33 }
 0x1ee   : > { %v11358_v45 = vpop.f32.mrf.mxu1  ;;  %v11555_v46 = vpop.f32.mrf.mxu0  ;;  %11630 = vmatprep.subr.bf16.mxu1 %v13933_v38  ;;  %v1741_v38 = vld [vmem:[#allocation2 + $0x5a] sm:$0xff] }
 0x1ef   : > { %v14717_v48 = vadd.f32 %v11358_v45, %v11357_v4  ;;  %v14719_v17 = vadd.f32 %v11555_v46, %v11554_v40  ;;  %v1740_v45 = vld [vmem:[#allocation2 + $0x52] sm:$0xff] }
 0x1f0   : > { %v11360_v50 = vpop.f32.mrf.mxu1  ;;  %v14721_v51 = vpop.f32.mrf.mxu0  ;;  %v1790_v49 = vpack.c.bf16 %v1741_v38, %v1740_v45 }
 0x1f1   : > { %11631 = vmatpush3.bf16.msra.mxu1 %v13934_v44  ;;  %v1768_v44 = vld [vmem:[#allocation2 + $0x77] sm:$0xff] }
 0x1f2   : > { %v11361_v54 = vpop.f32.mrf.mxu1  ;;  %v14724_v55 = vpop.f32.mrf.mxu0  ;;  %11632 = vmatprep.subr.bf16.mxu1 %v13935_v47 }
 0x1f3   : > { %v14727_v61 = vadd.f32 %v11361_v54, %v11360_v50  ;;  %v1767_v50 = vld [vmem:[#allocation2 + $0x6f] sm:$0xff] }
 0x1f4   : > { %v11363_v2 = vpop.f32.mrf.mxu1  ;;  %1992 = vmatmul.mubr.bf16.gmra.mxu1 %v1786_v58  ;;  %v11560_v6 = vpop.f32.mrf.mxu0  ;;  %v14757_v3 = vpack.c.bf16 %v1768_v44, %v1767_v50  ;;  %v1745_v44 = vld [vmem:[#allocation2 + $0x7a] sm:$0xff]  ;;  %v1744_v50 = vld [vmem:[#allocation2 + $0x72] sm:$0xff] }
 0x1f5   : > { %1999 = vmatprep.mubr.bf16.mxu1 %v14729_v1  ;;  %11633 = vmatpush3.bf16.msra.mxu1 %v13936_v52 }
 0x1f6   : > { %v11364_v8 = vpop.f32.mrf.mxu1  ;;  %v11561_v9 = vpop.f32.mrf.mxu0  ;;  %11634 = vmatprep.subr.bf16.mxu1 %v13937_v60 }
 0x1f7   : > { %v14733_v10 = vadd.f32 %v11364_v8, %v11363_v2  ;;  %v14735_v57 = vadd.f32 %v11561_v9, %v11560_v6  ;;  %v1743_v6 = vld [vmem:[#allocation2 + $0x6a] sm:$0xff] }
 0x1f8   : > { %v11366_v13 = vpop.f32.mrf.mxu1  ;;  %v14737_v14 = vpop.f32.mrf.mxu0  ;;  %v1770_v9 = vld [vmem:[#allocation2 + $0x87] sm:$0xff]  ;;  %v1792_v20 = vpack.c.bf16 %v1743_v6, %v1742_v12 }
 0x1f9   : > { %11635 = vmatpush3.bf16.msra.mxu1 %v13938_v7 }
 0x1fa   : > { %v11367_v25 = vpop.f32.mrf.mxu1  ;;  %v14739_v21 = vpop.f32.mrf.mxu0  ;;  %12689 = vmatprep.subr.bf16.mxu1 %v18180_v0 }
 0x1fb   : > { %18188 = vst [vmem:[#allocation3_spill] sm:$0xff] %v14739_v21  ;;  %v14742_v27 = vadd.f32 %v11367_v25, %v11366_v13  ;;  %v1769_v25 = vld [vmem:[#allocation2 + $0x7f] sm:$0xff] }
 0x1fc   : > { %v11369_v32 = vpop.f32.mrf.mxu1  ;;  %2000 = vmatmul.mubr.bf16.gmra.mxu1 %v1788_v41  ;;  %v11566_v62 = vpop.f32.mrf.mxu0  ;;  %v14770_v22 = vpack.c.bf16 %v1770_v9, %v1769_v25 }
 0x1fd   : > { %2007 = vmatprep.mubr.bf16.mxu1 %v14744_v28 }
 0x1fe   : > { %v11370_v33 = vpop.f32.mrf.mxu1  ;;  %v11567_v53 = vpop.f32.mrf.mxu0 }
 0x1ff   : > { %v14747_v36 = vadd.f32 %v11370_v33, %v11369_v32  ;;  %v14749_v37 = vadd.f32 %v11567_v53, %v11566_v62 }
 0x200   : > { %v11372_v4 = vpop.f32.mrf.mxu1  ;;  %v14751_v40 = vpop.f32.mrf.mxu0 }
 0x201   : > { %18189 = vst [vmem:[#allocation4_spill] sm:$0xff] %v14749_v37  ;;  %18190 = vst [vmem:[#allocation5_spill] sm:$0xff] %v14751_v40 }
 0x202   : > { %v11373_v46 = vpop.f32.mrf.mxu1  ;;  %v14753_v47 = vpop.f32.mrf.mxu0 }
 0x203   : > { %18191 = vst [vmem:[#allocation6_spill] sm:$0xff] %v14753_v47  ;;  %v14755_v15 = vadd.f32 %v11373_v46, %v11372_v4 }
 0x204   : > { %v11375_v52 = vpop.f32.mrf.mxu1  ;;  %2008 = vmatmul.mubr.bf16.gmra.mxu1 %v1790_v49  ;;  %v11572_v54 = vpop.f32.mrf.mxu0  ;;  %v1772_v49 = vld [vmem:[#allocation2 + $0x97] sm:$0xff] }
 0x205   : > { %2015 = vmatprep.mubr.bf16.mxu1 %v14757_v3 }
 0x206   : > { %v11376_v58 = vpop.f32.mrf.mxu1  ;;  %v11573_v59 = vpop.f32.mrf.mxu0 }
 0x207   : > { %v14760_v60 = vadd.f32 %v11376_v58, %v11375_v52  ;;  %v14762_v2 = vadd.f32 %v11573_v59, %v11572_v54  ;;  %v1794_v58 = vpack.c.bf16 %v1745_v44, %v1744_v50  ;;  %v1771_v59 = vld [vmem:[#allocation2 + $0x8f] sm:$0xff]  ;;  %v1774_v44 = vld [vmem:[#allocation2 + $0xa7] sm:$0xff] }
 0x208   : > { %v11378_v7 = vpop.f32.mrf.mxu1  ;;  %v14764_v8 = vpop.f32.mrf.mxu0 }
 0x209   : > { %18192 = vst [vmem:[#allocation7_spill] sm:$0xff] %v14762_v2  ;;  %18193 = vst [vmem:[#allocation8_spill] sm:$0xff] %v14764_v8 }
 0x20a   : > { %v11379_v13 = vpop.f32.mrf.mxu1  ;;  %v14766_v19 = vpop.f32.mrf.mxu0 }
 0x20b   : > { %18194 = vst [vmem:[#allocation9_spill] sm:$0xff] %v14766_v19  ;;  %v14768_v41 = vadd.f32 %v11379_v13, %v11378_v7  ;;  %v14783_v7 = vpack.c.bf16 %v1772_v49, %v1771_v59 }
 0x20c   : > { %v11381_v32 = vpop.f32.mrf.mxu1  ;;  %2016 = vmatmul.mubr.bf16.gmra.mxu1 %v1792_v20  ;;  %v11578_v62 = vpop.f32.mrf.mxu0 }
 0x20d   : > { %2023 = vmatprep.mubr.bf16.mxu1 %v14770_v22 }
 0x20e   : > { %v11382_v33 = vpop.f32.mrf.mxu1  ;;  %v11579_v53 = vpop.f32.mrf.mxu0 }
 0x20f   : > { %v14773_v38 = vadd.f32 %v11382_v33, %v11381_v32  ;;  %v14775_v4 = vadd.f32 %v11579_v53, %v11578_v62  ;;  %v1747_v62 = vld [vmem:[#allocation2 + $0x8a] sm:$0xff] }
 0x210   : > { %v11384_v45 = vpop.f32.mrf.mxu1  ;;  %v14777_v46 = vpop.f32.mrf.mxu0 }
 0x211   : > { %18195 = vst [vmem:[#allocation10_spill] sm:$0xff] %v14775_v4  ;;  %18196 = vst [vmem:[#allocation11_spill] sm:$0xff] %v14777_v46 }
 0x212   : > { %v11385_v52 = vpop.f32.mrf.mxu1  ;;  %v14779_v54 = vpop.f32.mrf.mxu0 }
 0x213   : > { %18197 = vst [vmem:[#allocation12_spill] sm:$0xff] %v14779_v54  ;;  %v14781_v6 = vadd.f32 %v11385_v52, %v11384_v45  ;;  %v1746_v45 = vld [vmem:[#allocation2 + $0x82] sm:$0xff] }
 0x214   : > { %v11387_v9 = vpop.f32.mrf.mxu1  ;;  %2024 = vmatmul.mubr.bf16.gmra.mxu1 %v1794_v58  ;;  %v11584_v12 = vpop.f32.mrf.mxu0  ;;  %v1796_v52 = vpack.c.bf16 %v1747_v62, %v1746_v45  ;;  %v1773_v58 = vld [vmem:[#allocation2 + $0x9f] sm:$0xff]  ;;  %v1776_v62 = vld [vmem:[#allocation2 + $0xb7] sm:$0xff] }
 0x215   : > { %2031 = vmatprep.mubr.bf16.mxu1 %v14783_v7  ;;  %v14796_v0 = vpack.c.bf16 %v1774_v44, %v1773_v58 }
 0x216   : > { %v11388_v13 = vpop.f32.mrf.mxu1  ;;  %v11585_v20 = vpop.f32.mrf.mxu0 }
 0x217   : > { %v14786_v25 = vadd.f32 %v11388_v13, %v11387_v9  ;;  %v14788_v32 = vadd.f32 %v11585_v20, %v11584_v12 }
 0x218   : > { %v11390_v33 = vpop.f32.mrf.mxu1  ;;  %v14790_v53 = vpop.f32.mrf.mxu0 }
 0x219   : > { %18198 = vst [vmem:[#allocation13_spill] sm:$0xff] %v14788_v32  ;;  %18199 = vst [vmem:[#allocation14_spill] sm:$0xff] %v14790_v53  ;;  %v1749_v32 = vld [vmem:[#allocation2 + $0x9a] sm:$0xff] }
 0x21a   : > { %v11391_v50 = vpop.f32.mrf.mxu1  ;;  %v14792_v49 = vpop.f32.mrf.mxu0 }
 0x21b   : > { %18200 = vst [vmem:[#allocation15_spill] sm:$0xff] %v14792_v49  ;;  %v14794_v59 = vadd.f32 %v11391_v50, %v11390_v33  ;;  %v1748_v33 = vld [vmem:[#allocation2 + $0x92] sm:$0xff] }
 0x21c   : > { %v11393_v54 = vpop.f32.mrf.mxu1  ;;  %2032 = vmatmul.mubr.bf16.gmra.mxu1 %v1796_v52  ;;  %v11590_v9 = vpop.f32.mrf.mxu0  ;;  %v1798_v50 = vpack.c.bf16 %v1749_v32, %v1748_v33  ;;  %v1775_v52 = vld [vmem:[#allocation2 + $0xaf] sm:$0xff]  ;;  %v1778_v32 = vld [vmem:[#allocation2 + $0xc7] sm:$0xff] }
 0x21d   : > { %2039 = vmatprep.mubr.bf16.mxu1 %v14796_v0  ;;  %v14809_v4 = vpack.c.bf16 %v1776_v62, %v1775_v52 }
 0x21e   : > { %v11394_v12 = vpop.f32.mrf.mxu1  ;;  %v11591_v13 = vpop.f32.mrf.mxu0 }
 0x21f   : > { %v14799_v20 = vadd.f32 %v11394_v12, %v11393_v54  ;;  %v14801_v53 = vadd.f32 %v11591_v13, %v11590_v9 }
 0x220   : > { %v11396_v46 = vpop.f32.mrf.mxu1  ;;  %v14803_v49 = vpop.f32.mrf.mxu0 }
 0x221   : > { %18201 = vst [vmem:[#allocation16_spill] sm:$0xff] %v14801_v53  ;;  %18202 = vst [vmem:[#allocation17_spill] sm:$0xff] %v14803_v49  ;;  %v1751_v53 = vld [vmem:[#allocation2 + $0xaa] sm:$0xff] }
 0x222   : > { %v11397_v45 = vpop.f32.mrf.mxu1  ;;  %v14805_v44 = vpop.f32.mrf.mxu0 }
 0x223   : > { %18203 = vst [vmem:[#allocation18_spill] sm:$0xff] %v14805_v44  ;;  %v14807_v58 = vadd.f32 %v11397_v45, %v11396_v46  ;;  %v1750_v46 = vld [vmem:[#allocation2 + $0xa2] sm:$0xff] }
 0x224   : > { %v11399_v19 = vpop.f32.mrf.mxu1  ;;  %2040 = vmatmul.mubr.bf16.gmra.mxu1 %v1798_v50  ;;  %v11596_v54 = vpop.f32.mrf.mxu0  ;;  %v1800_v45 = vpack.c.bf16 %v1751_v53, %v1750_v46  ;;  %v1777_v50 = vld [vmem:[#allocation2 + $0xbf] sm:$0xff]  ;;  %v1779_v53 = vld [vmem:[#allocation2 + $0xcf] sm:$0x7] }
 0x225   : > { %2047 = vmatprep.mubr.bf16.mxu1 %v14809_v4  ;;  %v14822_v2 = vpack.c.bf16 %v1778_v32, %v1777_v50 }
 0x226   : > { %v11400_v9 = vpop.f32.mrf.mxu1  ;;  %v11597_v12 = vpop.f32.mrf.mxu0 }
 0x227   : > { %v14812_v13 = vadd.f32 %v11400_v9, %v11399_v19  ;;  %v14814_v49 = vadd.f32 %v11597_v12, %v11596_v54 }
 0x228   : > { %v11402_v8 = vpop.f32.mrf.mxu1  ;;  %v14816_v44 = vpop.f32.mrf.mxu0 }
 0x229   : > { %18204 = vst [vmem:[#allocation19_spill] sm:$0xff] %v14814_v49  ;;  %18205 = vst [vmem:[#allocation20_spill] sm:$0xff] %v14816_v44  ;;  %v1753_v49 = vld [vmem:[#allocation2 + $0xba] sm:$0xff] }
 0x22a   : > { %v11403_v33 = vpop.f32.mrf.mxu1  ;;  %v14818_v62 = vpop.f32.mrf.mxu0 }
 0x22b   : > { %18206 = vst [vmem:[#allocation21_spill] sm:$0xff] %v14818_v62  ;;  %v14820_v52 = vadd.f32 %v11403_v33, %v11402_v8  ;;  %v1752_v8 = vld [vmem:[#allocation2 + $0xb2] sm:$0xff] }
 0x22c   : > { %v11405_v47 = vpop.f32.mrf.mxu1  ;;  %2048 = vmatmul.mubr.bf16.gmra.mxu1 %v1800_v45  ;;  %v11602_v19 = vpop.f32.mrf.mxu0  ;;  %v1802_v33 = vpack.c.bf16 %v1753_v49, %v1752_v8  ;;  %v1805_v45 = vpack.c.bf16 %v1779_v53, %v1779_v53 }
 0x22d   : > { %2055 = vmatprep.mubr.bf16.mxu1 %v14822_v2 }
 0x22e   : > { %v11406_v54 = vpop.f32.mrf.mxu1  ;;  %v11603_v9 = vpop.f32.mrf.mxu0 }
 0x22f   : > { %v14825_v12 = vadd.f32 %v11406_v54, %v11405_v47  ;;  %v14827_v44 = vadd.f32 %v11603_v9, %v11602_v19 }
 0x230   : > { %v11408_v40 = vpop.f32.mrf.mxu1  ;;  %v14829_v62 = vpop.f32.mrf.mxu0 }
 0x231   : > { %18207 = vst [vmem:[#allocation22_spill] sm:$0xff] %v14829_v62  ;;  %v1754_v40 = vld [vmem:[#allocation2 + $0xc2] sm:$0x7] }
 0x232   : > { %v11409_v46 = vpop.f32.mrf.mxu1  ;;  %v14831_v32 = vpop.f32.mrf.mxu0  ;;  %v1804_v8 = vpack.c.bf16 %v1754_v40, %v1754_v40 }
 0x234   : > { %v1628_v50 = vpop.f32.mrf.mxu1  ;;  %2056 = vmatmul.mubr.bf16.gmra.mxu1 %v1802_v33  ;;  %v11608_v37 = vpop.f32.mrf.mxu0 }
 0x235   : > { %v14834_v21 = vadd.f32 %v14665_v24, %v1628_v50  ;;  %2063 = vmatprep.mubr.bf16.mxu1 %v1805_v45 }
 0x236   : > { %v12579_v47 = vpop.f32.mrf.mxu1  ;;  %v11609_v19 = vpop.f32.mrf.mxu0 }
 0x237   : > { %v14836_v54 = vadd.f32 %v11609_v19, %v11608_v37  ;;  %v2463_v47 = vld [vmem:[#allocation2 + $0x26] sm:$0xff] }
 0x238   : > { %v1631_v9 = vpop.f32.mrf.mxu1  ;;  %v14838_v62 = vpop.f32.mrf.mxu0 }
 0x239   : > { %18208 = vst [vmem:[#allocation23_spill] sm:$0xff] %v14836_v54  ;;  %18209 = vst [vmem:[#allocation24_spill] sm:$0xff] %v14838_v62  ;;  %v14841_v46 = vadd.f32 %v14668_v35, %v1631_v9 }
 0x23a   : > { %v12580_v49 = vpop.f32.mrf.mxu1  ;;  %v14843_v53 = vpop.f32.mrf.mxu0 }
 0x23b   : > { %18210 = vst [vmem:[#allocation25_spill] sm:$0xff] %v14843_v53  ;;  %v2462_v49 = vld [vmem:[#allocation2 + $0x1e] sm:$0xff] }
 0x23c   : > { %v1636_v33 = vpop.f32.mrf.mxu1  ;;  %2064 = vmatmul.mubr.bf16.gmra.mxu1 %v1804_v8  ;;  %v11614_v24 = vpop.f32.mrf.mxu0  ;;  %v2512_v53 = vpack.c.bf16 %v2463_v47, %v2462_v49  ;;  %v2466_v49 = vld [vmem:[#allocation2 + $0x3e] sm:$0xff] }
 0x23d   : > { %v14846_v45 = vadd.f32 %v14671_v42, %v1636_v33  ;;  %2699 = vmatprep.mubr.bf16.mxu1 %v14678_v56  ;;  %v2465_v33 = vld [vmem:[#allocation2 + $0x36] sm:$0xff] }
 0x23e   : > { %v12583_v37 = vpop.f32.mrf.mxu1  ;;  %v11615_v50 = vpop.f32.mrf.mxu0 }
 0x23f   : > { %v14849_v19 = vadd.f32 %v11615_v50, %v11614_v24  ;;  %v2464_v50 = vld [vmem:[#allocation2 + $0x2e] sm:$0xff] }
 0x240   : > { %v1639_v62 = vpop.f32.mrf.mxu1  ;;  %v11617_v35 = vpop.f32.mrf.mxu0 }
 0x241   : > { %v14852_v9 = vadd.f32 %v14676_v30, %v1639_v62  ;;  %v2514_v62 = vpack.c.bf16 %v2465_v33, %v2464_v50  ;;  %v2469_v33 = vld [vmem:[#allocation2 + $0x56] sm:$0xff]  ;;  %v2468_v50 = vld [vmem:[#allocation2 + $0x4e] sm:$0xff] }
 0x242   : > { %v12584_v40 = vpop.f32.mrf.mxu1  ;;  %v11618_v8 = vpop.f32.mrf.mxu0 }
 0x244   : > { %v1644_v54 = vpop.f32.mrf.mxu1  ;;  %2700 = vmatmul.mubr.bf16.vlgmr.msra.gmra.mxu1 %v2512_v53 }
 0x245   : > { %v14855_v42 = vadd.f32 %v14683_v43, %v1644_v54  ;;  %2707 = vmatprep.mubr.bf16.mxu1 %v14695_v18  ;;  %v2467_v54 = vld [vmem:[#allocation2 + $0x46] sm:$0xff] }
 0x246   : > { %v12587_v56 = vpop.f32.mrf.mxu1 }
 0x248   : > { %v1647_v24 = vpop.f32.mrf.mxu1 }
 0x249   : > { %v14859_v37 = vadd.f32 %v14693_v16, %v1647_v24  ;;  %v2516_v16 = vpack.c.bf16 %v2467_v54, %v2466_v49  ;;  %v2471_v54 = vld [vmem:[#allocation2 + $0x66] sm:$0xff]  ;;  %v2470_v49 = vld [vmem:[#allocation2 + $0x5e] sm:$0xff] }
 0x24a   : > { %v12588_v30 = vpop.f32.mrf.mxu1 }
 0x24b   : > { %v2518_v30 = vpack.c.bf16 %v2469_v33, %v2468_v50  ;;  %v2472_v50 = vld [vmem:[#allocation2 + $0x6e] sm:$0xff] }
 0x24c   : > { %v1652_v35 = vpop.f32.mrf.mxu1  ;;  %2708 = vmatmul.mubr.bf16.gmra.mxu1 %v2514_v62 }
 0x24d   : > { %v14862_v47 = vadd.f32 %v14700_v23, %v1652_v35  ;;  %2715 = vmatprep.mubr.bf16.mxu1 %v14712_v39 }
 0x24e   : > { %v12591_v43 = vpop.f32.mrf.mxu1 }
 0x250   : > { %v1655_v53 = vpop.f32.mrf.mxu1 }
 0x251   : > { %v14866_v18 = vadd.f32 %v14710_v63, %v1655_v53  ;;  %v18211_v53 = vmov 0.0  }
 0x252   : > { %v12592_v40 = vpop.f32.mrf.mxu1 }
 0x254   : > { %v1660_v8 = vpop.f32.mrf.mxu1  ;;  %2716 = vmatmul.mubr.bf16.gmra.mxu1 %v2516_v16  ;;  %v2520_v16 = vpack.c.bf16 %v2471_v54, %v2470_v49  ;;  %v2474_v54 = vld [vmem:[#allocation2 + $0x7e] sm:$0xff] }
 0x255   : > { %v14869_v56 = vadd.f32 %v14717_v48, %v1660_v8  ;;  %2723 = vmatprep.mubr.bf16.mxu1 %v14729_v1  ;;  %v13939_v48 = vld [vmem:[%s14369_s9 + $0x38] sm:$0xff]  }
 0x256   : > { %v12595_v23 = vpop.f32.mrf.mxu1  ;;  %12690 = vmatpush3.bf16.msra.mxu1 %v13939_v48  ;;  %v2475_v48 = vld [vmem:[#allocation2 + $0x86] sm:$0xff] }
 0x257   : > { %12691 = vmatprep.subr.bf16.mxu1 %v18211_v53  ;;  %v2473_v23 = vld [vmem:[#allocation2 + $0x76] sm:$0xff] }
 0x258   : > { %v1663_v39 = vpop.f32.mrf.mxu1 }
 0x259   : > { %v14873_v24 = vadd.f32 %v14727_v61, %v1663_v39 }
 0x25a   : > { %v12596_v63 = vpop.f32.mrf.mxu1 }
 0x25c   : > { %v1668_v62 = vpop.f32.mrf.mxu1  ;;  %2724 = vmatmul.mubr.bf16.gmra.mxu1 %v2518_v30 }
 0x25d   : > { %v14876_v35 = vadd.f32 %v14733_v10, %v1668_v62  ;;  %2731 = vmatprep.mubr.bf16.mxu1 %v14744_v28 }
 0x25e   : > { %v12599_v43 = vpop.f32.mrf.mxu1 }
 0x260   : > { %v1671_v1 = vpop.f32.mrf.mxu1 }
 0x261   : > { %v14882_v61 = vadd.f32 %v14742_v27, %v1671_v1  ;;  %v2522_v27 = vpack.c.bf16 %v2473_v23, %v2472_v50  ;;  %v2524_v1 = vpack.c.bf16 %v2475_v48, %v2474_v54  ;;  %v13940_v23 = vld [vmem:[%s14369_s9 + $0x30] sm:$0xff]  }
 0x262   : > { %v12600_v40 = vpop.f32.mrf.mxu1  ;;  %12692 = vmatpush3.bf16.msra.mxu1 %v13940_v23  ;;  %v13944_v23 = vld [vmem:[%s14369_s9 + $0x28] sm:$0xff]  }
 0x263   : > { %12693 = vmatprep.subr.bf16.mxu1 %v18211_v53 }
 0x264   : > { %v1676_v8 = vpop.f32.mrf.mxu1  ;;  %2732 = vmatmul.mubr.bf16.gmra.mxu1 %v2520_v16  ;;  %v2477_v16 = vld [vmem:[#allocation2 + $0x96] sm:$0xff] }
 0x265   : > { %v14885_v10 = vadd.f32 %v14747_v36, %v1676_v8  ;;  %2739 = vmatprep.mubr.bf16.mxu1 %v14757_v3 }
 0x266   : > { %v12603_v28 = vpop.f32.mrf.mxu1  ;;  %12694 = vmatpush3.bf16.msra.mxu1 %v13944_v23  ;;  %v2486_v23 = vld [vmem:[#allocation2 + $0xde] sm:$0x7] }
 0x267   : > { %v2476_v28 = vld [vmem:[#allocation2 + $0x8e] sm:$0xff]  ;;  %12695 = vmatprep.subr.bf16.mxu1 %v18211_v53 }
 0x268   : > { %v1679_v33 = vpop.f32.mrf.mxu1 }
 0x269   : > { %v14889_v39 = vadd.f32 %v14755_v15, %v1679_v33  ;;  %v2526_v33 = vpack.c.bf16 %v2477_v16, %v2476_v28 }
 0x26a   : > { %v12604_v63 = vpop.f32.mrf.mxu1 }
 0x26b   : > { %v2479_v63 = vld [vmem:[#allocation2 + $0xa6] sm:$0xff] }
 0x26c   : > { %v1684_v30 = vpop.f32.mrf.mxu1  ;;  %2740 = vmatmul.mubr.bf16.gmra.mxu1 %v2522_v27 }
 0x26d   : > { %v14892_v62 = vadd.f32 %v14760_v60, %v1684_v30  ;;  %2747 = vmatprep.mubr.bf16.mxu1 %v14770_v22  ;;  %v2478_v30 = vld [vmem:[#allocation2 + $0x9e] sm:$0xff] }
 0x26e   : > { %v12607_v36 = vpop.f32.mrf.mxu1  ;;  %v2528_v48 = vpack.c.bf16 %v2479_v63, %v2478_v30  ;;  %v2482_v63 = vld [vmem:[#allocation2 + $0xbe] sm:$0xff] }
 0x26f   : > { %v13945_v30 = vld [vmem:[%s14369_s9] sm:$0xff]  }
 0x270   : > { %v1687_v3 = vpop.f32.mrf.mxu1 }
 0x271   : > { %v14896_v43 = vadd.f32 %v14768_v41, %v1687_v3 }
 0x272   : > { %v12608_v15 = vpop.f32.mrf.mxu1 }
 0x273   : > { %v13941_v15 = vld [vmem:[%s14369_s9 + $0x18] sm:$0xff]  }
 0x274   : > { %v1692_v49 = vpop.f32.mrf.mxu1  ;;  %2748 = vmatmul.mubr.bf16.gmra.mxu1 %v2524_v1  ;;  %12630 = vmatpush3.bf16.msra.mxu0 %v13941_v15  ;;  %v2485_v15 = vld [vmem:[#allocation2 + $0xd6] sm:$0xff] }
 0x275   : > { %v14899_v40 = vadd.f32 %v14773_v38, %v1692_v49  ;;  %2755 = vmatprep.mubr.bf16.mxu1 %v14783_v7  ;;  %v2480_v49 = vld [vmem:[#allocation2 + $0xae] sm:$0xff]  ;;  %12631 = vmatprep.subr.bf16.mxu0 %v18211_v53 }
 0x276   : > { %v12611_v60 = vpop.f32.mrf.mxu1 }
 0x278   : > { %v1695_v22 = vpop.f32.mrf.mxu1 }
 0x279   : > { %v14903_v8 = vadd.f32 %v14781_v6, %v1695_v22  ;;  %v13942_v22 = vld [vmem:[%s14369_s9 + $0x10] sm:$0xff]  }
 0x27a   : > { %v12612_v41 = vpop.f32.mrf.mxu1  ;;  %12632 = vmatpush3.bf16.msra.mxu0 %v13942_v22 }
 0x27b   : > { %12633 = vmatprep.subr.bf16.mxu0 %v18211_v53  ;;  %v2483_v41 = vld [vmem:[#allocation2 + $0xc6] sm:$0xff] }
 0x27c   : > { %v1700_v50 = vpop.f32.mrf.mxu1  ;;  %2756 = vmatmul.mubr.bf16.gmra.mxu1 %v2526_v33 }
 0x27d   : > { %v14908_v38 = vadd.f32 %v14786_v25, %v1700_v50  ;;  %2763 = vmatprep.mubr.bf16.mxu1 %v14796_v0  ;;  %v2481_v0 = vld [vmem:[#allocation2 + $0xb6] sm:$0xff] }
 0x27e   : > { %v12615_v7 = vpop.f32.mrf.mxu1  ;;  %v2530_v16 = vpack.c.bf16 %v2481_v0, %v2480_v49  ;;  %v2510_v50 = vld [vmem:[#allocation2 + $0xd7] sm:$0xff]  ;;  %v2484_v49 = vld [vmem:[#allocation2 + $0xce] sm:$0xff] }
 0x280   : > { %v1703_v27 = vpop.f32.mrf.mxu1 }
 0x281   : > { %v14912_v6 = vadd.f32 %v14794_v59, %v1703_v27  ;;  %v2509_v27 = vld [vmem:[#allocation2 + $0xcf] sm:$0xff] }
 0x282   : > { %v12616_v36 = vpop.f32.mrf.mxu1 }
 0x283   : > { %v13946_v36 = vld [vmem:[%s14369_s9 + $0x20] sm:$0xff]  }
 0x284   : > { %v1708_v3 = vpop.f32.mrf.mxu1  ;;  %2764 = vmatmul.mubr.bf16.gmra.mxu1 %v2528_v48  ;;  %v2535_v48 = vpack.c.bf16 %v2510_v50, %v2509_v27  ;;  %v2536_v50 = vpack.c.bf16 %v2486_v23, %v2486_v23  ;;  %v11547_v27 = vadd.f32 %v14690_v11, %v14687_v29  ;;  %v11553_v29 = vadd.f32 %v14707_v34, %v14704_v31 }
 0x285   : > { %v14915_v54 = vadd.f32 %v14799_v20, %v1708_v3  ;;  %2771 = vmatprep.mubr.bf16.mxu1 %v14809_v4  ;;  %12696 = vmatpush3.bf16.msra.mxu1 %v13946_v36 }
 0x286   : > { %v12619_v25 = vpop.f32.mrf.mxu1 }
 0x288   : > { %v1711_v1 = vpop.f32.mrf.mxu1 }
 0x289   : > { %v14920_v59 = vadd.f32 %v14807_v58, %v1711_v1  ;;  %v13943_v58 = vld [vmem:[%s14369_s9 + $0x8] sm:$0xff]   ;;  %v2511_v1 = vld [vmem:[#allocation2 + $0xdf] sm:$0x7] }
 0x28a   : > { %v12620_v60 = vpop.f32.mrf.mxu1  ;;  %12634 = vmatpush3.bf16.msra.mxu0 %v13943_v58  ;;  %v2537_v22 = vpack.c.bf16 %v2511_v1, %v2511_v1 }
 0x28b   : > { %12635 = vmatprep.subr.bf16.mxu0 %v18211_v53 }
 0x28c   : > { %v1716_v20 = vpop.f32.mrf.mxu1  ;;  %2772 = vmatmul.mubr.bf16.gmra.mxu1 %v2530_v16  ;;  %v2534_v16 = vpack.c.bf16 %v2485_v15, %v2484_v49 }
 0x28d   : > { %v14925_v4 = vadd.f32 %v14812_v13, %v1716_v20  ;;  %2779 = vmatprep.mubr.bf16.mxu1 %v14822_v2  ;;  %v2532_v13 = vpack.c.bf16 %v2483_v41, %v2482_v63 }
 0x28e   : > { %v12623_v28 = vpop.f32.mrf.mxu1  ;;  %12636 = vmatpush3.bf16.msra.mxu0 %v13945_v30 }
 0x290   : > { %v1719_v33 = vpop.f32.mrf.mxu1 }
 0x291   : > { %v14932_v7 = vadd.f32 %v14820_v52, %v1719_v33 }
 0x292   : > { %v12624_v2 = vpop.f32.mrf.mxu1 }
 0x294   : > { %v1724_v3 = vpop.f32.mrf.mxu1  ;;  %2780 = vmatmul.mubr.bf16.gmra.mxu1 %v2532_v13 }
 0x295   : > { %v14939_v25 = vadd.f32 %v14825_v12, %v1724_v3  ;;  %2787 = vmatprep.mubr.bf16.mxu1 %v2535_v48 }
 0x296   : > { %v12627_v52 = vpop.f32.mrf.mxu1 }
 0x298   : > { %v1727_v0 = vpop.f32.mrf.mxu1 }
 0x29a   : > { %v12628_v60 = vpop.f32.mrf.mxu1 }
 0x29c   : > { %v11448_v20 = vpop.f32.mrf.mxu1  ;;  %2788 = vmatmul.mubr.bf16.gmra.mxu1 %v2534_v16 }
 0x29d   : > { %2795 = vmatprep.mubr.bf16.mxu1 %v2537_v22 }
 0x29e   : > { %v11449_v28 = vpop.f32.mrf.mxu1 }
 0x29f   : > { %v11450_v58 = vadd.f32 %v11449_v28, %v11448_v20 }
 0x2a0   : > { %v11451_v41 = vpop.f32.mrf.mxu1 }
 0x2a1   : > { %v2071_v12 = vadd.f32 %v11450_v58, %v14834_v21  ;;  %v11559_v58 = vadd.f32 %v14724_v55, %v14721_v51 }
 0x2a2   : > { %v11452_v33 = vpop.f32.mrf.mxu1 }
 0x2a3   : > { %v11453_v63 = vadd.f32 %v11452_v33, %v11451_v41  ;;  %v14943_v2 = vadd.f32 %v14685_v5, %v2071_v12 }
 0x2a4   : > { %v11454_v13 = vpop.f32.mrf.mxu1  ;;  %2796 = vmatmul.mubr.bf16.gmra.mxu1 %v2536_v50 }
 0x2a5   : > { %v2072_v30 = vadd.f32 %v11453_v63, %v14841_v46  ;;  %12697 = vmatprep.mubr.msk.bf16.mxu1 %vm14245_vm0, %v18211_v53  ;;  %v18212_v63 = vld [vmem:[#allocation3_spill] sm:$0xff] }
 0x2a6   : > { %v11455_v36 = vpop.f32.mrf.mxu1 }
 0x2a7   : > { %v11456_v48 = vadd.f32 %v11455_v36, %v11454_v13  ;;  %v14950_v3 = vadd.f32 %v11547_v27, %v2072_v30  ;;  %v11565_v13 = vadd.f32 %v18212_v63, %v14737_v14 }
 0x2a8   : > { %v11457_v21 = vpop.f32.mrf.mxu1 }
 0x2a9   : > { %v2073_v52 = vadd.f32 %v11456_v48, %v14846_v45 }
 0x2aa   : > { %v11458_v15 = vpop.f32.mrf.mxu1 }
 0x2ab   : > { %v11459_v5 = vadd.f32 %v11458_v15, %v11457_v21  ;;  %v14954_v0 = vadd.f32 %v14702_v26, %v2073_v52  ;;  %v18213_v21 = vld [vmem:[#allocation4_spill] sm:$0xff]  ;;  %v18214_v15 = vld [vmem:[#allocation5_spill] sm:$0xff] }
 0x2ac   : > { %v11460_v1 = vpop.f32.mrf.mxu1 }
 0x2ad   : > { %v2074_v11 = vadd.f32 %v11459_v5, %v14852_v9  ;;  %v18215_v5 = vld [vmem:[#allocation6_spill] sm:$0xff] }
 0x2ae   : > { %v11461_v46 = vpop.f32.mrf.mxu1 }
 0x2af   : > { %v11462_v49 = vadd.f32 %v11461_v46, %v11460_v1  ;;  %v14959_v60 = vadd.f32 %v11553_v29, %v2074_v11  ;;  %v11571_v1 = vadd.f32 %v18215_v5, %v18214_v15  ;;  %v18222_v15 = vld [vmem:[#allocation13_spill] sm:$0xff] }
 0x2b0   : > { %v11463_v16 = vpop.f32.mrf.mxu1 }
 0x2b1   : > { %v2075_v22 = vadd.f32 %v11462_v49, %v14855_v42 }
 0x2b2   : > { %v11464_v20 = vpop.f32.mrf.mxu1 }
 0x2b3   : > { %v11465_v45 = vadd.f32 %v11464_v20, %v11463_v16  ;;  %v14963_v28 = vadd.f32 %v14719_v17, %v2075_v22  ;;  %v18216_v22 = vld [vmem:[#allocation7_spill] sm:$0xff] }
 0x2b4   : > { %v11466_v26 = vpop.f32.mrf.mxu1 }
 0x2b5   : > { %v2076_v31 = vadd.f32 %v11465_v45, %v14859_v37 }
 0x2b6   : > { %v11467_v34 = vpop.f32.mrf.mxu1 }
 0x2b7   : > { %v11468_v9 = vadd.f32 %v11467_v34, %v11466_v26  ;;  %v14968_v23 = vadd.f32 %v11559_v58, %v2076_v31  ;;  %v18217_v26 = vld [vmem:[#allocation8_spill] sm:$0xff]  ;;  %v18218_v58 = vld [vmem:[#allocation9_spill] sm:$0xff] }
 0x2b8   : > { %v11469_v41 = vpop.f32.mrf.mxu1  ;;  %v11577_v31 = vadd.f32 %v18218_v58, %v18217_v26  ;;  %v18225_v26 = vld [vmem:[#allocation16_spill] sm:$0xff] }
 0x2b9   : > { %v2077_v12 = vadd.f32 %v11468_v9, %v14862_v47 }
 0x2ba   : > { %v11470_v33 = vpop.f32.mrf.mxu1 }
 0x2bb   : > { %v11471_v42 = vadd.f32 %v11470_v33, %v11469_v41  ;;  %v14972_v50 = vadd.f32 %v14735_v57, %v2077_v12 }
 0x2bc   : > { %v11472_v17 = vpop.f32.mrf.mxu1 }
 0x2bd   : > { %v2078_v51 = vadd.f32 %v11471_v42, %v14866_v18 }
 0x2be   : > { %v11473_v55 = vpop.f32.mrf.mxu1 }
 0x2bf   : > { %v11474_v37 = vadd.f32 %v11473_v55, %v11472_v17  ;;  %v14977_v27 = vadd.f32 %v11565_v13, %v2078_v51  ;;  %v18219_v17 = vld [vmem:[#allocation10_spill] sm:$0xff]  ;;  %v18220_v51 = vld [vmem:[#allocation11_spill] sm:$0xff]  ;;  %v18221_v55 = vld [vmem:[#allocation12_spill] sm:$0xff] }
 0x2c0   : > { %v11475_v30 = vpop.f32.mrf.mxu1 }
 0x2c1   : > { %v2079_v36 = vadd.f32 %v11474_v37, %v14869_v56  ;;  %v11583_v37 = vadd.f32 %v18221_v55, %v18220_v51  ;;  %v18228_v51 = vld [vmem:[#allocation19_spill] sm:$0xff] }
 0x2c2   : > { %v11476_v48 = vpop.f32.mrf.mxu1 }
 0x2c3   : > { %v11477_v47 = vadd.f32 %v11476_v48, %v11475_v30  ;;  %v14981_v52 = vadd.f32 %v18213_v21, %v2079_v36 }
 0x2c4   : > { %v11478_v57 = vpop.f32.mrf.mxu1 }
 0x2c5   : > { %v2080_v14 = vadd.f32 %v11477_v47, %v14873_v24 }
 0x2c6   : > { %v11479_v29 = vpop.f32.mrf.mxu1 }
 0x2c7   : > { %v11480_v18 = vadd.f32 %v11479_v29, %v11478_v57  ;;  %v14986_v11 = vadd.f32 %v11571_v1, %v2080_v14  ;;  %v18223_v14 = vld [vmem:[#allocation14_spill] sm:$0xff]  ;;  %v18224_v29 = vld [vmem:[#allocation15_spill] sm:$0xff] }
 0x2c8   : > { %v11481_v46 = vpop.f32.mrf.mxu1 }
 0x2c9   : > { %v2081_v49 = vadd.f32 %v11480_v18, %v14876_v35  ;;  %v11589_v18 = vadd.f32 %v18224_v29, %v18223_v14 }
 0x2ca   : > { %v11482_v16 = vpop.f32.mrf.mxu1 }
 0x2cb   : > { %v11483_v56 = vadd.f32 %v11482_v16, %v11481_v46  ;;  %v14990_v20 = vadd.f32 %v18216_v22, %v2081_v49 }
 0x2cc   : > { %v11484_v45 = vpop.f32.mrf.mxu1 }
 0x2cd   : > { %v2082_v34 = vadd.f32 %v11483_v56, %v14882_v61 }
 0x2ce   : > { %v11485_v9 = vpop.f32.mrf.mxu1 }
 0x2cf   : > { %v11486_v24 = vadd.f32 %v11485_v9, %v11484_v45  ;;  %v14995_v41 = vadd.f32 %v11577_v31, %v2082_v34  ;;  %v18226_v34 = vld [vmem:[#allocation17_spill] sm:$0xff]  ;;  %v18227_v9 = vld [vmem:[#allocation18_spill] sm:$0xff] }
 0x2d0   : > { %v11487_v12 = vpop.f32.mrf.mxu1 }
 0x2d1   : > { %v2083_v33 = vadd.f32 %v11486_v24, %v14885_v10  ;;  %v11595_v24 = vadd.f32 %v18227_v9, %v18226_v34  ;;  %v18233_v34 = vld [vmem:[#allocation24_spill] sm:$0xff]  ;;  %v18234_v9 = vld [vmem:[#allocation25_spill] sm:$0xff] }
 0x2d2   : > { %v11488_v42 = vpop.f32.mrf.mxu1 }
 0x2d3   : > { %v11489_v35 = vadd.f32 %v11488_v42, %v11487_v12  ;;  %v14999_v63 = vadd.f32 %v18219_v17, %v2083_v33 }
 0x2d4   : > { %v11490_v13 = vpop.f32.mrf.mxu1 }
 0x2d5   : > { %v2084_v30 = vadd.f32 %v11489_v35, %v14889_v39 }
 0x2d6   : > { %v11491_v36 = vpop.f32.mrf.mxu1 }
 0x2d7   : > { %v11492_v61 = vadd.f32 %v11491_v36, %v11490_v13  ;;  %v15004_v48 = vadd.f32 %v11583_v37, %v2084_v30  ;;  %v18229_v30 = vld [vmem:[#allocation20_spill] sm:$0xff]  ;;  %v18230_v36 = vld [vmem:[#allocation21_spill] sm:$0xff] }
 0x2d8   : > { %v11493_v47 = vpop.f32.mrf.mxu1 }
 0x2d9   : > { %v2085_v21 = vadd.f32 %v11492_v61, %v14892_v62  ;;  %v11601_v61 = vadd.f32 %v18230_v36, %v18229_v30  ;;  %v15057_v36 = vld [vmem:[%s14462_s14 + $0x1] ss:$0 sm:$0xff] }
 0x2da   : > { %v11494_v57 = vpop.f32.mrf.mxu1 }
 0x2db   : > { %v11495_v10 = vadd.f32 %v11494_v57, %v11493_v47  ;;  %v15008_v5 = vadd.f32 %v18222_v15, %v2085_v21 }
 0x2dc   : > { %v11496_v1 = vpop.f32.mrf.mxu1 }
 0x2dd   : > { %v2086_v46 = vadd.f32 %v11495_v10, %v14896_v43 }
 0x2de   : > { %v11497_v49 = vpop.f32.mrf.mxu1 }
 0x2df   : > { %v11498_v39 = vadd.f32 %v11497_v49, %v11496_v1  ;;  %v15013_v16 = vadd.f32 %v11589_v18, %v2086_v46  ;;  %v18231_v18 = vld [vmem:[#allocation22_spill] sm:$0xff] }
 0x2e0   : > { %v11499_v56 = vpop.f32.mrf.mxu1  ;;  %v11607_v46 = vadd.f32 %v14831_v32, %v18231_v18 }
 0x2e1   : > { %v2087_v22 = vadd.f32 %v11498_v39, %v14899_v40 }
 0x2e2   : > { %v11500_v45 = vpop.f32.mrf.mxu1 }
 0x2e3   : > { %v11501_v62 = vadd.f32 %v11500_v45, %v11499_v56  ;;  %v15017_v58 = vadd.f32 %v18225_v26, %v2087_v22  ;;  %v18232_v26 = vld [vmem:[#allocation23_spill] sm:$0xff] }
 0x2e4   : > { %v11502_v31 = vpop.f32.mrf.mxu1 }
 0x2e5   : > { %v2088_v12 = vadd.f32 %v11501_v62, %v14903_v8 }
 0x2e6   : > { %v11503_v33 = vpop.f32.mrf.mxu1 }
 0x2e7   : > { %v11504_v43 = vadd.f32 %v11503_v33, %v11502_v31  ;;  %v15022_v42 = vadd.f32 %v11595_v24, %v2088_v12  ;;  %v11613_v24 = vadd.f32 %v18234_v9, %v18233_v34 }
 0x2e8   : > { %v11505_v35 = vpop.f32.mrf.mxu1 }
 0x2e9   : > { %v2089_v17 = vadd.f32 %v11504_v43, %v14908_v38 }
 0x2ea   : > { %v11506_v13 = vpop.f32.mrf.mxu1 }
 0x2eb   : > { %v11507_v40 = vadd.f32 %v11506_v13, %v11505_v35  ;;  %v15026_v55 = vadd.f32 %v18228_v51, %v2089_v17 }
 0x2ec   : > { %v11508_v37 = vpop.f32.mrf.mxu1 }
 0x2ed   : > { %v2090_v47 = vadd.f32 %v11507_v40, %v14912_v6 }
 0x2ee   : > { %v11509_v21 = vpop.f32.mrf.mxu1 }
 0x2ef   : > { %v11510_v8 = vadd.f32 %v11509_v21, %v11508_v37  ;;  %v15031_v57 = vadd.f32 %v11601_v61, %v2090_v47 }
 0x2f0   : > { %v11511_v10 = vpop.f32.mrf.mxu1 }
 0x2f1   : > { %v2091_v15 = vadd.f32 %v11510_v8, %v14915_v54 }
 0x2f2   : > { %v11512_v1 = vpop.f32.mrf.mxu1 }
 0x2f3   : > { %v11513_v38 = vadd.f32 %v11512_v1, %v11511_v10  ;;  %v15035_v14 = vadd.f32 %v14827_v44, %v2091_v15 }
 0x2f4   : > { %v11514_v29 = vpop.f32.mrf.mxu1 }
 0x2f5   : > { %v2092_v49 = vadd.f32 %v11513_v38, %v14920_v59 }
 0x2f6   : > { %v11515_v39 = vpop.f32.mrf.mxu1 }
 0x2f7   : > { %v11516_v6 = vadd.f32 %v11515_v39, %v11514_v29  ;;  %v15040_v56 = vadd.f32 %v11607_v46, %v2092_v49 }
 0x2f8   : > { %v11517_v22 = vpop.f32.mrf.mxu1 }
 0x2f9   : > { %v2093_v45 = vadd.f32 %v11516_v6, %v14925_v4 }
 0x2fa   : > { %v11518_v62 = vpop.f32.mrf.mxu1 }
 0x2fb   : > { %v11519_v54 = vadd.f32 %v11518_v62, %v11517_v22  ;;  %v15044_v31 = vadd.f32 %v18232_v26, %v2093_v45 }
 0x2fc   : > { %v11520_v44 = vpop.f32.mrf.mxu1 }
 0x2fd   : > { %v2094_v32 = vadd.f32 %v11519_v54, %v14932_v7 }
 0x2fe   : > { %v11521_v59 = vpop.f32.mrf.mxu1 }
 0x2ff   : > { %v11522_v12 = vadd.f32 %v11521_v59, %v11520_v44  ;;  %v15049_v33 = vadd.f32 %v11613_v24, %v2094_v32 }
 0x300   : > { %v11523_v43 = vpop.f32.mrf.mxu1 }
 0x301   : > { %v2095_v35 = vadd.f32 %v11522_v12, %v14939_v25 }
 0x302   : > { %v11524_v4 = vpop.f32.mrf.mxu1 }
 0x303   : > { %v15053_v17 = vadd.f32 %v14849_v19, %v2095_v35 }
 0x304   : > { %v11636_v13 = vpop.f32.mrf.mxu1 }
 0x306   : > { %v11637_v40 = vpop.f32.mrf.mxu1 }
 0x307   : > { %v11638_v51 = vadd.f32 %v11637_v40, %v11636_v13 }
 0x308   : > { %v11639_v37 = vpop.f32.mrf.mxu1 }
 0x309   : > { %v2803_v30 = vadd.f32 %v11638_v51, %v14943_v2 }
 0x30a   : > { %v11640_v7 = vpop.f32.mrf.mxu1 }
 0x30b   : > { %v11641_v61 = vadd.f32 %v11640_v7, %v11639_v37  ;;  %v2834_v21 = vadd.f32 %v15057_v36, %v2803_v30 }
 0x30c   : > { %v11642_v47 = vpop.f32.mrf.mxu1 }
 0x30d   : > { %v2804_v8 = vadd.f32 %v11641_v61, %v14950_v3  ;;  %v2859_v1 = vmax.f32 %v2834_v21, 0.0 }
 0x30e   : > { %v11643_v25 = vpop.f32.mrf.mxu1 }
 0x30f   : > { %v2835_v10 = vadd.f32 %v15057_v36, %v2804_v8  ;;  %v11644_v19 = vadd.f32 %v11643_v25, %v11642_v47 }
 0x310   : > { %v11645_v15 = vpop.f32.mrf.mxu1 }
 0x311   : > { %v2860_v38 = vmax.f32 %v2835_v10, 0.0  ;;  %v2805_v29 = vadd.f32 %v11644_v19, %v14954_v0 }
 0x312   : > { %v11646_v18 = vpop.f32.mrf.mxu1 }
 0x313   : > { %v15063_v2 = vpack.c.bf16 %v2860_v38, %v2859_v1  ;;  %v11647_v46 = vadd.f32 %v11646_v18, %v11645_v15  ;;  %v2836_v39 = vadd.f32 %v15057_v36, %v2805_v29 }
 0x314   : > { %v11648_v49 = vpop.f32.mrf.mxu1 }
 0x315   : > { %v2806_v6 = vadd.f32 %v11647_v46, %v14959_v60  ;;  %12638 = vmatmul.mubr.msk.bf16.vlgmr.msra.gmra.mxu0 %vm2929_vm1, %v15063_v2  ;;  %12698 = vmatmul.mubr.msk.bf16.vlgmr.msra.gmra.mxu1 %vm2929_vm1, %v15063_v2  ;;  %v2861_v62 = vmax.f32 %v2836_v39, 0.0 }
 0x316   : > { %v11649_v3 = vpop.f32.mrf.mxu1  ;;  %12641 = vmatprep.mubr.msk.bf16.mxu0 %vm14245_vm0, %v18211_v53  ;;  %12701 = vmatprep.mubr.msk.bf16.mxu1 %vm14245_vm0, %v18211_v53 }
 0x317   : > { %v2837_v0 = vadd.f32 %v15057_v36, %v2806_v6  ;;  %v11650_v22 = vadd.f32 %v11649_v3, %v11648_v49 }
 0x318   : > { %v11651_v45 = vpop.f32.mrf.mxu1 }
 0x319   : > { %v2862_v54 = vmax.f32 %v2837_v0, 0.0  ;;  %v2807_v60 = vadd.f32 %v11650_v22, %v14963_v28 }
 0x31a   : > { %v11652_v26 = vpop.f32.mrf.mxu1 }
 0x31b   : > { %v15077_v44 = vpack.c.bf16 %v2862_v54, %v2861_v62  ;;  %v11653_v34 = vadd.f32 %v11652_v26, %v11651_v45  ;;  %v2838_v24 = vadd.f32 %v15057_v36, %v2807_v60 }
 0x31c   : > { %v11654_v9 = vpop.f32.mrf.mxu1 }
 0x31d   : > { %v2808_v32 = vadd.f32 %v11653_v34, %v14968_v23  ;;  %12642 = vmatmul.mubr.msk.bf16.gmra.mxu0 %vm2929_vm1, %v15077_v44  ;;  %12702 = vmatmul.mubr.msk.bf16.gmra.mxu1 %vm2929_vm1, %v15077_v44  ;;  %v2863_v35 = vmax.f32 %v2838_v24, 0.0 }
 0x31e   : > { %v11655_v59 = vpop.f32.mrf.mxu1  ;;  %12645 = vmatprep.mubr.msk.bf16.mxu0 %vm14245_vm0, %v18211_v53  ;;  %12705 = vmatprep.mubr.msk.bf16.mxu1 %vm14245_vm0, %v18211_v53 }
 0x31f   : > { %v2839_v28 = vadd.f32 %v15057_v36, %v2808_v32  ;;  %v11656_v12 = vadd.f32 %v11655_v59, %v11654_v9 }
 0x320   : > { %v11657_v43 = vpop.f32.mrf.mxu1 }
 0x321   : > { %v2864_v4 = vmax.f32 %v2839_v28, 0.0  ;;  %v2809_v23 = vadd.f32 %v11656_v12, %v14972_v50 }
 0x322   : > { %v11658_v13 = vpop.f32.mrf.mxu1 }
 0x323   : > { %v15091_v40 = vpack.c.bf16 %v2864_v4, %v2863_v35  ;;  %v11659_v51 = vadd.f32 %v11658_v13, %v11657_v43  ;;  %v2840_v30 = vadd.f32 %v15057_v36, %v2809_v23 }
 0x324   : > { %v11660_v37 = vpop.f32.mrf.mxu1 }
 0x325   : > { %v2810_v7 = vadd.f32 %v11659_v51, %v14977_v27  ;;  %12646 = vmatmul.mubr.msk.bf16.gmra.mxu0 %vm2929_vm1, %v15091_v40  ;;  %12706 = vmatmul.mubr.msk.bf16.gmra.mxu1 %vm2929_vm1, %v15091_v40  ;;  %v2865_v8 = vmax.f32 %v2840_v30, 0.0 }
 0x326   : > { %v11661_v61 = vpop.f32.mrf.mxu1  ;;  %12649 = vmatprep.mubr.msk.bf16.mxu0 %vm14245_vm0, %v18211_v53  ;;  %12709 = vmatprep.mubr.msk.bf16.mxu1 %vm14245_vm0, %v18211_v53 }
 0x327   : > { %v2841_v50 = vadd.f32 %v15057_v36, %v2810_v7  ;;  %v11662_v47 = vadd.f32 %v11661_v61, %v11660_v37 }
 0x328   : > { %v11663_v21 = vpop.f32.mrf.mxu1 }
 0x329   : > { %v2866_v25 = vmax.f32 %v2841_v50, 0.0  ;;  %v2811_v27 = vadd.f32 %v11662_v47, %v14981_v52 }
 0x32a   : > { %v11664_v10 = vpop.f32.mrf.mxu1 }
 0x32b   : > { %v15105_v19 = vpack.c.bf16 %v2866_v25, %v2865_v8  ;;  %v11665_v15 = vadd.f32 %v11664_v10, %v11663_v21  ;;  %v2842_v38 = vadd.f32 %v15057_v36, %v2811_v27 }
 0x32c   : > { %v11666_v1 = vpop.f32.mrf.mxu1 }
 0x32d   : > { %v2812_v29 = vadd.f32 %v11665_v15, %v14986_v11  ;;  %12650 = vmatmul.mubr.msk.bf16.gmra.mxu0 %vm2929_vm1, %v15105_v19  ;;  %12710 = vmatmul.mubr.msk.bf16.gmra.mxu1 %vm2929_vm1, %v15105_v19  ;;  %v2867_v39 = vmax.f32 %v2842_v38, 0.0 }
 0x32e   : > { %v11667_v18 = vpop.f32.mrf.mxu1  ;;  %12653 = vmatprep.mubr.msk.bf16.mxu0 %vm14245_vm0, %v18211_v53  ;;  %12713 = vmatprep.mubr.msk.bf16.mxu1 %vm14245_vm0, %v18211_v53 }
 0x32f   : > { %v2843_v52 = vadd.f32 %v15057_v36, %v2812_v29  ;;  %v11668_v46 = vadd.f32 %v11667_v18, %v11666_v1 }
 0x330   : > { %v11669_v49 = vpop.f32.mrf.mxu1 }
 0x331   : > { %v2868_v6 = vmax.f32 %v2843_v52, 0.0  ;;  %v2813_v11 = vadd.f32 %v11668_v46, %v14990_v20 }
 0x332   : > { %v11670_v3 = vpop.f32.mrf.mxu1 }
 0x333   : > { %v15119_v0 = vpack.c.bf16 %v2868_v6, %v2867_v39  ;;  %v11671_v22 = vadd.f32 %v11670_v3, %v11669_v49  ;;  %v2844_v62 = vadd.f32 %v15057_v36, %v2813_v11 }
 0x334   : > { %v11672_v45 = vpop.f32.mrf.mxu1 }
 0x335   : > { %v2814_v54 = vadd.f32 %v11671_v22, %v14995_v41  ;;  %12654 = vmatmul.mubr.msk.bf16.gmra.mxu0 %vm2929_vm1, %v15119_v0  ;;  %12714 = vmatmul.mubr.msk.bf16.gmra.mxu1 %vm2929_vm1, %v15119_v0  ;;  %v2869_v9 = vmax.f32 %v2844_v62, 0.0 }
 0x336   : > { %v11673_v60 = vpop.f32.mrf.mxu1  ;;  %12657 = vmatprep.mubr.msk.bf16.mxu0 %vm14245_vm0, %v18211_v53  ;;  %12717 = vmatprep.mubr.msk.bf16.mxu1 %vm14245_vm0, %v18211_v53 }
 0x337   : > { %v2845_v20 = vadd.f32 %v15057_v36, %v2814_v54  ;;  %v11674_v26 = vadd.f32 %v11673_v60, %v11672_v45 }
 0x338   : > { %v11675_v34 = vpop.f32.mrf.mxu1 }
 0x339   : > { %v2870_v24 = vmax.f32 %v2845_v20, 0.0  ;;  %v2815_v41 = vadd.f32 %v11674_v26, %v14999_v63 }
 0x33a   : > { %v11676_v32 = vpop.f32.mrf.mxu1 }
 0x33b   : > { %v15133_v59 = vpack.c.bf16 %v2870_v24, %v2869_v9  ;;  %v11677_v28 = vadd.f32 %v11676_v32, %v11675_v34  ;;  %v2846_v43 = vadd.f32 %v15057_v36, %v2815_v41 }
 0x33c   : > { %v11678_v12 = vpop.f32.mrf.mxu1 }
 0x33d   : > { %v2816_v35 = vadd.f32 %v11677_v28, %v15004_v48  ;;  %12658 = vmatmul.mubr.msk.bf16.gmra.mxu0 %vm2929_vm1, %v15133_v59  ;;  %12718 = vmatmul.mubr.msk.bf16.gmra.mxu1 %vm2929_vm1, %v15133_v59  ;;  %v2871_v51 = vmax.f32 %v2846_v43, 0.0 }
 0x33e   : > { %v11679_v4 = vpop.f32.mrf.mxu1  ;;  %12661 = vmatprep.mubr.msk.bf16.mxu0 %vm14245_vm0, %v18211_v53  ;;  %12721 = vmatprep.mubr.msk.bf16.mxu1 %vm14245_vm0, %v18211_v53 }
 0x33f   : > { %v2847_v63 = vadd.f32 %v15057_v36, %v2816_v35  ;;  %v11680_v23 = vadd.f32 %v11679_v4, %v11678_v12 }
 0x340   : > { %v11681_v13 = vpop.f32.mrf.mxu1 }
 0x341   : > { %v2872_v37 = vmax.f32 %v2847_v63, 0.0  ;;  %v2817_v48 = vadd.f32 %v11680_v23, %v15008_v5 }
 0x342   : > { %v11682_v30 = vpop.f32.mrf.mxu1 }
 0x343   : > { %v15147_v7 = vpack.c.bf16 %v2872_v37, %v2871_v51  ;;  %v11683_v61 = vadd.f32 %v11682_v30, %v11681_v13  ;;  %v2848_v47 = vadd.f32 %v15057_v36, %v2817_v48 }
 0x344   : > { %v11684_v50 = vpop.f32.mrf.mxu1 }
 0x345   : > { %v2818_v21 = vadd.f32 %v11683_v61, %v15013_v16  ;;  %12662 = vmatmul.mubr.msk.bf16.gmra.mxu0 %vm2929_vm1, %v15147_v7  ;;  %12722 = vmatmul.mubr.msk.bf16.gmra.mxu1 %vm2929_vm1, %v15147_v7  ;;  %v2873_v10 = vmax.f32 %v2848_v47, 0.0 }
 0x346   : > { %v11685_v8 = vpop.f32.mrf.mxu1  ;;  %12665 = vmatprep.mubr.msk.bf16.mxu0 %vm14245_vm0, %v18211_v53  ;;  %12725 = vmatprep.mubr.msk.bf16.mxu1 %vm14245_vm0, %v18211_v53 }
 0x347   : > { %v2849_v5 = vadd.f32 %v15057_v36, %v2818_v21  ;;  %v11686_v25 = vadd.f32 %v11685_v8, %v11684_v50 }
 0x348   : > { %v11687_v27 = vpop.f32.mrf.mxu1 }
 0x349   : > { %v2874_v15 = vmax.f32 %v2849_v5, 0.0  ;;  %v2819_v16 = vadd.f32 %v11686_v25, %v15017_v58 }
 0x34a   : > { %v11688_v1 = vpop.f32.mrf.mxu1 }
 0x34b   : > { %v15161_v38 = vpack.c.bf16 %v2874_v15, %v2873_v10  ;;  %v11689_v29 = vadd.f32 %v11688_v1, %v11687_v27  ;;  %v2850_v52 = vadd.f32 %v15057_v36, %v2819_v16 }
 0x34c   : > { %v11690_v18 = vpop.f32.mrf.mxu1 }
 0x34d   : > { %v2820_v46 = vadd.f32 %v11689_v29, %v15022_v42  ;;  %12666 = vmatmul.mubr.msk.bf16.gmra.mxu0 %vm2929_vm1, %v15161_v38  ;;  %12726 = vmatmul.mubr.msk.bf16.gmra.mxu1 %vm2929_vm1, %v15161_v38  ;;  %v2875_v11 = vmax.f32 %v2850_v52, 0.0 }
 0x34e   : > { %v11691_v49 = vpop.f32.mrf.mxu1  ;;  %12669 = vmatprep.mubr.msk.bf16.mxu0 %vm14245_vm0, %v18211_v53  ;;  %12729 = vmatprep.mubr.msk.bf16.mxu1 %vm14245_vm0, %v18211_v53 }
 0x34f   : > { %v2851_v58 = vadd.f32 %v15057_v36, %v2820_v46  ;;  %v11692_v39 = vadd.f32 %v11691_v49, %v11690_v18 }
 0x350   : > { %v11693_v6 = vpop.f32.mrf.mxu1 }
 0x351   : > { %v2876_v3 = vmax.f32 %v2851_v58, 0.0  ;;  %v2821_v42 = vadd.f32 %v11692_v39, %v15026_v55 }
 0x352   : > { %v11694_v22 = vpop.f32.mrf.mxu1 }
 0x353   : > { %v15175_v45 = vpack.c.bf16 %v2876_v3, %v2875_v11  ;;  %v11695_v62 = vadd.f32 %v11694_v22, %v11693_v6  ;;  %v2852_v60 = vadd.f32 %v15057_v36, %v2821_v42 }
 0x354   : > { %v11696_v54 = vpop.f32.mrf.mxu1 }
 0x355   : > { %v2822_v20 = vadd.f32 %v11695_v62, %v15031_v57  ;;  %12670 = vmatmul.mubr.msk.bf16.gmra.mxu0 %vm2929_vm1, %v15175_v45  ;;  %12730 = vmatmul.mubr.msk.bf16.gmra.mxu1 %vm2929_vm1, %v15175_v45  ;;  %v2877_v24 = vmax.f32 %v2852_v60, 0.0 }
 0x356   : > { %v11697_v26 = vpop.f32.mrf.mxu1  ;;  %12673 = vmatprep.mubr.msk.bf16.mxu0 %vm14245_vm0, %v18211_v53  ;;  %12733 = vmatprep.mubr.msk.bf16.mxu1 %vm14245_vm0, %v18211_v53 }
 0x357   : > { %v2853_v55 = vadd.f32 %v15057_v36, %v2822_v20  ;;  %v11698_v34 = vadd.f32 %v11697_v26, %v11696_v54 }
 0x358   : > { %v11699_v9 = vpop.f32.mrf.mxu1 }
 0x359   : > { %v2878_v41 = vmax.f32 %v2853_v55, 0.0  ;;  %v2823_v57 = vadd.f32 %v11698_v34, %v15035_v14 }
 0x35a   : > { %v11700_v32 = vpop.f32.mrf.mxu1 }
 0x35b   : > { %v15189_v28 = vpack.c.bf16 %v2878_v41, %v2877_v24  ;;  %v11701_v12 = vadd.f32 %v11700_v32, %v11699_v9  ;;  %v2854_v35 = vadd.f32 %v15057_v36, %v2823_v57 }
 0x35c   : > { %v11702_v43 = vpop.f32.mrf.mxu1 }
 0x35d   : > { %v2824_v4 = vadd.f32 %v11701_v12, %v15040_v56  ;;  %12674 = vmatmul.mubr.msk.bf16.gmra.mxu0 %vm2929_vm1, %v15189_v28  ;;  %12734 = vmatmul.mubr.msk.bf16.gmra.mxu1 %vm2929_vm1, %v15189_v28  ;;  %v2879_v51 = vmax.f32 %v2854_v35, 0.0 }
 0x35e   : > { %v11703_v63 = vpop.f32.mrf.mxu1  ;;  %12677 = vmatprep.mubr.msk.bf16.mxu0 %vm14245_vm0, %v18211_v53  ;;  %12737 = vmatprep.mubr.msk.bf16.mxu1 %vm14245_vm0, %v18211_v53 }
 0x35f   : > { %v2855_v14 = vadd.f32 %v15057_v36, %v2824_v4  ;;  %v11704_v23 = vadd.f32 %v11703_v63, %v11702_v43 }
 0x360   : > { %v11705_v13 = vpop.f32.mrf.mxu1 }
 0x361   : > { %v2880_v37 = vmax.f32 %v2855_v14, 0.0  ;;  %v2825_v56 = vadd.f32 %v11704_v23, %v15044_v31 }
 0x362   : > { %v11706_v48 = vpop.f32.mrf.mxu1 }
 0x363   : > { %v15203_v30 = vpack.c.bf16 %v2880_v37, %v2879_v51  ;;  %v11707_v61 = vadd.f32 %v11706_v48, %v11705_v13  ;;  %v2856_v47 = vadd.f32 %v15057_v36, %v2825_v56 }
 0x364   : > { %v11708_v50 = vpop.f32.mrf.mxu1 }
 0x365   : > { %v2826_v21 = vadd.f32 %v11707_v61, %v15049_v33  ;;  %12678 = vmatmul.mubr.msk.bf16.gmra.mxu0 %vm2929_vm1, %v15203_v30  ;;  %12738 = vmatmul.mubr.msk.bf16.gmra.mxu1 %vm2929_vm1, %v15203_v30  ;;  %v2881_v27 = vmax.f32 %v2856_v47, 0.0 }
 0x366   : > { %v11709_v8 = vpop.f32.mrf.mxu1  ;;  %12681 = vmatprep.mubr.msk.bf16.mxu0 %vm14245_vm0, %v18211_v53  ;;  %12741 = vmatprep.mubr.msk.bf16.mxu1 %vm14245_vm0, %v18211_v53 }
 0x367   : > { %v2857_v31 = vadd.f32 %v15057_v36, %v2826_v21  ;;  %v11710_v5 = vadd.f32 %v11709_v8, %v11708_v50 }
 0x368   : > { %v11711_v25 = vpop.f32.mrf.mxu1 }
 0x369   : > { %v2882_v10 = vmax.f32 %v2857_v31, 0.0  ;;  %v2827_v33 = vadd.f32 %v11710_v5, %v15053_v17  ;;  %v18182_v17 = vmov 0  }
 0x36a   : > { %v11712_v15 = vpop.f32.mrf.mxu1  ;;  %3352 = vmatprep.subr.bf16.mxu0 %v18182_v17  ;;  %3724 = vmatprep.subr.bf16.mxu1 %v18182_v17 }
 0x36b   : > { %v15217_v16 = vpack.c.bf16 %v2882_v10, %v2881_v27  ;;  %v2858_v1 = vadd.f32 %v15057_v36, %v2827_v33  ;;  %v13949_v36 = vld [vmem:[%s18177_s6 + $0x2c] ss:$8 sps:$4 sm:$0xff]  }
 0x36d   : > { %12682 = vmatmul.mubr.msk.bf16.gmra.mxu0 %vm2929_vm1, %v15217_v16  ;;  %12742 = vmatmul.mubr.msk.bf16.gmra.mxu1 %vm2929_vm1, %v15217_v16  ;;  %v2883_v29 = vmax.f32 %v2858_v1, 0.0 }
 0x36e   : > { %12685 = vmatprep.mubr.msk.bf16.mxu0 %vm14245_vm0, %v18211_v53  ;;  %12745 = vmatprep.mubr.msk.bf16.mxu1 %vm14245_vm0, %v18211_v53 }
 0x36f   : > { %v15228_v18 = vpack.c.bf16 %v2883_v29, %v2883_v29 }
 0x375   : > { %12686 = vmatmul.mubr.msk.bf16.gmra.mxu0 %vm2929_vm1, %v15228_v18  ;;  %12746 = vmatmul.mubr.msk.bf16.gmra.mxu1 %vm2929_vm1, %v15228_v18 }
 0x376   : > { %10442 = vmatprep.mubr.msk.bf16.mxu0 %vm3335_vm2, %v13949_v36 }
 0x3d5   : > { %v15240_v52 = vpop.f32.mrf.mxu0  ;;  %v15242_v46 = vpop.f32.mrf.mxu1 }
 0x3d7   : > { %v12639_v49 = vpop.f32.mrf.mxu0  ;;  %v12699_v58 = vpop.f32.mrf.mxu1 }
 0x3d9   : > { %v15244_v39 = vpop.f32.mrf.mxu0  ;;  %v15246_v6 = vpop.f32.mrf.mxu1 }
 0x3da   : > { %v3298_v3 = vpack.c.bf16 %v15246_v6, %v15242_v46 }
 0x3db   : > { %v12640_v42 = vpop.f32.mrf.mxu0  ;;  %v12700_v22 = vpop.f32.mrf.mxu1 }
 0x3dd   : > { %v15252_v62 = vpop.f32.mrf.mxu0  ;;  %v15254_v54 = vpop.f32.mrf.mxu1 }
 0x3df   : > { %v12643_v60 = vpop.f32.mrf.mxu0  ;;  %v12703_v20 = vpop.f32.mrf.mxu1 }
 0x3e1   : > { %v15256_v26 = vpop.f32.mrf.mxu0  ;;  %v15258_v55 = vpop.f32.mrf.mxu1 }
 0x3e2   : > { %v3299_v9 = vpack.c.bf16 %v15258_v55, %v15254_v54  ;;  %v14247_v54 = vmov 65535  }
 0x3e3   : > { %v12644_v24 = vpop.f32.mrf.mxu0  ;;  %v12704_v41 = vpop.f32.mrf.mxu1  ;;  %v3347_v55 = vsel %vm3345_vm3, 4294967295, %v14247_v54 }
 0x3e5   : > { %v15264_v57 = vpop.f32.mrf.mxu0  ;;  %v15266_v32 = vpop.f32.mrf.mxu1 }
 0x3e7   : > { %v12647_v12 = vpop.f32.mrf.mxu0  ;;  %v12707_v43 = vpop.f32.mrf.mxu1 }
 0x3e9   : > { %v15268_v35 = vpop.f32.mrf.mxu0  ;;  %v15270_v4 = vpop.f32.mrf.mxu1 }
 0x3eb   : > { %v12648_v14 = vpop.f32.mrf.mxu0  ;;  %v12708_v23 = vpop.f32.mrf.mxu1 }
 0x3ed   : > { %v15274_v13 = vpop.f32.mrf.mxu0  ;;  %v15276_v51 = vpop.f32.mrf.mxu1 }
 0x3ef   : > { %v12651_v37 = vpop.f32.mrf.mxu0  ;;  %v12711_v56 = vpop.f32.mrf.mxu1 }
 0x3f1   : > { %v15278_v48 = vpop.f32.mrf.mxu0  ;;  %v15280_v61 = vpop.f32.mrf.mxu1 }
 0x3f3   : > { %v12652_v47 = vpop.f32.mrf.mxu0  ;;  %v12712_v21 = vpop.f32.mrf.mxu1 }
 0x3f5   : > { %v15284_v8 = vpop.f32.mrf.mxu0  ;;  %v3222_v31 = vpop.f32.mrf.mxu1 }
 0x3f7   : > { %v12655_v5 = vpop.f32.mrf.mxu0  ;;  %v12715_v25 = vpop.f32.mrf.mxu1 }
 0x3f9   : > { %v15286_v27 = vpop.f32.mrf.mxu0  ;;  %v3225_v10 = vpop.f32.mrf.mxu1 }
 0x3fb   : > { %v12656_v15 = vpop.f32.mrf.mxu0  ;;  %v12716_v1 = vpop.f32.mrf.mxu1 }
 0x3fd   : > { %v15290_v29 = vpop.f32.mrf.mxu0  ;;  %v3230_v36 = vpop.f32.mrf.mxu1 }
 0x3ff   : > { %v12659_v49 = vpop.f32.mrf.mxu0  ;;  %v12719_v58 = vpop.f32.mrf.mxu1 }
 0x401   : > { %v15292_v42 = vpop.f32.mrf.mxu0  ;;  %v3233_v22 = vpop.f32.mrf.mxu1 }
 0x402   : > { %v3115_v60 = vpack.c.bf16 %v15292_v42, %v15290_v29  ;;  %v18237_v29 = vpack.c.bf16 %v15278_v48, %v15274_v13  ;;  %v18238_v42 = vpack.c.bf16 %v15268_v35, %v15264_v57  ;;  %v18240_v13 = vpack.c.bf16 %v15244_v39, %v15240_v52  ;;  %v13955_v39 = vld [vmem:[%s18177_s6] ss:$8 sps:$4 sm:$0xff]   ;;  %v13958_v35 = vld [vmem:[%s18177_s6 + $0x14] ss:$8 sps:$4 sm:$0xff]  }
 0x403   : > { %v12660_v20 = vpop.f32.mrf.mxu0  ;;  %v12720_v24 = vpop.f32.mrf.mxu1 }
 0x405   : > { %v15296_v41 = vpop.f32.mrf.mxu0  ;;  %v3238_v12 = vpop.f32.mrf.mxu1 }
 0x407   : > { %v12663_v43 = vpop.f32.mrf.mxu0  ;;  %v12723_v14 = vpop.f32.mrf.mxu1 }
 0x409   : > { %v15298_v23 = vpop.f32.mrf.mxu0  ;;  %v3241_v37 = vpop.f32.mrf.mxu1 }
 0x40a   : > { %v3116_v56 = vpack.c.bf16 %v15298_v23, %v15296_v41  ;;  %v13957_v41 = vld [vmem:[%s18177_s6 + $0x4] ss:$8 sps:$4 sm:$0xff]   ;;  %v13962_v23 = vld [vmem:[%s14369_s9 + $0x50] sm:$0xff]  }
 0x40b   : > { %v12664_v47 = vpop.f32.mrf.mxu0  ;;  %v12724_v21 = vpop.f32.mrf.mxu1 }
 0x40c   : > { %v3304_v47 = vpack.c.bf16 %v3241_v37, %v3238_v12 }
 0x40d   : > { %v15302_v5 = vpop.f32.mrf.mxu0  ;;  %v3246_v25 = vpop.f32.mrf.mxu1 }
 0x40f   : > { %v12667_v15 = vpop.f32.mrf.mxu0  ;;  %v12727_v1 = vpop.f32.mrf.mxu1 }
 0x410   : > { %v15353_v1 = vsel %vm3346_vm4, %v3347_v55, 0 }
 0x411   : > { %v15304_v49 = vpop.f32.mrf.mxu0  ;;  %v3249_v58 = vpop.f32.mrf.mxu1  ;;  %18235 = vst [vmem:[#allocation3_spill] sm:$0xff] %v15353_v1 }
 0x412   : > { %v3305_v20 = vpack.c.bf16 %v3249_v58, %v3246_v25  ;;  %v3303_v25 = vpack.c.bf16 %v3233_v22, %v3230_v36  ;;  %v3301_v36 = vpack.c.bf16 %v15280_v61, %v15276_v51 }
 0x413   : > { %v12668_v24 = vpop.f32.mrf.mxu0  ;;  %v12728_v43 = vpop.f32.mrf.mxu1 }
 0x414   : > { %3353 = vmatpush1.bf16.msra.mxu0 %v3305_v20 }
 0x415   : > { %v15306_v14 = vpop.f32.mrf.mxu0  ;;  %v15308_v11 = vpop.f32.mrf.mxu1  ;;  %3354 = vmatprep.subr.bf16.mxu0 %v18182_v17 }
 0x417   : > { %v12671_v21 = vpop.f32.mrf.mxu0  ;;  %v12731_v34 = vpop.f32.mrf.mxu1 }
 0x418   : > { %3355 = vmatpush1.bf16.msra.mxu0 %v3304_v47  ;;  %v3302_v34 = vpack.c.bf16 %v3225_v10, %v3222_v31  ;;  %v3300_v10 = vpack.c.bf16 %v15270_v4, %v15266_v32 }
 0x419   : > { %v15311_v63 = vpop.f32.mrf.mxu0  ;;  %v15313_v15 = vpop.f32.mrf.mxu1  ;;  %3356 = vmatprep.subr.bf16.mxu0 %v18182_v17 }
 0x41a   : > { %v18243_v57 = vpack.c.bf16 %v15311_v63, %v15306_v14  ;;  %v3109_v63 = vld [vmem:[%s18177_s6 + $0x20] sm:$0x33] }
 0x41b   : > { %v12672_v58 = vpop.f32.mrf.mxu0  ;;  %v12732_v20 = vpop.f32.mrf.mxu1  ;;  %v10450_v14 = vcombine.high %v3109_v63, %v3109_v63 }
 0x41c   : > { %3357 = vmatpush1.bf16.msra.mxu0 %v3303_v25 }
 0x41d   : > { %v15318_v24 = vpop.f32.mrf.mxu0  ;;  %v15320_v43 = vpop.f32.mrf.mxu1  ;;  %3358 = vmatprep.subr.bf16.mxu0 %v18182_v17 }
 0x41f   : > { %v12675_v12 = vpop.f32.mrf.mxu0  ;;  %v12735_v37 = vpop.f32.mrf.mxu1 }
 0x420   : > { %3359 = vmatpush1.bf16.msra.mxu0 %v3302_v34 }
 0x421   : > { %v15323_v47 = vpop.f32.mrf.mxu0  ;;  %v3265_v21 = vpop.f32.mrf.mxu1  ;;  %3360 = vmatprep.subr.bf16.mxu0 %v18182_v17 }
 0x422   : > { %v18242_v52 = vpack.c.bf16 %v15323_v47, %v15318_v24  ;;  %v13965_v24 = vld [vmem:[%s14369_s9 + $0x48] sm:$0xff]   ;;  %v13966_v47 = vld [vmem:[%s14369_s9 + $0x40] sm:$0xff]  }
 0x423   : > { %v12676_v25 = vpop.f32.mrf.mxu0  ;;  %v12736_v58 = vpop.f32.mrf.mxu1 }
 0x424   : > { %3361 = vmatpush1.bf16.msra.mxu0 %v3301_v36 }
 0x425   : > { %v15330_v20 = vpop.f32.mrf.mxu0  ;;  %v3270_v31 = vpop.f32.mrf.mxu1  ;;  %3362 = vmatprep.subr.bf16.mxu0 %v18182_v17 }
 0x427   : > { %v12679_v34 = vpop.f32.mrf.mxu0  ;;  %v12739_v12 = vpop.f32.mrf.mxu1 }
 0x428   : > { %3363 = vmatpush1.bf16.msra.mxu0 %v3300_v10 }
 0x429   : > { %v15335_v37 = vpop.f32.mrf.mxu0  ;;  %v3273_v51 = vpop.f32.mrf.mxu1  ;;  %3364 = vmatprep.subr.bf16.mxu0 %v18182_v17 }
 0x42b   : > { %v12680_v36 = vpop.f32.mrf.mxu0  ;;  %v12740_v25 = vpop.f32.mrf.mxu1 }
 0x42c   : > { %3365 = vmatpush1.bf16.msra.mxu0 %v3299_v9 }
 0x42d   : > { %v15343_v58 = vpop.f32.mrf.mxu0  ;;  %v3278_v32 = vpop.f32.mrf.mxu1  ;;  %3366 = vmatprep.subr.bf16.mxu0 %v18182_v17 }
 0x42f   : > { %v12683_v4 = vpop.f32.mrf.mxu0  ;;  %v12743_v10 = vpop.f32.mrf.mxu1 }
 0x430   : > { %3367 = vmatpush1.bf16.msra.mxu0 %v3298_v3 }
 0x431   : > { %v15349_v34 = vpop.f32.mrf.mxu0  ;;  %v3281_v12 = vpop.f32.mrf.mxu1  ;;  %3374 = vmatprep.subr.bf16.mxu0 %v18182_v17 }
 0x432   : > { %v3309_v54 = vpack.c.bf16 %v3281_v12, %v3278_v32 }
 0x433   : > { %v12684_v9 = vpop.f32.mrf.mxu0  ;;  %v12744_v36 = vpop.f32.mrf.mxu1 }
 0x434   : > { %v3308_v9 = vpack.c.bf16 %v3273_v51, %v3270_v31 }
 0x435   : > { %v3099_v25 = vpop.f32.mrf.mxu0  ;;  %v3286_v4 = vpop.f32.mrf.mxu1 }
 0x436   : > { %v3310_v10 = vpack.c.bf16 %v3286_v4, %v3286_v4 }
 0x437   : > { %v12687_v22 = vpop.f32.mrf.mxu0  ;;  %v12747_v61 = vpop.f32.mrf.mxu1 }
 0x438   : > { %v3350_v46 = vand.u32 %v15353_v1, %v3310_v10  ;;  %v3307_v22 = vpack.c.bf16 %v3265_v21, %v15320_v43  ;;  %v3306_v61 = vpack.c.bf16 %v15313_v15, %v15308_v11  ;;  %v3117_v43 = vpack.c.bf16 %v15304_v49, %v15302_v5  ;;  %v10435_v11 = vld [vmem:[%s18177_s6 + $0x48] sm:$0x33]  ;;  %v13952_v15 = vld [vmem:[%s18177_s6 + $0x38] ss:$8 sps:$4 sm:$0xff]  }
 0x439   : > { %v3102_v6 = vpop.f32.mrf.mxu0  ;;  %v3289_v3 = vpop.f32.mrf.mxu1  ;;  %v10441_v21 = vcombine.high %v10435_v11, %v10435_v11  ;;  %v10440_v5 = vcombine.low %v10435_v11, %v10435_v11  ;;  %v18236_v49 = vpack.c.bf16 %v15286_v27, %v15284_v8  ;;  %v18239_v8 = vpack.c.bf16 %v15256_v26, %v15252_v62 }
 0x43a   : > { %3375 = vmatpush2.bf16.msra.mxu0 %v3350_v46  ;;  %v3122_v27 = vpack.c.bf16 %v3099_v25, %v3099_v25  ;;  %v3121_v62 = vpack.c.bf16 %v15349_v34, %v15343_v58  ;;  %v18241_v26 = vpack.c.bf16 %v15335_v37, %v15330_v20  ;;  %v10449_v20 = vcombine.low %v3109_v63, %v3109_v63 }
 0x43b   : > { %v12688_v50 = vpop.f32.mrf.mxu0  ;;  %v12748_v33 = vpop.f32.mrf.mxu1  ;;  %3376 = vmatprep.subr.bf16.mxu0 %v18182_v17 }
 0x43c   : > { %v13947_v50 = vld [vmem:[%s18177_s6 + $0x28] ss:$8 sps:$4 sm:$0xff]   ;;  %v13950_v33 = vld [vmem:[%s18177_s6 + $0x3c] ss:$8 sps:$4 sm:$0xff]   ;;  %v3442_v48 = vand.u32 %v15353_v1, %v3122_v27 }
 0x43e   : > { %3377 = vmatpush2.bf16.msra.mxu0 %v3309_v54 }
 0x43f   : > { %3378 = vmatprep.subr.bf16.mxu0 %v18182_v17 }
 0x442   : > { %3379 = vmatpush2.bf16.msra.mxu0 %v3308_v9 }
 0x443   : > { %3380 = vmatprep.subr.bf16.mxu0 %v18182_v17 }
 0x446   : > { %3381 = vmatpush2.bf16.msra.mxu0 %v3307_v22 }
 0x447   : > { %3382 = vmatprep.subr.bf16.mxu0 %v18182_v17 }
 0x44a   : > { %3383 = vmatpush2.bf16.msra.mxu0 %v3306_v61 }
 0x44b   : > { %3444 = vmatprep.subr.bf16.mxu0 %v18182_v17 }
 0x44d   : > { %3385 = vmatmul.mubr.bf16.vlgmr.msra.gmra.mxu0 %v13947_v50 }
 0x44e   : > { %3445 = vmatpush1.bf16.msra.mxu0 %v3117_v43  ;;  %10443 = vmatprep.mubr.msk.bf16.mxu0 %vm3335_vm2, %v13950_v33 }
 0x44f   : > { %3446 = vmatprep.subr.bf16.mxu0 %v18182_v17 }
 0x452   : > { %3447 = vmatpush1.bf16.msra.mxu0 %v3116_v56  ;;  %v13960_v56 = vld [vmem:[%s18177_s6 + $0x10] ss:$8 sps:$4 sm:$0xff]  }
 0x453   : > { %3448 = vmatprep.subr.bf16.mxu0 %v18182_v17 }
 0x455   : > { %3393 = vmatmul.mubr.bf16.gmra.mxu0 %v13952_v15  ;;  %v13969_v15 = vld [vmem:[%s18177_s6 + $0x54] ss:$8 sps:$4 sm:$0xff]  }
 0x456   : > { %3449 = vmatpush1.bf16.msra.mxu0 %v3115_v60  ;;  %10444 = vmatprep.mubr.msk.bf16.mxu0 %vm3335_vm2, %v10441_v21  ;;  %v13961_v60 = vld [vmem:[%s14369_s9 + $0x58] sm:$0xff]  }
 0x457   : > { %3450 = vmatprep.subr.bf16.mxu0 %v18182_v17  ;;  %10490 = vmatprep.mubr.msk.bf16.mxu1 %vm3335_vm2, %v13969_v15 }
 0x45a   : > { %3451 = vmatpush1.bf16.msra.mxu0 %v18236_v49 }
 0x45b   : > { %3452 = vmatprep.subr.bf16.mxu0 %v18182_v17 }
 0x45d   : > { %3401 = vmatmul.mubr.bf16.gmra.mxu0 %v10440_v5 }
 0x45e   : > { %3453 = vmatpush1.bf16.msra.mxu0 %v18237_v29  ;;  %10451 = vmatprep.mubr.msk.bf16.mxu0 %vm3335_vm2, %v13957_v41 }
 0x45f   : > { %3454 = vmatprep.subr.bf16.mxu0 %v18182_v17 }
 0x462   : > { %3455 = vmatpush1.bf16.msra.mxu0 %v18238_v42 }
 0x463   : > { %3456 = vmatprep.subr.bf16.mxu0 %v18182_v17 }
 0x466   : > { %3457 = vmatpush1.bf16.msra.mxu0 %v18239_v8 }
 0x467   : > { %3458 = vmatprep.subr.bf16.mxu0 %v18182_v17 }
 0x46a   : > { %3459 = vmatpush1.bf16.msra.mxu0 %v18240_v13 }
 0x46b   : > { %3466 = vmatprep.subr.bf16.mxu0 %v18182_v17 }
 0x46e   : > { %3467 = vmatpush2.bf16.msra.mxu0 %v3442_v48 }
 0x46f   : > { %3468 = vmatprep.subr.bf16.mxu0 %v18182_v17 }
 0x472   : > { %3469 = vmatpush2.bf16.msra.mxu0 %v3121_v62 }
 0x473   : > { %3470 = vmatprep.subr.bf16.mxu0 %v18182_v17 }
 0x476   : > { %3471 = vmatpush2.bf16.msra.mxu0 %v18241_v26 }
 0x477   : > { %3472 = vmatprep.subr.bf16.mxu0 %v18182_v17 }
 0x47a   : > { %3473 = vmatpush2.bf16.msra.mxu0 %v18242_v52 }
 0x47b   : > { %3474 = vmatprep.subr.bf16.mxu0 %v18182_v17 }
 0x47e   : > { %3475 = vmatpush2.bf16.msra.mxu0 %v18243_v57 }
 0x47f   : > { %12749 = vmatprep.subr.bf16.mxu0 %v18211_v53 }
 0x481   : > { %3477 = vmatmul.mubr.bf16.vlgmr.msra.gmra.mxu0 %v13955_v39 }
 0x482   : > { %10452 = vmatprep.mubr.msk.bf16.mxu0 %vm3335_vm2, %v13958_v35  ;;  %12750 = vmatpush3.bf16.msra.mxu0 %v13961_v60 }
 0x483   : > { %12751 = vmatprep.subr.bf16.mxu0 %v18211_v53 }
 0x486   : > { %12752 = vmatpush3.bf16.msra.mxu0 %v13962_v23 }
 0x487   : > { %12753 = vmatprep.subr.bf16.mxu0 %v18211_v53 }
 0x489   : > { %3485 = vmatmul.mubr.bf16.gmra.mxu0 %v13960_v56 }
 0x48a   : > { %10453 = vmatprep.mubr.msk.bf16.mxu0 %vm3335_vm2, %v10450_v14  ;;  %12754 = vmatpush3.bf16.msra.mxu0 %v13965_v24 }
 0x48b   : > { %12755 = vmatprep.subr.bf16.mxu0 %v18211_v53 }
 0x48e   : > { %12756 = vmatpush3.bf16.msra.mxu0 %v13966_v47 }
 0x48f   : > { %4009 = vmatprep.subr.bf16.mxu0 %v18182_v17 }
 0x491   : > { %3493 = vmatmul.mubr.bf16.gmra.mxu0 %v10449_v20 }
 0x492   : > { %12757 = vmatprep.mubr.msk.bf16.mxu0 %vm14245_vm0, %v18211_v53 }
 0x499   : > { %12758 = vmatmul.mubr.msk.bf16.vlgmr.msra.gmra.mxu0 %vm2929_vm1, %v15063_v2 }
 0x49a   : > { %12761 = vmatprep.mubr.msk.bf16.mxu0 %vm14245_vm0, %v18211_v53 }
 0x4a1   : > { %12762 = vmatmul.mubr.msk.bf16.gmra.mxu0 %vm2929_vm1, %v15077_v44 }
 0x4a2   : > { %12765 = vmatprep.mubr.msk.bf16.mxu0 %vm14245_vm0, %v18211_v53 }
 0x4a9   : > { %12766 = vmatmul.mubr.msk.bf16.gmra.mxu0 %vm2929_vm1, %v15091_v40 }
 0x4aa   : > { %12769 = vmatprep.mubr.msk.bf16.mxu0 %vm14245_vm0, %v18211_v53 }
 0x4b1   : > { %12770 = vmatmul.mubr.msk.bf16.gmra.mxu0 %vm2929_vm1, %v15105_v19 }
 0x4b2   : > { %12773 = vmatprep.mubr.msk.bf16.mxu0 %vm14245_vm0, %v18211_v53 }
 0x4b9   : > { %12774 = vmatmul.mubr.msk.bf16.gmra.mxu0 %vm2929_vm1, %v15119_v0 }
 0x4ba   : > { %12777 = vmatprep.mubr.msk.bf16.mxu0 %vm14245_vm0, %v18211_v53 }
 0x4c1   : > { %12778 = vmatmul.mubr.msk.bf16.gmra.mxu0 %vm2929_vm1, %v15133_v59 }
 0x4c2   : > { %12781 = vmatprep.mubr.msk.bf16.mxu0 %vm14245_vm0, %v18211_v53 }
 0x4c9   : > { %12782 = vmatmul.mubr.msk.bf16.gmra.mxu0 %vm2929_vm1, %v15147_v7 }
 0x4ca   : > { %12785 = vmatprep.mubr.msk.bf16.mxu0 %vm14245_vm0, %v18211_v53 }
 0x4d1   : > { %12786 = vmatmul.mubr.msk.bf16.gmra.mxu0 %vm2929_vm1, %v15161_v38 }
 0x4d2   : > { %12789 = vmatprep.mubr.msk.bf16.mxu0 %vm14245_vm0, %v18211_v53 }
 0x4d9   : > { %12790 = vmatmul.mubr.msk.bf16.gmra.mxu0 %vm2929_vm1, %v15175_v45 }
 0x4da   : > { %12793 = vmatprep.mubr.msk.bf16.mxu0 %vm14245_vm0, %v18211_v53 }
 0x4e1   : > { %12794 = vmatmul.mubr.msk.bf16.gmra.mxu0 %vm2929_vm1, %v15189_v28 }
 0x4e2   : > { %12797 = vmatprep.mubr.msk.bf16.mxu0 %vm14245_vm0, %v18211_v53 }
 0x4e9   : > { %12798 = vmatmul.mubr.msk.bf16.gmra.mxu0 %vm2929_vm1, %v15203_v30 }
 0x4ea   : > { %12801 = vmatprep.mubr.msk.bf16.mxu0 %vm14245_vm0, %v18211_v53 }
 0x4f1   : > { %12802 = vmatmul.mubr.msk.bf16.gmra.mxu0 %vm2929_vm1, %v15217_v16 }
 0x4f2   : > { %12805 = vmatprep.mubr.msk.bf16.mxu0 %vm14245_vm0, %v18211_v53 }
 0x4f9   : > { %12806 = vmatmul.mubr.msk.bf16.gmra.mxu0 %vm2929_vm1, %v15228_v18 }
 0x50d   : > { %v3386_v31 = vpop.f32.mrf.mxu0 }
 0x50f   : > { %v3388_v37 = vpop.f32.mrf.mxu0 }
 0x511   : > { %v3389_v51 = vpop.f32.mrf.mxu0 }
 0x513   : > { %v3391_v58 = vpop.f32.mrf.mxu0 }
 0x515   : > { %v3394_v32 = vpop.f32.mrf.mxu0 }
 0x517   : > { %v3396_v34 = vpop.f32.mrf.mxu0 }
 0x519   : > { %v3397_v12 = vpop.f32.mrf.mxu0 }
 0x51b   : > { %v3399_v55 = vpop.f32.mrf.mxu0 }
 0x51d   : > { %v3402_v36 = vpop.f32.mrf.mxu0 }
 0x51f   : > { %v3404_v25 = vpop.f32.mrf.mxu0 }
 0x521   : > { %v3405_v4 = vpop.f32.mrf.mxu0 }
 0x523   : > { %v3406_v10 = vpop.f32.mrf.mxu0 }
 0x541   : > { %v3478_v46 = vpop.f32.mrf.mxu0 }
 0x542   : > { %v15504_v6 = vadd.f32 %v3478_v46, %v3386_v31 }
 0x543   : > { %v3480_v3 = vpop.f32.mrf.mxu0 }
 0x545   : > { %v3481_v54 = vpop.f32.mrf.mxu0 }
 0x546   : > { %v15506_v9 = vadd.f32 %v3481_v54, %v3389_v51 }
 0x547   : > { %v3483_v22 = vpop.f32.mrf.mxu0 }
 0x549   : > { %v3486_v61 = vpop.f32.mrf.mxu0 }
 0x54a   : > { %v15508_v50 = vadd.f32 %v3486_v61, %v3394_v32 }
 0x54b   : > { %v3488_v33 = vpop.f32.mrf.mxu0 }
 0x54d   : > { %v3489_v43 = vpop.f32.mrf.mxu0 }
 0x54e   : > { %v15510_v11 = vadd.f32 %v3489_v43, %v3397_v12 }
 0x54f   : > { %v3491_v21 = vpop.f32.mrf.mxu0 }
 0x551   : > { %v3494_v5 = vpop.f32.mrf.mxu0 }
 0x552   : > { %v15516_v49 = vadd.f32 %v3494_v5, %v3402_v36 }
 0x553   : > { %v3496_v41 = vpop.f32.mrf.mxu0 }
 0x555   : > { %v3497_v29 = vpop.f32.mrf.mxu0 }
 0x557   : > { %v3498_v42 = vpop.f32.mrf.mxu0 }
 0x559   : > { %v15518_v8 = vpop.f32.mrf.mxu0 }
 0x55b   : > { %v12759_v27 = vpop.f32.mrf.mxu0 }
 0x55d   : > { %v15520_v13 = vpop.f32.mrf.mxu0 }
 0x55e   : > { %v3675_v48 = vpack.c.bf16 %v15520_v13, %v15518_v8 }
 0x55f   : > { %v12760_v62 = vpop.f32.mrf.mxu0 }
 0x561   : > { %v3575_v26 = vpop.f32.mrf.mxu0 }
 0x563   : > { %v12763_v52 = vpop.f32.mrf.mxu0 }
 0x565   : > { %v3578_v39 = vpop.f32.mrf.mxu0 }
 0x566   : > { %v3676_v57 = vpack.c.bf16 %v3578_v39, %v3575_v26 }
 0x567   : > { %v12764_v35 = vpop.f32.mrf.mxu0 }
 0x569   : > { %v3583_v60 = vpop.f32.mrf.mxu0 }
 0x56b   : > { %v12767_v23 = vpop.f32.mrf.mxu0 }
 0x56d   : > { %v3586_v63 = vpop.f32.mrf.mxu0 }
 0x56e   : > { %v3677_v35 = vpack.c.bf16 %v3586_v63, %v3583_v60 }
 0x56f   : > { %v12768_v56 = vpop.f32.mrf.mxu0 }
 0x571   : > { %v3591_v14 = vpop.f32.mrf.mxu0 }
 0x573   : > { %v12771_v24 = vpop.f32.mrf.mxu0 }
 0x575   : > { %v3594_v47 = vpop.f32.mrf.mxu0 }
 0x576   : > { %v3678_v26 = vpack.c.bf16 %v3594_v47, %v3591_v14 }
 0x577   : > { %v12772_v20 = vpop.f32.mrf.mxu0 }
 0x579   : > { %v3599_v31 = vpop.f32.mrf.mxu0 }
 0x57b   : > { %v12775_v37 = vpop.f32.mrf.mxu0 }
 0x57d   : > { %v3602_v51 = vpop.f32.mrf.mxu0 }
 0x57e   : > { %v3679_v42 = vpack.c.bf16 %v3602_v51, %v3599_v31 }
 0x57f   : > { %v12776_v58 = vpop.f32.mrf.mxu0 }
 0x581   : > { %v3607_v32 = vpop.f32.mrf.mxu0 }
 0x583   : > { %v12779_v34 = vpop.f32.mrf.mxu0 }
 0x584   : > { %v13967_v34 = vld [vmem:[%s18177_s6 + $0x50] ss:$8 sps:$4 sm:$0xff]  }
 0x585   : > { %v3610_v12 = vpop.f32.mrf.mxu0 }
 0x586   : > { %v3680_v5 = vpack.c.bf16 %v3610_v12, %v3607_v32  ;;  %v13970_v12 = vld [vmem:[%s18177_s6 + $0x64] ss:$8 sps:$4 sm:$0xff]  }
 0x587   : > { %v12780_v55 = vpop.f32.mrf.mxu0 }
 0x588   : > { %v13973_v55 = vld [vmem:[%s14369_s9 + $0x78] sm:$0xff]  }
 0x589   : > { %v3615_v36 = vpop.f32.mrf.mxu0 }
 0x58b   : > { %v12783_v25 = vpop.f32.mrf.mxu0 }
 0x58c   : > { %v10483_v25 = vld [vmem:[%s18177_s6 + $0x70] sm:$0x33] }
 0x58d   : > { %v3618_v4 = vpop.f32.mrf.mxu0 }
 0x58e   : > { %v3681_v43 = vpack.c.bf16 %v3618_v4, %v3615_v36  ;;  %v13974_v36 = vld [vmem:[%s14369_s9 + $0x70] sm:$0xff]   ;;  %v13972_v4 = vld [vmem:[%s18177_s6 + $0x60] ss:$8 sps:$4 sm:$0xff]  }
 0x58f   : > { %v12784_v10 = vpop.f32.mrf.mxu0 }
 0x590   : > { %v10489_v10 = vcombine.high %v10483_v25, %v10483_v25 }
 0x591   : > { %v3623_v46 = vpop.f32.mrf.mxu0 }
 0x593   : > { %v12787_v3 = vpop.f32.mrf.mxu0 }
 0x594   : > { %v13978_v3 = vld [vmem:[%s14369_s9 + $0x60] sm:$0xff]  }
 0x595   : > { %v3626_v54 = vpop.f32.mrf.mxu0 }
 0x596   : > { %v3682_v22 = vpack.c.bf16 %v3626_v54, %v3623_v46  ;;  %v13977_v46 = vld [vmem:[%s14369_s9 + $0x68] sm:$0xff]   ;;  %v10488_v54 = vcombine.low %v10483_v25, %v10483_v25 }
 0x597   : > { %v12788_v61 = vpop.f32.mrf.mxu0 }
 0x598   : > { %3725 = vmatpush1.bf16.msra.mxu1 %v3682_v22 }
 0x599   : > { %v3631_v33 = vpop.f32.mrf.mxu0  ;;  %3726 = vmatprep.subr.bf16.mxu1 %v18182_v17 }
 0x59b   : > { %v12791_v15 = vpop.f32.mrf.mxu0 }
 0x59c   : > { %3727 = vmatpush1.bf16.msra.mxu1 %v3681_v43 }
 0x59d   : > { %v3634_v21 = vpop.f32.mrf.mxu0  ;;  %3728 = vmatprep.subr.bf16.mxu1 %v18182_v17 }
 0x59f   : > { %v12792_v41 = vpop.f32.mrf.mxu0 }
 0x5a0   : > { %3729 = vmatpush1.bf16.msra.mxu1 %v3680_v5 }
 0x5a1   : > { %v3639_v29 = vpop.f32.mrf.mxu0  ;;  %3730 = vmatprep.subr.bf16.mxu1 %v18182_v17 }
 0x5a3   : > { %v12795_v27 = vpop.f32.mrf.mxu0 }
 0x5a4   : > { %3731 = vmatpush1.bf16.msra.mxu1 %v3679_v42 }
 0x5a5   : > { %v3642_v62 = vpop.f32.mrf.mxu0  ;;  %3732 = vmatprep.subr.bf16.mxu1 %v18182_v17 }
 0x5a6   : > { %v3684_v13 = vpack.c.bf16 %v3642_v62, %v3639_v29 }
 0x5a7   : > { %v12796_v52 = vpop.f32.mrf.mxu0 }
 0x5a8   : > { %3733 = vmatpush1.bf16.msra.mxu1 %v3678_v26 }
 0x5a9   : > { %v3647_v39 = vpop.f32.mrf.mxu0  ;;  %3734 = vmatprep.subr.bf16.mxu1 %v18182_v17 }
 0x5ab   : > { %v12799_v23 = vpop.f32.mrf.mxu0 }
 0x5ac   : > { %3735 = vmatpush1.bf16.msra.mxu1 %v3677_v35 }
 0x5ad   : > { %v3650_v56 = vpop.f32.mrf.mxu0  ;;  %3736 = vmatprep.subr.bf16.mxu1 %v18182_v17 }
 0x5ae   : > { %v3685_v8 = vpack.c.bf16 %v3650_v56, %v3647_v39 }
 0x5af   : > { %v12800_v24 = vpop.f32.mrf.mxu0 }
 0x5b0   : > { %3737 = vmatpush1.bf16.msra.mxu1 %v3676_v57 }
 0x5b1   : > { %v3655_v20 = vpop.f32.mrf.mxu0  ;;  %3738 = vmatprep.subr.bf16.mxu1 %v18182_v17 }
 0x5b3   : > { %v12803_v31 = vpop.f32.mrf.mxu0 }
 0x5b4   : > { %3739 = vmatpush1.bf16.msra.mxu1 %v3675_v48  ;;  %v3683_v48 = vpack.c.bf16 %v3634_v21, %v3631_v33 }
 0x5b5   : > { %v3658_v14 = vpop.f32.mrf.mxu0  ;;  %3746 = vmatprep.subr.bf16.mxu1 %v18182_v17 }
 0x5b6   : > { %v3686_v32 = vpack.c.bf16 %v3658_v14, %v3655_v20 }
 0x5b7   : > { %v12804_v47 = vpop.f32.mrf.mxu0 }
 0x5b9   : > { %v3663_v60 = vpop.f32.mrf.mxu0 }
 0x5ba   : > { %v3687_v63 = vpack.c.bf16 %v3663_v60, %v3663_v60 }
 0x5bb   : > { %v12807_v37 = vpop.f32.mrf.mxu0 }
 0x5bc   : > { %v3722_v51 = vand.u32 %v3687_v63, %v15353_v1 }
 0x5bd   : > { %v3666_v58 = vpop.f32.mrf.mxu0 }
 0x5be   : > { %3747 = vmatpush2.bf16.msra.mxu1 %v3722_v51 }
 0x5bf   : > { %v12808_v57 = vpop.f32.mrf.mxu0  ;;  %3748 = vmatprep.subr.bf16.mxu1 %v18182_v17 }
 0x5c2   : > { %3749 = vmatpush2.bf16.msra.mxu1 %v3686_v32 }
 0x5c3   : > { %3750 = vmatprep.subr.bf16.mxu1 %v18182_v17 }
 0x5c6   : > { %3751 = vmatpush2.bf16.msra.mxu1 %v3685_v8 }
 0x5c7   : > { %3752 = vmatprep.subr.bf16.mxu1 %v18182_v17 }
 0x5ca   : > { %3753 = vmatpush2.bf16.msra.mxu1 %v3684_v13 }
 0x5cb   : > { %3754 = vmatprep.subr.bf16.mxu1 %v18182_v17 }
 0x5ce   : > { %3755 = vmatpush2.bf16.msra.mxu1 %v3683_v48 }
 0x5cf   : > { %12809 = vmatprep.subr.bf16.mxu1 %v18211_v53 }
 0x5d1   : > { %3757 = vmatmul.mubr.bf16.vlgmr.msra.gmra.mxu1 %v13967_v34 }
 0x5d2   : > { %10491 = vmatprep.mubr.msk.bf16.mxu1 %vm3335_vm2, %v13970_v12  ;;  %12810 = vmatpush3.bf16.msra.mxu1 %v13973_v55 }
 0x5d3   : > { %12811 = vmatprep.subr.bf16.mxu1 %v18211_v53 }
 0x5d6   : > { %12812 = vmatpush3.bf16.msra.mxu1 %v13974_v36 }
 0x5d7   : > { %12813 = vmatprep.subr.bf16.mxu1 %v18211_v53 }
 0x5d9   : > { %3765 = vmatmul.mubr.bf16.gmra.mxu1 %v13972_v4 }
 0x5da   : > { %10492 = vmatprep.mubr.msk.bf16.mxu1 %vm3335_vm2, %v10489_v10  ;;  %12814 = vmatpush3.bf16.msra.mxu1 %v13977_v46 }
 0x5db   : > { %12815 = vmatprep.subr.bf16.mxu1 %v18211_v53 }
 0x5de   : > { %12816 = vmatpush3.bf16.msra.mxu1 %v13978_v3 }
 0x5df   : > { %4294 = vmatprep.subr.bf16.mxu1 %v18182_v17 }
 0x5e1   : > { %3773 = vmatmul.mubr.bf16.gmra.mxu1 %v10488_v54 }
 0x5e2   : > { %12817 = vmatprep.mubr.msk.bf16.mxu1 %vm14245_vm0, %v18211_v53 }
 0x5e9   : > { %12818 = vmatmul.mubr.msk.bf16.vlgmr.msra.gmra.mxu1 %vm2929_vm1, %v15063_v2 }
 0x5ea   : > { %12821 = vmatprep.mubr.msk.bf16.mxu1 %vm14245_vm0, %v18211_v53 }
 0x5f1   : > { %12822 = vmatmul.mubr.msk.bf16.gmra.mxu1 %vm2929_vm1, %v15077_v44 }
 0x5f2   : > { %12825 = vmatprep.mubr.msk.bf16.mxu1 %vm14245_vm0, %v18211_v53 }
 0x5f9   : > { %12826 = vmatmul.mubr.msk.bf16.gmra.mxu1 %vm2929_vm1, %v15091_v40 }
 0x5fa   : > { %12829 = vmatprep.mubr.msk.bf16.mxu1 %vm14245_vm0, %v18211_v53 }
 0x601   : > { %12830 = vmatmul.mubr.msk.bf16.gmra.mxu1 %vm2929_vm1, %v15105_v19 }
 0x602   : > { %12833 = vmatprep.mubr.msk.bf16.mxu1 %vm14245_vm0, %v18211_v53 }
 0x609   : > { %12834 = vmatmul.mubr.msk.bf16.gmra.mxu1 %vm2929_vm1, %v15119_v0 }
 0x60a   : > { %12837 = vmatprep.mubr.msk.bf16.mxu1 %vm14245_vm0, %v18211_v53 }
 0x611   : > { %12838 = vmatmul.mubr.msk.bf16.gmra.mxu1 %vm2929_vm1, %v15133_v59 }
 0x612   : > { %12841 = vmatprep.mubr.msk.bf16.mxu1 %vm14245_vm0, %v18211_v53 }
 0x619   : > { %12842 = vmatmul.mubr.msk.bf16.gmra.mxu1 %vm2929_vm1, %v15147_v7 }
 0x61a   : > { %12845 = vmatprep.mubr.msk.bf16.mxu1 %vm14245_vm0, %v18211_v53 }
 0x621   : > { %12846 = vmatmul.mubr.msk.bf16.gmra.mxu1 %vm2929_vm1, %v15161_v38 }
 0x622   : > { %12849 = vmatprep.mubr.msk.bf16.mxu1 %vm14245_vm0, %v18211_v53 }
 0x629   : > { %12850 = vmatmul.mubr.msk.bf16.gmra.mxu1 %vm2929_vm1, %v15175_v45 }
 0x62a   : > { %12853 = vmatprep.mubr.msk.bf16.mxu1 %vm14245_vm0, %v18211_v53 }
 0x631   : > { %12854 = vmatmul.mubr.msk.bf16.gmra.mxu1 %vm2929_vm1, %v15189_v28 }
 0x632   : > { %12857 = vmatprep.mubr.msk.bf16.mxu1 %vm14245_vm0, %v18211_v53 }
 0x639   : > { %12858 = vmatmul.mubr.msk.bf16.gmra.mxu1 %vm2929_vm1, %v15203_v30 }
 0x63a   : > { %12861 = vmatprep.mubr.msk.bf16.mxu1 %vm14245_vm0, %v18211_v53 }
 0x641   : > { %12862 = vmatmul.mubr.msk.bf16.gmra.mxu1 %vm2929_vm1, %v15217_v16 }
 0x642   : > { %12865 = vmatprep.mubr.msk.bf16.mxu1 %vm14245_vm0, %v18211_v53 }
 0x649   : > { %12866 = vmatmul.mubr.msk.bf16.gmra.mxu1 %vm2929_vm1, %v15228_v18 }
 0x691   : > { %v3758_v22 = vpop.f32.mrf.mxu1 }
 0x692   : > { %v15616_v61 = vadd.f32 %v3758_v22, %v15504_v6  ;;  %v13981_v6 = vld [vmem:[%s18177_s6 + $0x7c] ss:$8 sps:$4 sm:$0xff]  }
 0x693   : > { %v3760_v33 = vpop.f32.mrf.mxu1  ;;  %10529 = vmatprep.mubr.msk.bf16.mxu0 %vm3335_vm2, %v13981_v6 }
 0x695   : > { %v3761_v43 = vpop.f32.mrf.mxu1 }
 0x696   : > { %v15619_v15 = vadd.f32 %v3761_v43, %v15506_v9 }
 0x697   : > { %v3763_v21 = vpop.f32.mrf.mxu1 }
 0x699   : > { %v3766_v5 = vpop.f32.mrf.mxu1 }
 0x69a   : > { %v15622_v41 = vadd.f32 %v3766_v5, %v15508_v50 }
 0x69b   : > { %v3768_v29 = vpop.f32.mrf.mxu1 }
 0x69d   : > { %v3769_v42 = vpop.f32.mrf.mxu1 }
 0x69e   : > { %v15625_v27 = vadd.f32 %v3769_v42, %v15510_v11 }
 0x69f   : > { %v3771_v62 = vpop.f32.mrf.mxu1 }
 0x6a1   : > { %v3774_v26 = vpop.f32.mrf.mxu1 }
 0x6a2   : > { %v15632_v9 = vadd.f32 %v3774_v26, %v15516_v49 }
 0x6a3   : > { %v3776_v52 = vpop.f32.mrf.mxu1 }
 0x6a5   : > { %v3777_v39 = vpop.f32.mrf.mxu1 }
 0x6a7   : > { %v3778_v50 = vpop.f32.mrf.mxu1 }
 0x6a9   : > { %v15634_v35 = vpop.f32.mrf.mxu1 }
 0x6ab   : > { %v12819_v23 = vpop.f32.mrf.mxu1 }
 0x6ad   : > { %v15636_v56 = vpop.f32.mrf.mxu1 }
 0x6ae   : > { %v3960_v11 = vpack.c.bf16 %v15636_v56, %v15634_v35 }
 0x6af   : > { %v12820_v24 = vpop.f32.mrf.mxu1 }
 0x6b1   : > { %v3860_v20 = vpop.f32.mrf.mxu1 }
 0x6b3   : > { %v12823_v31 = vpop.f32.mrf.mxu1 }
 0x6b5   : > { %v3863_v14 = vpop.f32.mrf.mxu1 }
 0x6b6   : > { %v3961_v47 = vpack.c.bf16 %v3863_v14, %v3860_v20 }
 0x6b7   : > { %v12824_v60 = vpop.f32.mrf.mxu1 }
 0x6b9   : > { %v3868_v63 = vpop.f32.mrf.mxu1 }
 0x6bb   : > { %v12827_v49 = vpop.f32.mrf.mxu1 }
 0x6bd   : > { %v3871_v37 = vpop.f32.mrf.mxu1 }
 0x6be   : > { %v3962_v60 = vpack.c.bf16 %v3871_v37, %v3868_v63 }
 0x6bf   : > { %v12828_v51 = vpop.f32.mrf.mxu1 }
 0x6c1   : > { %v3876_v58 = vpop.f32.mrf.mxu1 }
 0x6c3   : > { %v12831_v57 = vpop.f32.mrf.mxu1 }
 0x6c5   : > { %v3879_v32 = vpop.f32.mrf.mxu1 }
 0x6c6   : > { %v3963_v20 = vpack.c.bf16 %v3879_v32, %v3876_v58 }
 0x6c7   : > { %v12832_v8 = vpop.f32.mrf.mxu1 }
 0x6c9   : > { %v3884_v13 = vpop.f32.mrf.mxu1 }
 0x6cb   : > { %v12835_v48 = vpop.f32.mrf.mxu1 }
 0x6cd   : > { %v3887_v34 = vpop.f32.mrf.mxu1 }
 0x6ce   : > { %v3964_v50 = vpack.c.bf16 %v3887_v34, %v3884_v13 }
 0x6cf   : > { %v12836_v12 = vpop.f32.mrf.mxu1 }
 0x6d1   : > { %v3892_v55 = vpop.f32.mrf.mxu1 }
 0x6d3   : > { %v12839_v36 = vpop.f32.mrf.mxu1 }
 0x6d4   : > { %v13979_v36 = vld [vmem:[%s18177_s6 + $0x78] ss:$8 sps:$4 sm:$0xff]  }
 0x6d5   : > { %v3895_v25 = vpop.f32.mrf.mxu1 }
 0x6d6   : > { %v3965_v26 = vpack.c.bf16 %v3895_v25, %v3892_v55  ;;  %v13982_v25 = vld [vmem:[%s18177_s6 + $0x8c] ss:$8 sps:$4 sm:$0xff]  }
 0x6d7   : > { %v12840_v4 = vpop.f32.mrf.mxu1 }
 0x6d8   : > { %v13985_v4 = vld [vmem:[%s14369_s9 + $0x98] sm:$0xff]  }
 0x6d9   : > { %v3900_v10 = vpop.f32.mrf.mxu1 }
 0x6db   : > { %v12843_v46 = vpop.f32.mrf.mxu1 }
 0x6dc   : > { %v10522_v46 = vld [vmem:[%s18177_s6 + $0x98] sm:$0x33] }
 0x6dd   : > { %v3903_v3 = vpop.f32.mrf.mxu1 }
 0x6de   : > { %v3966_v42 = vpack.c.bf16 %v3903_v3, %v3900_v10  ;;  %v13986_v10 = vld [vmem:[%s14369_s9 + $0x90] sm:$0xff]  }
 0x6df   : > { %v12844_v54 = vpop.f32.mrf.mxu1  ;;  %v13984_v3 = vld [vmem:[%s18177_s6 + $0x88] ss:$8 sps:$4 sm:$0xff]  }
 0x6e0   : > { %v10528_v54 = vcombine.high %v10522_v46, %v10522_v46 }
 0x6e1   : > { %v3908_v22 = vpop.f32.mrf.mxu1 }
 0x6e3   : > { %v12847_v33 = vpop.f32.mrf.mxu1 }
 0x6e4   : > { %v13990_v33 = vld [vmem:[%s14369_s9 + $0x80] sm:$0xff]  }
 0x6e5   : > { %v3911_v43 = vpop.f32.mrf.mxu1 }
 0x6e6   : > { %v3967_v21 = vpack.c.bf16 %v3911_v43, %v3908_v22  ;;  %v13989_v22 = vld [vmem:[%s14369_s9 + $0x88] sm:$0xff]   ;;  %v10527_v43 = vcombine.low %v10522_v46, %v10522_v46 }
 0x6e7   : > { %v12848_v5 = vpop.f32.mrf.mxu1 }
 0x6e8   : > { %4010 = vmatpush1.bf16.msra.mxu0 %v3967_v21 }
 0x6e9   : > { %v3916_v29 = vpop.f32.mrf.mxu1  ;;  %4011 = vmatprep.subr.bf16.mxu0 %v18182_v17 }
 0x6eb   : > { %v12851_v6 = vpop.f32.mrf.mxu1 }
 0x6ec   : > { %4012 = vmatpush1.bf16.msra.mxu0 %v3966_v42 }
 0x6ed   : > { %v3919_v62 = vpop.f32.mrf.mxu1  ;;  %4013 = vmatprep.subr.bf16.mxu0 %v18182_v17 }
 0x6ef   : > { %v12852_v52 = vpop.f32.mrf.mxu1 }
 0x6f0   : > { %4014 = vmatpush1.bf16.msra.mxu0 %v3965_v26 }
 0x6f1   : > { %v3924_v39 = vpop.f32.mrf.mxu1  ;;  %4015 = vmatprep.subr.bf16.mxu0 %v18182_v17 }
 0x6f3   : > { %v12855_v23 = vpop.f32.mrf.mxu1 }
 0x6f4   : > { %4016 = vmatpush1.bf16.msra.mxu0 %v3964_v50 }
 0x6f5   : > { %v3927_v24 = vpop.f32.mrf.mxu1  ;;  %4017 = vmatprep.subr.bf16.mxu0 %v18182_v17 }
 0x6f6   : > { %v3969_v56 = vpack.c.bf16 %v3927_v24, %v3924_v39 }
 0x6f7   : > { %v12856_v31 = vpop.f32.mrf.mxu1 }
 0x6f8   : > { %4018 = vmatpush1.bf16.msra.mxu0 %v3963_v20 }
 0x6f9   : > { %v3932_v14 = vpop.f32.mrf.mxu1  ;;  %4019 = vmatprep.subr.bf16.mxu0 %v18182_v17 }
 0x6fb   : > { %v12859_v49 = vpop.f32.mrf.mxu1 }
 0x6fc   : > { %4020 = vmatpush1.bf16.msra.mxu0 %v3962_v60 }
 0x6fd   : > { %v3935_v51 = vpop.f32.mrf.mxu1  ;;  %4021 = vmatprep.subr.bf16.mxu0 %v18182_v17 }
 0x6fe   : > { %v3970_v35 = vpack.c.bf16 %v3935_v51, %v3932_v14 }
 0x6ff   : > { %v12860_v57 = vpop.f32.mrf.mxu1 }
 0x700   : > { %4022 = vmatpush1.bf16.msra.mxu0 %v3961_v47 }
 0x701   : > { %v3940_v8 = vpop.f32.mrf.mxu1  ;;  %4023 = vmatprep.subr.bf16.mxu0 %v18182_v17 }
 0x703   : > { %v12863_v13 = vpop.f32.mrf.mxu1 }
 0x704   : > { %4024 = vmatpush1.bf16.msra.mxu0 %v3960_v11  ;;  %v3968_v11 = vpack.c.bf16 %v3919_v62, %v3916_v29 }
 0x705   : > { %v3943_v58 = vpop.f32.mrf.mxu1  ;;  %4031 = vmatprep.subr.bf16.mxu0 %v18182_v17 }
 0x706   : > { %v3971_v55 = vpack.c.bf16 %v3943_v58, %v3940_v8 }
 0x707   : > { %v12864_v32 = vpop.f32.mrf.mxu1 }
 0x709   : > { %v3948_v63 = vpop.f32.mrf.mxu1 }
 0x70a   : > { %v3972_v37 = vpack.c.bf16 %v3948_v63, %v3948_v63 }
 0x70b   : > { %v12867_v48 = vpop.f32.mrf.mxu1 }
 0x70c   : > { %v4007_v34 = vand.u32 %v3972_v37, %v15353_v1 }
 0x70d   : > { %v3951_v12 = vpop.f32.mrf.mxu1 }
 0x70e   : > { %4032 = vmatpush2.bf16.msra.mxu0 %v4007_v34 }
 0x70f   : > { %v12868_v47 = vpop.f32.mrf.mxu1  ;;  %4033 = vmatprep.subr.bf16.mxu0 %v18182_v17 }
 0x712   : > { %4034 = vmatpush2.bf16.msra.mxu0 %v3971_v55 }
 0x713   : > { %4035 = vmatprep.subr.bf16.mxu0 %v18182_v17 }
 0x716   : > { %4036 = vmatpush2.bf16.msra.mxu0 %v3970_v35 }
 0x717   : > { %4037 = vmatprep.subr.bf16.mxu0 %v18182_v17 }
 0x71a   : > { %4038 = vmatpush2.bf16.msra.mxu0 %v3969_v56 }
 0x71b   : > { %4039 = vmatprep.subr.bf16.mxu0 %v18182_v17 }
 0x71e   : > { %4040 = vmatpush2.bf16.msra.mxu0 %v3968_v11 }
 0x71f   : > { %12869 = vmatprep.subr.bf16.mxu0 %v18211_v53 }
 0x721   : > { %4042 = vmatmul.mubr.bf16.vlgmr.msra.gmra.mxu0 %v13979_v36 }
 0x722   : > { %10530 = vmatprep.mubr.msk.bf16.mxu0 %vm3335_vm2, %v13982_v25  ;;  %12870 = vmatpush3.bf16.msra.mxu0 %v13985_v4 }
 0x723   : > { %12871 = vmatprep.subr.bf16.mxu0 %v18211_v53 }
 0x726   : > { %12872 = vmatpush3.bf16.msra.mxu0 %v13986_v10 }
 0x727   : > { %12873 = vmatprep.subr.bf16.mxu0 %v18211_v53 }
 0x729   : > { %4050 = vmatmul.mubr.bf16.gmra.mxu0 %v13984_v3 }
 0x72a   : > { %10531 = vmatprep.mubr.msk.bf16.mxu0 %vm3335_vm2, %v10528_v54  ;;  %12874 = vmatpush3.bf16.msra.mxu0 %v13989_v22 }
 0x72b   : > { %12875 = vmatprep.subr.bf16.mxu0 %v18211_v53 }
 0x72e   : > { %12876 = vmatpush3.bf16.msra.mxu0 %v13990_v33 }
 0x72f   : > { %4579 = vmatprep.subr.bf16.mxu0 %v18182_v17 }
 0x731   : > { %4058 = vmatmul.mubr.bf16.gmra.mxu0 %v10527_v43 }
 0x732   : > { %12877 = vmatprep.mubr.msk.bf16.mxu0 %vm14245_vm0, %v18211_v53 }
 0x739   : > { %12878 = vmatmul.mubr.msk.bf16.vlgmr.msra.gmra.mxu0 %vm2929_vm1, %v15063_v2 }
 0x73a   : > { %12881 = vmatprep.mubr.msk.bf16.mxu0 %vm14245_vm0, %v18211_v53 }
 0x741   : > { %12882 = vmatmul.mubr.msk.bf16.gmra.mxu0 %vm2929_vm1, %v15077_v44 }
 0x742   : > { %12885 = vmatprep.mubr.msk.bf16.mxu0 %vm14245_vm0, %v18211_v53 }
 0x749   : > { %12886 = vmatmul.mubr.msk.bf16.gmra.mxu0 %vm2929_vm1, %v15091_v40 }
 0x74a   : > { %12889 = vmatprep.mubr.msk.bf16.mxu0 %vm14245_vm0, %v18211_v53 }
 0x751   : > { %12890 = vmatmul.mubr.msk.bf16.gmra.mxu0 %vm2929_vm1, %v15105_v19 }
 0x752   : > { %12893 = vmatprep.mubr.msk.bf16.mxu0 %vm14245_vm0, %v18211_v53 }
 0x759   : > { %12894 = vmatmul.mubr.msk.bf16.gmra.mxu0 %vm2929_vm1, %v15119_v0 }
 0x75a   : > { %12897 = vmatprep.mubr.msk.bf16.mxu0 %vm14245_vm0, %v18211_v53 }
 0x761   : > { %12898 = vmatmul.mubr.msk.bf16.gmra.mxu0 %vm2929_vm1, %v15133_v59 }
 0x762   : > { %12901 = vmatprep.mubr.msk.bf16.mxu0 %vm14245_vm0, %v18211_v53 }
 0x769   : > { %12902 = vmatmul.mubr.msk.bf16.gmra.mxu0 %vm2929_vm1, %v15147_v7 }
 0x76a   : > { %12905 = vmatprep.mubr.msk.bf16.mxu0 %vm14245_vm0, %v18211_v53 }
 0x771   : > { %12906 = vmatmul.mubr.msk.bf16.gmra.mxu0 %vm2929_vm1, %v15161_v38 }
 0x772   : > { %12909 = vmatprep.mubr.msk.bf16.mxu0 %vm14245_vm0, %v18211_v53 }
 0x779   : > { %12910 = vmatmul.mubr.msk.bf16.gmra.mxu0 %vm2929_vm1, %v15175_v45 }
 0x77a   : > { %12913 = vmatprep.mubr.msk.bf16.mxu0 %vm14245_vm0, %v18211_v53 }
 0x781   : > { %12914 = vmatmul.mubr.msk.bf16.gmra.mxu0 %vm2929_vm1, %v15189_v28 }
 0x782   : > { %12917 = vmatprep.mubr.msk.bf16.mxu0 %vm14245_vm0, %v18211_v53 }
 0x789   : > { %12918 = vmatmul.mubr.msk.bf16.gmra.mxu0 %vm2929_vm1, %v15203_v30 }
 0x78a   : > { %12921 = vmatprep.mubr.msk.bf16.mxu0 %vm14245_vm0, %v18211_v53 }
 0x791   : > { %12922 = vmatmul.mubr.msk.bf16.gmra.mxu0 %vm2929_vm1, %v15217_v16 }
 0x792   : > { %12925 = vmatprep.mubr.msk.bf16.mxu0 %vm14245_vm0, %v18211_v53 }
 0x799   : > { %12926 = vmatmul.mubr.msk.bf16.gmra.mxu0 %vm2929_vm1, %v15228_v18 }
 0x7e1   : > { %v4043_v21 = vpop.f32.mrf.mxu0 }
 0x7e2   : > { %v15732_v5 = vadd.f32 %v4043_v21, %v15616_v61  ;;  %v13993_v61 = vld [vmem:[%s18177_s6 + $0xa4] ss:$8 sps:$4 sm:$0xff]  }
 0x7e3   : > { %v4045_v29 = vpop.f32.mrf.mxu0  ;;  %10568 = vmatprep.mubr.msk.bf16.mxu1 %vm3335_vm2, %v13993_v61 }
 0x7e5   : > { %v4046_v42 = vpop.f32.mrf.mxu0 }
 0x7e6   : > { %v15735_v6 = vadd.f32 %v4046_v42, %v15619_v15 }
 0x7e7   : > { %v4048_v62 = vpop.f32.mrf.mxu0 }
 0x7e9   : > { %v4051_v26 = vpop.f32.mrf.mxu0 }
 0x7ea   : > { %v15738_v52 = vadd.f32 %v4051_v26, %v15622_v41 }
 0x7eb   : > { %v4053_v39 = vpop.f32.mrf.mxu0 }
 0x7ed   : > { %v4054_v50 = vpop.f32.mrf.mxu0 }
 0x7ee   : > { %v15741_v23 = vadd.f32 %v4054_v50, %v15625_v27 }
 0x7ef   : > { %v4056_v24 = vpop.f32.mrf.mxu0 }
 0x7f1   : > { %v4059_v20 = vpop.f32.mrf.mxu0 }
 0x7f2   : > { %v15748_v15 = vadd.f32 %v4059_v20, %v15632_v9 }
 0x7f3   : > { %v4061_v31 = vpop.f32.mrf.mxu0 }
 0x7f5   : > { %v4062_v14 = vpop.f32.mrf.mxu0 }
 0x7f7   : > { %v4063_v41 = vpop.f32.mrf.mxu0 }
 0x7f9   : > { %v15750_v60 = vpop.f32.mrf.mxu0 }
 0x7fb   : > { %v12879_v49 = vpop.f32.mrf.mxu0 }
 0x7fd   : > { %v15752_v51 = vpop.f32.mrf.mxu0 }
 0x7fe   : > { %v4245_v27 = vpack.c.bf16 %v15752_v51, %v15750_v60 }
 0x7ff   : > { %v12880_v57 = vpop.f32.mrf.mxu0 }
 0x801   : > { %v4145_v8 = vpop.f32.mrf.mxu0 }
 0x803   : > { %v12883_v13 = vpop.f32.mrf.mxu0 }
 0x805   : > { %v4148_v58 = vpop.f32.mrf.mxu0 }
 0x806   : > { %v4246_v32 = vpack.c.bf16 %v4148_v58, %v4145_v8 }
 0x807   : > { %v12884_v63 = vpop.f32.mrf.mxu0 }
 0x809   : > { %v4153_v37 = vpop.f32.mrf.mxu0 }
 0x80b   : > { %v12887_v9 = vpop.f32.mrf.mxu0 }
 0x80d   : > { %v4156_v48 = vpop.f32.mrf.mxu0 }
 0x80e   : > { %v4247_v63 = vpack.c.bf16 %v4156_v48, %v4153_v37 }
 0x80f   : > { %v12888_v34 = vpop.f32.mrf.mxu0 }
 0x811   : > { %v4161_v12 = vpop.f32.mrf.mxu0 }
 0x813   : > { %v12891_v47 = vpop.f32.mrf.mxu0 }
 0x815   : > { %v4164_v55 = vpop.f32.mrf.mxu0 }
 0x816   : > { %v4248_v8 = vpack.c.bf16 %v4164_v55, %v4161_v12 }
 0x817   : > { %v12892_v35 = vpop.f32.mrf.mxu0 }
 0x819   : > { %v4169_v56 = vpop.f32.mrf.mxu0 }
 0x81b   : > { %v12895_v11 = vpop.f32.mrf.mxu0 }
 0x81d   : > { %v4172_v36 = vpop.f32.mrf.mxu0 }
 0x81e   : > { %v4249_v41 = vpack.c.bf16 %v4172_v36, %v4169_v56 }
 0x81f   : > { %v12896_v25 = vpop.f32.mrf.mxu0 }
 0x821   : > { %v4177_v4 = vpop.f32.mrf.mxu0 }
 0x823   : > { %v12899_v10 = vpop.f32.mrf.mxu0 }
 0x824   : > { %v13991_v10 = vld [vmem:[%s18177_s6 + $0xa0] ss:$8 sps:$4 sm:$0xff]  }
 0x825   : > { %v4180_v46 = vpop.f32.mrf.mxu0 }
 0x826   : > { %v4250_v20 = vpack.c.bf16 %v4180_v46, %v4177_v4  ;;  %v13994_v46 = vld [vmem:[%s18177_s6 + $0xb4] ss:$8 sps:$4 sm:$0xff]  }
 0x827   : > { %v12900_v3 = vpop.f32.mrf.mxu0 }
 0x828   : > { %v13997_v3 = vld [vmem:[%s14369_s9 + $0xb8] sm:$0xff]  }
 0x829   : > { %v4185_v54 = vpop.f32.mrf.mxu0 }
 0x82b   : > { %v12903_v22 = vpop.f32.mrf.mxu0 }
 0x82c   : > { %v10561_v22 = vld [vmem:[%s18177_s6 + $0xc0] sm:$0x33] }
 0x82d   : > { %v4188_v33 = vpop.f32.mrf.mxu0 }
 0x82e   : > { %v4251_v50 = vpack.c.bf16 %v4188_v33, %v4185_v54  ;;  %v13998_v54 = vld [vmem:[%s14369_s9 + $0xb0] sm:$0xff]  }
 0x82f   : > { %v12904_v43 = vpop.f32.mrf.mxu0  ;;  %v13996_v33 = vld [vmem:[%s18177_s6 + $0xb0] ss:$8 sps:$4 sm:$0xff]  }
 0x830   : > { %v10567_v43 = vcombine.high %v10561_v22, %v10561_v22 }
 0x831   : > { %v4193_v21 = vpop.f32.mrf.mxu0 }
 0x833   : > { %v12907_v29 = vpop.f32.mrf.mxu0 }
 0x834   : > { %v14002_v29 = vld [vmem:[%s14369_s9 + $0xa0] sm:$0xff]  }
 0x835   : > { %v4196_v42 = vpop.f32.mrf.mxu0 }
 0x836   : > { %v4252_v62 = vpack.c.bf16 %v4196_v42, %v4193_v21  ;;  %v14001_v21 = vld [vmem:[%s14369_s9 + $0xa8] sm:$0xff]   ;;  %v10566_v42 = vcombine.low %v10561_v22, %v10561_v22 }
 0x837   : > { %v12908_v26 = vpop.f32.mrf.mxu0 }
 0x838   : > { %4295 = vmatpush1.bf16.msra.mxu1 %v4252_v62 }
 0x839   : > { %v4201_v39 = vpop.f32.mrf.mxu0  ;;  %4296 = vmatprep.subr.bf16.mxu1 %v18182_v17 }
 0x83b   : > { %v12911_v61 = vpop.f32.mrf.mxu0 }
 0x83c   : > { %4297 = vmatpush1.bf16.msra.mxu1 %v4251_v50 }
 0x83d   : > { %v4204_v24 = vpop.f32.mrf.mxu0  ;;  %4298 = vmatprep.subr.bf16.mxu1 %v18182_v17 }
 0x83f   : > { %v12912_v31 = vpop.f32.mrf.mxu0 }
 0x840   : > { %4299 = vmatpush1.bf16.msra.mxu1 %v4250_v20 }
 0x841   : > { %v4209_v14 = vpop.f32.mrf.mxu0  ;;  %4300 = vmatprep.subr.bf16.mxu1 %v18182_v17 }
 0x843   : > { %v12915_v49 = vpop.f32.mrf.mxu0 }
 0x844   : > { %4301 = vmatpush1.bf16.msra.mxu1 %v4249_v41 }
 0x845   : > { %v4212_v57 = vpop.f32.mrf.mxu0  ;;  %4302 = vmatprep.subr.bf16.mxu1 %v18182_v17 }
 0x846   : > { %v4254_v51 = vpack.c.bf16 %v4212_v57, %v4209_v14 }
 0x847   : > { %v12916_v13 = vpop.f32.mrf.mxu0 }
 0x848   : > { %4303 = vmatpush1.bf16.msra.mxu1 %v4248_v8 }
 0x849   : > { %v4217_v58 = vpop.f32.mrf.mxu0  ;;  %4304 = vmatprep.subr.bf16.mxu1 %v18182_v17 }
 0x84b   : > { %v12919_v9 = vpop.f32.mrf.mxu0 }
 0x84c   : > { %4305 = vmatpush1.bf16.msra.mxu1 %v4247_v63 }
 0x84d   : > { %v4220_v34 = vpop.f32.mrf.mxu0  ;;  %4306 = vmatprep.subr.bf16.mxu1 %v18182_v17 }
 0x84e   : > { %v4255_v60 = vpack.c.bf16 %v4220_v34, %v4217_v58 }
 0x84f   : > { %v12920_v47 = vpop.f32.mrf.mxu0 }
 0x850   : > { %4307 = vmatpush1.bf16.msra.mxu1 %v4246_v32 }
 0x851   : > { %v4225_v35 = vpop.f32.mrf.mxu0  ;;  %4308 = vmatprep.subr.bf16.mxu1 %v18182_v17 }
 0x853   : > { %v12923_v56 = vpop.f32.mrf.mxu0 }
 0x854   : > { %4309 = vmatpush1.bf16.msra.mxu1 %v4245_v27  ;;  %v4253_v27 = vpack.c.bf16 %v4204_v24, %v4201_v39 }
 0x855   : > { %v4228_v12 = vpop.f32.mrf.mxu0  ;;  %4316 = vmatprep.subr.bf16.mxu1 %v18182_v17 }
 0x856   : > { %v4256_v4 = vpack.c.bf16 %v4228_v12, %v4225_v35 }
 0x857   : > { %v12924_v55 = vpop.f32.mrf.mxu0 }
 0x859   : > { %v4233_v37 = vpop.f32.mrf.mxu0 }
 0x85a   : > { %v4257_v48 = vpack.c.bf16 %v4233_v37, %v4233_v37 }
 0x85b   : > { %v12927_v11 = vpop.f32.mrf.mxu0 }
 0x85c   : > { %v4292_v36 = vand.u32 %v4257_v48, %v15353_v1 }
 0x85d   : > { %v4236_v25 = vpop.f32.mrf.mxu0 }
 0x85e   : > { %4317 = vmatpush2.bf16.msra.mxu1 %v4292_v36 }
 0x85f   : > { %v12928_v32 = vpop.f32.mrf.mxu0  ;;  %4318 = vmatprep.subr.bf16.mxu1 %v18182_v17 }
 0x862   : > { %4319 = vmatpush2.bf16.msra.mxu1 %v4256_v4 }
 0x863   : > { %4320 = vmatprep.subr.bf16.mxu1 %v18182_v17 }
 0x866   : > { %4321 = vmatpush2.bf16.msra.mxu1 %v4255_v60 }
 0x867   : > { %4322 = vmatprep.subr.bf16.mxu1 %v18182_v17 }
 0x86a   : > { %4323 = vmatpush2.bf16.msra.mxu1 %v4254_v51 }
 0x86b   : > { %4324 = vmatprep.subr.bf16.mxu1 %v18182_v17 }
 0x86e   : > { %4325 = vmatpush2.bf16.msra.mxu1 %v4253_v27 }
 0x86f   : > { %12929 = vmatprep.subr.bf16.mxu1 %v18211_v53 }
 0x871   : > { %4327 = vmatmul.mubr.bf16.vlgmr.msra.gmra.mxu1 %v13991_v10 }
 0x872   : > { %10569 = vmatprep.mubr.msk.bf16.mxu1 %vm3335_vm2, %v13994_v46  ;;  %12930 = vmatpush3.bf16.msra.mxu1 %v13997_v3 }
 0x873   : > { %12931 = vmatprep.subr.bf16.mxu1 %v18211_v53 }
 0x876   : > { %12932 = vmatpush3.bf16.msra.mxu1 %v13998_v54 }
 0x877   : > { %12933 = vmatprep.subr.bf16.mxu1 %v18211_v53 }
 0x879   : > { %4335 = vmatmul.mubr.bf16.gmra.mxu1 %v13996_v33 }
 0x87a   : > { %10570 = vmatprep.mubr.msk.bf16.mxu1 %vm3335_vm2, %v10567_v43  ;;  %12934 = vmatpush3.bf16.msra.mxu1 %v14001_v21 }
 0x87b   : > { %12935 = vmatprep.subr.bf16.mxu1 %v18211_v53 }
 0x87e   : > { %12936 = vmatpush3.bf16.msra.mxu1 %v14002_v29 }
 0x87f   : > { %4864 = vmatprep.subr.bf16.mxu1 %v18182_v17 }
 0x881   : > { %4343 = vmatmul.mubr.bf16.gmra.mxu1 %v10566_v42 }
 0x882   : > { %12937 = vmatprep.mubr.msk.bf16.mxu1 %vm14245_vm0, %v18211_v53 }
 0x889   : > { %12938 = vmatmul.mubr.msk.bf16.vlgmr.msra.gmra.mxu1 %vm2929_vm1, %v15063_v2 }
 0x88a   : > { %12941 = vmatprep.mubr.msk.bf16.mxu1 %vm14245_vm0, %v18211_v53 }
 0x891   : > { %12942 = vmatmul.mubr.msk.bf16.gmra.mxu1 %vm2929_vm1, %v15077_v44 }
 0x892   : > { %12945 = vmatprep.mubr.msk.bf16.mxu1 %vm14245_vm0, %v18211_v53 }
 0x899   : > { %12946 = vmatmul.mubr.msk.bf16.gmra.mxu1 %vm2929_vm1, %v15091_v40 }
 0x89a   : > { %12949 = vmatprep.mubr.msk.bf16.mxu1 %vm14245_vm0, %v18211_v53 }
 0x8a1   : > { %12950 = vmatmul.mubr.msk.bf16.gmra.mxu1 %vm2929_vm1, %v15105_v19 }
 0x8a2   : > { %12953 = vmatprep.mubr.msk.bf16.mxu1 %vm14245_vm0, %v18211_v53 }
 0x8a9   : > { %12954 = vmatmul.mubr.msk.bf16.gmra.mxu1 %vm2929_vm1, %v15119_v0 }
 0x8aa   : > { %12957 = vmatprep.mubr.msk.bf16.mxu1 %vm14245_vm0, %v18211_v53 }
 0x8b1   : > { %12958 = vmatmul.mubr.msk.bf16.gmra.mxu1 %vm2929_vm1, %v15133_v59 }
 0x8b2   : > { %12961 = vmatprep.mubr.msk.bf16.mxu1 %vm14245_vm0, %v18211_v53 }
 0x8b9   : > { %12962 = vmatmul.mubr.msk.bf16.gmra.mxu1 %vm2929_vm1, %v15147_v7 }
 0x8ba   : > { %12965 = vmatprep.mubr.msk.bf16.mxu1 %vm14245_vm0, %v18211_v53 }
 0x8c1   : > { %12966 = vmatmul.mubr.msk.bf16.gmra.mxu1 %vm2929_vm1, %v15161_v38 }
 0x8c2   : > { %12969 = vmatprep.mubr.msk.bf16.mxu1 %vm14245_vm0, %v18211_v53 }
 0x8c9   : > { %12970 = vmatmul.mubr.msk.bf16.gmra.mxu1 %vm2929_vm1, %v15175_v45 }
 0x8ca   : > { %12973 = vmatprep.mubr.msk.bf16.mxu1 %vm14245_vm0, %v18211_v53 }
 0x8d1   : > { %12974 = vmatmul.mubr.msk.bf16.gmra.mxu1 %vm2929_vm1, %v15189_v28 }
 0x8d2   : > { %12977 = vmatprep.mubr.msk.bf16.mxu1 %vm14245_vm0, %v18211_v53 }
 0x8d9   : > { %12978 = vmatmul.mubr.msk.bf16.gmra.mxu1 %vm2929_vm1, %v15203_v30 }
 0x8da   : > { %12981 = vmatprep.mubr.msk.bf16.mxu1 %vm14245_vm0, %v18211_v53 }
 0x8e1   : > { %12982 = vmatmul.mubr.msk.bf16.gmra.mxu1 %vm2929_vm1, %v15217_v16 }
 0x8e2   : > { %12985 = vmatprep.mubr.msk.bf16.mxu1 %vm14245_vm0, %v18211_v53 }
 0x8e9   : > { %12986 = vmatmul.mubr.msk.bf16.gmra.mxu1 %vm2929_vm1, %v15228_v18 }
 0x931   : > { %v4328_v62 = vpop.f32.mrf.mxu1 }
 0x932   : > { %v15848_v26 = vadd.f32 %v4328_v62, %v15732_v5  ;;  %v14005_v5 = vld [vmem:[%s18177_s6 + $0xcc] ss:$8 sps:$4 sm:$0xff]  }
 0x933   : > { %v4330_v39 = vpop.f32.mrf.mxu1  ;;  %10607 = vmatprep.mubr.msk.bf16.mxu0 %vm3335_vm2, %v14005_v5 }
 0x935   : > { %v4331_v50 = vpop.f32.mrf.mxu1 }
 0x936   : > { %v15851_v61 = vadd.f32 %v4331_v50, %v15735_v6 }
 0x937   : > { %v4333_v24 = vpop.f32.mrf.mxu1 }
 0x939   : > { %v4336_v20 = vpop.f32.mrf.mxu1 }
 0x93a   : > { %v15854_v31 = vadd.f32 %v4336_v20, %v15738_v52 }
 0x93b   : > { %v4338_v14 = vpop.f32.mrf.mxu1 }
 0x93d   : > { %v4339_v41 = vpop.f32.mrf.mxu1 }
 0x93e   : > { %v15857_v49 = vadd.f32 %v4339_v41, %v15741_v23 }
 0x93f   : > { %v4341_v57 = vpop.f32.mrf.mxu1 }
 0x941   : > { %v4344_v8 = vpop.f32.mrf.mxu1 }
 0x942   : > { %v15864_v6 = vadd.f32 %v4344_v8, %v15748_v15 }
 0x943   : > { %v4346_v13 = vpop.f32.mrf.mxu1 }
 0x945   : > { %v4347_v58 = vpop.f32.mrf.mxu1 }
 0x947   : > { %v4348_v52 = vpop.f32.mrf.mxu1 }
 0x949   : > { %v15866_v63 = vpop.f32.mrf.mxu1 }
 0x94b   : > { %v12939_v9 = vpop.f32.mrf.mxu1 }
 0x94d   : > { %v15868_v34 = vpop.f32.mrf.mxu1 }
 0x94e   : > { %v4530_v23 = vpack.c.bf16 %v15868_v34, %v15866_v63 }
 0x94f   : > { %v12940_v47 = vpop.f32.mrf.mxu1 }
 0x951   : > { %v4430_v35 = vpop.f32.mrf.mxu1 }
 0x953   : > { %v12943_v56 = vpop.f32.mrf.mxu1 }
 0x955   : > { %v4433_v12 = vpop.f32.mrf.mxu1 }
 0x956   : > { %v4531_v55 = vpack.c.bf16 %v4433_v12, %v4430_v35 }
 0x957   : > { %v12944_v37 = vpop.f32.mrf.mxu1 }
 0x959   : > { %v4438_v48 = vpop.f32.mrf.mxu1 }
 0x95b   : > { %v12947_v15 = vpop.f32.mrf.mxu1 }
 0x95d   : > { %v4441_v11 = vpop.f32.mrf.mxu1 }
 0x95e   : > { %v4532_v37 = vpack.c.bf16 %v4441_v11, %v4438_v48 }
 0x95f   : > { %v12948_v36 = vpop.f32.mrf.mxu1 }
 0x961   : > { %v4446_v25 = vpop.f32.mrf.mxu1 }
 0x963   : > { %v12951_v32 = vpop.f32.mrf.mxu1 }
 0x965   : > { %v4449_v4 = vpop.f32.mrf.mxu1 }
 0x966   : > { %v4533_v35 = vpack.c.bf16 %v4449_v4, %v4446_v25 }
 0x967   : > { %v12952_v60 = vpop.f32.mrf.mxu1 }
 0x969   : > { %v4454_v51 = vpop.f32.mrf.mxu1 }
 0x96b   : > { %v12955_v27 = vpop.f32.mrf.mxu1 }
 0x96d   : > { %v4457_v10 = vpop.f32.mrf.mxu1 }
 0x96e   : > { %v4534_v52 = vpack.c.bf16 %v4457_v10, %v4454_v51 }
 0x96f   : > { %v12956_v46 = vpop.f32.mrf.mxu1 }
 0x971   : > { %v4462_v3 = vpop.f32.mrf.mxu1 }
 0x973   : > { %v12959_v54 = vpop.f32.mrf.mxu1 }
 0x974   : > { %v14003_v54 = vld [vmem:[%s18177_s6 + $0xc8] ss:$8 sps:$4 sm:$0xff]  }
 0x975   : > { %v4465_v22 = vpop.f32.mrf.mxu1 }
 0x976   : > { %v4535_v8 = vpack.c.bf16 %v4465_v22, %v4462_v3  ;;  %v14006_v22 = vld [vmem:[%s18177_s6 + $0xdc] ss:$8 sps:$4 sm:$0xff]  }
 0x977   : > { %v12960_v33 = vpop.f32.mrf.mxu1 }
 0x978   : > { %v14009_v33 = vld [vmem:[%s14369_s9 + $0xd8] sm:$0xff]  }
 0x979   : > { %v4470_v43 = vpop.f32.mrf.mxu1 }
 0x97b   : > { %v12963_v21 = vpop.f32.mrf.mxu1 }
 0x97c   : > { %v10600_v21 = vld [vmem:[%s18177_s6 + $0xe8] sm:$0x33] }
 0x97d   : > { %v4473_v29 = vpop.f32.mrf.mxu1 }
 0x97e   : > { %v4536_v41 = vpack.c.bf16 %v4473_v29, %v4470_v43  ;;  %v14010_v43 = vld [vmem:[%s14369_s9 + $0xd0] sm:$0xff]   ;;  %v14008_v29 = vld [vmem:[%s18177_s6 + $0xd8] ss:$8 sps:$4 sm:$0xff]  }
 0x97f   : > { %v12964_v42 = vpop.f32.mrf.mxu1 }
 0x980   : > { %v10606_v42 = vcombine.high %v10600_v21, %v10600_v21 }
 0x981   : > { %v4478_v62 = vpop.f32.mrf.mxu1 }
 0x983   : > { %v12967_v39 = vpop.f32.mrf.mxu1 }
 0x984   : > { %v14014_v39 = vld [vmem:[%s14369_s9 + $0xc0] sm:$0xff]  }
 0x985   : > { %v4481_v50 = vpop.f32.mrf.mxu1 }
 0x986   : > { %v4537_v24 = vpack.c.bf16 %v4481_v50, %v4478_v62  ;;  %v14013_v62 = vld [vmem:[%s14369_s9 + $0xc8] sm:$0xff]   ;;  %v10605_v50 = vcombine.low %v10600_v21, %v10600_v21 }
 0x987   : > { %v12968_v20 = vpop.f32.mrf.mxu1 }
 0x988   : > { %4580 = vmatpush1.bf16.msra.mxu0 %v4537_v24 }
 0x989   : > { %v4486_v14 = vpop.f32.mrf.mxu1  ;;  %4581 = vmatprep.subr.bf16.mxu0 %v18182_v17 }
 0x98b   : > { %v12971_v5 = vpop.f32.mrf.mxu1 }
 0x98c   : > { %4582 = vmatpush1.bf16.msra.mxu0 %v4536_v41 }
 0x98d   : > { %v4489_v57 = vpop.f32.mrf.mxu1  ;;  %4583 = vmatprep.subr.bf16.mxu0 %v18182_v17 }
 0x98f   : > { %v12972_v13 = vpop.f32.mrf.mxu1 }
 0x990   : > { %4584 = vmatpush1.bf16.msra.mxu0 %v4535_v8 }
 0x991   : > { %v4494_v58 = vpop.f32.mrf.mxu1  ;;  %4585 = vmatprep.subr.bf16.mxu0 %v18182_v17 }
 0x993   : > { %v12975_v9 = vpop.f32.mrf.mxu1 }
 0x994   : > { %4586 = vmatpush1.bf16.msra.mxu0 %v4534_v52 }
 0x995   : > { %v4497_v47 = vpop.f32.mrf.mxu1  ;;  %4587 = vmatprep.subr.bf16.mxu0 %v18182_v17 }
 0x996   : > { %v4539_v34 = vpack.c.bf16 %v4497_v47, %v4494_v58 }
 0x997   : > { %v12976_v56 = vpop.f32.mrf.mxu1 }
 0x998   : > { %4588 = vmatpush1.bf16.msra.mxu0 %v4533_v35 }
 0x999   : > { %v4502_v12 = vpop.f32.mrf.mxu1  ;;  %4589 = vmatprep.subr.bf16.mxu0 %v18182_v17 }
 0x99b   : > { %v12979_v15 = vpop.f32.mrf.mxu1 }
 0x99c   : > { %4590 = vmatpush1.bf16.msra.mxu0 %v4532_v37 }
 0x99d   : > { %v4505_v36 = vpop.f32.mrf.mxu1  ;;  %4591 = vmatprep.subr.bf16.mxu0 %v18182_v17 }
 0x99e   : > { %v4540_v63 = vpack.c.bf16 %v4505_v36, %v4502_v12 }
 0x99f   : > { %v12980_v32 = vpop.f32.mrf.mxu1 }
 0x9a0   : > { %4592 = vmatpush1.bf16.msra.mxu0 %v4531_v55 }
 0x9a1   : > { %v4510_v60 = vpop.f32.mrf.mxu1  ;;  %4593 = vmatprep.subr.bf16.mxu0 %v18182_v17 }
 0x9a3   : > { %v12983_v51 = vpop.f32.mrf.mxu1 }
 0x9a4   : > { %4594 = vmatpush1.bf16.msra.mxu0 %v4530_v23  ;;  %v4538_v23 = vpack.c.bf16 %v4489_v57, %v4486_v14 }
 0x9a5   : > { %v4513_v25 = vpop.f32.mrf.mxu1  ;;  %4601 = vmatprep.subr.bf16.mxu0 %v18182_v17 }
 0x9a6   : > { %v4541_v3 = vpack.c.bf16 %v4513_v25, %v4510_v60 }
 0x9a7   : > { %v12984_v4 = vpop.f32.mrf.mxu1 }
 0x9a9   : > { %v4518_v48 = vpop.f32.mrf.mxu1 }
 0x9aa   : > { %v4542_v11 = vpack.c.bf16 %v4518_v48, %v4518_v48 }
 0x9ab   : > { %v12987_v27 = vpop.f32.mrf.mxu1 }
 0x9ac   : > { %v4577_v10 = vand.u32 %v4542_v11, %v15353_v1 }
 0x9ad   : > { %v4521_v46 = vpop.f32.mrf.mxu1 }
 0x9ae   : > { %4602 = vmatpush2.bf16.msra.mxu0 %v4577_v10 }
 0x9af   : > { %v12988_v55 = vpop.f32.mrf.mxu1  ;;  %4603 = vmatprep.subr.bf16.mxu0 %v18182_v17 }
 0x9b2   : > { %4604 = vmatpush2.bf16.msra.mxu0 %v4541_v3 }
 0x9b3   : > { %4605 = vmatprep.subr.bf16.mxu0 %v18182_v17 }
 0x9b6   : > { %4606 = vmatpush2.bf16.msra.mxu0 %v4540_v63 }
 0x9b7   : > { %4607 = vmatprep.subr.bf16.mxu0 %v18182_v17 }
 0x9ba   : > { %4608 = vmatpush2.bf16.msra.mxu0 %v4539_v34 }
 0x9bb   : > { %4609 = vmatprep.subr.bf16.mxu0 %v18182_v17 }
 0x9be   : > { %4610 = vmatpush2.bf16.msra.mxu0 %v4538_v23 }
 0x9bf   : > { %12989 = vmatprep.subr.bf16.mxu0 %v18211_v53 }
 0x9c1   : > { %4612 = vmatmul.mubr.bf16.vlgmr.msra.gmra.mxu0 %v14003_v54 }
 0x9c2   : > { %10608 = vmatprep.mubr.msk.bf16.mxu0 %vm3335_vm2, %v14006_v22  ;;  %12990 = vmatpush3.bf16.msra.mxu0 %v14009_v33 }
 0x9c3   : > { %12991 = vmatprep.subr.bf16.mxu0 %v18211_v53 }
 0x9c6   : > { %12992 = vmatpush3.bf16.msra.mxu0 %v14010_v43 }
 0x9c7   : > { %12993 = vmatprep.subr.bf16.mxu0 %v18211_v53 }
 0x9c9   : > { %4620 = vmatmul.mubr.bf16.gmra.mxu0 %v14008_v29 }
 0x9ca   : > { %10609 = vmatprep.mubr.msk.bf16.mxu0 %vm3335_vm2, %v10606_v42  ;;  %12994 = vmatpush3.bf16.msra.mxu0 %v14013_v62 }
 0x9cb   : > { %12995 = vmatprep.subr.bf16.mxu0 %v18211_v53 }
 0x9ce   : > { %12996 = vmatpush3.bf16.msra.mxu0 %v14014_v39 }
 0x9cf   : > { %5149 = vmatprep.subr.bf16.mxu0 %v18182_v17 }
 0x9d1   : > { %4628 = vmatmul.mubr.bf16.gmra.mxu0 %v10605_v50 }
 0x9d2   : > { %12997 = vmatprep.mubr.msk.bf16.mxu0 %vm14245_vm0, %v18211_v53 }
 0x9d9   : > { %12998 = vmatmul.mubr.msk.bf16.vlgmr.msra.gmra.mxu0 %vm2929_vm1, %v15063_v2 }
 0x9da   : > { %13001 = vmatprep.mubr.msk.bf16.mxu0 %vm14245_vm0, %v18211_v53 }
 0x9e1   : > { %13002 = vmatmul.mubr.msk.bf16.gmra.mxu0 %vm2929_vm1, %v15077_v44 }
 0x9e2   : > { %13005 = vmatprep.mubr.msk.bf16.mxu0 %vm14245_vm0, %v18211_v53 }
 0x9e9   : > { %13006 = vmatmul.mubr.msk.bf16.gmra.mxu0 %vm2929_vm1, %v15091_v40 }
 0x9ea   : > { %13009 = vmatprep.mubr.msk.bf16.mxu0 %vm14245_vm0, %v18211_v53 }
 0x9f1   : > { %13010 = vmatmul.mubr.msk.bf16.gmra.mxu0 %vm2929_vm1, %v15105_v19 }
 0x9f2   : > { %13013 = vmatprep.mubr.msk.bf16.mxu0 %vm14245_vm0, %v18211_v53 }
 0x9f9   : > { %13014 = vmatmul.mubr.msk.bf16.gmra.mxu0 %vm2929_vm1, %v15119_v0 }
 0x9fa   : > { %13017 = vmatprep.mubr.msk.bf16.mxu0 %vm14245_vm0, %v18211_v53 }
 0xa01   : > { %13018 = vmatmul.mubr.msk.bf16.gmra.mxu0 %vm2929_vm1, %v15133_v59 }
 0xa02   : > { %13021 = vmatprep.mubr.msk.bf16.mxu0 %vm14245_vm0, %v18211_v53 }
 0xa09   : > { %13022 = vmatmul.mubr.msk.bf16.gmra.mxu0 %vm2929_vm1, %v15147_v7 }
 0xa0a   : > { %13025 = vmatprep.mubr.msk.bf16.mxu0 %vm14245_vm0, %v18211_v53 }
 0xa11   : > { %13026 = vmatmul.mubr.msk.bf16.gmra.mxu0 %vm2929_vm1, %v15161_v38 }
 0xa12   : > { %13029 = vmatprep.mubr.msk.bf16.mxu0 %vm14245_vm0, %v18211_v53 }
 0xa19   : > { %13030 = vmatmul.mubr.msk.bf16.gmra.mxu0 %vm2929_vm1, %v15175_v45 }
 0xa1a   : > { %13033 = vmatprep.mubr.msk.bf16.mxu0 %vm14245_vm0, %v18211_v53 }
 0xa21   : > { %13034 = vmatmul.mubr.msk.bf16.gmra.mxu0 %vm2929_vm1, %v15189_v28 }
 0xa22   : > { %13037 = vmatprep.mubr.msk.bf16.mxu0 %vm14245_vm0, %v18211_v53 }
 0xa29   : > { %13038 = vmatmul.mubr.msk.bf16.gmra.mxu0 %vm2929_vm1, %v15203_v30 }
 0xa2a   : > { %13041 = vmatprep.mubr.msk.bf16.mxu0 %vm14245_vm0, %v18211_v53 }
 0xa31   : > { %13042 = vmatmul.mubr.msk.bf16.gmra.mxu0 %vm2929_vm1, %v15217_v16 }
 0xa32   : > { %13045 = vmatprep.mubr.msk.bf16.mxu0 %vm14245_vm0, %v18211_v53 }
 0xa39   : > { %13046 = vmatmul.mubr.msk.bf16.gmra.mxu0 %vm2929_vm1, %v15228_v18 }
 0xa81   : > { %v4613_v24 = vpop.f32.mrf.mxu0 }
 0xa82   : > { %v15964_v20 = vadd.f32 %v4613_v24, %v15848_v26  ;;  %v14017_v26 = vld [vmem:[%s18177_s6 + $0xf4] ss:$8 sps:$4 sm:$0xff]  }
 0xa83   : > { %v4615_v14 = vpop.f32.mrf.mxu0  ;;  %10646 = vmatprep.mubr.msk.bf16.mxu1 %vm3335_vm2, %v14017_v26 }
 0xa85   : > { %v4616_v41 = vpop.f32.mrf.mxu0 }
 0xa86   : > { %v15967_v5 = vadd.f32 %v4616_v41, %v15851_v61 }
 0xa87   : > { %v4618_v57 = vpop.f32.mrf.mxu0 }
 0xa89   : > { %v4621_v8 = vpop.f32.mrf.mxu0 }
 0xa8a   : > { %v15970_v13 = vadd.f32 %v4621_v8, %v15854_v31 }
 0xa8b   : > { %v4623_v58 = vpop.f32.mrf.mxu0 }
 0xa8d   : > { %v4624_v52 = vpop.f32.mrf.mxu0 }
 0xa8e   : > { %v15973_v9 = vadd.f32 %v4624_v52, %v15857_v49 }
 0xa8f   : > { %v4626_v47 = vpop.f32.mrf.mxu0 }
 0xa91   : > { %v4629_v35 = vpop.f32.mrf.mxu0 }
 0xa92   : > { %v15980_v61 = vadd.f32 %v4629_v35, %v15864_v6 }
 0xa93   : > { %v4631_v56 = vpop.f32.mrf.mxu0 }
 0xa95   : > { %v4632_v12 = vpop.f32.mrf.mxu0 }
 0xa97   : > { %v4633_v31 = vpop.f32.mrf.mxu0 }
 0xa99   : > { %v15982_v37 = vpop.f32.mrf.mxu0 }
 0xa9b   : > { %v12999_v15 = vpop.f32.mrf.mxu0 }
 0xa9d   : > { %v15984_v36 = vpop.f32.mrf.mxu0 }
 0xa9e   : > { %v4815_v49 = vpack.c.bf16 %v15984_v36, %v15982_v37 }
 0xa9f   : > { %v13000_v32 = vpop.f32.mrf.mxu0 }
 0xaa1   : > { %v4715_v60 = vpop.f32.mrf.mxu0 }
 0xaa3   : > { %v13003_v51 = vpop.f32.mrf.mxu0 }
 0xaa5   : > { %v4718_v25 = vpop.f32.mrf.mxu0 }
 0xaa6   : > { %v4816_v4 = vpack.c.bf16 %v4718_v25, %v4715_v60 }
 0xaa7   : > { %v13004_v48 = vpop.f32.mrf.mxu0 }
 0xaa9   : > { %v4723_v11 = vpop.f32.mrf.mxu0 }
 0xaab   : > { %v13007_v6 = vpop.f32.mrf.mxu0 }
 0xaad   : > { %v4726_v27 = vpop.f32.mrf.mxu0 }
 0xaae   : > { %v4817_v48 = vpack.c.bf16 %v4726_v27, %v4723_v11 }
 0xaaf   : > { %v13008_v10 = vpop.f32.mrf.mxu0 }
 0xab1   : > { %v4731_v46 = vpop.f32.mrf.mxu0 }
 0xab3   : > { %v13011_v55 = vpop.f32.mrf.mxu0 }
 0xab5   : > { %v4734_v3 = vpop.f32.mrf.mxu0 }
 0xab6   : > { %v4818_v60 = vpack.c.bf16 %v4734_v3, %v4731_v46 }
 0xab7   : > { %v13012_v63 = vpop.f32.mrf.mxu0 }
 0xab9   : > { %v4739_v34 = vpop.f32.mrf.mxu0 }
 0xabb   : > { %v13015_v23 = vpop.f32.mrf.mxu0 }
 0xabd   : > { %v4742_v54 = vpop.f32.mrf.mxu0 }
 0xabe   : > { %v4819_v31 = vpack.c.bf16 %v4742_v54, %v4739_v34 }
 0xabf   : > { %v13016_v22 = vpop.f32.mrf.mxu0 }
 0xac1   : > { %v4747_v33 = vpop.f32.mrf.mxu0 }
 0xac3   : > { %v13019_v43 = vpop.f32.mrf.mxu0 }
 0xac4   : > { %v14015_v43 = vld [vmem:[%s18177_s6 + $0xf0] ss:$8 sps:$4 sm:$0xff]  }
 0xac5   : > { %v4750_v21 = vpop.f32.mrf.mxu0 }
 0xac6   : > { %v4820_v35 = vpack.c.bf16 %v4750_v21, %v4747_v33  ;;  %v14018_v21 = vld [vmem:[%s18177_s6 + $0x104] ss:$8 sps:$4 sm:$0xff]  }
 0xac7   : > { %v13020_v29 = vpop.f32.mrf.mxu0 }
 0xac8   : > { %v14021_v29 = vld [vmem:[%s14369_s9 + $0xf8] sm:$0xff]  }
 0xac9   : > { %v4755_v42 = vpop.f32.mrf.mxu0 }
 0xacb   : > { %v13023_v62 = vpop.f32.mrf.mxu0 }
 0xacc   : > { %v10639_v62 = vld [vmem:[%s18177_s6 + $0x110] sm:$0x33] }
 0xacd   : > { %v4758_v39 = vpop.f32.mrf.mxu0 }
 0xace   : > { %v4821_v52 = vpack.c.bf16 %v4758_v39, %v4755_v42  ;;  %v14022_v42 = vld [vmem:[%s14369_s9 + $0xf0] sm:$0xff]   ;;  %v14020_v39 = vld [vmem:[%s18177_s6 + $0x100] ss:$8 sps:$4 sm:$0xff]  }
 0xacf   : > { %v13024_v50 = vpop.f32.mrf.mxu0 }
 0xad0   : > { %v10645_v50 = vcombine.high %v10639_v62, %v10639_v62 }
 0xad1   : > { %v4763_v24 = vpop.f32.mrf.mxu0 }
 0xad3   : > { %v13027_v14 = vpop.f32.mrf.mxu0 }
 0xad4   : > { %v14026_v14 = vld [vmem:[%s14369_s9 + $0xe0] sm:$0xff]  }
 0xad5   : > { %v4766_v41 = vpop.f32.mrf.mxu0 }
 0xad6   : > { %v4822_v57 = vpack.c.bf16 %v4766_v41, %v4763_v24  ;;  %v14025_v24 = vld [vmem:[%s14369_s9 + $0xe8] sm:$0xff]   ;;  %v10644_v41 = vcombine.low %v10639_v62, %v10639_v62 }
 0xad7   : > { %v13028_v8 = vpop.f32.mrf.mxu0 }
 0xad8   : > { %4865 = vmatpush1.bf16.msra.mxu1 %v4822_v57 }
 0xad9   : > { %v4771_v58 = vpop.f32.mrf.mxu0  ;;  %4866 = vmatprep.subr.bf16.mxu1 %v18182_v17 }
 0xadb   : > { %v13031_v26 = vpop.f32.mrf.mxu0 }
 0xadc   : > { %4867 = vmatpush1.bf16.msra.mxu1 %v4821_v52 }
 0xadd   : > { %v4774_v47 = vpop.f32.mrf.mxu0  ;;  %4868 = vmatprep.subr.bf16.mxu1 %v18182_v17 }
 0xadf   : > { %v13032_v56 = vpop.f32.mrf.mxu0 }
 0xae0   : > { %4869 = vmatpush1.bf16.msra.mxu1 %v4820_v35 }
 0xae1   : > { %v4779_v12 = vpop.f32.mrf.mxu0  ;;  %4870 = vmatprep.subr.bf16.mxu1 %v18182_v17 }
 0xae3   : > { %v13035_v15 = vpop.f32.mrf.mxu0 }
 0xae4   : > { %4871 = vmatpush1.bf16.msra.mxu1 %v4819_v31 }
 0xae5   : > { %v4782_v32 = vpop.f32.mrf.mxu0  ;;  %4872 = vmatprep.subr.bf16.mxu1 %v18182_v17 }
 0xae6   : > { %v4824_v36 = vpack.c.bf16 %v4782_v32, %v4779_v12 }
 0xae7   : > { %v13036_v51 = vpop.f32.mrf.mxu0 }
 0xae8   : > { %4873 = vmatpush1.bf16.msra.mxu1 %v4818_v60 }
 0xae9   : > { %v4787_v25 = vpop.f32.mrf.mxu0  ;;  %4874 = vmatprep.subr.bf16.mxu1 %v18182_v17 }
 0xaeb   : > { %v13039_v6 = vpop.f32.mrf.mxu0 }
 0xaec   : > { %4875 = vmatpush1.bf16.msra.mxu1 %v4817_v48 }
 0xaed   : > { %v4790_v10 = vpop.f32.mrf.mxu0  ;;  %4876 = vmatprep.subr.bf16.mxu1 %v18182_v17 }
 0xaee   : > { %v4825_v37 = vpack.c.bf16 %v4790_v10, %v4787_v25 }
 0xaef   : > { %v13040_v55 = vpop.f32.mrf.mxu0 }
 0xaf0   : > { %4877 = vmatpush1.bf16.msra.mxu1 %v4816_v4 }
 0xaf1   : > { %v4795_v63 = vpop.f32.mrf.mxu0  ;;  %4878 = vmatprep.subr.bf16.mxu1 %v18182_v17 }
 0xaf3   : > { %v13043_v34 = vpop.f32.mrf.mxu0 }
 0xaf4   : > { %4879 = vmatpush1.bf16.msra.mxu1 %v4815_v49  ;;  %v4823_v49 = vpack.c.bf16 %v4774_v47, %v4771_v58 }
 0xaf5   : > { %v4798_v46 = vpop.f32.mrf.mxu0  ;;  %4886 = vmatprep.subr.bf16.mxu1 %v18182_v17 }
 0xaf6   : > { %v4826_v33 = vpack.c.bf16 %v4798_v46, %v4795_v63 }
 0xaf7   : > { %v13044_v3 = vpop.f32.mrf.mxu0 }
 0xaf9   : > { %v4803_v11 = vpop.f32.mrf.mxu0 }
 0xafa   : > { %v4827_v27 = vpack.c.bf16 %v4803_v11, %v4803_v11 }
 0xafb   : > { %v13047_v23 = vpop.f32.mrf.mxu0 }
 0xafc   : > { %v4862_v54 = vand.u32 %v4827_v27, %v15353_v1 }
 0xafd   : > { %v4806_v22 = vpop.f32.mrf.mxu0 }
 0xafe   : > { %4887 = vmatpush2.bf16.msra.mxu1 %v4862_v54 }
 0xaff   : > { %v13048_v4 = vpop.f32.mrf.mxu0  ;;  %4888 = vmatprep.subr.bf16.mxu1 %v18182_v17 }
 0xb02   : > { %4889 = vmatpush2.bf16.msra.mxu1 %v4826_v33 }
 0xb03   : > { %4890 = vmatprep.subr.bf16.mxu1 %v18182_v17 }
 0xb06   : > { %4891 = vmatpush2.bf16.msra.mxu1 %v4825_v37 }
 0xb07   : > { %4892 = vmatprep.subr.bf16.mxu1 %v18182_v17 }
 0xb0a   : > { %4893 = vmatpush2.bf16.msra.mxu1 %v4824_v36 }
 0xb0b   : > { %4894 = vmatprep.subr.bf16.mxu1 %v18182_v17 }
 0xb0e   : > { %4895 = vmatpush2.bf16.msra.mxu1 %v4823_v49 }
 0xb0f   : > { %13049 = vmatprep.subr.bf16.mxu1 %v18211_v53 }
 0xb11   : > { %4897 = vmatmul.mubr.bf16.vlgmr.msra.gmra.mxu1 %v14015_v43 }
 0xb12   : > { %10647 = vmatprep.mubr.msk.bf16.mxu1 %vm3335_vm2, %v14018_v21  ;;  %13050 = vmatpush3.bf16.msra.mxu1 %v14021_v29 }
 0xb13   : > { %13051 = vmatprep.subr.bf16.mxu1 %v18211_v53 }
 0xb16   : > { %13052 = vmatpush3.bf16.msra.mxu1 %v14022_v42 }
 0xb17   : > { %13053 = vmatprep.subr.bf16.mxu1 %v18211_v53 }
 0xb19   : > { %4905 = vmatmul.mubr.bf16.gmra.mxu1 %v14020_v39 }
 0xb1a   : > { %10648 = vmatprep.mubr.msk.bf16.mxu1 %vm3335_vm2, %v10645_v50  ;;  %13054 = vmatpush3.bf16.msra.mxu1 %v14025_v24 }
 0xb1b   : > { %13055 = vmatprep.subr.bf16.mxu1 %v18211_v53 }
 0xb1e   : > { %13056 = vmatpush3.bf16.msra.mxu1 %v14026_v14 }
 0xb1f   : > { %5434 = vmatprep.subr.bf16.mxu1 %v18182_v17 }
 0xb21   : > { %4913 = vmatmul.mubr.bf16.gmra.mxu1 %v10644_v41 }
 0xb22   : > { %13057 = vmatprep.mubr.msk.bf16.mxu1 %vm14245_vm0, %v18211_v53 }
 0xb29   : > { %13058 = vmatmul.mubr.msk.bf16.vlgmr.msra.gmra.mxu1 %vm2929_vm1, %v15063_v2 }
 0xb2a   : > { %13061 = vmatprep.mubr.msk.bf16.mxu1 %vm14245_vm0, %v18211_v53 }
 0xb31   : > { %13062 = vmatmul.mubr.msk.bf16.gmra.mxu1 %vm2929_vm1, %v15077_v44 }
 0xb32   : > { %13065 = vmatprep.mubr.msk.bf16.mxu1 %vm14245_vm0, %v18211_v53 }
 0xb39   : > { %13066 = vmatmul.mubr.msk.bf16.gmra.mxu1 %vm2929_vm1, %v15091_v40 }
 0xb3a   : > { %13069 = vmatprep.mubr.msk.bf16.mxu1 %vm14245_vm0, %v18211_v53 }
 0xb41   : > { %13070 = vmatmul.mubr.msk.bf16.gmra.mxu1 %vm2929_vm1, %v15105_v19 }
 0xb42   : > { %13073 = vmatprep.mubr.msk.bf16.mxu1 %vm14245_vm0, %v18211_v53 }
 0xb49   : > { %13074 = vmatmul.mubr.msk.bf16.gmra.mxu1 %vm2929_vm1, %v15119_v0 }
 0xb4a   : > { %13077 = vmatprep.mubr.msk.bf16.mxu1 %vm14245_vm0, %v18211_v53 }
 0xb51   : > { %13078 = vmatmul.mubr.msk.bf16.gmra.mxu1 %vm2929_vm1, %v15133_v59 }
 0xb52   : > { %13081 = vmatprep.mubr.msk.bf16.mxu1 %vm14245_vm0, %v18211_v53 }
 0xb59   : > { %13082 = vmatmul.mubr.msk.bf16.gmra.mxu1 %vm2929_vm1, %v15147_v7 }
 0xb5a   : > { %13085 = vmatprep.mubr.msk.bf16.mxu1 %vm14245_vm0, %v18211_v53 }
 0xb61   : > { %13086 = vmatmul.mubr.msk.bf16.gmra.mxu1 %vm2929_vm1, %v15161_v38 }
 0xb62   : > { %13089 = vmatprep.mubr.msk.bf16.mxu1 %vm14245_vm0, %v18211_v53 }
 0xb69   : > { %13090 = vmatmul.mubr.msk.bf16.gmra.mxu1 %vm2929_vm1, %v15175_v45 }
 0xb6a   : > { %13093 = vmatprep.mubr.msk.bf16.mxu1 %vm14245_vm0, %v18211_v53 }
 0xb71   : > { %13094 = vmatmul.mubr.msk.bf16.gmra.mxu1 %vm2929_vm1, %v15189_v28 }
 0xb72   : > { %13097 = vmatprep.mubr.msk.bf16.mxu1 %vm14245_vm0, %v18211_v53 }
 0xb79   : > { %13098 = vmatmul.mubr.msk.bf16.gmra.mxu1 %vm2929_vm1, %v15203_v30 }
 0xb7a   : > { %13101 = vmatprep.mubr.msk.bf16.mxu1 %vm14245_vm0, %v18211_v53 }
 0xb81   : > { %13102 = vmatmul.mubr.msk.bf16.gmra.mxu1 %vm2929_vm1, %v15217_v16 }
 0xb82   : > { %13105 = vmatprep.mubr.msk.bf16.mxu1 %vm14245_vm0, %v18211_v53 }
 0xb89   : > { %13106 = vmatmul.mubr.msk.bf16.gmra.mxu1 %vm2929_vm1, %v15228_v18 }
 0xbd1   : > { %v4898_v57 = vpop.f32.mrf.mxu1 }
 0xbd2   : > { %v16080_v8 = vadd.f32 %v4898_v57, %v15964_v20  ;;  %v14029_v20 = vld [vmem:[%s18177_s6 + $0x11c] ss:$8 sps:$4 sm:$0xff]  }
 0xbd3   : > { %v4900_v58 = vpop.f32.mrf.mxu1  ;;  %10685 = vmatprep.mubr.msk.bf16.mxu0 %vm3335_vm2, %v14029_v20 }
 0xbd5   : > { %v4901_v52 = vpop.f32.mrf.mxu1 }
 0xbd6   : > { %v16083_v26 = vadd.f32 %v4901_v52, %v15967_v5 }
 0xbd7   : > { %v4903_v47 = vpop.f32.mrf.mxu1 }
 0xbd9   : > { %v4906_v35 = vpop.f32.mrf.mxu1 }
 0xbda   : > { %v16086_v56 = vadd.f32 %v4906_v35, %v15970_v13 }
 0xbdb   : > { %v4908_v12 = vpop.f32.mrf.mxu1 }
 0xbdd   : > { %v4909_v31 = vpop.f32.mrf.mxu1 }
 0xbde   : > { %v16089_v15 = vadd.f32 %v4909_v31, %v15973_v9 }
 0xbdf   : > { %v4911_v32 = vpop.f32.mrf.mxu1 }
 0xbe1   : > { %v4914_v60 = vpop.f32.mrf.mxu1 }
 0xbe2   : > { %v16096_v5 = vadd.f32 %v4914_v60, %v15980_v61 }
 0xbe3   : > { %v4916_v51 = vpop.f32.mrf.mxu1 }
 0xbe5   : > { %v4917_v25 = vpop.f32.mrf.mxu1 }
 0xbe7   : > { %v4918_v13 = vpop.f32.mrf.mxu1 }
 0xbe9   : > { %v16098_v48 = vpop.f32.mrf.mxu1 }
 0xbeb   : > { %v13059_v6 = vpop.f32.mrf.mxu1 }
 0xbed   : > { %v16100_v10 = vpop.f32.mrf.mxu1 }
 0xbee   : > { %v5100_v9 = vpack.c.bf16 %v16100_v10, %v16098_v48 }
 0xbef   : > { %v13060_v55 = vpop.f32.mrf.mxu1 }
 0xbf1   : > { %v5000_v63 = vpop.f32.mrf.mxu1 }
 0xbf3   : > { %v13063_v34 = vpop.f32.mrf.mxu1 }
 0xbf5   : > { %v5003_v46 = vpop.f32.mrf.mxu1 }
 0xbf6   : > { %v5101_v3 = vpack.c.bf16 %v5003_v46, %v5000_v63 }
 0xbf7   : > { %v13064_v11 = vpop.f32.mrf.mxu1 }
 0xbf9   : > { %v5008_v27 = vpop.f32.mrf.mxu1 }
 0xbfb   : > { %v13067_v61 = vpop.f32.mrf.mxu1 }
 0xbfd   : > { %v5011_v23 = vpop.f32.mrf.mxu1 }
 0xbfe   : > { %v5102_v11 = vpack.c.bf16 %v5011_v23, %v5008_v27 }
 0xbff   : > { %v13068_v54 = vpop.f32.mrf.mxu1 }
 0xc01   : > { %v5016_v22 = vpop.f32.mrf.mxu1 }
 0xc03   : > { %v13071_v4 = vpop.f32.mrf.mxu1 }
 0xc05   : > { %v5019_v33 = vpop.f32.mrf.mxu1 }
 0xc06   : > { %v5103_v63 = vpack.c.bf16 %v5019_v33, %v5016_v22 }
 0xc07   : > { %v13072_v37 = vpop.f32.mrf.mxu1 }
 0xc09   : > { %v5024_v36 = vpop.f32.mrf.mxu1 }
 0xc0b   : > { %v13075_v49 = vpop.f32.mrf.mxu1 }
 0xc0d   : > { %v5027_v43 = vpop.f32.mrf.mxu1 }
 0xc0e   : > { %v5104_v13 = vpack.c.bf16 %v5027_v43, %v5024_v36 }
 0xc0f   : > { %v13076_v21 = vpop.f32.mrf.mxu1 }
 0xc11   : > { %v5032_v29 = vpop.f32.mrf.mxu1 }
 0xc13   : > { %v13079_v42 = vpop.f32.mrf.mxu1 }
 0xc14   : > { %v14027_v42 = vld [vmem:[%s18177_s6 + $0x118] ss:$8 sps:$4 sm:$0xff]  }
 0xc15   : > { %v5035_v62 = vpop.f32.mrf.mxu1 }
 0xc16   : > { %v5105_v60 = vpack.c.bf16 %v5035_v62, %v5032_v29  ;;  %v14030_v62 = vld [vmem:[%s18177_s6 + $0x12c] ss:$8 sps:$4 sm:$0xff]  }
 0xc17   : > { %v13080_v39 = vpop.f32.mrf.mxu1 }
 0xc18   : > { %v14033_v39 = vld [vmem:[%s14369_s9 + $0x118] sm:$0xff]  }
 0xc19   : > { %v5040_v50 = vpop.f32.mrf.mxu1 }
 0xc1b   : > { %v13083_v24 = vpop.f32.mrf.mxu1 }
 0xc1c   : > { %v10678_v24 = vld [vmem:[%s18177_s6 + $0x138] sm:$0x33] }
 0xc1d   : > { %v5043_v14 = vpop.f32.mrf.mxu1 }
 0xc1e   : > { %v5106_v31 = vpack.c.bf16 %v5043_v14, %v5040_v50  ;;  %v14034_v50 = vld [vmem:[%s14369_s9 + $0x110] sm:$0xff]  }
 0xc1f   : > { %v13084_v41 = vpop.f32.mrf.mxu1  ;;  %v14032_v14 = vld [vmem:[%s18177_s6 + $0x128] ss:$8 sps:$4 sm:$0xff]  }
 0xc20   : > { %v10684_v41 = vcombine.high %v10678_v24, %v10678_v24 }
 0xc21   : > { %v5048_v57 = vpop.f32.mrf.mxu1 }
 0xc23   : > { %v13087_v58 = vpop.f32.mrf.mxu1 }
 0xc24   : > { %v14038_v58 = vld [vmem:[%s14369_s9 + $0x100] sm:$0xff]  }
 0xc25   : > { %v5051_v52 = vpop.f32.mrf.mxu1 }
 0xc26   : > { %v5107_v47 = vpack.c.bf16 %v5051_v52, %v5048_v57  ;;  %v14037_v57 = vld [vmem:[%s14369_s9 + $0x108] sm:$0xff]   ;;  %v10683_v52 = vcombine.low %v10678_v24, %v10678_v24 }
 0xc27   : > { %v13088_v35 = vpop.f32.mrf.mxu1 }
 0xc28   : > { %5150 = vmatpush1.bf16.msra.mxu0 %v5107_v47  ;;  %v14039_v47 = vld [vmem:[%s14354_s23 + $0x38] sm:$0xff]   ;;  %v14040_v35 = vld [vmem:[%s14354_s23 + $0x30] sm:$0xff]  }
 0xc29   : > { %v5056_v12 = vpop.f32.mrf.mxu1  ;;  %5151 = vmatprep.subr.bf16.mxu0 %v18182_v17 }
 0xc2b   : > { %v13091_v20 = vpop.f32.mrf.mxu1 }
 0xc2c   : > { %5152 = vmatpush1.bf16.msra.mxu0 %v5106_v31  ;;  %v14043_v31 = vld [vmem:[%s14354_s23 + $0x18] sm:$0xff]   ;;  %v14045_v20 = vld [vmem:[%s14354_s23 + $0x8] sm:$0xff]  }
 0xc2d   : > { %v5059_v32 = vpop.f32.mrf.mxu1  ;;  %5153 = vmatprep.subr.bf16.mxu0 %v18182_v17 }
 0xc2f   : > { %v13092_v51 = vpop.f32.mrf.mxu1 }
 0xc30   : > { %5154 = vmatpush1.bf16.msra.mxu0 %v5105_v60  ;;  %v14053_v51 = vld [vmem:[%s14336_s20 + $0x160] sm:$0xff]  }
 0xc31   : > { %v5064_v25 = vpop.f32.mrf.mxu1  ;;  %5155 = vmatprep.subr.bf16.mxu0 %v18182_v17 }
 0xc33   : > { %v13095_v6 = vpop.f32.mrf.mxu1 }
 0xc34   : > { %5156 = vmatpush1.bf16.msra.mxu0 %v5104_v13  ;;  %v14055_v13 = vld [vmem:[%s14336_s20 + $0x158] sm:$0xff]   ;;  %v5630_v6 = vld [vmem:[#allocation2 + $0x128] sm:$0xff] }
 0xc35   : > { %v5067_v55 = vpop.f32.mrf.mxu1  ;;  %5157 = vmatprep.subr.bf16.mxu0 %v18182_v17 }
 0xc36   : > { %v5109_v10 = vpack.c.bf16 %v5067_v55, %v5064_v25  ;;  %v14054_v25 = vld [vmem:[%s14336_s20 + $0x120] sm:$0xff]   ;;  %v5631_v55 = vld [vmem:[#allocation2 + $0x130] sm:$0xff] }
 0xc37   : > { %v13096_v34 = vpop.f32.mrf.mxu1 }
 0xc38   : > { %5158 = vmatpush1.bf16.msra.mxu0 %v5103_v63  ;;  %v14056_v63 = vld [vmem:[%s14336_s20 + $0x118] sm:$0xff]   ;;  %v16232_v34 = vpack.c.bf16 %v5631_v55, %v5630_v6  ;;  %v6565_v55 = vld [vmem:[#allocation2 + $0x101] sm:$0xff] }
 0xc39   : > { %v5072_v46 = vpop.f32.mrf.mxu1  ;;  %5159 = vmatprep.subr.bf16.mxu0 %v18182_v17 }
 0xc3b   : > { %v13099_v61 = vpop.f32.mrf.mxu1 }
 0xc3c   : > { %5160 = vmatpush1.bf16.msra.mxu0 %v5102_v11  ;;  %v14058_v11 = vld [vmem:[%s14336_s20 + $0x110] sm:$0xff]   ;;  %v14059_v61 = vld [vmem:[%s14336_s20 + $0x148] sm:$0xff]  }
 0xc3d   : > { %v5075_v54 = vpop.f32.mrf.mxu1  ;;  %5161 = vmatprep.subr.bf16.mxu0 %v18182_v17 }
 0xc3e   : > { %v5110_v48 = vpack.c.bf16 %v5075_v54, %v5072_v46  ;;  %v14057_v46 = vld [vmem:[%s14336_s20 + $0x150] sm:$0xff]   ;;  %v5632_v54 = vld [vmem:[#allocation2 + $0x138] sm:$0xff] }
 0xc3f   : > { %v13100_v4 = vpop.f32.mrf.mxu1 }
 0xc40   : > { %5162 = vmatpush1.bf16.msra.mxu0 %v5101_v3  ;;  %v5633_v4 = vld [vmem:[#allocation2 + $0x140] sm:$0xff] }
 0xc41   : > { %v5080_v37 = vpop.f32.mrf.mxu1  ;;  %5163 = vmatprep.subr.bf16.mxu0 %v18182_v17 }
 0xc43   : > { %v13103_v36 = vpop.f32.mrf.mxu1 }
 0xc44   : > { %5164 = vmatpush1.bf16.msra.mxu0 %v5100_v9  ;;  %v5108_v9 = vpack.c.bf16 %v5059_v32, %v5056_v12  ;;  %v14041_v12 = vld [vmem:[%s14354_s23 + $0x28] sm:$0xff]   ;;  %v16241_v36 = vpack.c.bf16 %v5633_v4, %v5632_v54 }
 0xc45   : > { %v5083_v22 = vpop.f32.mrf.mxu1  ;;  %5171 = vmatprep.subr.bf16.mxu0 %v18182_v17  ;;  %v14052_v32 = vld [vmem:[%s14336_s20 + $0x128] sm:$0xff]  }
 0xc46   : > { %v5111_v29 = vpack.c.bf16 %v5083_v22, %v5080_v37  ;;  %v14060_v37 = vld [vmem:[%s14336_s20 + $0x108] sm:$0xff]   ;;  %v14061_v22 = vld [vmem:[%s14336_s20 + $0x140] sm:$0xff]  }
 0xc47   : > { %v13104_v33 = vpop.f32.mrf.mxu1 }
 0xc48   : > { %v14062_v33 = vld [vmem:[%s14336_s20 + $0x100] sm:$0xff]  }
 0xc49   : > { %v5088_v27 = vpop.f32.mrf.mxu1 }
 0xc4a   : > { %v5112_v23 = vpack.c.bf16 %v5088_v27, %v5088_v27  ;;  %v5634_v27 = vld [vmem:[#allocation2 + $0x148] sm:$0xff] }
 0xc4b   : > { %v13107_v49 = vpop.f32.mrf.mxu1 }
 0xc4c   : > { %v5147_v43 = vand.u32 %v5112_v23, %v15353_v1  ;;  %v5635_v23 = vld [vmem:[#allocation2 + $0x150] sm:$0xff] }
 0xc4d   : > { %v5091_v21 = vpop.f32.mrf.mxu1  ;;  %v16248_v49 = vpack.c.bf16 %v5635_v23, %v5634_v27  ;;  %v6566_v27 = vld [vmem:[#allocation2 + $0x109] sm:$0xff]  ;;  %v6567_v23 = vld [vmem:[#allocation2 + $0x111] sm:$0xff] }
 0xc4e   : > { %5172 = vmatpush2.bf16.msra.mxu0 %v5147_v43  ;;  %v5636_v43 = vld [vmem:[#allocation2 + $0x158] sm:$0xff]  ;;  %v5637_v21 = vld [vmem:[#allocation2 + $0x160] sm:$0xff] }
 0xc4f   : > { %v13108_v3 = vpop.f32.mrf.mxu1  ;;  %5173 = vmatprep.subr.bf16.mxu0 %v18182_v17 }
 0xc50   : > { %v16254_v3 = vpack.c.bf16 %v5637_v21, %v5636_v43 }
 0xc52   : > { %5174 = vmatpush2.bf16.msra.mxu0 %v5111_v29  ;;  %v5638_v29 = vld [vmem:[#allocation2 + $0x168] sm:$0xff] }
 0xc53   : > { %5175 = vmatprep.subr.bf16.mxu0 %v18182_v17 }
 0xc56   : > { %5176 = vmatpush2.bf16.msra.mxu0 %v5110_v48  ;;  %v5639_v48 = vld [vmem:[#allocation2 + $0x170] sm:$0xff] }
 0xc57   : > { %5177 = vmatprep.subr.bf16.mxu0 %v18182_v17 }
 0xc5a   : > { %5178 = vmatpush2.bf16.msra.mxu0 %v5109_v10  ;;  %v16259_v10 = vpack.c.bf16 %v5639_v48, %v5638_v29  ;;  %v16322_v48 = vpack.c.bf16 %v6567_v23, %v6566_v27 }
 0xc5b   : > { %5179 = vmatprep.subr.bf16.mxu0 %v18182_v17 }
 0xc5e   : > { %5180 = vmatpush2.bf16.msra.mxu0 %v5108_v9  ;;  %v5640_v9 = vld [vmem:[#allocation2 + $0x178] sm:$0xff] }
 0xc5f   : > { %13109 = vmatprep.subr.bf16.mxu0 %v18211_v53 }
 0xc61   : > { %5182 = vmatmul.mubr.bf16.vlgmr.msra.gmra.mxu0 %v14027_v42  ;;  %v5641_v42 = vld [vmem:[#allocation2 + $0x180] sm:$0xff] }
 0xc62   : > { %10686 = vmatprep.mubr.msk.bf16.mxu0 %vm3335_vm2, %v14030_v62  ;;  %13110 = vmatpush3.bf16.msra.mxu0 %v14033_v39  ;;  %v16264_v62 = vpack.c.bf16 %v5641_v42, %v5640_v9  ;;  %v5642_v39 = vld [vmem:[#allocation2 + $0x188] sm:$0xff] }
 0xc63   : > { %13111 = vmatprep.subr.bf16.mxu0 %v18211_v53 }
 0xc66   : > { %13112 = vmatpush3.bf16.msra.mxu0 %v14034_v50  ;;  %v5643_v50 = vld [vmem:[#allocation2 + $0x190] sm:$0xff] }
 0xc67   : > { %13113 = vmatprep.subr.bf16.mxu0 %v18211_v53  ;;  %v16269_v24 = vpack.c.bf16 %v5643_v50, %v5642_v39  ;;  %v6568_v50 = vld [vmem:[#allocation2 + $0x119] sm:$0xff] }
 0xc69   : > { %5190 = vmatmul.mubr.bf16.gmra.mxu0 %v14032_v14 }
 0xc6a   : > { %10687 = vmatprep.mubr.msk.bf16.mxu0 %vm3335_vm2, %v10684_v41  ;;  %13114 = vmatpush3.bf16.msra.mxu0 %v14037_v57 }
 0xc6b   : > { %13115 = vmatprep.subr.bf16.mxu0 %v18211_v53 }
 0xc6e   : > { %13116 = vmatpush3.bf16.msra.mxu0 %v14038_v58  ;;  %v5644_v58 = vld [vmem:[#allocation2 + $0x198] sm:$0xff] }
 0xc6f   : > { %13187 = vmatprep.subr.bf16.mxu0 %v18211_v53 }
 0xc71   : > { %5198 = vmatmul.mubr.bf16.gmra.mxu0 %v10683_v52  ;;  %v5645_v52 = vld [vmem:[#allocation2 + $0x1a0] sm:$0xff] }
 0xc72   : > { %13117 = vmatprep.mubr.msk.bf16.mxu0 %vm14245_vm0, %v18211_v53 }
 0xc79   : > { %13118 = vmatmul.mubr.msk.bf16.vlgmr.msra.gmra.mxu0 %vm2929_vm1, %v15063_v2  ;;  %v14042_v2 = vld [vmem:[%s14354_s23 + $0x20] sm:$0xff]  }
 0xc7a   : > { %13121 = vmatprep.mubr.msk.bf16.mxu0 %vm14245_vm0, %v18211_v53  ;;  %13188 = vmatpush3.bf16.msra.mxu0 %v14039_v47 }
 0xc7b   : > { %13189 = vmatprep.subr.bf16.mxu0 %v18211_v53 }
 0xc7e   : > { %13190 = vmatpush3.bf16.msra.mxu0 %v14040_v35 }
 0xc7f   : > { %13191 = vmatprep.subr.bf16.mxu0 %v18211_v53 }
 0xc81   : > { %13122 = vmatmul.mubr.msk.bf16.gmra.mxu0 %vm2929_vm1, %v15077_v44  ;;  %v14044_v44 = vld [vmem:[%s14354_s23 + $0x10] sm:$0xff]  }
 0xc82   : > { %13125 = vmatprep.mubr.msk.bf16.mxu0 %vm14245_vm0, %v18211_v53  ;;  %13192 = vmatpush3.bf16.msra.mxu0 %v14041_v12 }
 0xc83   : > { %13193 = vmatprep.subr.bf16.mxu0 %v18211_v53 }
 0xc86   : > { %13194 = vmatpush3.bf16.msra.mxu0 %v14042_v2  ;;  %v16280_v2 = vpack.c.bf16 %v5645_v52, %v5644_v58 }
 0xc87   : > { %13195 = vmatprep.subr.bf16.mxu0 %v18211_v53 }
 0xc89   : > { %13126 = vmatmul.mubr.msk.bf16.gmra.mxu0 %vm2929_vm1, %v15091_v40  ;;  %v14046_v40 = vld [vmem:[%s14354_s23] sm:$0xff]  }
 0xc8a   : > { %13129 = vmatprep.mubr.msk.bf16.mxu0 %vm14245_vm0, %v18211_v53  ;;  %13196 = vmatpush3.bf16.msra.mxu0 %v14043_v31 }
 0xc8b   : > { %13197 = vmatprep.subr.bf16.mxu0 %v18211_v53 }
 0xc8e   : > { %13198 = vmatpush3.bf16.msra.mxu0 %v14044_v44 }
 0xc8f   : > { %13199 = vmatprep.subr.bf16.mxu0 %v18211_v53 }
 0xc91   : > { %13130 = vmatmul.mubr.msk.bf16.gmra.mxu0 %vm2929_vm1, %v15105_v19  ;;  %v14047_v19 = vld [vmem:[%s14336_s20 + $0x178] sm:$0xff]  }
 0xc92   : > { %13133 = vmatprep.mubr.msk.bf16.mxu0 %vm14245_vm0, %v18211_v53  ;;  %13200 = vmatpush3.bf16.msra.mxu0 %v14045_v20  ;;  %v5646_v20 = vld [vmem:[#allocation2 + $0x1a8] sm:$0xff] }
 0xc93   : > { %13201 = vmatprep.subr.bf16.mxu0 %v18211_v53 }
 0xc96   : > { %13202 = vmatpush3.bf16.msra.mxu0 %v14046_v40  ;;  %v5647_v40 = vld [vmem:[#allocation2 + $0x1b0] sm:$0xff] }
 0xc97   : > { %12082 = vmatprep.subr.bf16.mxu0 %v14047_v19 }
 0xc99   : > { %13134 = vmatmul.mubr.msk.bf16.gmra.mxu0 %vm2929_vm1, %v15119_v0  ;;  %v5626_v0 = vld [vmem:[#allocation2 + $0x108] sm:$0xff] }
 0xc9a   : > { %13137 = vmatprep.mubr.msk.bf16.mxu0 %vm14245_vm0, %v18211_v53 }
 0xca1   : > { %13138 = vmatmul.mubr.msk.bf16.gmra.mxu0 %vm2929_vm1, %v15133_v59  ;;  %v5627_v59 = vld [vmem:[#allocation2 + $0x110] sm:$0xff] }
 0xca2   : > { %13141 = vmatprep.mubr.msk.bf16.mxu0 %vm14245_vm0, %v18211_v53 }
 0xca9   : > { %13142 = vmatmul.mubr.msk.bf16.gmra.mxu0 %vm2929_vm1, %v15147_v7  ;;  %v14048_v7 = vld [vmem:[%s14336_s20 + $0x138] sm:$0xff]  }
 0xcaa   : > { %13145 = vmatprep.mubr.msk.bf16.mxu0 %vm14245_vm0, %v18211_v53 }
 0xcb1   : > { %13146 = vmatmul.mubr.msk.bf16.gmra.mxu0 %vm2929_vm1, %v15161_v38  ;;  %v16214_v38 = vpack.c.bf16 %v5627_v59, %v5626_v0  ;;  %v16291_v59 = vpack.c.bf16 %v5647_v40, %v5646_v20 }
 0xcb2   : > { %13149 = vmatprep.mubr.msk.bf16.mxu0 %vm14245_vm0, %v18211_v53 }
 0xcb9   : > { %13150 = vmatmul.mubr.msk.bf16.gmra.mxu0 %vm2929_vm1, %v15175_v45  ;;  %v14049_v45 = vld [vmem:[%s14336_s20 + $0x170] sm:$0xff]  }
 0xcba   : > { %13153 = vmatprep.mubr.msk.bf16.mxu0 %vm14245_vm0, %v18211_v53 }
 0xcc1   : > { %13154 = vmatmul.mubr.msk.bf16.gmra.mxu0 %vm2929_vm1, %v15189_v28  ;;  %v14050_v28 = vld [vmem:[%s14336_s20 + $0x130] sm:$0xff]  }
 0xcc2   : > { %13157 = vmatprep.mubr.msk.bf16.mxu0 %vm14245_vm0, %v18211_v53 }
 0xcc9   : > { %13158 = vmatmul.mubr.msk.bf16.gmra.mxu0 %vm2929_vm1, %v15203_v30  ;;  %v14051_v30 = vld [vmem:[%s14336_s20 + $0x168] sm:$0xff]  }
 0xcca   : > { %13161 = vmatprep.mubr.msk.bf16.mxu0 %vm14245_vm0, %v18211_v53 }
 0xcd1   : > { %13162 = vmatmul.mubr.msk.bf16.gmra.mxu0 %vm2929_vm1, %v15217_v16  ;;  %v5628_v16 = vld [vmem:[#allocation2 + $0x118] sm:$0xff] }
 0xcd2   : > { %13165 = vmatprep.mubr.msk.bf16.mxu0 %vm14245_vm0, %v18211_v53 }
 0xcd9   : > { %13166 = vmatmul.mubr.msk.bf16.gmra.mxu0 %vm2929_vm1, %v15228_v18  ;;  %v5629_v18 = vld [vmem:[#allocation2 + $0x120] sm:$0xff] }
 0xcda   : > { %13203 = vmatprep.mubr.msk.bf16.mxu0 %vm14245_vm0, %v18211_v53  ;;  %v16223_v60 = vpack.c.bf16 %v5629_v18, %v5628_v16 }
 0xce1   : > { %13204 = vmatmul.mubr.bf16.vlgmr.msra.gmra.mxu0 %v16214_v38 }
 0xce2   : > { %13207 = vmatprep.mubr.msk.bf16.mxu0 %vm14245_vm0, %v18211_v53  ;;  %12083 = vmatpush3.bf16.msra.mxu0 %v14048_v7  ;;  %v14065_v7 = vld [vmem:[%s18177_s6 + $0x144] ss:$8 sps:$4 sm:$0xff]  }
 0xce3   : > { %12084 = vmatprep.subr.bf16.mxu0 %v14049_v45  ;;  %10724 = vmatprep.mubr.msk.bf16.mxu1 %vm3335_vm2, %v14065_v7 }
 0xce6   : > { %12085 = vmatpush3.bf16.msra.mxu0 %v14050_v28  ;;  %v5648_v28 = vld [vmem:[#allocation2 + $0x1b8] sm:$0xff] }
 0xce7   : > { %12086 = vmatprep.subr.bf16.mxu0 %v14051_v30  ;;  %v5649_v30 = vld [vmem:[#allocation2 + $0x1c0] sm:$0xff] }
 0xce9   : > { %13208 = vmatmul.mubr.bf16.gmra.mxu0 %v16223_v60 }
 0xcea   : > { %13211 = vmatprep.mubr.msk.bf16.mxu0 %vm14245_vm0, %v18211_v53  ;;  %12087 = vmatpush3.bf16.msra.mxu0 %v14052_v32  ;;  %v5662_v32 = vpack.c.bf16 %v5649_v30, %v5648_v28 }
 0xceb   : > { %12088 = vmatprep.subr.bf16.mxu0 %v14053_v51 }
 0xcee   : > { %12089 = vmatpush3.bf16.msra.mxu0 %v14054_v25 }
 0xcef   : > { %12090 = vmatprep.subr.bf16.mxu0 %v14055_v13  ;;  %v5650_v13 = vld [vmem:[#allocation2 + $0x1c8] sm:$0x7] }
 0xcf1   : > { %13212 = vmatmul.mubr.bf16.gmra.mxu0 %v16232_v34 }
 0xcf2   : > { %13215 = vmatprep.mubr.msk.bf16.mxu0 %vm14245_vm0, %v18211_v53  ;;  %12091 = vmatpush3.bf16.msra.mxu0 %v14056_v63 }
 0xcf3   : > { %12092 = vmatprep.subr.bf16.mxu0 %v14057_v46 }
 0xcf6   : > { %12093 = vmatpush3.bf16.msra.mxu0 %v14058_v11  ;;  %v5663_v11 = vpack.c.bf16 %v5650_v13, %v5650_v13  ;;  %v6575_v13 = vld [vmem:[#allocation2 + $0x151] sm:$0xff] }
 0xcf7   : > { %12094 = vmatprep.subr.bf16.mxu0 %v14059_v61 }
 0xcf9   : > { %13216 = vmatmul.mubr.bf16.gmra.mxu0 %v16241_v36 }
 0xcfa   : > { %13219 = vmatprep.mubr.msk.bf16.mxu0 %vm14245_vm0, %v18211_v53  ;;  %12095 = vmatpush3.bf16.msra.mxu0 %v14060_v37  ;;  %v6539_v37 = vld [vmem:[#allocation2 + $0xf8] sm:$0xff] }
 0xcfb   : > { %12096 = vmatprep.subr.bf16.mxu0 %v14061_v22  ;;  %v6540_v22 = vld [vmem:[#allocation2 + $0x100] sm:$0xff] }
 0xcfc   : > { %v16320_v29 = vpack.c.bf16 %v6540_v22, %v6539_v37  ;;  %v6576_v37 = vld [vmem:[#allocation2 + $0x159] sm:$0xff]  ;;  %v6577_v22 = vld [vmem:[#allocation2 + $0x161] sm:$0xff] }
 0xcfd   : > { %v16350_v23 = vpack.c.bf16 %v6577_v22, %v6576_v37 }
 0xcfe   : > { %12097 = vmatpush3.bf16.msra.mxu0 %v14062_v33 }
 0xcff   : > { %13255 = vmatprep.subr.bf16.mxu0 %v18211_v53 }
 0xd01   : > { %13220 = vmatmul.mubr.bf16.gmra.mxu0 %v16248_v49 }
 0xd02   : > { %13223 = vmatprep.mubr.msk.bf16.mxu0 %vm14245_vm0, %v18211_v53 }
 0xd09   : > { %13224 = vmatmul.mubr.bf16.gmra.mxu0 %v16254_v3 }
 0xd0a   : > { %13227 = vmatprep.mubr.msk.bf16.mxu0 %vm14245_vm0, %v18211_v53 }
 0xd11   : > { %13228 = vmatmul.mubr.bf16.gmra.mxu0 %v16259_v10 }
 0xd12   : > { %13231 = vmatprep.mubr.msk.bf16.mxu0 %vm14245_vm0, %v18211_v53 }
 0xd19   : > { %13232 = vmatmul.mubr.bf16.gmra.mxu0 %v16264_v62 }
 0xd1a   : > { %13235 = vmatprep.mubr.msk.bf16.mxu0 %vm14245_vm0, %v18211_v53 }
 0xd21   : > { %v5183_v14 = vpop.f32.mrf.mxu0  ;;  %13236 = vmatmul.mubr.bf16.gmra.mxu0 %v16269_v24 }
 0xd22   : > { %v16273_v41 = vadd.f32 %v5183_v14, %v16080_v8  ;;  %13239 = vmatprep.mubr.msk.bf16.mxu0 %vm14245_vm0, %v18211_v53  ;;  %v6569_v14 = vld [vmem:[#allocation2 + $0x121] sm:$0xff] }
 0xd23   : > { %v5185_v57 = vpop.f32.mrf.mxu0  ;;  %v16330_v58 = vpack.c.bf16 %v6569_v14, %v6568_v50  ;;  %v6578_v14 = vld [vmem:[#allocation2 + $0x169] sm:$0xff] }
 0xd25   : > { %v5186_v47 = vpop.f32.mrf.mxu0 }
 0xd26   : > { %v16278_v35 = vadd.f32 %v5186_v47, %v16083_v26 }
 0xd27   : > { %v5188_v12 = vpop.f32.mrf.mxu0 }
 0xd29   : > { %v5191_v31 = vpop.f32.mrf.mxu0  ;;  %13240 = vmatmul.mubr.bf16.gmra.mxu0 %v16280_v2 }
 0xd2a   : > { %v16284_v44 = vadd.f32 %v5191_v31, %v16086_v56  ;;  %13243 = vmatprep.mubr.msk.bf16.mxu0 %vm14245_vm0, %v18211_v53  ;;  %v6570_v31 = vld [vmem:[#allocation2 + $0x129] sm:$0xff] }
 0xd2b   : > { %v5193_v8 = vpop.f32.mrf.mxu0 }
 0xd2c   : > { %v6571_v8 = vld [vmem:[#allocation2 + $0x131] sm:$0xff] }
 0xd2d   : > { %v5194_v19 = vpop.f32.mrf.mxu0  ;;  %v16338_v40 = vpack.c.bf16 %v6571_v8, %v6570_v31 }
 0xd2e   : > { %v16289_v0 = vadd.f32 %v5194_v19, %v16089_v15 }
 0xd2f   : > { %v5196_v26 = vpop.f32.mrf.mxu0 }
 0xd31   : > { %v5199_v45 = vpop.f32.mrf.mxu0  ;;  %13244 = vmatmul.mubr.bf16.gmra.mxu0 %v16291_v59 }
 0xd32   : > { %v16299_v56 = vadd.f32 %v5199_v45, %v16096_v5  ;;  %13247 = vmatprep.mubr.msk.bf16.mxu0 %vm14245_vm0, %v18211_v53  ;;  %v6564_v5 = vld [vmem:[#allocation2 + $0xf9] sm:$0xff] }
 0xd33   : > { %v5201_v15 = vpop.f32.mrf.mxu0  ;;  %v16311_v61 = vpack.c.bf16 %v6565_v55, %v6564_v5  ;;  %v6572_v45 = vld [vmem:[#allocation2 + $0x139] sm:$0xff] }
 0xd34   : > { %v6573_v15 = vld [vmem:[#allocation2 + $0x141] sm:$0xff] }
 0xd35   : > { %v5202_v16 = vpop.f32.mrf.mxu0  ;;  %v16342_v30 = vpack.c.bf16 %v6573_v15, %v6572_v45 }
 0xd37   : > { %v5203_v18 = vpop.f32.mrf.mxu0 }
 0xd39   : > { %v16303_v51 = vpop.f32.mrf.mxu0  ;;  %13248 = vmatmul.mubr.bf16.gmra.mxu0 %v5662_v32 }
 0xd3a   : > { %13251 = vmatprep.mubr.msk.bf16.mxu0 %vm14245_vm0, %v18211_v53 }
 0xd3b   : > { %v13119_v25 = vpop.f32.mrf.mxu0 }
 0xd3c   : > { %v6574_v25 = vld [vmem:[#allocation2 + $0x149] sm:$0xff] }
 0xd3d   : > { %v16307_v6 = vpop.f32.mrf.mxu0  ;;  %v16346_v55 = vpack.c.bf16 %v6575_v13, %v6574_v25 }
 0xd3e   : > { %v5385_v63 = vpack.c.bf16 %v16307_v6, %v16303_v51 }
 0xd3f   : > { %v13120_v46 = vpop.f32.mrf.mxu0 }
 0xd41   : > { %v16313_v54 = vpop.f32.mrf.mxu0  ;;  %13252 = vmatmul.mubr.bf16.gmra.mxu0 %v5663_v11 }
 0xd42   : > { %6775 = vmatprep.mubr.bf16.mxu0 %v16311_v61 }
 0xd43   : > { %v13123_v4 = vpop.f32.mrf.mxu0 }
 0xd45   : > { %v16316_v33 = vpop.f32.mrf.mxu0 }
 0xd46   : > { %v5386_v43 = vpack.c.bf16 %v16316_v33, %v16313_v54 }
 0xd47   : > { %v13124_v21 = vpop.f32.mrf.mxu0 }
 0xd49   : > { %v16324_v9 = vpop.f32.mrf.mxu0  ;;  %6776 = vmatmul.mubr.bf16.vlgmr.msra.gmra.mxu0 %v16320_v29 }
 0xd4a   : > { %6783 = vmatprep.mubr.bf16.mxu0 %v16322_v48 }
 0xd4b   : > { %v13127_v42 = vpop.f32.mrf.mxu0 }
 0xd4d   : > { %v16328_v39 = vpop.f32.mrf.mxu0 }
 0xd4f   : > { %v13128_v57 = vpop.f32.mrf.mxu0 }
 0xd50   : > { %v6579_v57 = vld [vmem:[#allocation2 + $0x171] sm:$0xff] }
 0xd51   : > { %v16332_v52 = vpop.f32.mrf.mxu0  ;;  %6784 = vmatmul.mubr.bf16.gmra.mxu0 %v16214_v38  ;;  %v16354_v8 = vpack.c.bf16 %v6579_v57, %v6578_v14 }
 0xd52   : > { %6791 = vmatprep.mubr.bf16.mxu0 %v16330_v58 }
 0xd53   : > { %v13131_v47 = vpop.f32.mrf.mxu0 }
 0xd55   : > { %v16336_v12 = vpop.f32.mrf.mxu0 }
 0xd57   : > { %v13132_v20 = vpop.f32.mrf.mxu0 }
 0xd59   : > { %v5309_v19 = vpop.f32.mrf.mxu0  ;;  %6792 = vmatmul.mubr.bf16.gmra.mxu0 %v16223_v60 }
 0xd5a   : > { %6799 = vmatprep.mubr.bf16.mxu0 %v16338_v40 }
 0xd5b   : > { %v13135_v26 = vpop.f32.mrf.mxu0 }
 0xd5d   : > { %v5312_v7 = vpop.f32.mrf.mxu0 }
 0xd5f   : > { %v13136_v28 = vpop.f32.mrf.mxu0 }
 0xd60   : > { %v6580_v28 = vld [vmem:[#allocation2 + $0x179] sm:$0xff] }
 0xd61   : > { %v5317_v16 = vpop.f32.mrf.mxu0  ;;  %6800 = vmatmul.mubr.bf16.gmra.mxu0 %v16232_v34 }
 0xd62   : > { %6807 = vmatprep.mubr.bf16.mxu0 %v16342_v30 }
 0xd63   : > { %v13139_v18 = vpop.f32.mrf.mxu0 }
 0xd64   : > { %v6581_v18 = vld [vmem:[#allocation2 + $0x181] sm:$0xff] }
 0xd65   : > { %v5320_v32 = vpop.f32.mrf.mxu0 }
 0xd66   : > { %v5390_v25 = vpack.c.bf16 %v5320_v32, %v5317_v16  ;;  %v6582_v16 = vld [vmem:[#allocation2 + $0x189] sm:$0xff]  ;;  %v6583_v32 = vld [vmem:[#allocation2 + $0x191] sm:$0xff] }
 0xd67   : > { %v13140_v5 = vpop.f32.mrf.mxu0 }
 0xd68   : > { %v16364_v5 = vpack.c.bf16 %v6581_v18, %v6580_v28 }
 0xd69   : > { %v5325_v46 = vpop.f32.mrf.mxu0  ;;  %6808 = vmatmul.mubr.bf16.gmra.mxu0 %v16241_v36 }
 0xd6a   : > { %6815 = vmatprep.mubr.bf16.mxu0 %v16346_v55 }
 0xd6b   : > { %v13143_v11 = vpop.f32.mrf.mxu0 }
 0xd6c   : > { %v14234_v11 = vld [vmem:[%s14462_s14 + $0x1] ss:$0 sm:$0xff] }
 0xd6d   : > { %v5328_v4 = vpop.f32.mrf.mxu0  ;;  %5495 = vrot.lane.b32.xlu0 %v14234_v11, %s14248_s19  ;;  %v6588_v11 = vld [vmem:[#allocation2 + $0x1b9] sm:$0x7] }
 0xd6e   : > { %v5391_v26 = vpack.c.bf16 %v5328_v4, %v5325_v46  ;;  %v5389_v46 = vpack.c.bf16 %v5312_v7, %v5309_v19  ;;  %v5387_v19 = vpack.c.bf16 %v16328_v39, %v16324_v9 }
 0xd6f   : > { %v13144_v27 = vpop.f32.mrf.mxu0 }
 0xd70   : > { %v5388_v27 = vpack.c.bf16 %v16336_v12, %v16332_v52  ;;  %v6584_v52 = vld [vmem:[#allocation2 + $0x199] sm:$0xff]  ;;  %v6585_v12 = vld [vmem:[#allocation2 + $0x1a1] sm:$0xff] }
 0xd71   : > { %v5333_v21 = vpop.f32.mrf.mxu0  ;;  %6816 = vmatmul.mubr.bf16.gmra.mxu0 %v16248_v49 }
 0xd72   : > { %6823 = vmatprep.mubr.bf16.mxu0 %v16350_v23 }
 0xd73   : > { %v13147_v42 = vpop.f32.mrf.mxu0 }
 0xd74   : > { %v16377_v42 = vpack.c.bf16 %v6583_v32, %v6582_v16  ;;  %v6563_v32 = vld [vmem:[#allocation2 + $0x1b8] sm:$0x7] }
 0xd75   : > { %v5336_v50 = vpop.f32.mrf.mxu0 }
 0xd76   : > { %v5392_v47 = vpack.c.bf16 %v5336_v50, %v5333_v21 }
 0xd77   : > { %v13148_v31 = vpop.f32.mrf.mxu0 }
 0xd78   : > { %5435 = vmatpush1.bf16.msra.mxu1 %v5392_v47  ;;  %v16388_v47 = vpack.c.bf16 %v6585_v12, %v6584_v52  ;;  %v14063_v12 = vld [vmem:[%s18177_s6 + $0x140] ss:$8 sps:$4 sm:$0xff]  }
 0xd79   : > { %v16356_v20 = vpop.f32.mrf.mxu0  ;;  %6824 = vmatmul.mubr.bf16.gmra.mxu0 %v16254_v3  ;;  %5436 = vmatprep.subr.bf16.mxu1 %v18182_v17 }
 0xd7a   : > { %6831 = vmatprep.mubr.bf16.mxu0 %v16354_v8 }
 0xd7b   : > { %v13151_v45 = vpop.f32.mrf.mxu0 }
 0xd7c   : > { %5437 = vmatpush1.bf16.msra.mxu1 %v5391_v26  ;;  %v6586_v26 = vld [vmem:[#allocation2 + $0x1a9] sm:$0xff]  ;;  %v6587_v45 = vld [vmem:[#allocation2 + $0x1b1] sm:$0xff] }
 0xd7d   : > { %v16361_v15 = vpop.f32.mrf.mxu0  ;;  %5438 = vmatprep.subr.bf16.mxu1 %v18182_v17  ;;  %v6612_v33 = vpack.c.bf16 %v6587_v45, %v6586_v26 }
 0xd7f   : > { %v13152_v13 = vpop.f32.mrf.mxu0 }
 0xd80   : > { %5439 = vmatpush1.bf16.msra.mxu1 %v5390_v25 }
 0xd81   : > { %v16367_v37 = vpop.f32.mrf.mxu0  ;;  %6832 = vmatmul.mubr.bf16.gmra.mxu0 %v16259_v10  ;;  %5440 = vmatprep.subr.bf16.mxu1 %v18182_v17 }
 0xd82   : > { %6839 = vmatprep.mubr.bf16.mxu0 %v16364_v5 }
 0xd83   : > { %v13155_v4 = vpop.f32.mrf.mxu0 }
 0xd84   : > { %5441 = vmatpush1.bf16.msra.mxu1 %v5389_v46 }
 0xd85   : > { %v16372_v22 = vpop.f32.mrf.mxu0  ;;  %5442 = vmatprep.subr.bf16.mxu1 %v18182_v17 }
 0xd87   : > { %v13156_v21 = vpop.f32.mrf.mxu0 }
 0xd88   : > { %5443 = vmatpush1.bf16.msra.mxu1 %v5388_v27 }
 0xd89   : > { %v5357_v50 = vpop.f32.mrf.mxu0  ;;  %6840 = vmatmul.mubr.bf16.gmra.mxu0 %v16264_v62  ;;  %5444 = vmatprep.subr.bf16.mxu1 %v18182_v17 }
 0xd8a   : > { %6847 = vmatprep.mubr.bf16.mxu0 %v16377_v42 }
 0xd8b   : > { %v13159_v7 = vpop.f32.mrf.mxu0 }
 0xd8c   : > { %5445 = vmatpush1.bf16.msra.mxu1 %v5387_v19  ;;  %v6613_v19 = vpack.c.bf16 %v6563_v32, %v6563_v32  ;;  %v5394_v7 = vpack.c.bf16 %v16372_v22, %v16367_v37  ;;  %v14066_v37 = vld [vmem:[%s18177_s6 + $0x154] ss:$8 sps:$4 sm:$0xff]  }
 0xd8d   : > { %v5360_v14 = vpop.f32.mrf.mxu0  ;;  %5446 = vmatprep.subr.bf16.mxu1 %v18182_v17 }
 0xd8e   : > { %v5395_v16 = vpack.c.bf16 %v5360_v14, %v5357_v50  ;;  %v5393_v50 = vpack.c.bf16 %v16361_v15, %v16356_v20  ;;  %v10717_v15 = vld [vmem:[%s18177_s6 + $0x160] sm:$0x33] }
 0xd8f   : > { %v13160_v57 = vpop.f32.mrf.mxu0 }
 0xd90   : > { %5447 = vmatpush1.bf16.msra.mxu1 %v5386_v43 }
 0xd91   : > { %v5365_v31 = vpop.f32.mrf.mxu0  ;;  %6848 = vmatmul.mubr.bf16.gmra.mxu0 %v16269_v24  ;;  %5448 = vmatprep.subr.bf16.mxu1 %v18182_v17 }
 0xd92   : > { %6855 = vmatprep.mubr.bf16.mxu0 %v16388_v47 }
 0xd93   : > { %v13163_v9 = vpop.f32.mrf.mxu0 }
 0xd94   : > { %5449 = vmatpush1.bf16.msra.mxu1 %v5385_v63  ;;  %v6614_v63 = vpack.c.bf16 %v6588_v11, %v6588_v11  ;;  %v14068_v9 = vld [vmem:[%s18177_s6 + $0x150] ss:$8 sps:$4 sm:$0xff]  }
 0xd95   : > { %v5368_v39 = vpop.f32.mrf.mxu0  ;;  %5456 = vmatprep.subr.bf16.mxu1 %v18182_v17 }
 0xd96   : > { %v5396_v6 = vpack.c.bf16 %v5368_v39, %v5365_v31  ;;  %v10723_v39 = vcombine.high %v10717_v15, %v10717_v15 }
 0xd97   : > { %v13164_v54 = vpop.f32.mrf.mxu0 }
 0xd99   : > { %v5373_v43 = vpop.f32.mrf.mxu0  ;;  %6856 = vmatmul.mubr.bf16.gmra.mxu0 %v16280_v2 }
 0xd9a   : > { %v5397_v28 = vpack.c.bf16 %v5373_v43, %v5373_v43  ;;  %6863 = vmatprep.mubr.bf16.mxu0 %v6612_v33  ;;  %v10722_v43 = vcombine.low %v10717_v15, %v10717_v15 }
 0xd9b   : > { %v13167_v18 = vpop.f32.mrf.mxu0 }
 0xd9c   : > { %v5432_v25 = vand.u32 %v5397_v28, %v15353_v1 }
 0xd9d   : > { %v5376_v13 = vpop.f32.mrf.mxu0 }
 0xd9e   : > { %5457 = vmatpush2.bf16.msra.mxu1 %v5432_v25 }
 0xd9f   : > { %v13168_v51 = vpop.f32.mrf.mxu0  ;;  %5458 = vmatprep.subr.bf16.mxu1 %v18182_v17 }
 0xda1   : > { %v16400_v46 = vpop.f32.mrf.mxu0  ;;  %6864 = vmatmul.mubr.bf16.gmra.mxu0 %v16291_v59 }
 0xda2   : > { %5459 = vmatpush2.bf16.msra.mxu1 %v5396_v6  ;;  %6871 = vmatprep.mubr.bf16.mxu0 %v6614_v63 }
 0xda3   : > { %v13205_v4 = vpop.f32.mrf.mxu0  ;;  %5460 = vmatprep.subr.bf16.mxu1 %v18182_v17 }
 0xda5   : > { %v16404_v27 = vpop.f32.mrf.mxu0 }
 0xda6   : > { %5461 = vmatpush2.bf16.msra.mxu1 %v5395_v16 }
 0xda7   : > { %v13206_v21 = vpop.f32.mrf.mxu0  ;;  %5462 = vmatprep.subr.bf16.mxu1 %v18182_v17 }
 0xda9   : > { %v16409_v52 = vpop.f32.mrf.mxu0  ;;  %6872 = vmatmul.mubr.bf16.gmra.mxu0 %v6613_v19 }
 0xdaa   : > { %5463 = vmatpush2.bf16.msra.mxu1 %v5394_v7  ;;  %13263 = vmatprep.mubr.msk.bf16.mxu0 %vm14245_vm0, %v18211_v53 }
 0xdab   : > { %v13209_v59 = vpop.f32.mrf.mxu0  ;;  %5464 = vmatprep.subr.bf16.mxu1 %v18182_v17 }
 0xdad   : > { %v16416_v14 = vpop.f32.mrf.mxu0 }
 0xdae   : > { %5465 = vmatpush2.bf16.msra.mxu1 %v5393_v50 }
 0xdaf   : > { %v13210_v22 = vpop.f32.mrf.mxu0  ;;  %13169 = vmatprep.subr.bf16.mxu1 %v18211_v53 }
 0xdb1   : > { %5467 = vmatmul.mubr.bf16.vlgmr.msra.gmra.mxu1 %v14063_v12  ;;  %v16425_v57 = vpop.f32.mrf.mxu0 }
 0xdb2   : > { %10725 = vmatprep.mubr.msk.bf16.mxu1 %vm3335_vm2, %v14066_v37 }
 0xdb3   : > { %v13213_v20 = vpop.f32.mrf.mxu0 }
 0xdb5   : > { %v16431_v31 = vpop.f32.mrf.mxu0 }
 0xdb7   : > { %v13214_v26 = vpop.f32.mrf.mxu0 }
 0xdb9   : > { %5475 = vmatmul.mubr.bf16.gmra.mxu1 %v14068_v9  ;;  %v16436_v45 = vpop.f32.mrf.mxu0 }
 0xdba   : > { %10726 = vmatprep.mubr.msk.bf16.mxu1 %vm3335_vm2, %v10723_v39 }
 0xdbb   : > { %v13217_v54 = vpop.f32.mrf.mxu0 }
 0xdbd   : > { %v16439_v33 = vpop.f32.mrf.mxu0 }
 0xdbf   : > { %v13218_v28 = vpop.f32.mrf.mxu0 }
 0xdc1   : > { %5483 = vmatmul.mubr.bf16.gmra.mxu1 %v10722_v43  ;;  %v16441_v18 = vpop.f32.mrf.mxu0 }
 0xdc2   : > { %18244 = vst [vmem:[#allocation4_spill] sm:$0xff] %v16441_v18  ;;  %13175 = vmatprep.mubr.msk.bf16.mxu1 %vm14245_vm0, %v18211_v53 }
 0xdc3   : > { %v13221_v25 = vpop.f32.mrf.mxu0 }
 0xdc5   : > { %v16445_v13 = vpop.f32.mrf.mxu0 }
 0xdc6   : > { %18245 = vst [vmem:[#allocation5_spill] sm:$0xff] %v16445_v13 }
 0xdc7   : > { %v13222_v11 = vpop.f32.mrf.mxu0 }
 0xdc9   : > { %v16447_v51 = vpop.f32.mrf.mxu0 }
 0xdca   : > { %18246 = vst [vmem:[#allocation6_spill] sm:$0xff] %v16447_v51 }
 0xdcb   : > { %v13225_v6 = vpop.f32.mrf.mxu0 }
 0xdcd   : > { %v16449_v63 = vpop.f32.mrf.mxu0 }
 0xdce   : > { %18247 = vst [vmem:[#allocation7_spill] sm:$0xff] %v16449_v63 }
 0xdcf   : > { %v13226_v4 = vpop.f32.mrf.mxu0 }
 0xdd1   : > { %v16451_v16 = vpop.f32.mrf.mxu0 }
 0xdd2   : > { %18248 = vst [vmem:[#allocation8_spill] sm:$0xff] %v16451_v16 }
 0xdd3   : > { %v13229_v32 = vpop.f32.mrf.mxu0 }
 0xdd5   : > { %v16453_v21 = vpop.f32.mrf.mxu0 }
 0xdd6   : > { %18249 = vst [vmem:[#allocation9_spill] sm:$0xff] %v16453_v21 }
 0xdd7   : > { %v13230_v19 = vpop.f32.mrf.mxu0 }
 0xdd9   : > { %v16455_v7 = vpop.f32.mrf.mxu0 }
 0xdda   : > { %18250 = vst [vmem:[#allocation10_spill] sm:$0xff] %v16455_v7 }
 0xddb   : > { %v13233_v59 = vpop.f32.mrf.mxu0 }
 0xddd   : > { %v16457_v50 = vpop.f32.mrf.mxu0 }
 0xdde   : > { %18251 = vst [vmem:[#allocation11_spill] sm:$0xff] %v16457_v50 }
 0xddf   : > { %v13234_v12 = vpop.f32.mrf.mxu0 }
 0xde1   : > { %v16459_v37 = vpop.f32.mrf.mxu0 }
 0xde2   : > { %18252 = vst [vmem:[#allocation12_spill] sm:$0xff] %v16459_v37 }
 0xde3   : > { %v13237_v22 = vpop.f32.mrf.mxu0 }
 0xde5   : > { %v16461_v20 = vpop.f32.mrf.mxu0 }
 0xde6   : > { %18253 = vst [vmem:[#allocation13_spill] sm:$0xff] %v16461_v20 }
 0xde7   : > { %v13238_v15 = vpop.f32.mrf.mxu0 }
 0xde9   : > { %v16463_v9 = vpop.f32.mrf.mxu0 }
 0xdea   : > { %18254 = vst [vmem:[#allocation14_spill] sm:$0xff] %v16463_v9 }
 0xdeb   : > { %v13241_v39 = vpop.f32.mrf.mxu0 }
 0xded   : > { %v16465_v26 = vpop.f32.mrf.mxu0 }
 0xdee   : > { %18255 = vst [vmem:[#allocation15_spill] sm:$0xff] %v16465_v26 }
 0xdef   : > { %v13242_v54 = vpop.f32.mrf.mxu0 }
 0xdf1   : > { %v16467_v43 = vpop.f32.mrf.mxu0 }
 0xdf2   : > { %18256 = vst [vmem:[#allocation16_spill] sm:$0xff] %v16467_v43 }
 0xdf3   : > { %v13245_v28 = vpop.f32.mrf.mxu0 }
 0xdf5   : > { %v16469_v25 = vpop.f32.mrf.mxu0 }
 0xdf6   : > { %18257 = vst [vmem:[#allocation17_spill] sm:$0xff] %v16469_v25 }
 0xdf7   : > { %v13246_v11 = vpop.f32.mrf.mxu0 }
 0xdf9   : > { %v16471_v6 = vpop.f32.mrf.mxu0 }
 0xdfa   : > { %18258 = vst [vmem:[#allocation18_spill] sm:$0xff] %v16471_v6 }
 0xdfb   : > { %v13249_v4 = vpop.f32.mrf.mxu0 }
 0xdfd   : > { %v16473_v32 = vpop.f32.mrf.mxu0 }
 0xdfe   : > { %18259 = vst [vmem:[#allocation19_spill] sm:$0xff] %v16473_v32 }
 0xdff   : > { %v13250_v19 = vpop.f32.mrf.mxu0 }
 0xe01   : > { %v16475_v59 = vpop.f32.mrf.mxu0 }
 0xe02   : > { %18260 = vst [vmem:[#allocation20_spill] sm:$0xff] %v16475_v59 }
 0xe03   : > { %v13253_v12 = vpop.f32.mrf.mxu0 }
 0xe05   : > { %v6171_v22 = vpop.f32.mrf.mxu0 }
 0xe07   : > { %v13254_v15 = vpop.f32.mrf.mxu0 }
 0xe09   : > { %v12098_v39 = vpop.f32.mrf.mxu0 }
 0xe0b   : > { %v12099_v54 = vpop.f32.mrf.mxu0 }
 0xe0c   : > { %v16477_v17 = vadd.f32 %v12099_v54, %v12098_v39 }
 0xe0d   : > { %v16479_v28 = vpop.f32.mrf.mxu0 }
 0xe0f   : > { %v16481_v1 = vpop.f32.mrf.mxu0 }
 0xe11   : > { %v12104_v11 = vpop.f32.mrf.mxu0 }
 0xe13   : > { %v12105_v25 = vpop.f32.mrf.mxu0 }
 0xe14   : > { %v16484_v4 = vadd.f32 %v12105_v25, %v12104_v11 }
 0xe15   : > { %v16486_v32 = vpop.f32.mrf.mxu0 }
 0xe17   : > { %v16493_v19 = vpop.f32.mrf.mxu0 }
 0xe19   : > { %v12110_v12 = vpop.f32.mrf.mxu0 }
 0xe1b   : > { %v12111_v22 = vpop.f32.mrf.mxu0 }
 0xe1c   : > { %v16495_v15 = vadd.f32 %v12111_v22, %v12110_v12 }
 0xe1d   : > { %v16497_v39 = vpop.f32.mrf.mxu0 }
 0xe1f   : > { %v16499_v54 = vpop.f32.mrf.mxu0 }
 0xe21   : > { %v12116_v59 = vpop.f32.mrf.mxu0 }
 0xe23   : > { %v12117_v25 = vpop.f32.mrf.mxu0 }
 0xe24   : > { %v16501_v11 = vadd.f32 %v12117_v25, %v12116_v59 }
 0xe25   : > { %v16503_v6 = vpop.f32.mrf.mxu0 }
 0xe27   : > { %v16505_v43 = vpop.f32.mrf.mxu0 }
 0xe29   : > { %v12122_v26 = vpop.f32.mrf.mxu0 }
 0xe2b   : > { %v12123_v9 = vpop.f32.mrf.mxu0 }
 0xe2c   : > { %v16507_v20 = vadd.f32 %v12123_v9, %v12122_v26 }
 0xe2d   : > { %v16509_v37 = vpop.f32.mrf.mxu0 }
 0xe2e   : > { %18261 = vst [vmem:[#allocation21_spill] sm:$0xff] %v16507_v20  ;;  %18262 = vst [vmem:[#allocation22_spill] sm:$0xff] %v16509_v37 }
 0xe2f   : > { %v16511_v12 = vpop.f32.mrf.mxu0 }
 0xe30   : > { %18263 = vst [vmem:[#allocation23_spill] sm:$0xff] %v16511_v12 }
 0xe31   : > { %v12128_v22 = vpop.f32.mrf.mxu0 }
 0xe33   : > { %v12129_v50 = vpop.f32.mrf.mxu0 }
 0xe34   : > { %v16513_v7 = vadd.f32 %v12129_v50, %v12128_v22 }
 0xe35   : > { %v16515_v21 = vpop.f32.mrf.mxu0 }
 0xe36   : > { %18264 = vst [vmem:[#allocation24_spill] sm:$0xff] %v16513_v7  ;;  %18265 = vst [vmem:[#allocation25_spill] sm:$0xff] %v16515_v21 }
 0xe37   : > { %v16517_v59 = vpop.f32.mrf.mxu0 }
 0xe38   : > { %18266 = vst [vmem:[#allocation26_spill] sm:$0xff] %v16517_v59 }
 0xe39   : > { %v12134_v25 = vpop.f32.mrf.mxu0 }
 0xe3b   : > { %v12135_v16 = vpop.f32.mrf.mxu0 }
 0xe3c   : > { %v16519_v63 = vadd.f32 %v12135_v16, %v12134_v25 }
 0xe3d   : > { %v16521_v51 = vpop.f32.mrf.mxu0 }
 0xe3e   : > { %18267 = vst [vmem:[#allocation27_spill] sm:$0xff] %v16519_v63  ;;  %18268 = vst [vmem:[#allocation28_spill] sm:$0xff] %v16521_v51 }
 0xe3f   : > { %v16523_v9 = vpop.f32.mrf.mxu0 }
 0xe40   : > { %18269 = vst [vmem:[#allocation29_spill] sm:$0xff] %v16523_v9 }
 0xe41   : > { %v12140_v26 = vpop.f32.mrf.mxu0 }
 0xe43   : > { %v12141_v37 = vpop.f32.mrf.mxu0 }
 0xe44   : > { %v16525_v20 = vadd.f32 %v12141_v37, %v12140_v26 }
 0xe45   : > { %v16527_v12 = vpop.f32.mrf.mxu0 }
 0xe46   : > { %18270 = vst [vmem:[#allocation30_spill] sm:$0xff] %v16525_v20  ;;  %18271 = vst [vmem:[#allocation31_spill] sm:$0xff] %v16527_v12 }
 0xe47   : > { %v16529_v50 = vpop.f32.mrf.mxu0 }
 0xe48   : > { %18272 = vst [vmem:[#allocation32_spill] sm:$0xff] %v16529_v50 }
 0xe49   : > { %v12146_v22 = vpop.f32.mrf.mxu0 }
 0xe4b   : > { %v12147_v21 = vpop.f32.mrf.mxu0 }
 0xe4c   : > { %v16531_v7 = vadd.f32 %v12147_v21, %v12146_v22 }
 0xe4d   : > { %v16533_v59 = vpop.f32.mrf.mxu0 }
 0xe4e   : > { %18273 = vst [vmem:[#allocation33_spill] sm:$0xff] %v16531_v7  ;;  %18274 = vst [vmem:[#allocation34_spill] sm:$0xff] %v16533_v59 }
 0xe4f   : > { %v16535_v16 = vpop.f32.mrf.mxu0 }
 0xe50   : > { %18275 = vst [vmem:[#allocation35_spill] sm:$0xff] %v16535_v16 }
 0xe51   : > { %v12152_v25 = vpop.f32.mrf.mxu0 }
 0xe53   : > { %v12153_v51 = vpop.f32.mrf.mxu0 }
 0xe54   : > { %v16537_v63 = vadd.f32 %v12153_v51, %v12152_v25 }
 0xe55   : > { %v16539_v9 = vpop.f32.mrf.mxu0 }
 0xe56   : > { %18276 = vst [vmem:[#allocation36_spill] sm:$0xff] %v16537_v63  ;;  %18277 = vst [vmem:[#allocation37_spill] sm:$0xff] %v16539_v9 }
 0xe57   : > { %v16541_v37 = vpop.f32.mrf.mxu0 }
 0xe58   : > { %18278 = vst [vmem:[#allocation38_spill] sm:$0xff] %v16541_v37 }
 0xe59   : > { %v12158_v26 = vpop.f32.mrf.mxu0 }
 0xe5b   : > { %v12159_v12 = vpop.f32.mrf.mxu0 }
 0xe5c   : > { %v16543_v20 = vadd.f32 %v12159_v12, %v12158_v26 }
 0xe5d   : > { %v16545_v50 = vpop.f32.mrf.mxu0 }
 0xe5e   : > { %18279 = vst [vmem:[#allocation39_spill] sm:$0xff] %v16543_v20  ;;  %18280 = vst [vmem:[#allocation40_spill] sm:$0xff] %v16545_v50  ;;  %v16558_v20 = vpop.permute.xlu0 %5495 }
 0xe5f   : > { %v16547_v21 = vpop.f32.mrf.mxu0  ;;  %18286 = vst [vmem:[#allocation46_spill] sm:$0xff] %v16558_v20 }
 0xe60   : > { %18281 = vst [vmem:[#allocation41_spill] sm:$0xff] %v16547_v21 }
 0xe61   : > { %v12164_v22 = vpop.f32.mrf.mxu0 }
 0xe63   : > { %v12165_v59 = vpop.f32.mrf.mxu0 }
 0xe64   : > { %v16549_v7 = vadd.f32 %v12165_v59, %v12164_v22 }
 0xe65   : > { %v16551_v16 = vpop.f32.mrf.mxu0 }
 0xe66   : > { %18282 = vst [vmem:[#allocation42_spill] sm:$0xff] %v16549_v7  ;;  %18283 = vst [vmem:[#allocation43_spill] sm:$0xff] %v16551_v16 }
 0xe67   : > { %v16553_v51 = vpop.f32.mrf.mxu0 }
 0xe68   : > { %18284 = vst [vmem:[#allocation44_spill] sm:$0xff] %v16553_v51 }
 0xe69   : > { %v12170_v25 = vpop.f32.mrf.mxu0 }
 0xe6b   : > { %v12171_v9 = vpop.f32.mrf.mxu0 }
 0xe6c   : > { %v16555_v63 = vadd.f32 %v12171_v9, %v12170_v25 }
 0xe6d   : > { %v12173_v37 = vpop.f32.mrf.mxu0 }
 0xe6e   : > { %18285 = vst [vmem:[#allocation45_spill] sm:$0xff] %v16555_v63 }
 0xe6f   : > { %v12174_v13 = vpop.f32.mrf.mxu0 }
 0xe71   : > { %v5468_v12 = vpop.f32.mrf.mxu1 }
 0xe72   : > { %v5490_v26 = vadd.f32 %v5468_v12, %v16273_v41 }
 0xe73   : > { %v5470_v50 = vpop.f32.mrf.mxu1 }
 0xe74   : > { %v5498_v22 = vadd.f32 %v16558_v20, %v5490_v26 }
 0xe75   : > { %v5471_v21 = vpop.f32.mrf.mxu1 }
 0xe76   : > { %v5491_v59 = vadd.f32 %v5471_v21, %v16278_v35  ;;  %v5503_v18 = vmax.f32 %v5498_v22, 0.0 }
 0xe77   : > { %v5473_v16 = vpop.f32.mrf.mxu1 }
 0xe78   : > { %v5499_v51 = vadd.f32 %v16558_v20, %v5491_v59 }
 0xe79   : > { %v5476_v7 = vpop.f32.mrf.mxu1 }
 0xe7a   : > { %v5504_v9 = vmax.f32 %v5499_v51, 0.0  ;;  %v5492_v37 = vadd.f32 %v5476_v7, %v16284_v44 }
 0xe7b   : > { %v5478_v13 = vpop.f32.mrf.mxu1 }
 0xe7c   : > { %v5508_v25 = vpack.c.bf16 %v5504_v9, %v5503_v18  ;;  %v5500_v41 = vadd.f32 %v16558_v20, %v5492_v37  ;;  %v14071_v37 = vld [vmem:[%s16491_s16] sm:$0xff]   ;;  %v14073_v13 = vld [vmem:[%s14336_s20 + $0x38] sm:$0xff]  }
 0xe7d   : > { %v5479_v63 = vpop.f32.mrf.mxu1 }
 0xe7e   : > { %v5493_v50 = vadd.f32 %v5479_v63, %v16289_v0  ;;  %v5505_v16 = vmax.f32 %v5500_v41, 0.0  ;;  %v14074_v41 = vld [vmem:[%s14336_s20 + $0x70] sm:$0xff]  }
 0xe7f   : > { %v5481_v12 = vpop.f32.mrf.mxu1 }
 0xe80   : > { %v5501_v35 = vadd.f32 %v16558_v20, %v5493_v50  ;;  %v14075_v50 = vld [vmem:[%s14336_s20 + $0x30] sm:$0xff]   ;;  %v14077_v12 = vld [vmem:[%s14336_s20 + $0x68] sm:$0xff]  }
 0xe81   : > { %v5484_v21 = vpop.f32.mrf.mxu1 }
 0xe82   : > { %v5506_v26 = vmax.f32 %v5501_v35, 0.0  ;;  %v5494_v59 = vadd.f32 %v5484_v21, %v16299_v56  ;;  %v14072_v56 = vld [vmem:[%s14336_s20 + $0x78] sm:$0xff]   ;;  %v14076_v35 = vld [vmem:[%s16491_s16 + $0x8] sm:$0xff]   ;;  %v14079_v21 = vld [vmem:[%s14336_s20 + $0x60] sm:$0xff]  }
 0xe83   : > { %v5486_v51 = vpop.f32.mrf.mxu1 }
 0xe84   : > { %v5509_v44 = vpack.c.bf16 %v5506_v26, %v5505_v16  ;;  %v5502_v18 = vadd.f32 %v16558_v20, %v5494_v59  ;;  %v14080_v16 = vld [vmem:[%s14336_s20 + $0x20] sm:$0xff]   ;;  %v14082_v26 = vld [vmem:[%s14336_s20 + $0x58] sm:$0xff]   ;;  %v14081_v59 = vld [vmem:[%s16491_s16 + $0x10] ss:$0 sps:$4 sm:$0x33]  }
 0xe85   : > { %v5487_v7 = vpop.f32.mrf.mxu1  ;;  %v5685_v51 = vld [vmem:[#allocation2 + $0xe9] sm:$0xff] }
 0xe86   : > { %v5507_v22 = vmax.f32 %v5502_v18, 0.0  ;;  %v14083_v18 = vld [vmem:[%s14336_s20 + $0x18] sm:$0xff]   ;;  %v14084_v7 = vld [vmem:[%s14336_s20 + $0x50] sm:$0xff]  }
 0xe87   : > { %v5488_v9 = vpop.f32.mrf.mxu1 }
 0xe88   : > { %v5510_v0 = vpack.c.bf16 %v5507_v22, %v5507_v22  ;;  %v14085_v9 = vld [vmem:[%s14336_s20 + $0x10] sm:$0xff]  }
 0xe8a   : > { %v5540_v63 = vsel %vm3346_vm4, %v5510_v0, 0  ;;  %v14086_v0 = vld [vmem:[%s14336_s20 + $0x48] sm:$0xff]  }
 0xe8b   : > { %13170 = vmatpush3.bf16.msra.mxu1 %v5540_v63  ;;  %v14087_v63 = vld [vmem:[%s14336_s20 + $0x8] sm:$0xff]  }
 0xe8c   : > { %13171 = vmatprep.subr.bf16.mxu1 %v18211_v53 }
 0xe8f   : > { %13172 = vmatpush3.bf16.msra.mxu1 %v5509_v44  ;;  %v5686_v44 = vld [vmem:[#allocation2 + $0xf1] sm:$0xff] }
 0xe90   : > { %13173 = vmatprep.subr.bf16.mxu1 %v18211_v53  ;;  %v5711_v22 = vpack.c.bf16 %v5686_v44, %v5685_v51  ;;  %v14097_v51 = vld [vmem:[%s14336_s20 + $0xa0] sm:$0xff]   ;;  %v14099_v44 = vld [vmem:[%s14336_s20 + $0x98] sm:$0xff]  }
 0xe93   : > { %13174 = vmatpush3.bf16.msra.mxu1 %v5508_v25  ;;  %v14078_v25 = vld [vmem:[%s14336_s20 + $0x28] sm:$0xff]  }
 0xe94   : > { %11873 = vmatprep.subr.bf16.mxu1 %v14072_v56  ;;  %v14088_v56 = vld [vmem:[%s14336_s20 + $0x40] sm:$0xff]  }
 0xe96   : > { %13176 = vmatmul.mubr.msk.bf16.vlgmr.msra.gmra.mxu1 %vm5529_vm5, %v14071_v37  ;;  %v14089_v37 = vld [vmem:[%s14336_s20] sm:$0xff]  }
 0xe97   : > { %11874 = vmatpush3.bf16.msra.mxu1 %v14073_v13  ;;  %13179 = vmatprep.mubr.msk.bf16.mxu1 %vm14245_vm0, %v18211_v53  ;;  %v14090_v13 = vld [vmem:[%s14336_s20 + $0xf8] sm:$0xff]  }
 0xe98   : > { %11875 = vmatprep.subr.bf16.mxu1 %v14074_v41  ;;  %v5680_v41 = vld [vmem:[#allocation2 + $0xe8] sm:$0xff] }
 0xe9b   : > { %11876 = vmatpush3.bf16.msra.mxu1 %v14075_v50  ;;  %v5681_v50 = vld [vmem:[#allocation2 + $0xf0] sm:$0xff] }
 0xe9c   : > { %11877 = vmatprep.subr.bf16.mxu1 %v14077_v12  ;;  %v14091_v12 = vld [vmem:[%s14336_s20 + $0xb8] sm:$0xff]  }
 0xe9e   : > { %13180 = vmatmul.mubr.msk.bf16.gmra.mxu1 %vm5529_vm5, %v14076_v35  ;;  %v5710_v35 = vpack.c.bf16 %v5681_v50, %v5680_v41  ;;  %v14112_v41 = vld [vmem:[%s14336_s20 + $0x1e0] sm:$0xff]  }
 0xe9f   : > { %11878 = vmatpush3.bf16.msra.mxu1 %v14078_v25  ;;  %13183 = vmatprep.mubr.msk.bf16.mxu1 %vm14245_vm0, %v18211_v53  ;;  %v14092_v25 = vld [vmem:[%s14336_s20 + $0xf0] sm:$0xff]  }
 0xea0   : > { %11879 = vmatprep.subr.bf16.mxu1 %v14079_v21  ;;  %v14093_v21 = vld [vmem:[%s14336_s20 + $0xb0] sm:$0xff]  }
 0xea3   : > { %11880 = vmatpush3.bf16.msra.mxu1 %v14080_v16  ;;  %v14094_v16 = vld [vmem:[%s14336_s20 + $0xe8] sm:$0xff]  }
 0xea4   : > { %11881 = vmatprep.subr.bf16.mxu1 %v14082_v26  ;;  %v14095_v26 = vld [vmem:[%s14336_s20 + $0xa8] sm:$0xff]  }
 0xea6   : > { %13184 = vmatmul.mubr.msk.bf16.gmra.mxu1 %vm5529_vm5, %v14081_v59  ;;  %v14096_v59 = vld [vmem:[%s14336_s20 + $0xe0] sm:$0xff]  }
 0xea7   : > { %11882 = vmatpush3.bf16.msra.mxu1 %v14083_v18  ;;  %5886 = vmatprep.mubr.bf16.mxu1 %v5711_v22  ;;  %v14100_v18 = vld [vmem:[%s14336_s20 + $0xd0] sm:$0xff]   ;;  %v14104_v22 = vld [vmem:[%s14336_s20 + $0xc0] sm:$0xff]  }
 0xea8   : > { %11883 = vmatprep.subr.bf16.mxu1 %v14084_v7  ;;  %v14103_v7 = vld [vmem:[%s14336_s20 + $0x88] sm:$0xff]  }
 0xeab   : > { %11884 = vmatpush3.bf16.msra.mxu1 %v14085_v9  ;;  %v14105_v9 = vld [vmem:[%s14336_s20 + $0x80] sm:$0xff]  }
 0xeac   : > { %11885 = vmatprep.subr.bf16.mxu1 %v14086_v0  ;;  %v14106_v0 = vld [vmem:[%s14336_s20 + $0x1f8] sm:$0xff]  }
 0xeaf   : > { %11886 = vmatpush3.bf16.msra.mxu1 %v14087_v63  ;;  %v6203_v63 = vld [vmem:[#allocation2 + $0x117] sm:$0xff] }
 0xeb0   : > { %11887 = vmatprep.subr.bf16.mxu1 %v14088_v56  ;;  %v6204_v56 = vld [vmem:[#allocation2 + $0x11f] sm:$0xff] }
 0xeb1   : > { %v16646_v50 = vpack.c.bf16 %v6204_v56, %v6203_v63  ;;  %v6213_v63 = vld [vmem:[#allocation2 + $0x167] sm:$0xff]  ;;  %v6214_v56 = vld [vmem:[#allocation2 + $0x16f] sm:$0xff] }
 0xeb3   : > { %11888 = vmatpush3.bf16.msra.mxu1 %v14089_v37  ;;  %v14111_v37 = vld [vmem:[%s14336_s20 + $0x1a8] sm:$0xff]  }
 0xeb4   : > { %11988 = vmatprep.subr.bf16.mxu1 %v14090_v13 }
 0xeb6   : > { %5887 = vmatmul.mubr.bf16.vlgmr.msra.gmra.mxu1 %v5710_v35  ;;  %v14114_v35 = vld [vmem:[%s14336_s20 + $0x1d8] sm:$0xff]  }
 0xeb7   : > { %5894 = vmatprep.mubr.bf16.mxu1 %v16311_v61  ;;  %11989 = vmatpush3.bf16.msra.mxu1 %v14091_v12  ;;  %v14098_v61 = vld [vmem:[%s14336_s20 + $0xd8] sm:$0xff]   ;;  %v14113_v12 = vld [vmem:[%s14336_s20 + $0x1a0] sm:$0xff]  }
 0xeb8   : > { %11990 = vmatprep.subr.bf16.mxu1 %v14092_v25  ;;  %v6178_v25 = vld [vmem:[#allocation2 + $0x10a] sm:$0xff] }
 0xebb   : > { %11991 = vmatpush3.bf16.msra.mxu1 %v14093_v21  ;;  %v6179_v21 = vld [vmem:[#allocation2 + $0x112] sm:$0xff] }
 0xebc   : > { %11992 = vmatprep.subr.bf16.mxu1 %v14094_v16  ;;  %v6205_v16 = vld [vmem:[#allocation2 + $0x127] sm:$0xff] }
 0xebe   : > { %5895 = vmatmul.mubr.bf16.gmra.mxu1 %v16320_v29  ;;  %v14101_v29 = vld [vmem:[%s14336_s20 + $0x90] sm:$0xff]  }
 0xebf   : > { %5902 = vmatprep.mubr.bf16.mxu1 %v16322_v48  ;;  %11993 = vmatpush3.bf16.msra.mxu1 %v14095_v26  ;;  %v14102_v48 = vld [vmem:[%s14336_s20 + $0xc8] sm:$0xff]  }
 0xec0   : > { %11994 = vmatprep.subr.bf16.mxu1 %v14096_v59  ;;  %v6206_v26 = vld [vmem:[#allocation2 + $0x12f] sm:$0xff]  ;;  %v14115_v59 = vld [vmem:[%s14336_s20 + $0x198] sm:$0xff]  }
 0xec3   : > { %11995 = vmatpush3.bf16.msra.mxu1 %v14097_v51  ;;  %v6228_v51 = vpack.c.bf16 %v6179_v21, %v6178_v25  ;;  %v6216_v25 = vld [vmem:[#allocation2 + $0x17f] sm:$0xff] }
 0xec4   : > { %11996 = vmatprep.subr.bf16.mxu1 %v14098_v61  ;;  %v14116_v61 = vld [vmem:[%s14336_s20 + $0x1d0] sm:$0xff]  }
 0xec6   : > { %5903 = vmatmul.mubr.bf16.gmra.mxu1 %v16214_v38  ;;  %v5709_v38 = vld [vmem:[#allocation2 + $0x1a9] sm:$0x7] }
 0xec7   : > { %5910 = vmatprep.mubr.bf16.mxu1 %v16330_v58  ;;  %11997 = vmatpush3.bf16.msra.mxu1 %v14099_v44  ;;  %v6201_v58 = vld [vmem:[#allocation2 + $0x107] sm:$0xff]  ;;  %v16653_v44 = vpack.c.bf16 %v6206_v26, %v6205_v16 }
 0xec8   : > { %11998 = vmatprep.subr.bf16.mxu1 %v14100_v18  ;;  %v14117_v18 = vld [vmem:[%s14336_s20 + $0x190] sm:$0xff]  }
 0xecb   : > { %11999 = vmatpush3.bf16.msra.mxu1 %v14101_v29  ;;  %v14118_v29 = vld [vmem:[%s14336_s20 + $0x1c8] sm:$0xff]  }
 0xecc   : > { %12000 = vmatprep.subr.bf16.mxu1 %v14102_v48  ;;  %v6180_v48 = vld [vmem:[#allocation2 + $0x11a] sm:$0xff] }
 0xece   : > { %5911 = vmatmul.mubr.bf16.gmra.mxu1 %v16223_v60  ;;  %v5725_v60 = vpack.c.bf16 %v5709_v38, %v5709_v38 }
 0xecf   : > { %5918 = vmatprep.mubr.bf16.mxu1 %v16338_v40  ;;  %12001 = vmatpush3.bf16.msra.mxu1 %v14103_v7  ;;  %v6202_v40 = vld [vmem:[#allocation2 + $0x10f] sm:$0xff]  ;;  %v6181_v7 = vld [vmem:[#allocation2 + $0x122] sm:$0xff] }
 0xed0   : > { %12002 = vmatprep.subr.bf16.mxu1 %v14104_v22  ;;  %v6207_v22 = vld [vmem:[#allocation2 + $0x137] sm:$0xff]  ;;  %v6230_v38 = vpack.c.bf16 %v6181_v7, %v6180_v48  ;;  %v6217_v48 = vld [vmem:[#allocation2 + $0x187] sm:$0xff]  ;;  %v6218_v7 = vld [vmem:[#allocation2 + $0x18f] sm:$0xff] }
 0xed3   : > { %12003 = vmatpush3.bf16.msra.mxu1 %v14105_v9  ;;  %v6208_v9 = vld [vmem:[#allocation2 + $0x13f] sm:$0xff] }
 0xed4   : > { %12176 = vmatprep.subr.bf16.mxu1 %v14106_v0  ;;  %v14119_v0 = vld [vmem:[%s14336_s20 + $0x188] sm:$0xff]  }
 0xed6   : > { %5919 = vmatmul.mubr.bf16.gmra.mxu1 %v16232_v34  ;;  %v5684_v34 = vld [vmem:[#allocation2 + $0x1a8] sm:$0x7] }
 0xed7   : > { %5926 = vmatprep.mubr.bf16.mxu1 %v16342_v30  ;;  %v14107_v30 = vld [vmem:[%s14336_s20 + $0x1b8] sm:$0xff]  }
 0xede   : > { %5927 = vmatmul.mubr.bf16.gmra.mxu1 %v16241_v36  ;;  %v6199_v36 = vld [vmem:[#allocation2 + $0xf7] sm:$0xff] }
 0xedf   : > { %5934 = vmatprep.mubr.bf16.mxu1 %v16346_v55 }
 0xee6   : > { %5935 = vmatmul.mubr.bf16.gmra.mxu1 %v16248_v49  ;;  %v6200_v49 = vld [vmem:[#allocation2 + $0xff] sm:$0xff] }
 0xee7   : > { %5942 = vmatprep.mubr.bf16.mxu1 %v16350_v23  ;;  %v14108_v23 = vld [vmem:[%s14336_s20 + $0x1f0] sm:$0xff]  }
 0xeee   : > { %5943 = vmatmul.mubr.bf16.gmra.mxu1 %v16254_v3  ;;  %v5724_v3 = vpack.c.bf16 %v5684_v34, %v5684_v34  ;;  %v16660_v34 = vpack.c.bf16 %v6208_v9, %v6207_v22 }
 0xeef   : > { %5950 = vmatprep.mubr.bf16.mxu1 %v16354_v8  ;;  %v14109_v8 = vld [vmem:[%s14336_s20 + $0x1b0] sm:$0xff]  }
 0xef6   : > { %5951 = vmatmul.mubr.bf16.gmra.mxu1 %v16259_v10  ;;  %v6225_v10 = vpack.c.bf16 %v6200_v49, %v6199_v36  ;;  %v14121_v36 = vld [vmem:[%s14336_s20 + $0x180] sm:$0xff]   ;;  %v6182_v49 = vld [vmem:[#allocation2 + $0x12a] sm:$0xff] }
 0xef7   : > { %5958 = vmatprep.mubr.bf16.mxu1 %v16364_v5  ;;  %v14110_v5 = vld [vmem:[%s14336_s20 + $0x1e8] sm:$0xff]  }
 0xefe   : > { %5959 = vmatmul.mubr.bf16.gmra.mxu1 %v16264_v62  ;;  %v6174_v62 = vld [vmem:[#allocation2 + $0xea] sm:$0xff] }
 0xeff   : > { %5966 = vmatprep.mubr.bf16.mxu1 %v16377_v42  ;;  %v6176_v42 = vld [vmem:[#allocation2 + $0xfa] sm:$0xff] }
 0xf06   : > { %5967 = vmatmul.mubr.bf16.gmra.mxu1 %v16269_v24  ;;  %v6175_v24 = vld [vmem:[#allocation2 + $0xf2] sm:$0xff] }
 0xf07   : > { %5974 = vmatprep.mubr.bf16.mxu1 %v16388_v47  ;;  %v6224_v55 = vpack.c.bf16 %v6175_v24, %v6174_v62  ;;  %v6177_v47 = vld [vmem:[#allocation2 + $0x102] sm:$0xff]  ;;  %v6210_v62 = vld [vmem:[#allocation2 + $0x14f] sm:$0xff] }
 0xf08   : > { %v6226_v13 = vpack.c.bf16 %v6177_v47, %v6176_v42  ;;  %v6186_v42 = vld [vmem:[#allocation2 + $0x14a] sm:$0xff]  ;;  %v6187_v47 = vld [vmem:[#allocation2 + $0x152] sm:$0xff] }
 0xf0e   : > { %5975 = vmatmul.mubr.bf16.gmra.mxu1 %v16280_v2  ;;  %v16639_v2 = vpack.c.bf16 %v6202_v40, %v6201_v58  ;;  %v6184_v40 = vld [vmem:[#allocation2 + $0x13a] sm:$0xff] }
 0xf0f   : > { %5982 = vmatprep.mubr.bf16.mxu1 %v5725_v60  ;;  %v14120_v60 = vld [vmem:[%s14336_s20 + $0x1c0] sm:$0xff]   ;;  %s13816_s20 = smul.u32 20, %s18344_s30 }
 0xf11   : > { %s16680_s23 = scalar_lea.vmem %s18179_s8, %s13816_s20 }
 0xf16   : > { %5983 = vmatmul.mubr.bf16.gmra.mxu1 %v5724_v3  ;;  %v6183_v3 = vld [vmem:[#allocation2 + $0x132] sm:$0xff] }
 0xf17   : > { %6410 = vmatprep.mubr.bf16.mxu1 %v6225_v10  ;;  %v6209_v10 = vld [vmem:[#allocation2 + $0x147] sm:$0xff]  ;;  %v6232_v24 = vpack.c.bf16 %v6183_v3, %v6182_v49  ;;  %v6192_v3 = vld [vmem:[#allocation2 + $0x17a] sm:$0xff] }
 0xf18   : > { %v16665_v58 = vpack.c.bf16 %v6210_v62, %v6209_v10  ;;  %v6193_v10 = vld [vmem:[#allocation2 + $0x182] sm:$0xff] }
 0xf1e   : > { %6411 = vmatmul.mubr.bf16.vlgmr.msra.gmra.mxu1 %v6224_v55  ;;  %v6211_v55 = vld [vmem:[#allocation2 + $0x157] sm:$0xff] }
 0xf1f   : > { %6418 = vmatprep.mubr.bf16.mxu1 %v16639_v2  ;;  %12177 = vmatpush3.bf16.msra.mxu1 %v14107_v30  ;;  %v6185_v30 = vld [vmem:[#allocation2 + $0x142] sm:$0xff] }
 0xf20   : > { %12178 = vmatprep.subr.bf16.mxu1 %v14108_v23  ;;  %v6212_v23 = vld [vmem:[#allocation2 + $0x15f] sm:$0xff] }
 0xf23   : > { %12179 = vmatpush3.bf16.msra.mxu1 %v14109_v8  ;;  %v6234_v8 = vpack.c.bf16 %v6185_v30, %v6184_v40  ;;  %v6220_v40 = vld [vmem:[#allocation2 + $0x19f] sm:$0xff] }
 0xf24   : > { %12180 = vmatprep.subr.bf16.mxu1 %v14110_v5  ;;  %v16668_v5 = vpack.c.bf16 %v6212_v23, %v6211_v55  ;;  %v6242_v23 = vpack.c.bf16 %v6193_v10, %v6192_v3 }
 0xf26   : > { %6419 = vmatmul.mubr.bf16.gmra.mxu1 %v6226_v13  ;;  %v16672_v13 = vpack.c.bf16 %v6214_v56, %v6213_v63  ;;  %v6194_v56 = vld [vmem:[#allocation2 + $0x18a] sm:$0xff] }
 0xf27   : > { %6426 = vmatprep.mubr.bf16.mxu1 %v16646_v50  ;;  %12181 = vmatpush3.bf16.msra.mxu1 %v14111_v37  ;;  %v6236_v37 = vpack.c.bf16 %v6187_v47, %v6186_v42 }
 0xf28   : > { %12182 = vmatprep.subr.bf16.mxu1 %v14112_v41  ;;  %v6188_v41 = vld [vmem:[#allocation2 + $0x15a] sm:$0xff] }
 0xf2b   : > { %12183 = vmatpush3.bf16.msra.mxu1 %v14113_v12  ;;  %v6189_v12 = vld [vmem:[#allocation2 + $0x162] sm:$0xff] }
 0xf2c   : > { %12184 = vmatprep.subr.bf16.mxu1 %v14114_v35  ;;  %v6215_v35 = vld [vmem:[#allocation2 + $0x177] sm:$0xff]  ;;  %v6238_v21 = vpack.c.bf16 %v6189_v12, %v6188_v41  ;;  %v6221_v12 = vld [vmem:[#allocation2 + $0x1a7] sm:$0xff] }
 0xf2d   : > { %v16675_v16 = vpack.c.bf16 %v6216_v25, %v6215_v35  ;;  %v6222_v35 = vld [vmem:[#allocation2 + $0x1af] sm:$0xff] }
 0xf2e   : > { %6427 = vmatmul.mubr.bf16.gmra.mxu1 %v6228_v51 }
 0xf2f   : > { %6434 = vmatprep.mubr.bf16.mxu1 %v16653_v44  ;;  %12185 = vmatpush3.bf16.msra.mxu1 %v14115_v59 }
 0xf30   : > { %12186 = vmatprep.subr.bf16.mxu1 %v14116_v61  ;;  %v6190_v61 = vld [vmem:[#allocation2 + $0x16a] sm:$0xff] }
 0xf33   : > { %12187 = vmatpush3.bf16.msra.mxu1 %v14117_v18  ;;  %v6191_v18 = vld [vmem:[#allocation2 + $0x172] sm:$0xff] }
 0xf34   : > { %12188 = vmatprep.subr.bf16.mxu1 %v14118_v29 }
 0xf36   : > { %6435 = vmatmul.mubr.bf16.gmra.mxu1 %v6230_v38  ;;  %v16687_v38 = vpack.c.bf16 %v6218_v7, %v6217_v48 }
 0xf37   : > { %6442 = vmatprep.mubr.bf16.mxu1 %v16660_v34  ;;  %12189 = vmatpush3.bf16.msra.mxu1 %v14119_v0  ;;  %v6240_v0 = vpack.c.bf16 %v6191_v18, %v6190_v61  ;;  %v6223_v61 = vld [vmem:[#allocation2 + $0x1b7] sm:$0x7] }
 0xf38   : > { %12190 = vmatprep.subr.bf16.mxu1 %v14120_v60 }
 0xf3b   : > { %12191 = vmatpush3.bf16.msra.mxu1 %v14121_v36 }
 0xf3c   : > { %13315 = vmatprep.subr.bf16.mxu1 %v18211_v53 }
 0xf3e   : > { %6443 = vmatmul.mubr.bf16.gmra.mxu1 %v6232_v24  ;;  %v6219_v24 = vld [vmem:[#allocation2 + $0x197] sm:$0xff] }
 0xf3f   : > { %6450 = vmatprep.mubr.bf16.mxu1 %v16665_v58 }
 0xf46   : > { %6451 = vmatmul.mubr.bf16.gmra.mxu1 %v6234_v8  ;;  %v16694_v8 = vpack.c.bf16 %v6220_v40, %v6219_v24  ;;  %v6904_v24 = vld [vmem:[#allocation2 + $0x106] sm:$0xff]  ;;  %v6905_v40 = vld [vmem:[#allocation2 + $0x10e] sm:$0xff] }
 0xf47   : > { %6458 = vmatprep.mubr.bf16.mxu1 %v16668_v5 }
 0xf4e   : > { %6459 = vmatmul.mubr.bf16.gmra.mxu1 %v6236_v37  ;;  %v6195_v37 = vld [vmem:[#allocation2 + $0x192] sm:$0xff] }
 0xf4f   : > { %6466 = vmatprep.mubr.bf16.mxu1 %v16672_v13 }
 0xf56   : > { %v5576_v26 = vpop.f32.mrf.mxu1  ;;  %6467 = vmatmul.mubr.bf16.gmra.mxu1 %v6238_v21  ;;  %v6244_v21 = vpack.c.bf16 %v6195_v37, %v6194_v56  ;;  %v6906_v37 = vld [vmem:[#allocation2 + $0x116] sm:$0xff] }
 0xf57   : > { %v11270_v59 = vpack.c.bf16 %v5576_v26, %v5576_v26  ;;  %6474 = vmatprep.mubr.bf16.mxu1 %v16675_v16  ;;  %v16699_v26 = vpack.c.bf16 %v6222_v35, %v6221_v12 }
 0xf58   : > { %v13177_v51 = vpop.f32.mrf.mxu1 }
 0xf59   : > { %5620 = vst.msk [vmem:[%s16680_s23] sm:$0xf] %vm5619_vm6, %v11270_v59  ;;  %v6196_v59 = vld [vmem:[#allocation2 + $0x19a] sm:$0xff]  ;;  %v6197_v51 = vld [vmem:[#allocation2 + $0x1a2] sm:$0xff] }
 0xf5a   : > { %v5579_v29 = vpop.f32.mrf.mxu1  ;;  %v6246_v18 = vpack.c.bf16 %v6197_v51, %v6196_v59 }
 0xf5b   : > { %v11271_v22 = vpack.c.bf16 %v5579_v29, %v5579_v29  ;;  %v6249_v29 = vpack.c.bf16 %v6223_v61, %v6223_v61  ;;  %v6908_v61 = vld [vmem:[#allocation2 + $0x126] sm:$0xff] }
 0xf5c   : > { %v13178_v9 = vpop.f32.mrf.mxu1 }
 0xf5d   : > { %5621 = vst.msk [vmem:[%s16680_s23 + $0x4] sm:$0xf] %vm5619_vm6, %v11271_v22  ;;  %v6198_v9 = vld [vmem:[#allocation2 + $0x1aa] sm:$0x7] }
 0xf5e   : > { %6475 = vmatmul.mubr.bf16.gmra.mxu1 %v6240_v0  ;;  %v5584_v60 = vpop.f32.mrf.mxu1 }
 0xf5f   : > { %6482 = vmatprep.mubr.bf16.mxu1 %v16687_v38  ;;  %v11272_v36 = vpack.c.bf16 %v5584_v60, %v5584_v60 }
 0xf60   : > { %v13181_v49 = vpop.f32.mrf.mxu1 }
 0xf61   : > { %5622 = vst.msk [vmem:[%s16680_s23 + $0x8] sm:$0xf] %vm5619_vm6, %v11272_v36  ;;  %v6248_v36 = vpack.c.bf16 %v6198_v9, %v6198_v9 }
 0xf62   : > { %v5587_v62 = vpop.f32.mrf.mxu1 }
 0xf63   : > { %v11273_v30 = vpack.c.bf16 %v5587_v62, %v5587_v62 }
 0xf64   : > { %v13182_v55 = vpop.f32.mrf.mxu1 }
 0xf65   : > { %5623 = vst.msk [vmem:[%s16680_s23 + $0xc] sm:$0xf] %vm5619_vm6, %v11273_v30 }
 0xf66   : > { %6483 = vmatmul.mubr.bf16.gmra.mxu1 %v6242_v23  ;;  %v5592_v42 = vpop.f32.mrf.mxu1  ;;  %v6954_v23 = vpack.c.bf16 %v6905_v40, %v6904_v24 }
 0xf67   : > { %6490 = vmatprep.mubr.bf16.mxu1 %v16694_v8  ;;  %v11274_v47 = vpack.c.bf16 %v5592_v42, %v5592_v42 }
 0xf68   : > { %v13185_v63 = vpop.f32.mrf.mxu1 }
 0xf69   : > { %5625 = vst.msk [vmem:[%s16680_s23 + $0x10] sm:$0x3] %vm5624_vm7, %v11274_v47 }
 0xf6a   : > { %v5595_v41 = vpop.f32.mrf.mxu1 }
 0xf6b   : > { %v6907_v41 = vld [vmem:[#allocation2 + $0x11e] sm:$0xff] }
 0xf6c   : > { %v13186_v25 = vpop.f32.mrf.mxu1  ;;  %v6956_v35 = vpack.c.bf16 %v6907_v41, %v6906_v37 }
 0xf6e   : > { %6491 = vmatmul.mubr.bf16.gmra.mxu1 %v6244_v21 }
 0xf6f   : > { %6498 = vmatprep.mubr.bf16.mxu1 %v16699_v26 }
 0xf76   : > { %v11889_v48 = vpop.f32.mrf.mxu1  ;;  %6499 = vmatmul.mubr.bf16.gmra.mxu1 %v6246_v18  ;;  %v6909_v18 = vld [vmem:[#allocation2 + $0x12e] sm:$0xff] }
 0xf77   : > { %6506 = vmatprep.mubr.bf16.mxu1 %v6249_v29 }
 0xf78   : > { %v11890_v7 = vpop.f32.mrf.mxu1 }
 0xf79   : > { %v16702_v22 = vadd.f32 %v11890_v7, %v11889_v48  ;;  %v6958_v48 = vpack.c.bf16 %v6909_v18, %v6908_v61  ;;  %v6915_v61 = vld [vmem:[#allocation2 + $0x15e] sm:$0xff] }
 0xf7a   : > { %v11892_v0 = vpop.f32.mrf.mxu1 }
 0xf7c   : > { %v11893_v60 = vpop.f32.mrf.mxu1 }
 0xf7d   : > { %v16704_v49 = vadd.f32 %v11893_v60, %v11892_v0 }
 0xf7e   : > { %v11895_v3 = vpop.f32.mrf.mxu1  ;;  %6507 = vmatmul.mubr.bf16.gmra.mxu1 %v6248_v36  ;;  %v6910_v36 = vld [vmem:[#allocation2 + $0x136] sm:$0xff] }
 0xf7f   : > { %7140 = vmatprep.mubr.bf16.mxu1 %v16639_v2 }
 0xf80   : > { %v11896_v10 = vpop.f32.mrf.mxu1 }
 0xf81   : > { %v16707_v62 = vadd.f32 %v11896_v10, %v11895_v3 }
 0xf82   : > { %v11898_v30 = vpop.f32.mrf.mxu1 }
 0xf84   : > { %v11899_v55 = vpop.f32.mrf.mxu1 }
 0xf85   : > { %v16709_v42 = vadd.f32 %v11899_v55, %v11898_v30  ;;  %v14122_v55 = vld [vmem:[%s14369_s9 + $0x38] sm:$0xff]  }
 0xf86   : > { %v11901_v47 = vpop.f32.mrf.mxu1  ;;  %7141 = vmatmul.mubr.bf16.vlgmr.msra.gmra.mxu1 %v6954_v23 }
 0xf87   : > { %7148 = vmatprep.mubr.bf16.mxu1 %v16646_v50  ;;  %13316 = vmatpush3.bf16.msra.mxu1 %v14122_v55 }
 0xf88   : > { %v11902_v63 = vpop.f32.mrf.mxu1  ;;  %13317 = vmatprep.subr.bf16.mxu1 %v18211_v53 }
 0xf89   : > { %v16712_v56 = vadd.f32 %v11902_v63, %v11901_v47  ;;  %v6912_v63 = vld [vmem:[#allocation2 + $0x146] sm:$0xff] }
 0xf8a   : > { %v11904_v2 = vpop.f32.mrf.mxu1 }
 0xf8c   : > { %v11905_v12 = vpop.f32.mrf.mxu1 }
 0xf8d   : > { %v16714_v25 = vadd.f32 %v11905_v12, %v11904_v2 }
 0xf8e   : > { %v11907_v21 = vpop.f32.mrf.mxu1  ;;  %7149 = vmatmul.mubr.bf16.gmra.mxu1 %v6956_v35 }
 0xf8f   : > { %7156 = vmatprep.mubr.bf16.mxu1 %v16653_v44  ;;  %v6911_v44 = vld [vmem:[#allocation2 + $0x13e] sm:$0xff] }
 0xf90   : > { %v11908_v59 = vpop.f32.mrf.mxu1  ;;  %v6960_v24 = vpack.c.bf16 %v6911_v44, %v6910_v36  ;;  %v6916_v44 = vld [vmem:[#allocation2 + $0x166] sm:$0xff] }
 0xf91   : > { %v16717_v51 = vadd.f32 %v11908_v59, %v11907_v21  ;;  %v6914_v59 = vld [vmem:[#allocation2 + $0x156] sm:$0xff] }
 0xf92   : > { %v11910_v50 = vpop.f32.mrf.mxu1 }
 0xf94   : > { %v11911_v29 = vpop.f32.mrf.mxu1 }
 0xf95   : > { %v16719_v7 = vadd.f32 %v11911_v29, %v11910_v50  ;;  %v6964_v29 = vpack.c.bf16 %v6915_v61, %v6914_v59 }
 0xf96   : > { %v11913_v9 = vpop.f32.mrf.mxu1  ;;  %7157 = vmatmul.mubr.bf16.gmra.mxu1 %v6958_v48 }
 0xf97   : > { %7164 = vmatprep.mubr.bf16.mxu1 %v16660_v34  ;;  %v6913_v34 = vld [vmem:[#allocation2 + $0x14e] sm:$0xff] }
 0xf98   : > { %v11914_v0 = vpop.f32.mrf.mxu1  ;;  %v6962_v2 = vpack.c.bf16 %v6913_v34, %v6912_v63  ;;  %v6918_v34 = vld [vmem:[#allocation2 + $0x176] sm:$0xff] }
 0xf99   : > { %v16722_v60 = vadd.f32 %v11914_v0, %v11913_v9 }
 0xf9a   : > { %v11916_v3 = vpop.f32.mrf.mxu1 }
 0xf9c   : > { %v11917_v10 = vpop.f32.mrf.mxu1 }
 0xf9d   : > { %v16724_v40 = vadd.f32 %v11917_v10, %v11916_v3 }
 0xf9e   : > { %v11919_v30 = vpop.f32.mrf.mxu1  ;;  %7165 = vmatmul.mubr.bf16.gmra.mxu1 %v6960_v24 }
 0xf9f   : > { %7172 = vmatprep.mubr.bf16.mxu1 %v16665_v58 }
 0xfa0   : > { %v11920_v23 = vpop.f32.mrf.mxu1 }
 0xfa1   : > { %v16728_v47 = vadd.f32 %v11920_v23, %v11919_v30 }
 0xfa2   : > { %v11922_v37 = vpop.f32.mrf.mxu1 }
 0xfa4   : > { %v11923_v41 = vpop.f32.mrf.mxu1 }
 0xfa5   : > { %v16731_v12 = vadd.f32 %v11923_v41, %v11922_v37  ;;  %v14123_v41 = vld [vmem:[%s14369_s9 + $0x30] sm:$0xff]  }
 0xfa6   : > { %v11925_v35 = vpop.f32.mrf.mxu1  ;;  %7173 = vmatmul.mubr.bf16.gmra.mxu1 %v6962_v2 }
 0xfa7   : > { %7180 = vmatprep.mubr.bf16.mxu1 %v16668_v5  ;;  %v6917_v5 = vld [vmem:[#allocation2 + $0x16e] sm:$0xff]  ;;  %13318 = vmatpush3.bf16.msra.mxu1 %v14123_v41 }
 0xfa8   : > { %v11926_v21 = vpop.f32.mrf.mxu1  ;;  %v6966_v24 = vpack.c.bf16 %v6917_v5, %v6916_v44  ;;  %13319 = vmatprep.subr.bf16.mxu1 %v18211_v53 }
 0xfa9   : > { %v16734_v58 = vadd.f32 %v11926_v21, %v11925_v35 }
 0xfaa   : > { %v11928_v18 = vpop.f32.mrf.mxu1 }
 0xfac   : > { %v11929_v50 = vpop.f32.mrf.mxu1 }
 0xfad   : > { %v16736_v48 = vadd.f32 %v11929_v50, %v11928_v18  ;;  %v6920_v18 = vld [vmem:[#allocation2 + $0x186] sm:$0xff]  ;;  %v6921_v50 = vld [vmem:[#allocation2 + $0x18e] sm:$0xff] }
 0xfae   : > { %v11931_v9 = vpop.f32.mrf.mxu1  ;;  %7181 = vmatmul.mubr.bf16.gmra.mxu1 %v6964_v29 }
 0xfaf   : > { %7188 = vmatprep.mubr.bf16.mxu1 %v16672_v13  ;;  %v6919_v13 = vld [vmem:[#allocation2 + $0x17e] sm:$0xff] }
 0xfb0   : > { %v11932_v0 = vpop.f32.mrf.mxu1  ;;  %v6968_v35 = vpack.c.bf16 %v6919_v13, %v6918_v34 }
 0xfb1   : > { %v16739_v36 = vadd.f32 %v11932_v0, %v11931_v9  ;;  %v6970_v0 = vpack.c.bf16 %v6921_v50, %v6920_v18  ;;  %v6924_v18 = vld [vmem:[#allocation2 + $0x1a6] sm:$0xff]  ;;  %v6925_v50 = vld [vmem:[#allocation2 + $0x1ae] sm:$0xff] }
 0xfb2   : > { %v11934_v3 = vpop.f32.mrf.mxu1 }
 0xfb4   : > { %v11935_v10 = vpop.f32.mrf.mxu1 }
 0xfb5   : > { %v16741_v30 = vadd.f32 %v11935_v10, %v11934_v3  ;;  %v14124_v10 = vld [vmem:[%s14369_s9 + $0x18] sm:$0xff]  }
 0xfb6   : > { %v11937_v55 = vpop.f32.mrf.mxu1  ;;  %7189 = vmatmul.mubr.bf16.gmra.mxu1 %v6966_v24  ;;  %13256 = vmatpush3.bf16.msra.mxu0 %v14124_v10  ;;  %v14129_v10 = vld [vmem:[%s14369_s9 + $0x20] sm:$0xff]  }
 0xfb7   : > { %7196 = vmatprep.mubr.bf16.mxu1 %v16675_v16  ;;  %13257 = vmatprep.subr.bf16.mxu0 %v18211_v53 }
 0xfb8   : > { %v11938_v23 = vpop.f32.mrf.mxu1 }
 0xfb9   : > { %v16744_v63 = vadd.f32 %v11938_v23, %v11937_v55  ;;  %v6923_v55 = vld [vmem:[#allocation2 + $0x19e] sm:$0xff] }
 0xfba   : > { %v11940_v37 = vpop.f32.mrf.mxu1 }
 0xfbc   : > { %v11941_v2 = vpop.f32.mrf.mxu1 }
 0xfbd   : > { %v16747_v21 = vadd.f32 %v11941_v2, %v11940_v37  ;;  %v14125_v37 = vld [vmem:[%s14369_s9 + $0x10] sm:$0xff]  }
 0xfbe   : > { %v11943_v59 = vpop.f32.mrf.mxu1  ;;  %7197 = vmatmul.mubr.bf16.gmra.mxu1 %v6968_v35  ;;  %13258 = vmatpush3.bf16.msra.mxu0 %v14125_v37  ;;  %v14126_v35 = vld [vmem:[%s14369_s9 + $0x8] sm:$0xff]   ;;  %v6926_v37 = vld [vmem:[#allocation2 + $0x1b6] sm:$0xff] }
 0xfbf   : > { %7204 = vmatprep.mubr.bf16.mxu1 %v16687_v38  ;;  %v6922_v38 = vld [vmem:[#allocation2 + $0x196] sm:$0xff]  ;;  %13259 = vmatprep.subr.bf16.mxu0 %v18211_v53 }
 0xfc0   : > { %v11944_v16 = vpop.f32.mrf.mxu1  ;;  %v6972_v13 = vpack.c.bf16 %v6923_v55, %v6922_v38 }
 0xfc1   : > { %v16751_v61 = vadd.f32 %v11944_v16, %v11943_v59  ;;  %v14127_v59 = vld [vmem:[%s14369_s9 + $0x28] sm:$0xff]  }
 0xfc2   : > { %v11946_v29 = vpop.f32.mrf.mxu1  ;;  %13260 = vmatpush3.bf16.msra.mxu0 %v14126_v35  ;;  %13320 = vmatpush3.bf16.msra.mxu1 %v14127_v59  ;;  %v6953_v35 = vld [vmem:[#allocation2 + $0x1c7] sm:$0x7] }
 0xfc3   : > { %13261 = vmatprep.subr.bf16.mxu0 %v18211_v53  ;;  %13321 = vmatprep.subr.bf16.mxu1 %v18211_v53 }
 0xfc4   : > { %v11947_v9 = vpop.f32.mrf.mxu1 }
 0xfc5   : > { %v16753_v44 = vadd.f32 %v11947_v9, %v11946_v29  ;;  %v6951_v9 = vld [vmem:[#allocation2 + $0x1b7] sm:$0xff] }
 0xfc6   : > { %v11949_v5 = vpop.f32.mrf.mxu1  ;;  %7205 = vmatmul.mubr.bf16.gmra.mxu1 %v6970_v0  ;;  %v6952_v0 = vld [vmem:[#allocation2 + $0x1bf] sm:$0xff] }
 0xfc7   : > { %7212 = vmatprep.mubr.bf16.mxu1 %v16694_v8  ;;  %v6977_v38 = vpack.c.bf16 %v6952_v0, %v6951_v9  ;;  %13322 = vmatpush3.bf16.msra.mxu1 %v14129_v10  ;;  %v6928_v10 = vld [vmem:[#allocation2 + $0x1c6] sm:$0x7] }
 0xfc8   : > { %v11950_v3 = vpop.f32.mrf.mxu1  ;;  %13375 = vmatprep.subr.bf16.mxu1 %v18211_v53 }
 0xfc9   : > { %v16757_v24 = vadd.f32 %v11950_v3, %v11949_v5  ;;  %v6974_v5 = vpack.c.bf16 %v6925_v50, %v6924_v18  ;;  %v14128_v3 = vld [vmem:[%s14369_s9] sm:$0xff]   ;;  %v6979_v50 = vpack.c.bf16 %v6953_v35, %v6953_v35  ;;  %v12103_v35 = vadd.f32 %v16481_v1, %v16479_v28 }
 0xfca   : > { %v11952_v23 = vpop.f32.mrf.mxu1  ;;  %13262 = vmatpush3.bf16.msra.mxu0 %v14128_v3 }
 0xfcc   : > { %v11953_v34 = vpop.f32.mrf.mxu1 }
 0xfcd   : > { %v16761_v41 = vadd.f32 %v11953_v34, %v11952_v23  ;;  %v18287_v34 = vmov 0  }
 0xfce   : > { %v11955_v2 = vpop.f32.mrf.mxu1  ;;  %7213 = vmatmul.mubr.bf16.gmra.mxu1 %v6972_v13  ;;  %7779 = vmatprep.subr.bf16.mxu0 %v18287_v34 }
 0xfcf   : > { %7220 = vmatprep.mubr.bf16.mxu1 %v16699_v26 }
 0xfd0   : > { %v11956_v8 = vpop.f32.mrf.mxu1 }
 0xfd1   : > { %v16767_v16 = vadd.f32 %v11956_v8, %v11955_v2  ;;  %v6927_v2 = vld [vmem:[#allocation2 + $0x1be] sm:$0xff] }
 0xfd2   : > { %v16769_v29 = vpop.f32.mrf.mxu1  ;;  %v6976_v18 = vpack.c.bf16 %v6927_v2, %v6926_v37 }
 0xfd4   : > { %v16773_v26 = vpop.f32.mrf.mxu1 }
 0xfd6   : > { %v11961_v55 = vpop.f32.mrf.mxu1  ;;  %7221 = vmatmul.mubr.bf16.gmra.mxu1 %v6974_v5  ;;  %v6073_v5 = vadd.f32 %v16702_v22, %v16400_v46  ;;  %v6081_v22 = vadd.f32 %v16707_v62, %v16409_v52  ;;  %v6089_v52 = vadd.f32 %v16712_v56, %v16425_v57  ;;  %v6097_v57 = vadd.f32 %v16717_v51, %v16436_v45  ;;  %v18288_v45 = vld [vmem:[#allocation4_spill] sm:$0xff] }
 0xfd7   : > { %7228 = vmatprep.mubr.bf16.mxu1 %v6977_v38  ;;  %v6105_v51 = vadd.f32 %v16722_v60, %v18288_v45  ;;  %v18293_v60 = vld [vmem:[#allocation6_spill] sm:$0xff] }
 0xfd8   : > { %v11962_v23 = vpop.f32.mrf.mxu1 }
 0xfd9   : > { %v16779_v13 = vadd.f32 %v11962_v23, %v11961_v55  ;;  %v6978_v23 = vpack.c.bf16 %v6928_v10, %v6928_v10 }
 0xfda   : > { %v11964_v8 = vpop.f32.mrf.mxu1 }
 0xfdb   : > { %v6076_v8 = vadd.f32 %v16704_v49, %v16404_v27 }
 0xfdc   : > { %v11965_v59 = vpop.f32.mrf.mxu1 }
 0xfde   : > { %v12004_v9 = vpop.f32.mrf.mxu1  ;;  %7229 = vmatmul.mubr.bf16.gmra.mxu1 %v6976_v18 }
 0xfdf   : > { %7236 = vmatprep.mubr.bf16.mxu1 %v6979_v50 }
 0xfe0   : > { %v12005_v0 = vpop.f32.mrf.mxu1 }
 0xfe1   : > { %v12006_v3 = vadd.f32 %v12005_v0, %v12004_v9 }
 0xfe2   : > { %v12007_v38 = vpop.f32.mrf.mxu1 }
 0xfe3   : > { %v6514_v20 = vadd.f32 %v12006_v3, %v6073_v5 }
 0xfe4   : > { %v12008_v55 = vpop.f32.mrf.mxu1 }
 0xfe5   : > { %v12009_v34 = vadd.f32 %v12008_v55, %v12007_v38  ;;  %v16786_v37 = vadd.f32 %v16477_v17, %v6514_v20  ;;  %v6084_v20 = vadd.f32 %v16709_v42, %v16416_v14  ;;  %v6092_v14 = vadd.f32 %v16714_v25, %v16431_v31 }
 0xfe6   : > { %v12010_v2 = vpop.f32.mrf.mxu1  ;;  %7237 = vmatmul.mubr.bf16.gmra.mxu1 %v6978_v23  ;;  %v6100_v31 = vadd.f32 %v16719_v7, %v16439_v33  ;;  %v18289_v33 = vld [vmem:[#allocation5_spill] sm:$0xff] }
 0xfe7   : > { %v6515_v59 = vadd.f32 %v12009_v34, %v6076_v8  ;;  %13323 = vmatprep.mubr.msk.bf16.mxu1 %vm14245_vm0, %v18211_v53  ;;  %v12109_v34 = vadd.f32 %v16493_v19, %v16486_v32  ;;  %v12115_v32 = vadd.f32 %v16499_v54, %v16497_v39  ;;  %v12121_v39 = vadd.f32 %v16505_v43, %v16503_v6  ;;  %v18291_v43 = vld [vmem:[#allocation22_spill] sm:$0xff]  ;;  %v18292_v6 = vld [vmem:[#allocation23_spill] sm:$0xff] }
 0xfe8   : > { %v12011_v46 = vpop.f32.mrf.mxu1  ;;  %v6108_v7 = vadd.f32 %v16724_v40, %v18289_v33  ;;  %v18294_v40 = vld [vmem:[#allocation7_spill] sm:$0xff] }
 0xfe9   : > { %v12012_v18 = vadd.f32 %v12011_v46, %v12010_v2  ;;  %v16794_v50 = vadd.f32 %v12103_v35, %v6515_v59 }
 0xfea   : > { %v12013_v27 = vpop.f32.mrf.mxu1 }
 0xfeb   : > { %v6516_v49 = vadd.f32 %v12012_v18, %v6081_v22 }
 0xfec   : > { %v12014_v17 = vpop.f32.mrf.mxu1 }
 0xfed   : > { %v12015_v9 = vadd.f32 %v12014_v17, %v12013_v27  ;;  %v16799_v1 = vadd.f32 %v16484_v4, %v6516_v49 }
 0xfee   : > { %v12016_v28 = vpop.f32.mrf.mxu1 }
 0xfef   : > { %v6517_v0 = vadd.f32 %v12015_v9, %v6084_v20 }
 0xff0   : > { %v12017_v5 = vpop.f32.mrf.mxu1 }
 0xff1   : > { %v12018_v62 = vadd.f32 %v12017_v5, %v12016_v28  ;;  %v16805_v3 = vadd.f32 %v12109_v34, %v6517_v0  ;;  %v18290_v28 = vld [vmem:[#allocation21_spill] sm:$0xff]  ;;  %v12127_v5 = vadd.f32 %v18292_v6, %v18291_v43 }
 0xff2   : > { %v12019_v10 = vpop.f32.mrf.mxu1 }
 0xff3   : > { %v6518_v38 = vadd.f32 %v12018_v62, %v6089_v52 }
 0xff4   : > { %v12020_v55 = vpop.f32.mrf.mxu1 }
 0xff5   : > { %v12021_v4 = vadd.f32 %v12020_v55, %v12019_v10  ;;  %v16810_v42 = vadd.f32 %v16495_v15, %v6518_v38  ;;  %v6113_v10 = vadd.f32 %v16728_v47, %v18293_v60  ;;  %v18298_v47 = vld [vmem:[#allocation8_spill] sm:$0xff] }
 0xff6   : > { %v12022_v23 = vpop.f32.mrf.mxu1 }
 0xff7   : > { %v6519_v19 = vadd.f32 %v12021_v4, %v6092_v14 }
 0xff8   : > { %v12023_v8 = vpop.f32.mrf.mxu1 }
 0xff9   : > { %v12024_v56 = vadd.f32 %v12023_v8, %v12022_v23  ;;  %v16816_v2 = vadd.f32 %v12115_v32, %v6519_v19  ;;  %v6116_v32 = vadd.f32 %v16731_v12, %v18294_v40  ;;  %v18295_v8 = vld [vmem:[#allocation24_spill] sm:$0xff]  ;;  %v18299_v12 = vld [vmem:[#allocation9_spill] sm:$0xff] }
 0xffa   : > { %v12025_v35 = vpop.f32.mrf.mxu1 }
 0xffb   : > { %v6520_v59 = vadd.f32 %v12024_v56, %v6097_v57 }
 0xffc   : > { %v12026_v46 = vpop.f32.mrf.mxu1 }
 0xffd   : > { %v12027_v15 = vadd.f32 %v12026_v46, %v12025_v35  ;;  %v16821_v25 = vadd.f32 %v16501_v11, %v6520_v59  ;;  %v18296_v35 = vld [vmem:[#allocation25_spill] sm:$0xff]  ;;  %v18297_v59 = vld [vmem:[#allocation26_spill] sm:$0xff] }
 0xffe   : > { %v12028_v22 = vpop.f32.mrf.mxu1  ;;  %v12133_v46 = vadd.f32 %v18297_v59, %v18296_v35 }
 0xfff   : > { %v6521_v54 = vadd.f32 %v12027_v15, %v6100_v31 }
0x1000   : > { %v12029_v18 = vpop.f32.mrf.mxu1 }
0x1001   : > { %v12030_v27 = vadd.f32 %v12029_v18, %v12028_v22  ;;  %v16827_v49 = vadd.f32 %v12121_v39, %v6521_v54  ;;  %v6121_v22 = vadd.f32 %v16734_v58, %v18298_v47  ;;  %v18303_v58 = vld [vmem:[#allocation10_spill] sm:$0xff] }
0x1002   : > { %v12031_v17 = vpop.f32.mrf.mxu1  ;;  %v6129_v6 = vadd.f32 %v16739_v36, %v18303_v58  ;;  %v18308_v36 = vld [vmem:[#allocation12_spill] sm:$0xff] }
0x1003   : > { %v6522_v20 = vadd.f32 %v12030_v27, %v6105_v51  ;;  %v6124_v27 = vadd.f32 %v16736_v48, %v18299_v12  ;;  %v18304_v48 = vld [vmem:[#allocation11_spill] sm:$0xff]  ;;  %v6137_v59 = vadd.f32 %v16744_v63, %v18308_v36  ;;  %v18313_v63 = vld [vmem:[#allocation14_spill] sm:$0xff] }
0x1004   : > { %v12032_v9 = vpop.f32.mrf.mxu1 }
0x1005   : > { %v12033_v11 = vadd.f32 %v12032_v9, %v12031_v17  ;;  %v16832_v34 = vadd.f32 %v18290_v28, %v6522_v20  ;;  %v18300_v20 = vld [vmem:[#allocation27_spill] sm:$0xff] }
0x1006   : > { %v12034_v0 = vpop.f32.mrf.mxu1 }
0x1007   : > { %v6523_v52 = vadd.f32 %v12033_v11, %v6108_v7  ;;  %v18301_v7 = vld [vmem:[#allocation28_spill] sm:$0xff]  ;;  %v18302_v11 = vld [vmem:[#allocation29_spill] sm:$0xff] }
0x1008   : > { %v12035_v62 = vpop.f32.mrf.mxu1  ;;  %v12139_v28 = vadd.f32 %v18302_v11, %v18301_v7  ;;  %v6145_v11 = vadd.f32 %v16751_v61, %v18313_v63  ;;  %v18318_v61 = vld [vmem:[#allocation16_spill] sm:$0xff] }
0x1009   : > { %v12036_v38 = vadd.f32 %v12035_v62, %v12034_v0  ;;  %v16838_v55 = vadd.f32 %v12127_v5, %v6523_v52 }
0x100a   : > { %v12037_v14 = vpop.f32.mrf.mxu1 }
0x100b   : > { %v6524_v4 = vadd.f32 %v12036_v38, %v6113_v10  ;;  %v6132_v38 = vadd.f32 %v16741_v30, %v18304_v48  ;;  %v18309_v30 = vld [vmem:[#allocation13_spill] sm:$0xff] }
0x100c   : > { %v12038_v23 = vpop.f32.mrf.mxu1 }
0x100d   : > { %v12039_v19 = vadd.f32 %v12038_v23, %v12037_v14  ;;  %v16843_v57 = vadd.f32 %v18295_v8, %v6524_v4  ;;  %v18305_v4 = vld [vmem:[#allocation30_spill] sm:$0xff] }
0x100e   : > { %v12040_v56 = vpop.f32.mrf.mxu1 }
0x100f   : > { %v6525_v31 = vadd.f32 %v12039_v19, %v6116_v32  ;;  %v18306_v32 = vld [vmem:[#allocation31_spill] sm:$0xff]  ;;  %v18307_v19 = vld [vmem:[#allocation32_spill] sm:$0xff] }
0x1010   : > { %v12041_v15 = vpop.f32.mrf.mxu1  ;;  %v12145_v8 = vadd.f32 %v18307_v19, %v18306_v32  ;;  %v6153_v19 = vadd.f32 %v16757_v24, %v18318_v61  ;;  %v18323_v24 = vld [vmem:[#allocation18_spill] sm:$0xff] }
0x1011   : > { %v12042_v39 = vadd.f32 %v12041_v15, %v12040_v56  ;;  %v16849_v54 = vadd.f32 %v12133_v46, %v6525_v31 }
0x1012   : > { %v12043_v18 = vpop.f32.mrf.mxu1 }
0x1013   : > { %v6526_v45 = vadd.f32 %v12042_v39, %v6121_v22  ;;  %v6140_v39 = vadd.f32 %v16747_v21, %v18309_v30  ;;  %v18314_v21 = vld [vmem:[#allocation15_spill] sm:$0xff] }
0x1014   : > { %v12044_v51 = vpop.f32.mrf.mxu1 }
0x1015   : > { %v12045_v17 = vadd.f32 %v12044_v51, %v12043_v18  ;;  %v16854_v9 = vadd.f32 %v18300_v20, %v6526_v45  ;;  %v18310_v45 = vld [vmem:[#allocation33_spill] sm:$0xff] }
0x1016   : > { %v12046_v33 = vpop.f32.mrf.mxu1 }
0x1017   : > { %v6527_v0 = vadd.f32 %v12045_v17, %v6124_v27  ;;  %v18311_v27 = vld [vmem:[#allocation34_spill] sm:$0xff]  ;;  %v18312_v17 = vld [vmem:[#allocation35_spill] sm:$0xff] }
0x1018   : > { %v12047_v43 = vpop.f32.mrf.mxu1  ;;  %v12151_v20 = vadd.f32 %v18312_v17, %v18311_v27  ;;  %v6161_v17 = vadd.f32 %v16767_v16, %v18323_v24 }
0x1019   : > { %v12048_v5 = vadd.f32 %v12047_v43, %v12046_v33  ;;  %v16860_v52 = vadd.f32 %v12139_v28, %v6527_v0 }
0x101a   : > { %v12049_v62 = vpop.f32.mrf.mxu1 }
0x101b   : > { %v6528_v60 = vadd.f32 %v12048_v5, %v6129_v6  ;;  %v6148_v5 = vadd.f32 %v16753_v44, %v18314_v21  ;;  %v18319_v44 = vld [vmem:[#allocation17_spill] sm:$0xff] }
0x101c   : > { %v12050_v10 = vpop.f32.mrf.mxu1 }
0x101d   : > { %v12051_v14 = vadd.f32 %v12050_v10, %v12049_v62  ;;  %v16865_v23 = vadd.f32 %v18305_v4, %v6528_v60  ;;  %v18315_v60 = vld [vmem:[#allocation36_spill] sm:$0xff] }
0x101e   : > { %v12052_v40 = vpop.f32.mrf.mxu1 }
0x101f   : > { %v6529_v56 = vadd.f32 %v12051_v14, %v6132_v38  ;;  %v18316_v38 = vld [vmem:[#allocation37_spill] sm:$0xff]  ;;  %v18317_v14 = vld [vmem:[#allocation38_spill] sm:$0xff] }
0x1020   : > { %v12053_v35 = vpop.f32.mrf.mxu1  ;;  %v12157_v4 = vadd.f32 %v18317_v14, %v18316_v38  ;;  %v18328_v14 = vld [vmem:[#allocation20_spill] sm:$0xff] }
0x1021   : > { %v12054_v46 = vadd.f32 %v12053_v35, %v12052_v40  ;;  %v16871_v31 = vadd.f32 %v12145_v8, %v6529_v56 }
0x1022   : > { %v12055_v15 = vpop.f32.mrf.mxu1 }
0x1023   : > { %v6530_v47 = vadd.f32 %v12054_v46, %v6137_v59  ;;  %v6156_v46 = vadd.f32 %v16761_v41, %v18319_v44 }
0x1024   : > { %v12056_v22 = vpop.f32.mrf.mxu1 }
0x1025   : > { %v12057_v18 = vadd.f32 %v12056_v22, %v12055_v15  ;;  %v16876_v51 = vadd.f32 %v18310_v45, %v6530_v47  ;;  %v18320_v47 = vld [vmem:[#allocation39_spill] sm:$0xff] }
0x1026   : > { %v12058_v12 = vpop.f32.mrf.mxu1 }
0x1027   : > { %v6531_v33 = vadd.f32 %v12057_v18, %v6140_v39  ;;  %v18321_v39 = vld [vmem:[#allocation40_spill] sm:$0xff]  ;;  %v18322_v18 = vld [vmem:[#allocation41_spill] sm:$0xff] }
0x1028   : > { %v12059_v7 = vpop.f32.mrf.mxu1  ;;  %v12163_v45 = vadd.f32 %v18322_v18, %v18321_v39 }
0x1029   : > { %v12060_v28 = vadd.f32 %v12059_v7, %v12058_v12  ;;  %v16882_v0 = vadd.f32 %v12151_v20, %v6531_v33  ;;  %v11960_v20 = vadd.f32 %v16773_v26, %v16769_v29  ;;  %v6169_v29 = vadd.f32 %v16779_v13, %v18328_v14  ;;  %v16923_v13 = vld [vmem:[%s14462_s14 + $0x1] ss:$0 sm:$0xff] }
0x102a   : > { %v12061_v43 = vpop.f32.mrf.mxu1 }
0x102b   : > { %v6532_v58 = vadd.f32 %v12060_v28, %v6145_v11  ;;  %v18324_v28 = vld [vmem:[#allocation19_spill] sm:$0xff] }
0x102c   : > { %v12062_v6 = vpop.f32.mrf.mxu1 }
0x102d   : > { %v12063_v62 = vadd.f32 %v12062_v6, %v12061_v43  ;;  %v16887_v10 = vadd.f32 %v18315_v60, %v6532_v58  ;;  %v6164_v43 = vadd.f32 %v11960_v20, %v18324_v28  ;;  %v18325_v6 = vld [vmem:[#allocation42_spill] sm:$0xff]  ;;  %v18327_v60 = vld [vmem:[#allocation44_spill] sm:$0xff] }
0x102e   : > { %v12064_v48 = vpop.f32.mrf.mxu1 }
0x102f   : > { %v6533_v40 = vadd.f32 %v12063_v62, %v6148_v5  ;;  %v18326_v62 = vld [vmem:[#allocation43_spill] sm:$0xff] }
0x1030   : > { %v12065_v32 = vpop.f32.mrf.mxu1 }
0x1031   : > { %v12066_v8 = vadd.f32 %v12065_v32, %v12064_v48  ;;  %v16893_v56 = vadd.f32 %v12157_v4, %v6533_v40  ;;  %v12169_v48 = vadd.f32 %v18327_v60, %v18326_v62 }
0x1032   : > { %v12067_v35 = vpop.f32.mrf.mxu1 }
0x1033   : > { %v6534_v36 = vadd.f32 %v12066_v8, %v6153_v19  ;;  %v18329_v19 = vld [vmem:[#allocation45_spill] sm:$0xff] }
0x1034   : > { %v12068_v59 = vpop.f32.mrf.mxu1 }
0x1035   : > { %v12069_v15 = vadd.f32 %v12068_v59, %v12067_v35  ;;  %v16898_v22 = vadd.f32 %v18320_v47, %v6534_v36 }
0x1036   : > { %v12070_v30 = vpop.f32.mrf.mxu1 }
0x1037   : > { %v6535_v12 = vadd.f32 %v12069_v15, %v6156_v46 }
0x1038   : > { %v12071_v27 = vpop.f32.mrf.mxu1 }
0x1039   : > { %v12072_v33 = vadd.f32 %v12071_v27, %v12070_v30  ;;  %v16906_v7 = vadd.f32 %v12163_v45, %v6535_v12 }
0x103a   : > { %v12073_v41 = vpop.f32.mrf.mxu1 }
0x103b   : > { %v6536_v63 = vadd.f32 %v12072_v33, %v6161_v17 }
0x103c   : > { %v12074_v11 = vpop.f32.mrf.mxu1 }
0x103d   : > { %v12075_v58 = vadd.f32 %v12074_v11, %v12073_v41  ;;  %v16910_v21 = vadd.f32 %v18325_v6, %v6536_v63  ;;  %v14130_v11 = vld [vmem:[%s14369_s9 + $0x58] sm:$0xff]  }
0x103e   : > { %v12076_v5 = vpop.f32.mrf.mxu1 }
0x103f   : > { %v6537_v16 = vadd.f32 %v12075_v58, %v6164_v43 }
0x1040   : > { %v12077_v38 = vpop.f32.mrf.mxu1 }
0x1041   : > { %v12078_v26 = vadd.f32 %v12077_v38, %v12076_v5  ;;  %v16916_v4 = vadd.f32 %v12169_v48, %v6537_v16  ;;  %v14131_v5 = vld [vmem:[%s14369_s9 + $0x50] sm:$0xff]  }
0x1042   : > { %v12079_v40 = vpop.f32.mrf.mxu1 }
0x1043   : > { %v6538_v32 = vadd.f32 %v12078_v26, %v6169_v29  ;;  %v14132_v29 = vld [vmem:[%s14369_s9 + $0x48] sm:$0xff]  }
0x1044   : > { %v12080_v61 = vpop.f32.mrf.mxu1 }
0x1045   : > { %v16919_v8 = vadd.f32 %v18329_v19, %v6538_v32 }
0x1046   : > { %v12192_v35 = vpop.f32.mrf.mxu1 }
0x1048   : > { %v12193_v36 = vpop.f32.mrf.mxu1 }
0x1049   : > { %v12194_v59 = vadd.f32 %v12193_v36, %v12192_v35  ;;  %v14133_v35 = vld [vmem:[%s14369_s9 + $0x40] sm:$0xff]  }
0x104a   : > { %v12195_v44 = vpop.f32.mrf.mxu1 }
0x104b   : > { %v7244_v46 = vadd.f32 %v12194_v59, %v16786_v37 }
0x104c   : > { %v12196_v15 = vpop.f32.mrf.mxu1 }
0x104d   : > { %v12197_v47 = vadd.f32 %v12196_v15, %v12195_v44  ;;  %v7269_v39 = vadd.f32 %v16923_v13, %v7244_v46 }
0x104e   : > { %v12198_v30 = vpop.f32.mrf.mxu1 }
0x104f   : > { %v7245_v18 = vadd.f32 %v12197_v47, %v16794_v50  ;;  %v7294_v17 = vmax.f32 %v7269_v39, 0.0  ;;  %v18330_v39 = vmov 0  }
0x1050   : > { %v12199_v45 = vpop.f32.mrf.mxu1 }
0x1051   : > { %v7270_v12 = vadd.f32 %v16923_v13, %v7245_v18  ;;  %v12200_v27 = vadd.f32 %v12199_v45, %v12198_v30 }
0x1052   : > { %v12201_v24 = vpop.f32.mrf.mxu1 }
0x1053   : > { %v7295_v20 = vmax.f32 %v7270_v12, 0.0  ;;  %v7246_v33 = vadd.f32 %v12200_v27, %v16799_v1 }
0x1054   : > { %v12202_v37 = vpop.f32.mrf.mxu1 }
0x1055   : > { %v16929_v41 = vpack.c.bf16 %v7295_v20, %v7294_v17  ;;  %v12203_v63 = vadd.f32 %v12202_v37, %v12201_v24  ;;  %v7271_v43 = vadd.f32 %v16923_v13, %v7246_v33 }
0x1056   : > { %v12204_v28 = vpop.f32.mrf.mxu1 }
0x1057   : > { %v7247_v50 = vadd.f32 %v12203_v63, %v16805_v3  ;;  %13264 = vmatmul.mubr.msk.bf16.vlgmr.msra.gmra.mxu0 %vm2929_vm1, %v16929_v41  ;;  %13324 = vmatmul.mubr.msk.bf16.vlgmr.msra.gmra.mxu1 %vm2929_vm1, %v16929_v41  ;;  %v7296_v62 = vmax.f32 %v7271_v43, 0.0 }
0x1058   : > { %v12205_v58 = vpop.f32.mrf.mxu1  ;;  %13267 = vmatprep.mubr.msk.bf16.mxu0 %vm14245_vm0, %v18211_v53  ;;  %13327 = vmatprep.mubr.msk.bf16.mxu1 %vm14245_vm0, %v18211_v53 }
0x1059   : > { %v7272_v1 = vadd.f32 %v16923_v13, %v7247_v50  ;;  %v12206_v6 = vadd.f32 %v12205_v58, %v12204_v28  ;;  %13376 = vmatpush3.bf16.msra.mxu1 %v14130_v11 }
0x105a   : > { %v12207_v3 = vpop.f32.mrf.mxu1  ;;  %13377 = vmatprep.subr.bf16.mxu1 %v18211_v53 }
0x105b   : > { %v7297_v60 = vmax.f32 %v7272_v1, 0.0  ;;  %v7248_v48 = vadd.f32 %v12206_v6, %v16810_v42 }
0x105c   : > { %v12208_v16 = vpop.f32.mrf.mxu1 }
0x105d   : > { %v16946_v38 = vpack.c.bf16 %v7297_v60, %v7296_v62  ;;  %v12209_v14 = vadd.f32 %v12208_v16, %v12207_v3  ;;  %13378 = vmatpush3.bf16.msra.mxu1 %v14131_v5  ;;  %v7273_v40 = vadd.f32 %v16923_v13, %v7248_v48 }
0x105e   : > { %v12210_v26 = vpop.f32.mrf.mxu1  ;;  %13379 = vmatprep.subr.bf16.mxu1 %v18211_v53 }
0x105f   : > { %v7249_v32 = vadd.f32 %v12209_v14, %v16816_v2  ;;  %13268 = vmatmul.mubr.msk.bf16.gmra.mxu0 %vm2929_vm1, %v16946_v38  ;;  %13328 = vmatmul.mubr.msk.bf16.gmra.mxu1 %vm2929_vm1, %v16946_v38  ;;  %v7298_v2 = vmax.f32 %v7273_v40, 0.0 }
0x1060   : > { %v12211_v42 = vpop.f32.mrf.mxu1  ;;  %13271 = vmatprep.mubr.msk.bf16.mxu0 %vm14245_vm0, %v18211_v53  ;;  %13331 = vmatprep.mubr.msk.bf16.mxu1 %vm14245_vm0, %v18211_v53 }
0x1061   : > { %v7274_v61 = vadd.f32 %v16923_v13, %v7249_v32  ;;  %v12212_v19 = vadd.f32 %v12211_v42, %v12210_v26  ;;  %13380 = vmatpush3.bf16.msra.mxu1 %v14132_v29 }
0x1062   : > { %v12213_v36 = vpop.f32.mrf.mxu1  ;;  %13381 = vmatprep.subr.bf16.mxu1 %v18211_v53 }
0x1063   : > { %v7299_v59 = vmax.f32 %v7274_v61, 0.0  ;;  %v7250_v44 = vadd.f32 %v12212_v19, %v16821_v25 }
0x1064   : > { %v12214_v46 = vpop.f32.mrf.mxu1 }
0x1065   : > { %v16964_v15 = vpack.c.bf16 %v7299_v59, %v7298_v2  ;;  %v12215_v47 = vadd.f32 %v12214_v46, %v12213_v36  ;;  %13382 = vmatpush3.bf16.msra.mxu1 %v14133_v35  ;;  %v7275_v18 = vadd.f32 %v16923_v13, %v7250_v44 }
0x1066   : > { %v12216_v30 = vpop.f32.mrf.mxu1  ;;  %8432 = vmatprep.subr.bf16.mxu1 %v18330_v39 }
0x1067   : > { %v7251_v45 = vadd.f32 %v12215_v47, %v16827_v49  ;;  %13272 = vmatmul.mubr.msk.bf16.gmra.mxu0 %vm2929_vm1, %v16964_v15  ;;  %13332 = vmatmul.mubr.msk.bf16.gmra.mxu1 %vm2929_vm1, %v16964_v15  ;;  %v7300_v17 = vmax.f32 %v7275_v18, 0.0 }
0x1068   : > { %v12217_v12 = vpop.f32.mrf.mxu1  ;;  %13275 = vmatprep.mubr.msk.bf16.mxu0 %vm14245_vm0, %v18211_v53  ;;  %13335 = vmatprep.mubr.msk.bf16.mxu1 %vm14245_vm0, %v18211_v53 }
0x1069   : > { %v7276_v25 = vadd.f32 %v16923_v13, %v7251_v45  ;;  %v12218_v27 = vadd.f32 %v12217_v12, %v12216_v30 }
0x106a   : > { %v12219_v24 = vpop.f32.mrf.mxu1 }
0x106b   : > { %v7301_v20 = vmax.f32 %v7276_v25, 0.0  ;;  %v7252_v49 = vadd.f32 %v12218_v27, %v16832_v34 }
0x106c   : > { %v12220_v33 = vpop.f32.mrf.mxu1 }
0x106d   : > { %v16979_v37 = vpack.c.bf16 %v7301_v20, %v7300_v17  ;;  %v12221_v63 = vadd.f32 %v12220_v33, %v12219_v24  ;;  %v7277_v28 = vadd.f32 %v16923_v13, %v7252_v49 }
0x106e   : > { %v12222_v11 = vpop.f32.mrf.mxu1 }
0x106f   : > { %v7253_v43 = vadd.f32 %v12221_v63, %v16838_v55  ;;  %13276 = vmatmul.mubr.msk.bf16.gmra.mxu0 %vm2929_vm1, %v16979_v37  ;;  %13336 = vmatmul.mubr.msk.bf16.gmra.mxu1 %vm2929_vm1, %v16979_v37  ;;  %v7302_v6 = vmax.f32 %v7277_v28, 0.0 }
0x1070   : > { %v12223_v50 = vpop.f32.mrf.mxu1  ;;  %13279 = vmatprep.mubr.msk.bf16.mxu0 %vm14245_vm0, %v18211_v53  ;;  %13339 = vmatprep.mubr.msk.bf16.mxu1 %vm14245_vm0, %v18211_v53 }
0x1071   : > { %v7278_v34 = vadd.f32 %v16923_v13, %v7253_v43  ;;  %v12224_v58 = vadd.f32 %v12223_v50, %v12222_v11 }
0x1072   : > { %v12225_v1 = vpop.f32.mrf.mxu1 }
0x1073   : > { %v7303_v5 = vmax.f32 %v7278_v34, 0.0  ;;  %v7254_v55 = vadd.f32 %v12224_v58, %v16843_v57 }
0x1074   : > { %v12226_v3 = vpop.f32.mrf.mxu1 }
0x1075   : > { %v16993_v62 = vpack.c.bf16 %v7303_v5, %v7302_v6  ;;  %v12227_v60 = vadd.f32 %v12226_v3, %v12225_v1  ;;  %v7279_v16 = vadd.f32 %v16923_v13, %v7254_v55 }
0x1076   : > { %v12228_v48 = vpop.f32.mrf.mxu1 }
0x1077   : > { %v7255_v14 = vadd.f32 %v12227_v60, %v16849_v54  ;;  %13280 = vmatmul.mubr.msk.bf16.gmra.mxu0 %vm2929_vm1, %v16993_v62  ;;  %13340 = vmatmul.mubr.msk.bf16.gmra.mxu1 %vm2929_vm1, %v16993_v62  ;;  %v7304_v32 = vmax.f32 %v7279_v16, 0.0 }
0x1078   : > { %v12229_v29 = vpop.f32.mrf.mxu1  ;;  %13283 = vmatprep.mubr.msk.bf16.mxu0 %vm14245_vm0, %v18211_v53  ;;  %13343 = vmatprep.mubr.msk.bf16.mxu1 %vm14245_vm0, %v18211_v53 }
0x1079   : > { %v7280_v57 = vadd.f32 %v16923_v13, %v7255_v14  ;;  %v12230_v26 = vadd.f32 %v12229_v29, %v12228_v48 }
0x107a   : > { %v12231_v40 = vpop.f32.mrf.mxu1 }
0x107b   : > { %v7305_v42 = vmax.f32 %v7280_v57, 0.0  ;;  %v7256_v54 = vadd.f32 %v12230_v26, %v16854_v9 }
0x107c   : > { %v12232_v61 = vpop.f32.mrf.mxu1 }
0x107d   : > { %v17007_v19 = vpack.c.bf16 %v7305_v42, %v7304_v32  ;;  %v12233_v35 = vadd.f32 %v12232_v61, %v12231_v40  ;;  %v7281_v2 = vadd.f32 %v16923_v13, %v7256_v54 }
0x107e   : > { %v12234_v36 = vpop.f32.mrf.mxu1 }
0x107f   : > { %v7257_v59 = vadd.f32 %v12233_v35, %v16860_v52  ;;  %13284 = vmatmul.mubr.msk.bf16.gmra.mxu0 %vm2929_vm1, %v17007_v19  ;;  %13344 = vmatmul.mubr.msk.bf16.gmra.mxu1 %vm2929_vm1, %v17007_v19  ;;  %v7306_v30 = vmax.f32 %v7281_v2, 0.0 }
0x1080   : > { %v12235_v44 = vpop.f32.mrf.mxu1  ;;  %13287 = vmatprep.mubr.msk.bf16.mxu0 %vm14245_vm0, %v18211_v53  ;;  %13347 = vmatprep.mubr.msk.bf16.mxu1 %vm14245_vm0, %v18211_v53 }
0x1081   : > { %v7282_v9 = vadd.f32 %v16923_v13, %v7257_v59  ;;  %v12236_v46 = vadd.f32 %v12235_v44, %v12234_v36 }
0x1082   : > { %v12237_v47 = vpop.f32.mrf.mxu1 }
0x1083   : > { %v7307_v18 = vmax.f32 %v7282_v9, 0.0  ;;  %v7258_v52 = vadd.f32 %v12236_v46, %v16865_v23 }
0x1084   : > { %v12238_v45 = vpop.f32.mrf.mxu1 }
0x1085   : > { %v17021_v12 = vpack.c.bf16 %v7307_v18, %v7306_v30  ;;  %v12239_v25 = vadd.f32 %v12238_v45, %v12237_v47  ;;  %v7283_v24 = vadd.f32 %v16923_v13, %v7258_v52 }
0x1086   : > { %v12240_v27 = vpop.f32.mrf.mxu1 }
0x1087   : > { %v7259_v17 = vadd.f32 %v12239_v25, %v16871_v31  ;;  %13288 = vmatmul.mubr.msk.bf16.gmra.mxu0 %vm2929_vm1, %v17021_v12  ;;  %13348 = vmatmul.mubr.msk.bf16.gmra.mxu1 %vm2929_vm1, %v17021_v12  ;;  %v7308_v63 = vmax.f32 %v7283_v24, 0.0 }
0x1088   : > { %v12241_v20 = vpop.f32.mrf.mxu1  ;;  %13291 = vmatprep.mubr.msk.bf16.mxu0 %vm14245_vm0, %v18211_v53  ;;  %13351 = vmatprep.mubr.msk.bf16.mxu1 %vm14245_vm0, %v18211_v53 }
0x1089   : > { %v7284_v23 = vadd.f32 %v16923_v13, %v7259_v17  ;;  %v12242_v49 = vadd.f32 %v12241_v20, %v12240_v27 }
0x108a   : > { %v12243_v33 = vpop.f32.mrf.mxu1 }
0x108b   : > { %v7309_v11 = vmax.f32 %v7284_v23, 0.0  ;;  %v7260_v31 = vadd.f32 %v12242_v49, %v16876_v51 }
0x108c   : > { %v12244_v28 = vpop.f32.mrf.mxu1 }
0x108d   : > { %v17035_v43 = vpack.c.bf16 %v7309_v11, %v7308_v63  ;;  %v12245_v50 = vadd.f32 %v12244_v28, %v12243_v33  ;;  %v7285_v58 = vadd.f32 %v16923_v13, %v7260_v31 }
0x108e   : > { %v12246_v34 = vpop.f32.mrf.mxu1 }
0x108f   : > { %v7261_v1 = vadd.f32 %v12245_v50, %v16882_v0  ;;  %13292 = vmatmul.mubr.msk.bf16.gmra.mxu0 %vm2929_vm1, %v17035_v43  ;;  %13352 = vmatmul.mubr.msk.bf16.gmra.mxu1 %vm2929_vm1, %v17035_v43  ;;  %v7310_v3 = vmax.f32 %v7285_v58, 0.0 }
0x1090   : > { %v12247_v6 = vpop.f32.mrf.mxu1  ;;  %13295 = vmatprep.mubr.msk.bf16.mxu0 %vm14245_vm0, %v18211_v53  ;;  %13355 = vmatprep.mubr.msk.bf16.mxu1 %vm14245_vm0, %v18211_v53 }
0x1091   : > { %v7286_v51 = vadd.f32 %v16923_v13, %v7261_v1  ;;  %v12248_v5 = vadd.f32 %v12247_v6, %v12246_v34 }
0x1092   : > { %v12249_v55 = vpop.f32.mrf.mxu1 }
0x1093   : > { %v7311_v60 = vmax.f32 %v7286_v51, 0.0  ;;  %v7262_v0 = vadd.f32 %v12248_v5, %v16887_v10 }
0x1094   : > { %v12250_v48 = vpop.f32.mrf.mxu1 }
0x1095   : > { %v17049_v16 = vpack.c.bf16 %v7311_v60, %v7310_v3  ;;  %v12251_v14 = vadd.f32 %v12250_v48, %v12249_v55  ;;  %v7287_v57 = vadd.f32 %v16923_v13, %v7262_v0 }
0x1096   : > { %v12252_v29 = vpop.f32.mrf.mxu1 }
0x1097   : > { %v7263_v26 = vadd.f32 %v12251_v14, %v16893_v56  ;;  %13296 = vmatmul.mubr.msk.bf16.gmra.mxu0 %vm2929_vm1, %v17049_v16  ;;  %13356 = vmatmul.mubr.msk.bf16.gmra.mxu1 %vm2929_vm1, %v17049_v16  ;;  %v7312_v54 = vmax.f32 %v7287_v57, 0.0 }
0x1098   : > { %v12253_v40 = vpop.f32.mrf.mxu1  ;;  %13299 = vmatprep.mubr.msk.bf16.mxu0 %vm14245_vm0, %v18211_v53  ;;  %13359 = vmatprep.mubr.msk.bf16.mxu1 %vm14245_vm0, %v18211_v53 }
0x1099   : > { %v7288_v10 = vadd.f32 %v16923_v13, %v7263_v26  ;;  %v12254_v32 = vadd.f32 %v12253_v40, %v12252_v29 }
0x109a   : > { %v12255_v42 = vpop.f32.mrf.mxu1 }
0x109b   : > { %v7313_v61 = vmax.f32 %v7288_v10, 0.0  ;;  %v7264_v56 = vadd.f32 %v12254_v32, %v16898_v22 }
0x109c   : > { %v12256_v35 = vpop.f32.mrf.mxu1 }
0x109d   : > { %v17063_v36 = vpack.c.bf16 %v7313_v61, %v7312_v54  ;;  %v12257_v2 = vadd.f32 %v12256_v35, %v12255_v42  ;;  %v7289_v44 = vadd.f32 %v16923_v13, %v7264_v56 }
0x109e   : > { %v12258_v59 = vpop.f32.mrf.mxu1 }
0x109f   : > { %v7265_v9 = vadd.f32 %v12257_v2, %v16906_v7  ;;  %13300 = vmatmul.mubr.msk.bf16.gmra.mxu0 %vm2929_vm1, %v17063_v36  ;;  %13360 = vmatmul.mubr.msk.bf16.gmra.mxu1 %vm2929_vm1, %v17063_v36  ;;  %v7314_v18 = vmax.f32 %v7289_v44, 0.0 }
0x10a0   : > { %v12259_v46 = vpop.f32.mrf.mxu1  ;;  %13303 = vmatprep.mubr.msk.bf16.mxu0 %vm14245_vm0, %v18211_v53  ;;  %13363 = vmatprep.mubr.msk.bf16.mxu1 %vm14245_vm0, %v18211_v53 }
0x10a1   : > { %v7290_v22 = vadd.f32 %v16923_v13, %v7265_v9  ;;  %v12260_v47 = vadd.f32 %v12259_v46, %v12258_v59 }
0x10a2   : > { %v12261_v30 = vpop.f32.mrf.mxu1 }
0x10a3   : > { %v7315_v52 = vmax.f32 %v7290_v22, 0.0  ;;  %v7266_v7 = vadd.f32 %v12260_v47, %v16910_v21 }
0x10a4   : > { %v12262_v45 = vpop.f32.mrf.mxu1 }
0x10a5   : > { %v17077_v25 = vpack.c.bf16 %v7315_v52, %v7314_v18  ;;  %v12263_v27 = vadd.f32 %v12262_v45, %v12261_v30  ;;  %v7291_v17 = vadd.f32 %v16923_v13, %v7266_v7 }
0x10a6   : > { %v12264_v24 = vpop.f32.mrf.mxu1 }
0x10a7   : > { %v7267_v20 = vadd.f32 %v12263_v27, %v16916_v4  ;;  %13304 = vmatmul.mubr.msk.bf16.gmra.mxu0 %vm2929_vm1, %v17077_v25  ;;  %13364 = vmatmul.mubr.msk.bf16.gmra.mxu1 %vm2929_vm1, %v17077_v25  ;;  %v7316_v63 = vmax.f32 %v7291_v17, 0.0 }
0x10a8   : > { %v12265_v23 = vpop.f32.mrf.mxu1  ;;  %13307 = vmatprep.mubr.msk.bf16.mxu0 %vm14245_vm0, %v18211_v53  ;;  %13367 = vmatprep.mubr.msk.bf16.mxu1 %vm14245_vm0, %v18211_v53 }
0x10a9   : > { %v7292_v21 = vadd.f32 %v16923_v13, %v7267_v20  ;;  %v12266_v49 = vadd.f32 %v12265_v23, %v12264_v24 }
0x10aa   : > { %v12267_v33 = vpop.f32.mrf.mxu1 }
0x10ab   : > { %v7317_v11 = vmax.f32 %v7292_v21, 0.0  ;;  %v7268_v4 = vadd.f32 %v12266_v49, %v16919_v8  ;;  %v14136_v8 = vld [vmem:[%s18177_s6 + $0x2c] ss:$8 sps:$4 sm:$0xff]  }
0x10ac   : > { %v12268_v31 = vpop.f32.mrf.mxu1 }
0x10ad   : > { %v17091_v28 = vpack.c.bf16 %v7317_v11, %v7316_v63  ;;  %v7293_v50 = vadd.f32 %v16923_v13, %v7268_v4 }
0x10af   : > { %13308 = vmatmul.mubr.msk.bf16.gmra.mxu0 %vm2929_vm1, %v17091_v28  ;;  %13368 = vmatmul.mubr.msk.bf16.gmra.mxu1 %vm2929_vm1, %v17091_v28  ;;  %v7318_v34 = vmax.f32 %v7293_v50, 0.0 }
0x10b0   : > { %13311 = vmatprep.mubr.msk.bf16.mxu0 %vm14245_vm0, %v18211_v53  ;;  %13371 = vmatprep.mubr.msk.bf16.mxu1 %vm14245_vm0, %v18211_v53 }
0x10b1   : > { %v17102_v58 = vpack.c.bf16 %v7318_v34, %v7318_v34 }
0x10b7   : > { %13312 = vmatmul.mubr.msk.bf16.gmra.mxu0 %vm2929_vm1, %v17102_v58  ;;  %13372 = vmatmul.mubr.msk.bf16.gmra.mxu1 %vm2929_vm1, %v17102_v58 }
0x10b8   : > { %13383 = vmatprep.mubr.msk.bf16.mxu1 %vm14245_vm0, %v18211_v53  ;;  %10959 = vmatprep.mubr.msk.bf16.mxu0 %vm3335_vm2, %v14136_v8 }
0x10bf   : > { %13384 = vmatmul.mubr.msk.bf16.vlgmr.msra.gmra.mxu1 %vm2929_vm1, %v16929_v41 }
0x10c0   : > { %13387 = vmatprep.mubr.msk.bf16.mxu1 %vm14245_vm0, %v18211_v53 }
0x10c7   : > { %13388 = vmatmul.mubr.msk.bf16.gmra.mxu1 %vm2929_vm1, %v16946_v38 }
0x10c8   : > { %13391 = vmatprep.mubr.msk.bf16.mxu1 %vm14245_vm0, %v18211_v53 }
0x10cf   : > { %13392 = vmatmul.mubr.msk.bf16.gmra.mxu1 %vm2929_vm1, %v16964_v15 }
0x10d0   : > { %13395 = vmatprep.mubr.msk.bf16.mxu1 %vm14245_vm0, %v18211_v53 }
0x10d7   : > { %13396 = vmatmul.mubr.msk.bf16.gmra.mxu1 %vm2929_vm1, %v16979_v37 }
0x10d8   : > { %13399 = vmatprep.mubr.msk.bf16.mxu1 %vm14245_vm0, %v18211_v53 }
0x10df   : > { %13400 = vmatmul.mubr.msk.bf16.gmra.mxu1 %vm2929_vm1, %v16993_v62 }
0x10e0   : > { %13403 = vmatprep.mubr.msk.bf16.mxu1 %vm14245_vm0, %v18211_v53 }
0x10e7   : > { %13404 = vmatmul.mubr.msk.bf16.gmra.mxu1 %vm2929_vm1, %v17007_v19 }
0x10e8   : > { %13407 = vmatprep.mubr.msk.bf16.mxu1 %vm14245_vm0, %v18211_v53 }
0x10ef   : > { %13408 = vmatmul.mubr.msk.bf16.gmra.mxu1 %vm2929_vm1, %v17021_v12 }
0x10f0   : > { %13411 = vmatprep.mubr.msk.bf16.mxu1 %vm14245_vm0, %v18211_v53 }
0x10f7   : > { %13412 = vmatmul.mubr.msk.bf16.gmra.mxu1 %vm2929_vm1, %v17035_v43 }
0x10f8   : > { %13415 = vmatprep.mubr.msk.bf16.mxu1 %vm14245_vm0, %v18211_v53 }
0x10ff   : > { %13416 = vmatmul.mubr.msk.bf16.gmra.mxu1 %vm2929_vm1, %v17049_v16 }
0x1100   : > { %13419 = vmatprep.mubr.msk.bf16.mxu1 %vm14245_vm0, %v18211_v53 }
0x1107   : > { %13420 = vmatmul.mubr.msk.bf16.gmra.mxu1 %vm2929_vm1, %v17063_v36 }
0x1108   : > { %13423 = vmatprep.mubr.msk.bf16.mxu1 %vm14245_vm0, %v18211_v53 }
0x110f   : > { %13424 = vmatmul.mubr.msk.bf16.gmra.mxu1 %vm2929_vm1, %v17077_v25 }
0x1110   : > { %13427 = vmatprep.mubr.msk.bf16.mxu1 %vm14245_vm0, %v18211_v53 }
0x1117   : > { %v17158_v13 = vpop.f32.mrf.mxu0  ;;  %v17160_v1 = vpop.f32.mrf.mxu1  ;;  %13428 = vmatmul.mubr.msk.bf16.gmra.mxu1 %vm2929_vm1, %v17091_v28 }
0x1118   : > { %13431 = vmatprep.mubr.msk.bf16.mxu1 %vm14245_vm0, %v18211_v53 }
0x1119   : > { %v13265_v6 = vpop.f32.mrf.mxu0  ;;  %v13325_v51 = vpop.f32.mrf.mxu1 }
0x111b   : > { %v17166_v5 = vpop.f32.mrf.mxu0  ;;  %v17168_v55 = vpop.f32.mrf.mxu1 }
0x111c   : > { %v7730_v60 = vpack.c.bf16 %v17168_v55, %v17160_v1 }
0x111d   : > { %v13266_v0 = vpop.f32.mrf.mxu0  ;;  %v13326_v48 = vpop.f32.mrf.mxu1 }
0x111f   : > { %v17174_v14 = vpop.f32.mrf.mxu0  ;;  %v17176_v29 = vpop.f32.mrf.mxu1  ;;  %13432 = vmatmul.mubr.msk.bf16.gmra.mxu1 %vm2929_vm1, %v17102_v58 }
0x1121   : > { %v13269_v57 = vpop.f32.mrf.mxu0  ;;  %v13329_v26 = vpop.f32.mrf.mxu1 }
0x1123   : > { %v17180_v40 = vpop.f32.mrf.mxu0  ;;  %v17182_v10 = vpop.f32.mrf.mxu1 }
0x1124   : > { %v7731_v42 = vpack.c.bf16 %v17182_v10, %v17176_v29 }
0x1125   : > { %v13270_v54 = vpop.f32.mrf.mxu0  ;;  %v13330_v61 = vpop.f32.mrf.mxu1 }
0x1127   : > { %v17188_v56 = vpop.f32.mrf.mxu0  ;;  %v17190_v35 = vpop.f32.mrf.mxu1 }
0x1129   : > { %v13273_v2 = vpop.f32.mrf.mxu0  ;;  %v13333_v59 = vpop.f32.mrf.mxu1 }
0x112b   : > { %v17192_v44 = vpop.f32.mrf.mxu0  ;;  %v17194_v9 = vpop.f32.mrf.mxu1 }
0x112d   : > { %v13274_v22 = vpop.f32.mrf.mxu0  ;;  %v13334_v47 = vpop.f32.mrf.mxu1 }
0x112f   : > { %v17198_v30 = vpop.f32.mrf.mxu0  ;;  %v17200_v18 = vpop.f32.mrf.mxu1 }
0x1131   : > { %v13277_v52 = vpop.f32.mrf.mxu0  ;;  %v13337_v7 = vpop.f32.mrf.mxu1 }
0x1133   : > { %v17202_v45 = vpop.f32.mrf.mxu0  ;;  %v17204_v27 = vpop.f32.mrf.mxu1 }
0x1135   : > { %v13278_v17 = vpop.f32.mrf.mxu0  ;;  %v13338_v20 = vpop.f32.mrf.mxu1 }
0x1137   : > { %v17208_v23 = vpop.f32.mrf.mxu0  ;;  %v7655_v21 = vpop.f32.mrf.mxu1 }
0x1139   : > { %v13281_v49 = vpop.f32.mrf.mxu0  ;;  %v13341_v33 = vpop.f32.mrf.mxu1 }
0x113b   : > { %v17210_v63 = vpop.f32.mrf.mxu0  ;;  %v7658_v11 = vpop.f32.mrf.mxu1 }
0x113d   : > { %v13282_v31 = vpop.f32.mrf.mxu0  ;;  %v13342_v50 = vpop.f32.mrf.mxu1 }
0x113f   : > { %v17214_v34 = vpop.f32.mrf.mxu0  ;;  %v7663_v8 = vpop.f32.mrf.mxu1 }
0x1141   : > { %v13285_v6 = vpop.f32.mrf.mxu0  ;;  %v13345_v51 = vpop.f32.mrf.mxu1 }
0x1143   : > { %v17216_v0 = vpop.f32.mrf.mxu0  ;;  %v7666_v48 = vpop.f32.mrf.mxu1 }
0x1144   : > { %v7549_v57 = vpack.c.bf16 %v17216_v0, %v17214_v34  ;;  %v18333_v0 = vpack.c.bf16 %v17202_v45, %v17198_v30 }
0x1145   : > { %v13286_v26 = vpop.f32.mrf.mxu0  ;;  %v13346_v54 = vpop.f32.mrf.mxu1 }
0x1147   : > { %v17220_v61 = vpop.f32.mrf.mxu0  ;;  %v7671_v2 = vpop.f32.mrf.mxu1 }
0x1149   : > { %v13289_v59 = vpop.f32.mrf.mxu0  ;;  %v13349_v22 = vpop.f32.mrf.mxu1 }
0x114b   : > { %v17222_v47 = vpop.f32.mrf.mxu0  ;;  %v7674_v52 = vpop.f32.mrf.mxu1 }
0x114c   : > { %v7550_v7 = vpack.c.bf16 %v17222_v47, %v17220_v61  ;;  %v18332_v47 = vpack.c.bf16 %v17210_v63, %v17208_v23  ;;  %v18334_v63 = vpack.c.bf16 %v17192_v44, %v17188_v56 }
0x114d   : > { %v13290_v17 = vpop.f32.mrf.mxu0  ;;  %v13350_v20 = vpop.f32.mrf.mxu1 }
0x114e   : > { %v7736_v17 = vpack.c.bf16 %v7674_v52, %v7671_v2 }
0x114f   : > { %v17226_v49 = vpop.f32.mrf.mxu0  ;;  %v7679_v33 = vpop.f32.mrf.mxu1 }
0x1151   : > { %v13293_v31 = vpop.f32.mrf.mxu0  ;;  %v13353_v50 = vpop.f32.mrf.mxu1 }
0x1153   : > { %v17228_v6 = vpop.f32.mrf.mxu0  ;;  %v7682_v51 = vpop.f32.mrf.mxu1 }
0x1154   : > { %v7737_v26 = vpack.c.bf16 %v7682_v51, %v7679_v33  ;;  %v7735_v33 = vpack.c.bf16 %v7666_v48, %v7663_v8  ;;  %v7733_v8 = vpack.c.bf16 %v17204_v27, %v17200_v18  ;;  %v18331_v27 = vld [vmem:[#allocation3_spill] sm:$0xff] }
0x1155   : > { %v13294_v54 = vpop.f32.mrf.mxu0  ;;  %v13354_v59 = vpop.f32.mrf.mxu1 }
0x1156   : > { %7780 = vmatpush1.bf16.msra.mxu0 %v7737_v26 }
0x1157   : > { %v17230_v22 = vpop.f32.mrf.mxu0  ;;  %v17232_v3 = vpop.f32.mrf.mxu1  ;;  %7781 = vmatprep.subr.bf16.mxu0 %v18330_v39 }
0x1159   : > { %v13297_v20 = vpop.f32.mrf.mxu0  ;;  %v13357_v32 = vpop.f32.mrf.mxu1 }
0x115a   : > { %7782 = vmatpush1.bf16.msra.mxu0 %v7736_v17  ;;  %v7734_v32 = vpack.c.bf16 %v7658_v11, %v7655_v21  ;;  %v7732_v11 = vpack.c.bf16 %v17194_v9, %v17190_v35 }
0x115b   : > { %v17235_v46 = vpop.f32.mrf.mxu0  ;;  %v17237_v31 = vpop.f32.mrf.mxu1  ;;  %7783 = vmatprep.subr.bf16.mxu0 %v18330_v39 }
0x115d   : > { %v13298_v51 = vpop.f32.mrf.mxu0  ;;  %v13358_v26 = vpop.f32.mrf.mxu1 }
0x115e   : > { %7784 = vmatpush1.bf16.msra.mxu0 %v7735_v33 }
0x115f   : > { %v17242_v54 = vpop.f32.mrf.mxu0  ;;  %v17244_v59 = vpop.f32.mrf.mxu1  ;;  %7785 = vmatprep.subr.bf16.mxu0 %v18330_v39 }
0x1161   : > { %v13301_v2 = vpop.f32.mrf.mxu0  ;;  %v13361_v52 = vpop.f32.mrf.mxu1 }
0x1162   : > { %7786 = vmatpush1.bf16.msra.mxu0 %v7734_v32 }
0x1163   : > { %v17247_v17 = vpop.f32.mrf.mxu0  ;;  %v7698_v20 = vpop.f32.mrf.mxu1  ;;  %7787 = vmatprep.subr.bf16.mxu0 %v18330_v39 }
0x1165   : > { %v13302_v33 = vpop.f32.mrf.mxu0  ;;  %v13362_v51 = vpop.f32.mrf.mxu1 }
0x1166   : > { %7788 = vmatpush1.bf16.msra.mxu0 %v7733_v8 }
0x1167   : > { %v17254_v26 = vpop.f32.mrf.mxu0  ;;  %v7703_v21 = vpop.f32.mrf.mxu1  ;;  %7789 = vmatprep.subr.bf16.mxu0 %v18330_v39 }
0x1169   : > { %v13305_v32 = vpop.f32.mrf.mxu0  ;;  %v13365_v2 = vpop.f32.mrf.mxu1 }
0x116a   : > { %7790 = vmatpush1.bf16.msra.mxu0 %v7732_v11 }
0x116b   : > { %v17259_v52 = vpop.f32.mrf.mxu0  ;;  %v7706_v18 = vpop.f32.mrf.mxu1  ;;  %7791 = vmatprep.subr.bf16.mxu0 %v18330_v39 }
0x116d   : > { %v13306_v8 = vpop.f32.mrf.mxu0  ;;  %v13366_v33 = vpop.f32.mrf.mxu1 }
0x116e   : > { %7792 = vmatpush1.bf16.msra.mxu0 %v7731_v42 }
0x116f   : > { %v17267_v51 = vpop.f32.mrf.mxu0  ;;  %v7711_v35 = vpop.f32.mrf.mxu1  ;;  %7793 = vmatprep.subr.bf16.mxu0 %v18330_v39 }
0x1171   : > { %v13309_v9 = vpop.f32.mrf.mxu0  ;;  %v13369_v11 = vpop.f32.mrf.mxu1 }
0x1172   : > { %7794 = vmatpush1.bf16.msra.mxu0 %v7730_v60 }
0x1173   : > { %v17273_v32 = vpop.f32.mrf.mxu0  ;;  %v7714_v2 = vpop.f32.mrf.mxu1  ;;  %7801 = vmatprep.subr.bf16.mxu0 %v18330_v39 }
0x1174   : > { %v7741_v60 = vpack.c.bf16 %v7714_v2, %v7711_v35  ;;  %v14134_v2 = vld [vmem:[%s18177_s6 + $0x28] ss:$8 sps:$4 sm:$0xff]  }
0x1175   : > { %v13310_v8 = vpop.f32.mrf.mxu0  ;;  %v13370_v33 = vpop.f32.mrf.mxu1 }
0x1176   : > { %v7740_v33 = vpack.c.bf16 %v7706_v18, %v7703_v21  ;;  %v7738_v21 = vpack.c.bf16 %v17237_v31, %v17232_v3  ;;  %v7551_v3 = vpack.c.bf16 %v17228_v6, %v17226_v49 }
0x1177   : > { %v17276_v29 = vpop.f32.mrf.mxu0  ;;  %v7719_v10 = vpop.f32.mrf.mxu1 }
0x1178   : > { %v7742_v42 = vpack.c.bf16 %v7719_v10, %v7719_v10  ;;  %v7556_v45 = vpack.c.bf16 %v17276_v29, %v17276_v29 }
0x1179   : > { %v13313_v50 = vpop.f32.mrf.mxu0  ;;  %v13373_v48 = vpop.f32.mrf.mxu1 }
0x117a   : > { %v7777_v9 = vand.u32 %v7742_v42, %v18331_v27  ;;  %v7739_v48 = vpack.c.bf16 %v7698_v20, %v17244_v59  ;;  %v14137_v59 = vld [vmem:[%s18177_s6 + $0x3c] ss:$8 sps:$4 sm:$0xff]   ;;  %v7869_v44 = vand.u32 %v7556_v45, %v18331_v27 }
0x117b   : > { %v7536_v11 = vpop.f32.mrf.mxu0  ;;  %v7722_v24 = vpop.f32.mrf.mxu1 }
0x117c   : > { %7802 = vmatpush2.bf16.msra.mxu0 %v7777_v9 }
0x117d   : > { %v13314_v1 = vpop.f32.mrf.mxu0  ;;  %v13374_v55 = vpop.f32.mrf.mxu1  ;;  %7803 = vmatprep.subr.bf16.mxu0 %v18330_v39 }
0x117e   : > { %v10952_v1 = vld [vmem:[%s18177_s6 + $0x48] sm:$0x33] }
0x117f   : > { %v17280_v4 = vpop.f32.mrf.mxu1  ;;  %v10958_v6 = vcombine.high %v10952_v1, %v10952_v1  ;;  %v10957_v61 = vcombine.low %v10952_v1, %v10952_v1 }
0x1180   : > { %7804 = vmatpush2.bf16.msra.mxu0 %v7741_v60  ;;  %v14139_v60 = vld [vmem:[%s18177_s6 + $0x38] ss:$8 sps:$4 sm:$0xff]  }
0x1181   : > { %v13385_v8 = vpop.f32.mrf.mxu1  ;;  %7805 = vmatprep.subr.bf16.mxu0 %v18330_v39 }
0x1183   : > { %v17283_v10 = vpop.f32.mrf.mxu1 }
0x1184   : > { %v8100_v50 = vpack.c.bf16 %v17283_v10, %v17280_v4  ;;  %7806 = vmatpush2.bf16.msra.mxu0 %v7740_v33 }
0x1185   : > { %v13386_v24 = vpop.f32.mrf.mxu1  ;;  %7807 = vmatprep.subr.bf16.mxu0 %v18330_v39 }
0x1187   : > { %v17289_v42 = vpop.f32.mrf.mxu1 }
0x1188   : > { %7808 = vmatpush2.bf16.msra.mxu0 %v7739_v48 }
0x1189   : > { %v13389_v35 = vpop.f32.mrf.mxu1  ;;  %7809 = vmatprep.subr.bf16.mxu0 %v18330_v39 }
0x118b   : > { %v17294_v18 = vpop.f32.mrf.mxu1 }
0x118c   : > { %v8101_v9 = vpack.c.bf16 %v17294_v18, %v17289_v42  ;;  %7810 = vmatpush2.bf16.msra.mxu0 %v7738_v21 }
0x118d   : > { %v13390_v20 = vpop.f32.mrf.mxu1  ;;  %7871 = vmatprep.subr.bf16.mxu0 %v18330_v39 }
0x118f   : > { %7812 = vmatmul.mubr.bf16.vlgmr.msra.gmra.mxu0 %v14134_v2  ;;  %v17307_v31 = vpop.f32.mrf.mxu1 }
0x1190   : > { %7872 = vmatpush1.bf16.msra.mxu0 %v7551_v3  ;;  %10960 = vmatprep.mubr.msk.bf16.mxu0 %vm3335_vm2, %v14137_v59  ;;  %v18335_v59 = vpack.c.bf16 %v17180_v40, %v17174_v14  ;;  %v18336_v3 = vpack.c.bf16 %v17166_v5, %v17158_v13  ;;  %v7555_v40 = vpack.c.bf16 %v17273_v32, %v17267_v51  ;;  %v14142_v32 = vld [vmem:[%s18177_s6] ss:$8 sps:$4 sm:$0xff]  }
0x1191   : > { %v13393_v11 = vpop.f32.mrf.mxu1  ;;  %7873 = vmatprep.subr.bf16.mxu0 %v18330_v39  ;;  %v18337_v5 = vpack.c.bf16 %v17259_v52, %v17254_v26  ;;  %v18339_v26 = vpack.c.bf16 %v17235_v46, %v17230_v22  ;;  %v14145_v52 = vld [vmem:[%s18177_s6 + $0x14] ss:$8 sps:$4 sm:$0xff]   ;;  %v7543_v46 = vld [vmem:[%s18177_s6 + $0x20] sm:$0x33] }
0x1193   : > { %v17314_v55 = vpop.f32.mrf.mxu1 }
0x1194   : > { %v8102_v49 = vpack.c.bf16 %v17314_v55, %v17307_v31  ;;  %7874 = vmatpush1.bf16.msra.mxu0 %v7550_v7  ;;  %v14144_v7 = vld [vmem:[%s18177_s6 + $0x4] ss:$8 sps:$4 sm:$0xff]  }
0x1195   : > { %v13394_v8 = vpop.f32.mrf.mxu1  ;;  %7875 = vmatprep.subr.bf16.mxu0 %v18330_v39 }
0x1196   : > { %v18338_v8 = vpack.c.bf16 %v17247_v17, %v17242_v54 }
0x1197   : > { %v17325_v33 = vpop.f32.mrf.mxu1  ;;  %7820 = vmatmul.mubr.bf16.gmra.mxu0 %v14139_v60 }
0x1198   : > { %7876 = vmatpush1.bf16.msra.mxu0 %v7549_v57  ;;  %10961 = vmatprep.mubr.msk.bf16.mxu0 %vm3335_vm2, %v10958_v6 }
0x1199   : > { %v13397_v24 = vpop.f32.mrf.mxu1  ;;  %7877 = vmatprep.subr.bf16.mxu0 %v18330_v39 }
0x119b   : > { %v17332_v48 = vpop.f32.mrf.mxu1 }
0x119c   : > { %7878 = vmatpush1.bf16.msra.mxu0 %v18332_v47 }
0x119d   : > { %v13398_v35 = vpop.f32.mrf.mxu1  ;;  %7879 = vmatprep.subr.bf16.mxu0 %v18330_v39 }
0x119e   : > { %v14147_v35 = vld [vmem:[%s18177_s6 + $0x10] ss:$8 sps:$4 sm:$0xff]  }
0x119f   : > { %v17341_v34 = vpop.f32.mrf.mxu1  ;;  %7828 = vmatmul.mubr.bf16.gmra.mxu0 %v10957_v61 }
0x11a0   : > { %7880 = vmatpush1.bf16.msra.mxu0 %v18333_v0  ;;  %10968 = vmatprep.mubr.msk.bf16.mxu0 %vm3335_vm2, %v14144_v7  ;;  %v10967_v0 = vcombine.high %v7543_v46, %v7543_v46 }
0x11a1   : > { %v13401_v57 = vpop.f32.mrf.mxu1  ;;  %7881 = vmatprep.subr.bf16.mxu0 %v18330_v39 }
0x11a3   : > { %v8028_v23 = vpop.f32.mrf.mxu1 }
0x11a4   : > { %7882 = vmatpush1.bf16.msra.mxu0 %v18334_v63 }
0x11a5   : > { %v13402_v21 = vpop.f32.mrf.mxu1  ;;  %7883 = vmatprep.subr.bf16.mxu0 %v18330_v39 }
0x11a7   : > { %v8033_v2 = vpop.f32.mrf.mxu1 }
0x11a8   : > { %7884 = vmatpush1.bf16.msra.mxu0 %v18335_v59 }
0x11a9   : > { %v13405_v30 = vpop.f32.mrf.mxu1  ;;  %7885 = vmatprep.subr.bf16.mxu0 %v18330_v39 }
0x11aa   : > { %v8104_v30 = vpack.c.bf16 %v8028_v23, %v17341_v34 }
0x11ab   : > { %v8036_v20 = vpop.f32.mrf.mxu1 }
0x11ac   : > { %7886 = vmatpush1.bf16.msra.mxu0 %v18336_v3  ;;  %v8105_v63 = vpack.c.bf16 %v8036_v20, %v8033_v2  ;;  %v10966_v3 = vcombine.low %v7543_v46, %v7543_v46  ;;  %v8103_v2 = vpack.c.bf16 %v17332_v48, %v17325_v33 }
0x11ad   : > { %v13406_v56 = vpop.f32.mrf.mxu1  ;;  %7893 = vmatprep.subr.bf16.mxu0 %v18330_v39 }
0x11ae   : > { %v14152_v56 = vld [vmem:[%s18177_s6 + $0x54] ss:$8 sps:$4 sm:$0xff]  }
0x11af   : > { %v8041_v11 = vpop.f32.mrf.mxu1 }
0x11b0   : > { %7894 = vmatpush2.bf16.msra.mxu0 %v7869_v44 }
0x11b1   : > { %v13409_v14 = vpop.f32.mrf.mxu1  ;;  %7895 = vmatprep.subr.bf16.mxu0 %v18330_v39 }
0x11b3   : > { %v8044_v1 = vpop.f32.mrf.mxu1 }
0x11b4   : > { %7896 = vmatpush2.bf16.msra.mxu0 %v7555_v40  ;;  %v8106_v22 = vpack.c.bf16 %v8044_v1, %v8041_v11 }
0x11b5   : > { %v13410_v29 = vpop.f32.mrf.mxu1  ;;  %7897 = vmatprep.subr.bf16.mxu0 %v18330_v39 }
0x11b6   : > { %v14156_v29 = vld [vmem:[%s14369_s9 + $0x78] sm:$0xff]  }
0x11b7   : > { %v8049_v13 = vpop.f32.mrf.mxu1 }
0x11b8   : > { %7898 = vmatpush2.bf16.msra.mxu0 %v18337_v5  ;;  %v11000_v5 = vld [vmem:[%s18177_s6 + $0x70] sm:$0x33] }
0x11b9   : > { %v13413_v60 = vpop.f32.mrf.mxu1  ;;  %7899 = vmatprep.subr.bf16.mxu0 %v18330_v39 }
0x11ba   : > { %v14155_v60 = vld [vmem:[%s18177_s6 + $0x60] ss:$8 sps:$4 sm:$0xff]  }
0x11bb   : > { %v8052_v6 = vpop.f32.mrf.mxu1 }
0x11bc   : > { %7900 = vmatpush2.bf16.msra.mxu0 %v18338_v8  ;;  %v8107_v54 = vpack.c.bf16 %v8052_v6, %v8049_v13  ;;  %v14157_v13 = vld [vmem:[%s14369_s9 + $0x70] sm:$0xff]   ;;  %v11006_v6 = vcombine.high %v11000_v5, %v11000_v5  ;;  %v14160_v8 = vld [vmem:[%s14369_s9 + $0x68] sm:$0xff]  }
0x11bd   : > { %v13414_v24 = vpop.f32.mrf.mxu1  ;;  %7901 = vmatprep.subr.bf16.mxu0 %v18330_v39 }
0x11be   : > { %v14161_v24 = vld [vmem:[%s14369_s9 + $0x60] sm:$0xff]  }
0x11bf   : > { %v17375_v51 = vpop.f32.mrf.mxu1 }
0x11c0   : > { %7902 = vmatpush2.bf16.msra.mxu0 %v18339_v26 }
0x11c1   : > { %v13417_v61 = vpop.f32.mrf.mxu1  ;;  %8149 = vmatprep.subr.bf16.mxu0 %v18330_v39 }
0x11c3   : > { %7904 = vmatmul.mubr.bf16.vlgmr.msra.gmra.mxu0 %v14142_v32  ;;  %v17387_v17 = vpop.f32.mrf.mxu1 }
0x11c4   : > { %8150 = vmatpush1.bf16.msra.mxu0 %v8107_v54  ;;  %10969 = vmatprep.mubr.msk.bf16.mxu0 %vm3335_vm2, %v14145_v52  ;;  %v8108_v10 = vpack.c.bf16 %v17387_v17, %v17375_v51  ;;  %v11005_v51 = vcombine.low %v11000_v5, %v11000_v5 }
0x11c5   : > { %v13418_v47 = vpop.f32.mrf.mxu1  ;;  %8151 = vmatprep.subr.bf16.mxu0 %v18330_v39 }
0x11c7   : > { %v8065_v7 = vpop.f32.mrf.mxu1 }
0x11c8   : > { %8152 = vmatpush1.bf16.msra.mxu0 %v8106_v22 }
0x11c9   : > { %v13421_v57 = vpop.f32.mrf.mxu1  ;;  %8153 = vmatprep.subr.bf16.mxu0 %v18330_v39 }
0x11cb   : > { %7912 = vmatmul.mubr.bf16.gmra.mxu0 %v14147_v35  ;;  %v8068_v21 = vpop.f32.mrf.mxu1 }
0x11cc   : > { %8154 = vmatpush1.bf16.msra.mxu0 %v8105_v63  ;;  %10970 = vmatprep.mubr.msk.bf16.mxu0 %vm3335_vm2, %v10967_v0  ;;  %v8109_v4 = vpack.c.bf16 %v8068_v21, %v8065_v7 }
0x11cd   : > { %v13422_v59 = vpop.f32.mrf.mxu1  ;;  %8155 = vmatprep.subr.bf16.mxu0 %v18330_v39 }
0x11cf   : > { %v8073_v45 = vpop.f32.mrf.mxu1 }
0x11d0   : > { %8156 = vmatpush1.bf16.msra.mxu0 %v8104_v30 }
0x11d1   : > { %v13425_v44 = vpop.f32.mrf.mxu1  ;;  %8157 = vmatprep.subr.bf16.mxu0 %v18330_v39 }
0x11d3   : > { %7920 = vmatmul.mubr.bf16.gmra.mxu0 %v10966_v3  ;;  %v8076_v20 = vpop.f32.mrf.mxu1 }
0x11d4   : > { %8158 = vmatpush1.bf16.msra.mxu0 %v8103_v2  ;;  %11007 = vmatprep.mubr.msk.bf16.mxu0 %vm3335_vm2, %v14152_v56  ;;  %v8110_v18 = vpack.c.bf16 %v8076_v20, %v8073_v45 }
0x11d5   : > { %v13426_v11 = vpop.f32.mrf.mxu1  ;;  %8159 = vmatprep.subr.bf16.mxu0 %v18330_v39 }
0x11d7   : > { %v8081_v34 = vpop.f32.mrf.mxu1 }
0x11d8   : > { %8160 = vmatpush1.bf16.msra.mxu0 %v8102_v49 }
0x11d9   : > { %v13429_v23 = vpop.f32.mrf.mxu1  ;;  %8161 = vmatprep.subr.bf16.mxu0 %v18330_v39 }
0x11db   : > { %v8084_v14 = vpop.f32.mrf.mxu1 }
0x11dc   : > { %8162 = vmatpush1.bf16.msra.mxu0 %v8101_v9  ;;  %v8111_v42 = vpack.c.bf16 %v8084_v14, %v8081_v34  ;;  %v14153_v9 = vld [vmem:[%s18177_s6 + $0x64] ss:$8 sps:$4 sm:$0xff]  }
0x11dd   : > { %v13430_v33 = vpop.f32.mrf.mxu1  ;;  %8163 = vmatprep.subr.bf16.mxu0 %v18330_v39 }
0x11df   : > { %v8089_v48 = vpop.f32.mrf.mxu1 }
0x11e0   : > { %v8112_v40 = vpack.c.bf16 %v8089_v48, %v8089_v48  ;;  %8164 = vmatpush1.bf16.msra.mxu0 %v8100_v50  ;;  %v14150_v50 = vld [vmem:[%s18177_s6 + $0x50] ss:$8 sps:$4 sm:$0xff]  }
0x11e1   : > { %v13433_v1 = vpop.f32.mrf.mxu1  ;;  %8171 = vmatprep.subr.bf16.mxu0 %v18330_v39 }
0x11e2   : > { %v8147_v31 = vand.u32 %v8112_v40, %v18331_v27 }
0x11e3   : > { %v8092_v55 = vpop.f32.mrf.mxu1 }
0x11e4   : > { %8172 = vmatpush2.bf16.msra.mxu0 %v8147_v31 }
0x11e5   : > { %v13434_v49 = vpop.f32.mrf.mxu1  ;;  %8173 = vmatprep.subr.bf16.mxu0 %v18330_v39 }
0x11e8   : > { %8174 = vmatpush2.bf16.msra.mxu0 %v8111_v42 }
0x11e9   : > { %8175 = vmatprep.subr.bf16.mxu0 %v18330_v39 }
0x11ec   : > { %8176 = vmatpush2.bf16.msra.mxu0 %v8110_v18 }
0x11ed   : > { %8177 = vmatprep.subr.bf16.mxu0 %v18330_v39 }
0x11f0   : > { %8178 = vmatpush2.bf16.msra.mxu0 %v8109_v4 }
0x11f1   : > { %8179 = vmatprep.subr.bf16.mxu0 %v18330_v39 }
0x11f4   : > { %8180 = vmatpush2.bf16.msra.mxu0 %v8108_v10 }
0x11f5   : > { %13435 = vmatprep.subr.bf16.mxu0 %v18211_v53 }
0x11f7   : > { %8182 = vmatmul.mubr.bf16.vlgmr.msra.gmra.mxu0 %v14150_v50 }
0x11f8   : > { %11008 = vmatprep.mubr.msk.bf16.mxu0 %vm3335_vm2, %v14153_v9  ;;  %13436 = vmatpush3.bf16.msra.mxu0 %v14156_v29  ;;  %v14164_v29 = vld [vmem:[%s18177_s6 + $0x7c] ss:$8 sps:$4 sm:$0xff]  }
0x11f9   : > { %13437 = vmatprep.subr.bf16.mxu0 %v18211_v53  ;;  %11046 = vmatprep.mubr.msk.bf16.mxu1 %vm3335_vm2, %v14164_v29 }
0x11fc   : > { %13438 = vmatpush3.bf16.msra.mxu0 %v14157_v13 }
0x11fd   : > { %13439 = vmatprep.subr.bf16.mxu0 %v18211_v53 }
0x11ff   : > { %8190 = vmatmul.mubr.bf16.gmra.mxu0 %v14155_v60 }
0x1200   : > { %11009 = vmatprep.mubr.msk.bf16.mxu0 %vm3335_vm2, %v11006_v6  ;;  %13440 = vmatpush3.bf16.msra.mxu0 %v14160_v8 }
0x1201   : > { %13441 = vmatprep.subr.bf16.mxu0 %v18211_v53 }
0x1204   : > { %13442 = vmatpush3.bf16.msra.mxu0 %v14161_v24 }
0x1205   : > { %8715 = vmatprep.subr.bf16.mxu0 %v18330_v39 }
0x1207   : > { %8198 = vmatmul.mubr.bf16.gmra.mxu0 %v11005_v51 }
0x1208   : > { %13443 = vmatprep.mubr.msk.bf16.mxu0 %vm14245_vm0, %v18211_v53 }
0x120f   : > { %13444 = vmatmul.mubr.msk.bf16.vlgmr.msra.gmra.mxu0 %vm2929_vm1, %v16929_v41 }
0x1210   : > { %13447 = vmatprep.mubr.msk.bf16.mxu0 %vm14245_vm0, %v18211_v53 }
0x1217   : > { %13448 = vmatmul.mubr.msk.bf16.gmra.mxu0 %vm2929_vm1, %v16946_v38 }
0x1218   : > { %13451 = vmatprep.mubr.msk.bf16.mxu0 %vm14245_vm0, %v18211_v53 }
0x121f   : > { %13452 = vmatmul.mubr.msk.bf16.gmra.mxu0 %vm2929_vm1, %v16964_v15 }
0x1220   : > { %13455 = vmatprep.mubr.msk.bf16.mxu0 %vm14245_vm0, %v18211_v53 }
0x1227   : > { %13456 = vmatmul.mubr.msk.bf16.gmra.mxu0 %vm2929_vm1, %v16979_v37 }
0x1228   : > { %13459 = vmatprep.mubr.msk.bf16.mxu0 %vm14245_vm0, %v18211_v53 }
0x122f   : > { %13460 = vmatmul.mubr.msk.bf16.gmra.mxu0 %vm2929_vm1, %v16993_v62 }
0x1230   : > { %13463 = vmatprep.mubr.msk.bf16.mxu0 %vm14245_vm0, %v18211_v53 }
0x1237   : > { %13464 = vmatmul.mubr.msk.bf16.gmra.mxu0 %vm2929_vm1, %v17007_v19 }
0x1238   : > { %13467 = vmatprep.mubr.msk.bf16.mxu0 %vm14245_vm0, %v18211_v53 }
0x123f   : > { %13468 = vmatmul.mubr.msk.bf16.gmra.mxu0 %vm2929_vm1, %v17021_v12 }
0x1240   : > { %13471 = vmatprep.mubr.msk.bf16.mxu0 %vm14245_vm0, %v18211_v53 }
0x1247   : > { %13472 = vmatmul.mubr.msk.bf16.gmra.mxu0 %vm2929_vm1, %v17035_v43 }
0x1248   : > { %13475 = vmatprep.mubr.msk.bf16.mxu0 %vm14245_vm0, %v18211_v53 }
0x124f   : > { %v7813_v32 = vpop.f32.mrf.mxu0  ;;  %13476 = vmatmul.mubr.msk.bf16.gmra.mxu0 %vm2929_vm1, %v17049_v16 }
0x1250   : > { %13479 = vmatprep.mubr.msk.bf16.mxu0 %vm14245_vm0, %v18211_v53 }
0x1251   : > { %v7815_v26 = vpop.f32.mrf.mxu0 }
0x1253   : > { %v7816_v52 = vpop.f32.mrf.mxu0 }
0x1255   : > { %v7818_v61 = vpop.f32.mrf.mxu0 }
0x1257   : > { %13480 = vmatmul.mubr.msk.bf16.gmra.mxu0 %vm2929_vm1, %v17063_v36  ;;  %v7821_v54 = vpop.f32.mrf.mxu0 }
0x1258   : > { %13483 = vmatprep.mubr.msk.bf16.mxu0 %vm14245_vm0, %v18211_v53 }
0x1259   : > { %v7823_v17 = vpop.f32.mrf.mxu0 }
0x125b   : > { %v7824_v47 = vpop.f32.mrf.mxu0 }
0x125d   : > { %v7826_v46 = vpop.f32.mrf.mxu0 }
0x125f   : > { %13484 = vmatmul.mubr.msk.bf16.gmra.mxu0 %vm2929_vm1, %v17077_v25  ;;  %v7829_v22 = vpop.f32.mrf.mxu0 }
0x1260   : > { %13487 = vmatprep.mubr.msk.bf16.mxu0 %vm14245_vm0, %v18211_v53 }
0x1261   : > { %v7831_v7 = vpop.f32.mrf.mxu0 }
0x1263   : > { %v7832_v35 = vpop.f32.mrf.mxu0 }
0x1265   : > { %v7833_v0 = vpop.f32.mrf.mxu0 }
0x1267   : > { %13488 = vmatmul.mubr.msk.bf16.gmra.mxu0 %vm2929_vm1, %v17091_v28 }
0x1268   : > { %13491 = vmatprep.mubr.msk.bf16.mxu0 %vm14245_vm0, %v18211_v53 }
0x126f   : > { %13492 = vmatmul.mubr.msk.bf16.gmra.mxu0 %vm2929_vm1, %v17102_v58 }
0x1283   : > { %v7905_v57 = vpop.f32.mrf.mxu0 }
0x1284   : > { %v7906_v63 = vadd.f32 %v7905_v57, %v7813_v32 }
0x1285   : > { %v7907_v21 = vpop.f32.mrf.mxu0 }
0x1287   : > { %v7908_v59 = vpop.f32.mrf.mxu0 }
0x1288   : > { %v7909_v30 = vadd.f32 %v7908_v59, %v7816_v52 }
0x1289   : > { %v7910_v45 = vpop.f32.mrf.mxu0 }
0x128b   : > { %v7913_v3 = vpop.f32.mrf.mxu0 }
0x128c   : > { %v7914_v56 = vadd.f32 %v7913_v3, %v7821_v54 }
0x128d   : > { %v7915_v44 = vpop.f32.mrf.mxu0 }
0x128f   : > { %v7916_v2 = vpop.f32.mrf.mxu0 }
0x1290   : > { %v7917_v20 = vadd.f32 %v7916_v2, %v7824_v47 }
0x1291   : > { %v7918_v11 = vpop.f32.mrf.mxu0 }
0x1293   : > { %v7921_v34 = vpop.f32.mrf.mxu0 }
0x1294   : > { %v7922_v23 = vadd.f32 %v7921_v34, %v7829_v22 }
0x1295   : > { %v7923_v14 = vpop.f32.mrf.mxu0 }
0x1297   : > { %v7924_v33 = vpop.f32.mrf.mxu0 }
0x1299   : > { %v7925_v48 = vpop.f32.mrf.mxu0 }
0x12b7   : > { %v8183_v40 = vpop.f32.mrf.mxu0 }
0x12b8   : > { %v17503_v1 = vadd.f32 %v8183_v40, %v7906_v63 }
0x12b9   : > { %v8185_v31 = vpop.f32.mrf.mxu0 }
0x12bb   : > { %v8186_v55 = vpop.f32.mrf.mxu0 }
0x12bc   : > { %v17505_v49 = vadd.f32 %v8186_v55, %v7909_v30 }
0x12bd   : > { %v8188_v42 = vpop.f32.mrf.mxu0 }
0x12bf   : > { %v8191_v18 = vpop.f32.mrf.mxu0 }
0x12c0   : > { %v17507_v4 = vadd.f32 %v8191_v18, %v7914_v56 }
0x12c1   : > { %v8193_v10 = vpop.f32.mrf.mxu0 }
0x12c3   : > { %v8194_v50 = vpop.f32.mrf.mxu0 }
0x12c4   : > { %v17509_v9 = vadd.f32 %v8194_v50, %v7917_v20 }
0x12c5   : > { %v8196_v13 = vpop.f32.mrf.mxu0 }
0x12c7   : > { %v8199_v5 = vpop.f32.mrf.mxu0 }
0x12c8   : > { %v17515_v60 = vadd.f32 %v8199_v5, %v7922_v23 }
0x12c9   : > { %v8201_v6 = vpop.f32.mrf.mxu0 }
0x12cb   : > { %v8202_v8 = vpop.f32.mrf.mxu0 }
0x12cd   : > { %v8203_v24 = vpop.f32.mrf.mxu0 }
0x12cf   : > { %v17517_v51 = vpop.f32.mrf.mxu0 }
0x12d1   : > { %v13445_v32 = vpop.f32.mrf.mxu0 }
0x12d3   : > { %v17519_v26 = vpop.f32.mrf.mxu0 }
0x12d4   : > { %v8383_v52 = vpack.c.bf16 %v17519_v26, %v17517_v51 }
0x12d5   : > { %v13446_v61 = vpop.f32.mrf.mxu0 }
0x12d7   : > { %v8284_v54 = vpop.f32.mrf.mxu0 }
0x12d9   : > { %v13449_v17 = vpop.f32.mrf.mxu0 }
0x12db   : > { %v8287_v47 = vpop.f32.mrf.mxu0 }
0x12dc   : > { %v8384_v46 = vpack.c.bf16 %v8287_v47, %v8284_v54 }
0x12dd   : > { %v13450_v22 = vpop.f32.mrf.mxu0 }
0x12df   : > { %v8292_v7 = vpop.f32.mrf.mxu0 }
0x12e1   : > { %v13453_v35 = vpop.f32.mrf.mxu0 }
0x12e3   : > { %v8295_v0 = vpop.f32.mrf.mxu0 }
0x12e4   : > { %v8385_v22 = vpack.c.bf16 %v8295_v0, %v8292_v7 }
0x12e5   : > { %v13454_v57 = vpop.f32.mrf.mxu0 }
0x12e7   : > { %v8300_v63 = vpop.f32.mrf.mxu0 }
0x12e9   : > { %v13457_v21 = vpop.f32.mrf.mxu0 }
0x12eb   : > { %v8303_v59 = vpop.f32.mrf.mxu0 }
0x12ec   : > { %v8386_v54 = vpack.c.bf16 %v8303_v59, %v8300_v63 }
0x12ed   : > { %v13458_v30 = vpop.f32.mrf.mxu0 }
0x12ef   : > { %v8308_v45 = vpop.f32.mrf.mxu0 }
0x12f1   : > { %v13461_v3 = vpop.f32.mrf.mxu0 }
0x12f3   : > { %v8311_v56 = vpop.f32.mrf.mxu0 }
0x12f4   : > { %v8387_v24 = vpack.c.bf16 %v8311_v56, %v8308_v45 }
0x12f5   : > { %v13462_v44 = vpop.f32.mrf.mxu0 }
0x12f7   : > { %v8316_v2 = vpop.f32.mrf.mxu0 }
0x12f9   : > { %v13465_v20 = vpop.f32.mrf.mxu0 }
0x12fa   : > { %v14162_v20 = vld [vmem:[%s18177_s6 + $0x78] ss:$8 sps:$4 sm:$0xff]  }
0x12fb   : > { %v8319_v11 = vpop.f32.mrf.mxu0 }
0x12fc   : > { %v8388_v5 = vpack.c.bf16 %v8319_v11, %v8316_v2  ;;  %v14165_v11 = vld [vmem:[%s18177_s6 + $0x8c] ss:$8 sps:$4 sm:$0xff]  }
0x12fd   : > { %v13466_v34 = vpop.f32.mrf.mxu0 }
0x12fe   : > { %v14168_v34 = vld [vmem:[%s14369_s9 + $0x98] sm:$0xff]  }
0x12ff   : > { %v8324_v23 = vpop.f32.mrf.mxu0 }
0x1301   : > { %v13469_v14 = vpop.f32.mrf.mxu0 }
0x1302   : > { %v11039_v14 = vld [vmem:[%s18177_s6 + $0x98] sm:$0x33] }
0x1303   : > { %v8327_v33 = vpop.f32.mrf.mxu0 }
0x1304   : > { %v8389_v50 = vpack.c.bf16 %v8327_v33, %v8324_v23  ;;  %v14169_v23 = vld [vmem:[%s14369_s9 + $0x90] sm:$0xff]  }
0x1305   : > { %v13470_v48 = vpop.f32.mrf.mxu0  ;;  %v14167_v33 = vld [vmem:[%s18177_s6 + $0x88] ss:$8 sps:$4 sm:$0xff]  }
0x1306   : > { %v11045_v48 = vcombine.high %v11039_v14, %v11039_v14 }
0x1307   : > { %v8332_v40 = vpop.f32.mrf.mxu0 }
0x1309   : > { %v13473_v31 = vpop.f32.mrf.mxu0 }
0x130a   : > { %v14173_v31 = vld [vmem:[%s14369_s9 + $0x80] sm:$0xff]  }
0x130b   : > { %v8335_v55 = vpop.f32.mrf.mxu0 }
0x130c   : > { %v8390_v42 = vpack.c.bf16 %v8335_v55, %v8332_v40  ;;  %v14172_v40 = vld [vmem:[%s14369_s9 + $0x88] sm:$0xff]   ;;  %v11044_v55 = vcombine.low %v11039_v14, %v11039_v14 }
0x130d   : > { %v13474_v18 = vpop.f32.mrf.mxu0 }
0x130e   : > { %8433 = vmatpush1.bf16.msra.mxu1 %v8390_v42 }
0x130f   : > { %v8340_v10 = vpop.f32.mrf.mxu0  ;;  %8434 = vmatprep.subr.bf16.mxu1 %v18330_v39 }
0x1311   : > { %v13477_v29 = vpop.f32.mrf.mxu0 }
0x1312   : > { %8435 = vmatpush1.bf16.msra.mxu1 %v8389_v50 }
0x1313   : > { %v8343_v13 = vpop.f32.mrf.mxu0  ;;  %8436 = vmatprep.subr.bf16.mxu1 %v18330_v39 }
0x1315   : > { %v13478_v6 = vpop.f32.mrf.mxu0 }
0x1316   : > { %8437 = vmatpush1.bf16.msra.mxu1 %v8388_v5 }
0x1317   : > { %v8348_v8 = vpop.f32.mrf.mxu0  ;;  %8438 = vmatprep.subr.bf16.mxu1 %v18330_v39 }
0x1319   : > { %v13481_v32 = vpop.f32.mrf.mxu0 }
0x131a   : > { %8439 = vmatpush1.bf16.msra.mxu1 %v8387_v24 }
0x131b   : > { %v8351_v61 = vpop.f32.mrf.mxu0  ;;  %8440 = vmatprep.subr.bf16.mxu1 %v18330_v39 }
0x131c   : > { %v8392_v26 = vpack.c.bf16 %v8351_v61, %v8348_v8 }
0x131d   : > { %v13482_v17 = vpop.f32.mrf.mxu0 }
0x131e   : > { %8441 = vmatpush1.bf16.msra.mxu1 %v8386_v54 }
0x131f   : > { %v8356_v47 = vpop.f32.mrf.mxu0  ;;  %8442 = vmatprep.subr.bf16.mxu1 %v18330_v39 }
0x1321   : > { %v13485_v35 = vpop.f32.mrf.mxu0 }
0x1322   : > { %8443 = vmatpush1.bf16.msra.mxu1 %v8385_v22 }
0x1323   : > { %v8359_v57 = vpop.f32.mrf.mxu0  ;;  %8444 = vmatprep.subr.bf16.mxu1 %v18330_v39 }
0x1324   : > { %v8393_v51 = vpack.c.bf16 %v8359_v57, %v8356_v47 }
0x1325   : > { %v13486_v21 = vpop.f32.mrf.mxu0 }
0x1326   : > { %8445 = vmatpush1.bf16.msra.mxu1 %v8384_v46 }
0x1327   : > { %v8364_v30 = vpop.f32.mrf.mxu0  ;;  %8446 = vmatprep.subr.bf16.mxu1 %v18330_v39 }
0x1329   : > { %v13489_v45 = vpop.f32.mrf.mxu0 }
0x132a   : > { %8447 = vmatpush1.bf16.msra.mxu1 %v8383_v52  ;;  %v8391_v52 = vpack.c.bf16 %v8343_v13, %v8340_v10 }
0x132b   : > { %v8367_v63 = vpop.f32.mrf.mxu0  ;;  %8454 = vmatprep.subr.bf16.mxu1 %v18330_v39 }
0x132c   : > { %v8394_v2 = vpack.c.bf16 %v8367_v63, %v8364_v30 }
0x132d   : > { %v13490_v59 = vpop.f32.mrf.mxu0 }
0x132f   : > { %v8372_v7 = vpop.f32.mrf.mxu0 }
0x1330   : > { %v8395_v0 = vpack.c.bf16 %v8372_v7, %v8372_v7 }
0x1331   : > { %v13493_v3 = vpop.f32.mrf.mxu0 }
0x1332   : > { %v8430_v56 = vand.u32 %v8395_v0, %v18331_v27 }
0x1333   : > { %v8375_v44 = vpop.f32.mrf.mxu0 }
0x1334   : > { %8455 = vmatpush2.bf16.msra.mxu1 %v8430_v56 }
0x1335   : > { %v13494_v46 = vpop.f32.mrf.mxu0  ;;  %8456 = vmatprep.subr.bf16.mxu1 %v18330_v39 }
0x1338   : > { %8457 = vmatpush2.bf16.msra.mxu1 %v8394_v2 }
0x1339   : > { %8458 = vmatprep.subr.bf16.mxu1 %v18330_v39 }
0x133c   : > { %8459 = vmatpush2.bf16.msra.mxu1 %v8393_v51 }
0x133d   : > { %8460 = vmatprep.subr.bf16.mxu1 %v18330_v39 }
0x1340   : > { %8461 = vmatpush2.bf16.msra.mxu1 %v8392_v26 }
0x1341   : > { %8462 = vmatprep.subr.bf16.mxu1 %v18330_v39 }
0x1344   : > { %8463 = vmatpush2.bf16.msra.mxu1 %v8391_v52 }
0x1345   : > { %13495 = vmatprep.subr.bf16.mxu1 %v18211_v53 }
0x1347   : > { %8465 = vmatmul.mubr.bf16.vlgmr.msra.gmra.mxu1 %v14162_v20 }
0x1348   : > { %11047 = vmatprep.mubr.msk.bf16.mxu1 %vm3335_vm2, %v14165_v11  ;;  %13496 = vmatpush3.bf16.msra.mxu1 %v14168_v34 }
0x1349   : > { %13497 = vmatprep.subr.bf16.mxu1 %v18211_v53 }
0x134c   : > { %13498 = vmatpush3.bf16.msra.mxu1 %v14169_v23 }
0x134d   : > { %13499 = vmatprep.subr.bf16.mxu1 %v18211_v53 }
0x134f   : > { %8473 = vmatmul.mubr.bf16.gmra.mxu1 %v14167_v33 }
0x1350   : > { %11048 = vmatprep.mubr.msk.bf16.mxu1 %vm3335_vm2, %v11045_v48  ;;  %13500 = vmatpush3.bf16.msra.mxu1 %v14172_v40 }
0x1351   : > { %13501 = vmatprep.subr.bf16.mxu1 %v18211_v53 }
0x1354   : > { %13502 = vmatpush3.bf16.msra.mxu1 %v14173_v31 }
0x1355   : > { %8998 = vmatprep.subr.bf16.mxu1 %v18330_v39 }
0x1357   : > { %8481 = vmatmul.mubr.bf16.gmra.mxu1 %v11044_v55 }
0x1358   : > { %13503 = vmatprep.mubr.msk.bf16.mxu1 %vm14245_vm0, %v18211_v53 }
0x135f   : > { %13504 = vmatmul.mubr.msk.bf16.vlgmr.msra.gmra.mxu1 %vm2929_vm1, %v16929_v41 }
0x1360   : > { %13507 = vmatprep.mubr.msk.bf16.mxu1 %vm14245_vm0, %v18211_v53 }
0x1367   : > { %13508 = vmatmul.mubr.msk.bf16.gmra.mxu1 %vm2929_vm1, %v16946_v38 }
0x1368   : > { %13511 = vmatprep.mubr.msk.bf16.mxu1 %vm14245_vm0, %v18211_v53 }
0x136f   : > { %13512 = vmatmul.mubr.msk.bf16.gmra.mxu1 %vm2929_vm1, %v16964_v15 }
0x1370   : > { %13515 = vmatprep.mubr.msk.bf16.mxu1 %vm14245_vm0, %v18211_v53 }
0x1377   : > { %13516 = vmatmul.mubr.msk.bf16.gmra.mxu1 %vm2929_vm1, %v16979_v37 }
0x1378   : > { %13519 = vmatprep.mubr.msk.bf16.mxu1 %vm14245_vm0, %v18211_v53 }
0x137f   : > { %13520 = vmatmul.mubr.msk.bf16.gmra.mxu1 %vm2929_vm1, %v16993_v62 }
0x1380   : > { %13523 = vmatprep.mubr.msk.bf16.mxu1 %vm14245_vm0, %v18211_v53 }
0x1387   : > { %13524 = vmatmul.mubr.msk.bf16.gmra.mxu1 %vm2929_vm1, %v17007_v19 }
0x1388   : > { %13527 = vmatprep.mubr.msk.bf16.mxu1 %vm14245_vm0, %v18211_v53 }
0x138f   : > { %13528 = vmatmul.mubr.msk.bf16.gmra.mxu1 %vm2929_vm1, %v17021_v12 }
0x1390   : > { %13531 = vmatprep.mubr.msk.bf16.mxu1 %vm14245_vm0, %v18211_v53 }
0x1397   : > { %13532 = vmatmul.mubr.msk.bf16.gmra.mxu1 %vm2929_vm1, %v17035_v43 }
0x1398   : > { %13535 = vmatprep.mubr.msk.bf16.mxu1 %vm14245_vm0, %v18211_v53 }
0x139f   : > { %13536 = vmatmul.mubr.msk.bf16.gmra.mxu1 %vm2929_vm1, %v17049_v16 }
0x13a0   : > { %13539 = vmatprep.mubr.msk.bf16.mxu1 %vm14245_vm0, %v18211_v53 }
0x13a7   : > { %13540 = vmatmul.mubr.msk.bf16.gmra.mxu1 %vm2929_vm1, %v17063_v36 }
0x13a8   : > { %13543 = vmatprep.mubr.msk.bf16.mxu1 %vm14245_vm0, %v18211_v53 }
0x13af   : > { %13544 = vmatmul.mubr.msk.bf16.gmra.mxu1 %vm2929_vm1, %v17077_v25 }
0x13b0   : > { %13547 = vmatprep.mubr.msk.bf16.mxu1 %vm14245_vm0, %v18211_v53 }
0x13b7   : > { %13548 = vmatmul.mubr.msk.bf16.gmra.mxu1 %vm2929_vm1, %v17091_v28 }
0x13b8   : > { %13551 = vmatprep.mubr.msk.bf16.mxu1 %vm14245_vm0, %v18211_v53 }
0x13bf   : > { %13552 = vmatmul.mubr.msk.bf16.gmra.mxu1 %vm2929_vm1, %v17102_v58 }
0x1407   : > { %v8466_v42 = vpop.f32.mrf.mxu1 }
0x1408   : > { %v17615_v18 = vadd.f32 %v8466_v42, %v17503_v1  ;;  %v14176_v1 = vld [vmem:[%s18177_s6 + $0xa4] ss:$8 sps:$4 sm:$0xff]  }
0x1409   : > { %v8468_v10 = vpop.f32.mrf.mxu1  ;;  %11085 = vmatprep.mubr.msk.bf16.mxu0 %vm3335_vm2, %v14176_v1 }
0x140b   : > { %v8469_v50 = vpop.f32.mrf.mxu1 }
0x140c   : > { %v17618_v29 = vadd.f32 %v8469_v50, %v17505_v49 }
0x140d   : > { %v8471_v13 = vpop.f32.mrf.mxu1 }
0x140f   : > { %v8474_v5 = vpop.f32.mrf.mxu1 }
0x1410   : > { %v17621_v6 = vadd.f32 %v8474_v5, %v17507_v4 }
0x1411   : > { %v8476_v8 = vpop.f32.mrf.mxu1 }
0x1413   : > { %v8477_v24 = vpop.f32.mrf.mxu1 }
0x1414   : > { %v17624_v32 = vadd.f32 %v8477_v24, %v17509_v9 }
0x1415   : > { %v8479_v61 = vpop.f32.mrf.mxu1 }
0x1417   : > { %v8482_v54 = vpop.f32.mrf.mxu1 }
0x1418   : > { %v17631_v49 = vadd.f32 %v8482_v54, %v17515_v60 }
0x1419   : > { %v8484_v17 = vpop.f32.mrf.mxu1 }
0x141b   : > { %v8485_v47 = vpop.f32.mrf.mxu1 }
0x141d   : > { %v8486_v4 = vpop.f32.mrf.mxu1 }
0x141f   : > { %v17633_v22 = vpop.f32.mrf.mxu1 }
0x1421   : > { %v13505_v35 = vpop.f32.mrf.mxu1 }
0x1423   : > { %v17635_v57 = vpop.f32.mrf.mxu1 }
0x1424   : > { %v8666_v9 = vpack.c.bf16 %v17635_v57, %v17633_v22 }
0x1425   : > { %v13506_v21 = vpop.f32.mrf.mxu1 }
0x1427   : > { %v8567_v30 = vpop.f32.mrf.mxu1 }
0x1429   : > { %v13509_v45 = vpop.f32.mrf.mxu1 }
0x142b   : > { %v8570_v63 = vpop.f32.mrf.mxu1 }
0x142c   : > { %v8667_v59 = vpack.c.bf16 %v8570_v63, %v8567_v30 }
0x142d   : > { %v13510_v7 = vpop.f32.mrf.mxu1 }
0x142f   : > { %v8575_v0 = vpop.f32.mrf.mxu1 }
0x1431   : > { %v13513_v60 = vpop.f32.mrf.mxu1 }
0x1433   : > { %v8578_v3 = vpop.f32.mrf.mxu1 }
0x1434   : > { %v8668_v7 = vpack.c.bf16 %v8578_v3, %v8575_v0 }
0x1435   : > { %v13514_v56 = vpop.f32.mrf.mxu1 }
0x1437   : > { %v8583_v44 = vpop.f32.mrf.mxu1 }
0x1439   : > { %v13517_v46 = vpop.f32.mrf.mxu1 }
0x143b   : > { %v8586_v2 = vpop.f32.mrf.mxu1 }
0x143c   : > { %v8669_v30 = vpack.c.bf16 %v8586_v2, %v8583_v44 }
0x143d   : > { %v13518_v51 = vpop.f32.mrf.mxu1 }
0x143f   : > { %v8591_v26 = vpop.f32.mrf.mxu1 }
0x1441   : > { %v13521_v52 = vpop.f32.mrf.mxu1 }
0x1443   : > { %v8594_v20 = vpop.f32.mrf.mxu1 }
0x1444   : > { %v8670_v4 = vpack.c.bf16 %v8594_v20, %v8591_v26 }
0x1445   : > { %v13522_v11 = vpop.f32.mrf.mxu1 }
0x1447   : > { %v8599_v34 = vpop.f32.mrf.mxu1 }
0x1449   : > { %v13525_v23 = vpop.f32.mrf.mxu1 }
0x144a   : > { %v14174_v23 = vld [vmem:[%s18177_s6 + $0xa0] ss:$8 sps:$4 sm:$0xff]  }
0x144b   : > { %v8602_v14 = vpop.f32.mrf.mxu1 }
0x144c   : > { %v8671_v54 = vpack.c.bf16 %v8602_v14, %v8599_v34  ;;  %v14177_v14 = vld [vmem:[%s18177_s6 + $0xb4] ss:$8 sps:$4 sm:$0xff]  }
0x144d   : > { %v13526_v33 = vpop.f32.mrf.mxu1 }
0x144e   : > { %v14180_v33 = vld [vmem:[%s14369_s9 + $0xb8] sm:$0xff]  }
0x144f   : > { %v8607_v48 = vpop.f32.mrf.mxu1 }
0x1451   : > { %v13529_v40 = vpop.f32.mrf.mxu1 }
0x1452   : > { %v11078_v40 = vld [vmem:[%s18177_s6 + $0xc0] sm:$0x33] }
0x1453   : > { %v8610_v31 = vpop.f32.mrf.mxu1 }
0x1454   : > { %v8672_v24 = vpack.c.bf16 %v8610_v31, %v8607_v48  ;;  %v14181_v48 = vld [vmem:[%s14369_s9 + $0xb0] sm:$0xff]  }
0x1455   : > { %v13530_v55 = vpop.f32.mrf.mxu1  ;;  %v14179_v31 = vld [vmem:[%s18177_s6 + $0xb0] ss:$8 sps:$4 sm:$0xff]  }
0x1456   : > { %v11084_v55 = vcombine.high %v11078_v40, %v11078_v40 }
0x1457   : > { %v8615_v42 = vpop.f32.mrf.mxu1 }
0x1459   : > { %v13533_v10 = vpop.f32.mrf.mxu1 }
0x145a   : > { %v14185_v10 = vld [vmem:[%s14369_s9 + $0xa0] sm:$0xff]  }
0x145b   : > { %v8618_v50 = vpop.f32.mrf.mxu1 }
0x145c   : > { %v8673_v13 = vpack.c.bf16 %v8618_v50, %v8615_v42  ;;  %v14184_v42 = vld [vmem:[%s14369_s9 + $0xa8] sm:$0xff]   ;;  %v11083_v50 = vcombine.low %v11078_v40, %v11078_v40 }
0x145d   : > { %v13534_v5 = vpop.f32.mrf.mxu1 }
0x145e   : > { %8716 = vmatpush1.bf16.msra.mxu0 %v8673_v13 }
0x145f   : > { %v8623_v8 = vpop.f32.mrf.mxu1  ;;  %8717 = vmatprep.subr.bf16.mxu0 %v18330_v39 }
0x1461   : > { %v13537_v1 = vpop.f32.mrf.mxu1 }
0x1462   : > { %8718 = vmatpush1.bf16.msra.mxu0 %v8672_v24 }
0x1463   : > { %v8626_v61 = vpop.f32.mrf.mxu1  ;;  %8719 = vmatprep.subr.bf16.mxu0 %v18330_v39 }
0x1465   : > { %v13538_v17 = vpop.f32.mrf.mxu1 }
0x1466   : > { %8720 = vmatpush1.bf16.msra.mxu0 %v8671_v54 }
0x1467   : > { %v8631_v47 = vpop.f32.mrf.mxu1  ;;  %8721 = vmatprep.subr.bf16.mxu0 %v18330_v39 }
0x1469   : > { %v13541_v35 = vpop.f32.mrf.mxu1 }
0x146a   : > { %8722 = vmatpush1.bf16.msra.mxu0 %v8670_v4 }
0x146b   : > { %v8634_v21 = vpop.f32.mrf.mxu1  ;;  %8723 = vmatprep.subr.bf16.mxu0 %v18330_v39 }
0x146c   : > { %v8675_v57 = vpack.c.bf16 %v8634_v21, %v8631_v47 }
0x146d   : > { %v13542_v45 = vpop.f32.mrf.mxu1 }
0x146e   : > { %8724 = vmatpush1.bf16.msra.mxu0 %v8669_v30 }
0x146f   : > { %v8639_v63 = vpop.f32.mrf.mxu1  ;;  %8725 = vmatprep.subr.bf16.mxu0 %v18330_v39 }
0x1471   : > { %v13545_v60 = vpop.f32.mrf.mxu1 }
0x1472   : > { %8726 = vmatpush1.bf16.msra.mxu0 %v8668_v7 }
0x1473   : > { %v8642_v56 = vpop.f32.mrf.mxu1  ;;  %8727 = vmatprep.subr.bf16.mxu0 %v18330_v39 }
0x1474   : > { %v8676_v22 = vpack.c.bf16 %v8642_v56, %v8639_v63 }
0x1475   : > { %v13546_v46 = vpop.f32.mrf.mxu1 }
0x1476   : > { %8728 = vmatpush1.bf16.msra.mxu0 %v8667_v59 }
0x1477   : > { %v8647_v51 = vpop.f32.mrf.mxu1  ;;  %8729 = vmatprep.subr.bf16.mxu0 %v18330_v39 }
0x1479   : > { %v13549_v26 = vpop.f32.mrf.mxu1 }
0x147a   : > { %8730 = vmatpush1.bf16.msra.mxu0 %v8666_v9  ;;  %v8674_v9 = vpack.c.bf16 %v8626_v61, %v8623_v8 }
0x147b   : > { %v8650_v44 = vpop.f32.mrf.mxu1  ;;  %8737 = vmatprep.subr.bf16.mxu0 %v18330_v39 }
0x147c   : > { %v8677_v34 = vpack.c.bf16 %v8650_v44, %v8647_v51 }
0x147d   : > { %v13550_v2 = vpop.f32.mrf.mxu1 }
0x147f   : > { %v8655_v0 = vpop.f32.mrf.mxu1 }
0x1480   : > { %v8678_v3 = vpack.c.bf16 %v8655_v0, %v8655_v0 }
0x1481   : > { %v13553_v52 = vpop.f32.mrf.mxu1 }
0x1482   : > { %v8713_v20 = vand.u32 %v8678_v3, %v18331_v27 }
0x1483   : > { %v8658_v11 = vpop.f32.mrf.mxu1 }
0x1484   : > { %8738 = vmatpush2.bf16.msra.mxu0 %v8713_v20 }
0x1485   : > { %v13554_v59 = vpop.f32.mrf.mxu1  ;;  %8739 = vmatprep.subr.bf16.mxu0 %v18330_v39 }
0x1488   : > { %8740 = vmatpush2.bf16.msra.mxu0 %v8677_v34 }
0x1489   : > { %8741 = vmatprep.subr.bf16.mxu0 %v18330_v39 }
0x148c   : > { %8742 = vmatpush2.bf16.msra.mxu0 %v8676_v22 }
0x148d   : > { %8743 = vmatprep.subr.bf16.mxu0 %v18330_v39 }
0x1490   : > { %8744 = vmatpush2.bf16.msra.mxu0 %v8675_v57 }
0x1491   : > { %8745 = vmatprep.subr.bf16.mxu0 %v18330_v39 }
0x1494   : > { %8746 = vmatpush2.bf16.msra.mxu0 %v8674_v9 }
0x1495   : > { %13555 = vmatprep.subr.bf16.mxu0 %v18211_v53 }
0x1497   : > { %8748 = vmatmul.mubr.bf16.vlgmr.msra.gmra.mxu0 %v14174_v23 }
0x1498   : > { %11086 = vmatprep.mubr.msk.bf16.mxu0 %vm3335_vm2, %v14177_v14  ;;  %13556 = vmatpush3.bf16.msra.mxu0 %v14180_v33 }
0x1499   : > { %13557 = vmatprep.subr.bf16.mxu0 %v18211_v53 }
0x149c   : > { %13558 = vmatpush3.bf16.msra.mxu0 %v14181_v48 }
0x149d   : > { %13559 = vmatprep.subr.bf16.mxu0 %v18211_v53 }
0x149f   : > { %8756 = vmatmul.mubr.bf16.gmra.mxu0 %v14179_v31 }
0x14a0   : > { %11087 = vmatprep.mubr.msk.bf16.mxu0 %vm3335_vm2, %v11084_v55  ;;  %13560 = vmatpush3.bf16.msra.mxu0 %v14184_v42 }
0x14a1   : > { %13561 = vmatprep.subr.bf16.mxu0 %v18211_v53 }
0x14a4   : > { %13562 = vmatpush3.bf16.msra.mxu0 %v14185_v10 }
0x14a5   : > { %9281 = vmatprep.subr.bf16.mxu0 %v18330_v39 }
0x14a7   : > { %8764 = vmatmul.mubr.bf16.gmra.mxu0 %v11083_v50 }
0x14a8   : > { %13563 = vmatprep.mubr.msk.bf16.mxu0 %vm14245_vm0, %v18211_v53 }
0x14af   : > { %13564 = vmatmul.mubr.msk.bf16.vlgmr.msra.gmra.mxu0 %vm2929_vm1, %v16929_v41 }
0x14b0   : > { %13567 = vmatprep.mubr.msk.bf16.mxu0 %vm14245_vm0, %v18211_v53 }
0x14b7   : > { %13568 = vmatmul.mubr.msk.bf16.gmra.mxu0 %vm2929_vm1, %v16946_v38 }
0x14b8   : > { %13571 = vmatprep.mubr.msk.bf16.mxu0 %vm14245_vm0, %v18211_v53 }
0x14bf   : > { %13572 = vmatmul.mubr.msk.bf16.gmra.mxu0 %vm2929_vm1, %v16964_v15 }
0x14c0   : > { %13575 = vmatprep.mubr.msk.bf16.mxu0 %vm14245_vm0, %v18211_v53 }
0x14c7   : > { %13576 = vmatmul.mubr.msk.bf16.gmra.mxu0 %vm2929_vm1, %v16979_v37 }
0x14c8   : > { %13579 = vmatprep.mubr.msk.bf16.mxu0 %vm14245_vm0, %v18211_v53 }
0x14cf   : > { %13580 = vmatmul.mubr.msk.bf16.gmra.mxu0 %vm2929_vm1, %v16993_v62 }
0x14d0   : > { %13583 = vmatprep.mubr.msk.bf16.mxu0 %vm14245_vm0, %v18211_v53 }
0x14d7   : > { %13584 = vmatmul.mubr.msk.bf16.gmra.mxu0 %vm2929_vm1, %v17007_v19 }
0x14d8   : > { %13587 = vmatprep.mubr.msk.bf16.mxu0 %vm14245_vm0, %v18211_v53 }
0x14df   : > { %13588 = vmatmul.mubr.msk.bf16.gmra.mxu0 %vm2929_vm1, %v17021_v12 }
0x14e0   : > { %13591 = vmatprep.mubr.msk.bf16.mxu0 %vm14245_vm0, %v18211_v53 }
0x14e7   : > { %13592 = vmatmul.mubr.msk.bf16.gmra.mxu0 %vm2929_vm1, %v17035_v43 }
0x14e8   : > { %13595 = vmatprep.mubr.msk.bf16.mxu0 %vm14245_vm0, %v18211_v53 }
0x14ef   : > { %13596 = vmatmul.mubr.msk.bf16.gmra.mxu0 %vm2929_vm1, %v17049_v16 }
0x14f0   : > { %13599 = vmatprep.mubr.msk.bf16.mxu0 %vm14245_vm0, %v18211_v53 }
0x14f7   : > { %13600 = vmatmul.mubr.msk.bf16.gmra.mxu0 %vm2929_vm1, %v17063_v36 }
0x14f8   : > { %13603 = vmatprep.mubr.msk.bf16.mxu0 %vm14245_vm0, %v18211_v53 }
0x14ff   : > { %13604 = vmatmul.mubr.msk.bf16.gmra.mxu0 %vm2929_vm1, %v17077_v25 }
0x1500   : > { %13607 = vmatprep.mubr.msk.bf16.mxu0 %vm14245_vm0, %v18211_v53 }
0x1507   : > { %13608 = vmatmul.mubr.msk.bf16.gmra.mxu0 %vm2929_vm1, %v17091_v28 }
0x1508   : > { %13611 = vmatprep.mubr.msk.bf16.mxu0 %vm14245_vm0, %v18211_v53 }
0x150f   : > { %13612 = vmatmul.mubr.msk.bf16.gmra.mxu0 %vm2929_vm1, %v17102_v58 }
0x1557   : > { %v8749_v13 = vpop.f32.mrf.mxu0 }
0x1558   : > { %v17731_v5 = vadd.f32 %v8749_v13, %v17615_v18  ;;  %v14188_v18 = vld [vmem:[%s18177_s6 + $0xcc] ss:$8 sps:$4 sm:$0xff]  }
0x1559   : > { %v8751_v8 = vpop.f32.mrf.mxu0  ;;  %11124 = vmatprep.mubr.msk.bf16.mxu1 %vm3335_vm2, %v14188_v18 }
0x155b   : > { %v8752_v24 = vpop.f32.mrf.mxu0 }
0x155c   : > { %v17734_v1 = vadd.f32 %v8752_v24, %v17618_v29 }
0x155d   : > { %v8754_v61 = vpop.f32.mrf.mxu0 }
0x155f   : > { %v8757_v54 = vpop.f32.mrf.mxu0 }
0x1560   : > { %v17737_v17 = vadd.f32 %v8757_v54, %v17621_v6 }
0x1561   : > { %v8759_v47 = vpop.f32.mrf.mxu0 }
0x1563   : > { %v8760_v4 = vpop.f32.mrf.mxu0 }
0x1564   : > { %v17740_v35 = vadd.f32 %v8760_v4, %v17624_v32 }
0x1565   : > { %v8762_v21 = vpop.f32.mrf.mxu0 }
0x1567   : > { %v8765_v30 = vpop.f32.mrf.mxu0 }
0x1568   : > { %v17747_v29 = vadd.f32 %v8765_v30, %v17631_v49 }
0x1569   : > { %v8767_v45 = vpop.f32.mrf.mxu0 }
0x156b   : > { %v8768_v63 = vpop.f32.mrf.mxu0 }
0x156d   : > { %v8769_v6 = vpop.f32.mrf.mxu0 }
0x156f   : > { %v17749_v7 = vpop.f32.mrf.mxu0 }
0x1571   : > { %v13565_v60 = vpop.f32.mrf.mxu0 }
0x1573   : > { %v17751_v56 = vpop.f32.mrf.mxu0 }
0x1574   : > { %v8949_v32 = vpack.c.bf16 %v17751_v56, %v17749_v7 }
0x1575   : > { %v13566_v46 = vpop.f32.mrf.mxu0 }
0x1577   : > { %v8850_v51 = vpop.f32.mrf.mxu0 }
0x1579   : > { %v13569_v26 = vpop.f32.mrf.mxu0 }
0x157b   : > { %v8853_v44 = vpop.f32.mrf.mxu0 }
0x157c   : > { %v8950_v2 = vpack.c.bf16 %v8853_v44, %v8850_v51 }
0x157d   : > { %v13570_v0 = vpop.f32.mrf.mxu0 }
0x157f   : > { %v8858_v3 = vpop.f32.mrf.mxu0 }
0x1581   : > { %v13573_v49 = vpop.f32.mrf.mxu0 }
0x1583   : > { %v8861_v52 = vpop.f32.mrf.mxu0 }
0x1584   : > { %v8951_v0 = vpack.c.bf16 %v8861_v52, %v8858_v3 }
0x1585   : > { %v13574_v20 = vpop.f32.mrf.mxu0 }
0x1587   : > { %v8866_v11 = vpop.f32.mrf.mxu0 }
0x1589   : > { %v13577_v59 = vpop.f32.mrf.mxu0 }
0x158b   : > { %v8869_v34 = vpop.f32.mrf.mxu0 }
0x158c   : > { %v8952_v51 = vpack.c.bf16 %v8869_v34, %v8866_v11 }
0x158d   : > { %v13578_v22 = vpop.f32.mrf.mxu0 }
0x158f   : > { %v8874_v57 = vpop.f32.mrf.mxu0 }
0x1591   : > { %v13581_v9 = vpop.f32.mrf.mxu0 }
0x1593   : > { %v8877_v23 = vpop.f32.mrf.mxu0 }
0x1594   : > { %v8953_v6 = vpack.c.bf16 %v8877_v23, %v8874_v57 }
0x1595   : > { %v13582_v14 = vpop.f32.mrf.mxu0 }
0x1597   : > { %v8882_v33 = vpop.f32.mrf.mxu0 }
0x1599   : > { %v13585_v48 = vpop.f32.mrf.mxu0 }
0x159a   : > { %v14186_v48 = vld [vmem:[%s18177_s6 + $0xc8] ss:$8 sps:$4 sm:$0xff]  }
0x159b   : > { %v8885_v40 = vpop.f32.mrf.mxu0 }
0x159c   : > { %v8954_v30 = vpack.c.bf16 %v8885_v40, %v8882_v33  ;;  %v14189_v40 = vld [vmem:[%s18177_s6 + $0xdc] ss:$8 sps:$4 sm:$0xff]  }
0x159d   : > { %v13586_v31 = vpop.f32.mrf.mxu0 }
0x159e   : > { %v14192_v31 = vld [vmem:[%s14369_s9 + $0xd8] sm:$0xff]  }
0x159f   : > { %v8890_v55 = vpop.f32.mrf.mxu0 }
0x15a1   : > { %v13589_v42 = vpop.f32.mrf.mxu0 }
0x15a2   : > { %v11117_v42 = vld [vmem:[%s18177_s6 + $0xe8] sm:$0x33] }
0x15a3   : > { %v8893_v10 = vpop.f32.mrf.mxu0 }
0x15a4   : > { %v8955_v4 = vpack.c.bf16 %v8893_v10, %v8890_v55  ;;  %v14193_v55 = vld [vmem:[%s14369_s9 + $0xd0] sm:$0xff]   ;;  %v14191_v10 = vld [vmem:[%s18177_s6 + $0xd8] ss:$8 sps:$4 sm:$0xff]  }
0x15a5   : > { %v13590_v50 = vpop.f32.mrf.mxu0 }
0x15a6   : > { %v11123_v50 = vcombine.high %v11117_v42, %v11117_v42 }
0x15a7   : > { %v8898_v13 = vpop.f32.mrf.mxu0 }
0x15a9   : > { %v13593_v8 = vpop.f32.mrf.mxu0 }
0x15aa   : > { %v14197_v8 = vld [vmem:[%s14369_s9 + $0xc0] sm:$0xff]  }
0x15ab   : > { %v8901_v24 = vpop.f32.mrf.mxu0 }
0x15ac   : > { %v8956_v61 = vpack.c.bf16 %v8901_v24, %v8898_v13  ;;  %v14196_v13 = vld [vmem:[%s14369_s9 + $0xc8] sm:$0xff]   ;;  %v11122_v24 = vcombine.low %v11117_v42, %v11117_v42 }
0x15ad   : > { %v13594_v54 = vpop.f32.mrf.mxu0 }
0x15ae   : > { %8999 = vmatpush1.bf16.msra.mxu1 %v8956_v61 }
0x15af   : > { %v8906_v47 = vpop.f32.mrf.mxu0  ;;  %9000 = vmatprep.subr.bf16.mxu1 %v18330_v39 }
0x15b1   : > { %v13597_v18 = vpop.f32.mrf.mxu0 }
0x15b2   : > { %9001 = vmatpush1.bf16.msra.mxu1 %v8955_v4 }
0x15b3   : > { %v8909_v21 = vpop.f32.mrf.mxu0  ;;  %9002 = vmatprep.subr.bf16.mxu1 %v18330_v39 }
0x15b5   : > { %v13598_v45 = vpop.f32.mrf.mxu0 }
0x15b6   : > { %9003 = vmatpush1.bf16.msra.mxu1 %v8954_v30 }
0x15b7   : > { %v8914_v63 = vpop.f32.mrf.mxu0  ;;  %9004 = vmatprep.subr.bf16.mxu1 %v18330_v39 }
0x15b9   : > { %v13601_v60 = vpop.f32.mrf.mxu0 }
0x15ba   : > { %9005 = vmatpush1.bf16.msra.mxu1 %v8953_v6 }
0x15bb   : > { %v8917_v46 = vpop.f32.mrf.mxu0  ;;  %9006 = vmatprep.subr.bf16.mxu1 %v18330_v39 }
0x15bc   : > { %v8958_v56 = vpack.c.bf16 %v8917_v46, %v8914_v63 }
0x15bd   : > { %v13602_v26 = vpop.f32.mrf.mxu0 }
0x15be   : > { %9007 = vmatpush1.bf16.msra.mxu1 %v8952_v51 }
0x15bf   : > { %v8922_v44 = vpop.f32.mrf.mxu0  ;;  %9008 = vmatprep.subr.bf16.mxu1 %v18330_v39 }
0x15c1   : > { %v13605_v49 = vpop.f32.mrf.mxu0 }
0x15c2   : > { %9009 = vmatpush1.bf16.msra.mxu1 %v8951_v0 }
0x15c3   : > { %v8925_v20 = vpop.f32.mrf.mxu0  ;;  %9010 = vmatprep.subr.bf16.mxu1 %v18330_v39 }
0x15c4   : > { %v8959_v7 = vpack.c.bf16 %v8925_v20, %v8922_v44 }
0x15c5   : > { %v13606_v59 = vpop.f32.mrf.mxu0 }
0x15c6   : > { %9011 = vmatpush1.bf16.msra.mxu1 %v8950_v2 }
0x15c7   : > { %v8930_v22 = vpop.f32.mrf.mxu0  ;;  %9012 = vmatprep.subr.bf16.mxu1 %v18330_v39 }
0x15c9   : > { %v13609_v57 = vpop.f32.mrf.mxu0 }
0x15ca   : > { %9013 = vmatpush1.bf16.msra.mxu1 %v8949_v32  ;;  %v8957_v32 = vpack.c.bf16 %v8909_v21, %v8906_v47 }
0x15cb   : > { %v8933_v11 = vpop.f32.mrf.mxu0  ;;  %9020 = vmatprep.subr.bf16.mxu1 %v18330_v39 }
0x15cc   : > { %v8960_v33 = vpack.c.bf16 %v8933_v11, %v8930_v22 }
0x15cd   : > { %v13610_v34 = vpop.f32.mrf.mxu0 }
0x15cf   : > { %v8938_v3 = vpop.f32.mrf.mxu0 }
0x15d0   : > { %v8961_v52 = vpack.c.bf16 %v8938_v3, %v8938_v3 }
0x15d1   : > { %v13613_v9 = vpop.f32.mrf.mxu0 }
0x15d2   : > { %v8996_v23 = vand.u32 %v8961_v52, %v18331_v27 }
0x15d3   : > { %v8941_v14 = vpop.f32.mrf.mxu0 }
0x15d4   : > { %9021 = vmatpush2.bf16.msra.mxu1 %v8996_v23 }
0x15d5   : > { %v13614_v2 = vpop.f32.mrf.mxu0  ;;  %9022 = vmatprep.subr.bf16.mxu1 %v18330_v39 }
0x15d8   : > { %9023 = vmatpush2.bf16.msra.mxu1 %v8960_v33 }
0x15d9   : > { %9024 = vmatprep.subr.bf16.mxu1 %v18330_v39 }
0x15dc   : > { %9025 = vmatpush2.bf16.msra.mxu1 %v8959_v7 }
0x15dd   : > { %9026 = vmatprep.subr.bf16.mxu1 %v18330_v39 }
0x15e0   : > { %9027 = vmatpush2.bf16.msra.mxu1 %v8958_v56 }
0x15e1   : > { %9028 = vmatprep.subr.bf16.mxu1 %v18330_v39 }
0x15e4   : > { %9029 = vmatpush2.bf16.msra.mxu1 %v8957_v32 }
0x15e5   : > { %13615 = vmatprep.subr.bf16.mxu1 %v18211_v53 }
0x15e7   : > { %9031 = vmatmul.mubr.bf16.vlgmr.msra.gmra.mxu1 %v14186_v48 }
0x15e8   : > { %11125 = vmatprep.mubr.msk.bf16.mxu1 %vm3335_vm2, %v14189_v40  ;;  %13616 = vmatpush3.bf16.msra.mxu1 %v14192_v31 }
0x15e9   : > { %13617 = vmatprep.subr.bf16.mxu1 %v18211_v53 }
0x15ec   : > { %13618 = vmatpush3.bf16.msra.mxu1 %v14193_v55 }
0x15ed   : > { %13619 = vmatprep.subr.bf16.mxu1 %v18211_v53 }
0x15ef   : > { %9039 = vmatmul.mubr.bf16.gmra.mxu1 %v14191_v10 }
0x15f0   : > { %11126 = vmatprep.mubr.msk.bf16.mxu1 %vm3335_vm2, %v11123_v50  ;;  %13620 = vmatpush3.bf16.msra.mxu1 %v14196_v13 }
0x15f1   : > { %13621 = vmatprep.subr.bf16.mxu1 %v18211_v53 }
0x15f4   : > { %13622 = vmatpush3.bf16.msra.mxu1 %v14197_v8 }
0x15f5   : > { %9564 = vmatprep.subr.bf16.mxu1 %v18330_v39 }
0x15f7   : > { %9047 = vmatmul.mubr.bf16.gmra.mxu1 %v11122_v24 }
0x15f8   : > { %13623 = vmatprep.mubr.msk.bf16.mxu1 %vm14245_vm0, %v18211_v53 }
0x15ff   : > { %13624 = vmatmul.mubr.msk.bf16.vlgmr.msra.gmra.mxu1 %vm2929_vm1, %v16929_v41 }
0x1600   : > { %13627 = vmatprep.mubr.msk.bf16.mxu1 %vm14245_vm0, %v18211_v53 }
0x1607   : > { %13628 = vmatmul.mubr.msk.bf16.gmra.mxu1 %vm2929_vm1, %v16946_v38 }
0x1608   : > { %13631 = vmatprep.mubr.msk.bf16.mxu1 %vm14245_vm0, %v18211_v53 }
0x160f   : > { %13632 = vmatmul.mubr.msk.bf16.gmra.mxu1 %vm2929_vm1, %v16964_v15 }
0x1610   : > { %13635 = vmatprep.mubr.msk.bf16.mxu1 %vm14245_vm0, %v18211_v53 }
0x1617   : > { %13636 = vmatmul.mubr.msk.bf16.gmra.mxu1 %vm2929_vm1, %v16979_v37 }
0x1618   : > { %13639 = vmatprep.mubr.msk.bf16.mxu1 %vm14245_vm0, %v18211_v53 }
0x161f   : > { %13640 = vmatmul.mubr.msk.bf16.gmra.mxu1 %vm2929_vm1, %v16993_v62 }
0x1620   : > { %13643 = vmatprep.mubr.msk.bf16.mxu1 %vm14245_vm0, %v18211_v53 }
0x1627   : > { %13644 = vmatmul.mubr.msk.bf16.gmra.mxu1 %vm2929_vm1, %v17007_v19 }
0x1628   : > { %13647 = vmatprep.mubr.msk.bf16.mxu1 %vm14245_vm0, %v18211_v53 }
0x162f   : > { %13648 = vmatmul.mubr.msk.bf16.gmra.mxu1 %vm2929_vm1, %v17021_v12 }
0x1630   : > { %13651 = vmatprep.mubr.msk.bf16.mxu1 %vm14245_vm0, %v18211_v53 }
0x1637   : > { %13652 = vmatmul.mubr.msk.bf16.gmra.mxu1 %vm2929_vm1, %v17035_v43 }
0x1638   : > { %13655 = vmatprep.mubr.msk.bf16.mxu1 %vm14245_vm0, %v18211_v53 }
0x163f   : > { %13656 = vmatmul.mubr.msk.bf16.gmra.mxu1 %vm2929_vm1, %v17049_v16 }
0x1640   : > { %13659 = vmatprep.mubr.msk.bf16.mxu1 %vm14245_vm0, %v18211_v53 }
0x1647   : > { %13660 = vmatmul.mubr.msk.bf16.gmra.mxu1 %vm2929_vm1, %v17063_v36 }
0x1648   : > { %13663 = vmatprep.mubr.msk.bf16.mxu1 %vm14245_vm0, %v18211_v53 }
0x164f   : > { %13664 = vmatmul.mubr.msk.bf16.gmra.mxu1 %vm2929_vm1, %v17077_v25 }
0x1650   : > { %13667 = vmatprep.mubr.msk.bf16.mxu1 %vm14245_vm0, %v18211_v53 }
0x1657   : > { %13668 = vmatmul.mubr.msk.bf16.gmra.mxu1 %vm2929_vm1, %v17091_v28 }
0x1658   : > { %13671 = vmatprep.mubr.msk.bf16.mxu1 %vm14245_vm0, %v18211_v53 }
0x165f   : > { %13672 = vmatmul.mubr.msk.bf16.gmra.mxu1 %vm2929_vm1, %v17102_v58 }
0x16a7   : > { %v9032_v61 = vpop.f32.mrf.mxu1 }
0x16a8   : > { %v17847_v54 = vadd.f32 %v9032_v61, %v17731_v5  ;;  %v14200_v5 = vld [vmem:[%s18177_s6 + $0xf4] ss:$8 sps:$4 sm:$0xff]  }
0x16a9   : > { %v9034_v47 = vpop.f32.mrf.mxu1  ;;  %11163 = vmatprep.mubr.msk.bf16.mxu0 %vm3335_vm2, %v14200_v5 }
0x16ab   : > { %v9035_v4 = vpop.f32.mrf.mxu1 }
0x16ac   : > { %v17850_v18 = vadd.f32 %v9035_v4, %v17734_v1 }
0x16ad   : > { %v9037_v21 = vpop.f32.mrf.mxu1 }
0x16af   : > { %v9040_v30 = vpop.f32.mrf.mxu1 }
0x16b0   : > { %v17853_v45 = vadd.f32 %v9040_v30, %v17737_v17 }
0x16b1   : > { %v9042_v63 = vpop.f32.mrf.mxu1 }
0x16b3   : > { %v9043_v6 = vpop.f32.mrf.mxu1 }
0x16b4   : > { %v17856_v60 = vadd.f32 %v9043_v6, %v17740_v35 }
0x16b5   : > { %v9045_v46 = vpop.f32.mrf.mxu1 }
0x16b7   : > { %v9048_v51 = vpop.f32.mrf.mxu1 }
0x16b8   : > { %v17863_v1 = vadd.f32 %v9048_v51, %v17747_v29 }
0x16b9   : > { %v9050_v26 = vpop.f32.mrf.mxu1 }
0x16bb   : > { %v9051_v44 = vpop.f32.mrf.mxu1 }
0x16bd   : > { %v9052_v17 = vpop.f32.mrf.mxu1 }
0x16bf   : > { %v17865_v0 = vpop.f32.mrf.mxu1 }
0x16c1   : > { %v13625_v49 = vpop.f32.mrf.mxu1 }
0x16c3   : > { %v17867_v20 = vpop.f32.mrf.mxu1 }
0x16c4   : > { %v9232_v35 = vpack.c.bf16 %v17867_v20, %v17865_v0 }
0x16c5   : > { %v13626_v59 = vpop.f32.mrf.mxu1 }
0x16c7   : > { %v9133_v22 = vpop.f32.mrf.mxu1 }
0x16c9   : > { %v13629_v57 = vpop.f32.mrf.mxu1 }
0x16cb   : > { %v9136_v11 = vpop.f32.mrf.mxu1 }
0x16cc   : > { %v9233_v34 = vpack.c.bf16 %v9136_v11, %v9133_v22 }
0x16cd   : > { %v13630_v3 = vpop.f32.mrf.mxu1 }
0x16cf   : > { %v9141_v52 = vpop.f32.mrf.mxu1 }
0x16d1   : > { %v13633_v29 = vpop.f32.mrf.mxu1 }
0x16d3   : > { %v9144_v9 = vpop.f32.mrf.mxu1 }
0x16d4   : > { %v9234_v3 = vpack.c.bf16 %v9144_v9, %v9141_v52 }
0x16d5   : > { %v13634_v23 = vpop.f32.mrf.mxu1 }
0x16d7   : > { %v9149_v14 = vpop.f32.mrf.mxu1 }
0x16d9   : > { %v13637_v2 = vpop.f32.mrf.mxu1 }
0x16db   : > { %v9152_v33 = vpop.f32.mrf.mxu1 }
0x16dc   : > { %v9235_v22 = vpack.c.bf16 %v9152_v33, %v9149_v14 }
0x16dd   : > { %v13638_v7 = vpop.f32.mrf.mxu1 }
0x16df   : > { %v9157_v56 = vpop.f32.mrf.mxu1 }
0x16e1   : > { %v13641_v32 = vpop.f32.mrf.mxu1 }
0x16e3   : > { %v9160_v48 = vpop.f32.mrf.mxu1 }
0x16e4   : > { %v9236_v17 = vpack.c.bf16 %v9160_v48, %v9157_v56 }
0x16e5   : > { %v13642_v40 = vpop.f32.mrf.mxu1 }
0x16e7   : > { %v9165_v31 = vpop.f32.mrf.mxu1 }
0x16e9   : > { %v13645_v55 = vpop.f32.mrf.mxu1 }
0x16ea   : > { %v14198_v55 = vld [vmem:[%s18177_s6 + $0xf0] ss:$8 sps:$4 sm:$0xff]  }
0x16eb   : > { %v9168_v42 = vpop.f32.mrf.mxu1 }
0x16ec   : > { %v9237_v51 = vpack.c.bf16 %v9168_v42, %v9165_v31  ;;  %v14201_v42 = vld [vmem:[%s18177_s6 + $0x104] ss:$8 sps:$4 sm:$0xff]  }
0x16ed   : > { %v13646_v10 = vpop.f32.mrf.mxu1 }
0x16ee   : > { %v14204_v10 = vld [vmem:[%s14369_s9 + $0xf8] sm:$0xff]  }
0x16ef   : > { %v9173_v50 = vpop.f32.mrf.mxu1 }
0x16f1   : > { %v13649_v13 = vpop.f32.mrf.mxu1 }
0x16f2   : > { %v11156_v13 = vld [vmem:[%s18177_s6 + $0x110] sm:$0x33] }
0x16f3   : > { %v9176_v8 = vpop.f32.mrf.mxu1 }
0x16f4   : > { %v9238_v6 = vpack.c.bf16 %v9176_v8, %v9173_v50  ;;  %v14205_v50 = vld [vmem:[%s14369_s9 + $0xf0] sm:$0xff]   ;;  %v14203_v8 = vld [vmem:[%s18177_s6 + $0x100] ss:$8 sps:$4 sm:$0xff]  }
0x16f5   : > { %v13650_v24 = vpop.f32.mrf.mxu1 }
0x16f6   : > { %v11162_v24 = vcombine.high %v11156_v13, %v11156_v13 }
0x16f7   : > { %v9181_v61 = vpop.f32.mrf.mxu1 }
0x16f9   : > { %v13653_v47 = vpop.f32.mrf.mxu1 }
0x16fa   : > { %v14209_v47 = vld [vmem:[%s14369_s9 + $0xe0] sm:$0xff]  }
0x16fb   : > { %v9184_v4 = vpop.f32.mrf.mxu1 }
0x16fc   : > { %v9239_v21 = vpack.c.bf16 %v9184_v4, %v9181_v61  ;;  %v14208_v61 = vld [vmem:[%s14369_s9 + $0xe8] sm:$0xff]   ;;  %v11161_v4 = vcombine.low %v11156_v13, %v11156_v13 }
0x16fd   : > { %v13654_v30 = vpop.f32.mrf.mxu1 }
0x16fe   : > { %9282 = vmatpush1.bf16.msra.mxu0 %v9239_v21 }
0x16ff   : > { %v9189_v63 = vpop.f32.mrf.mxu1  ;;  %9283 = vmatprep.subr.bf16.mxu0 %v18330_v39 }
0x1701   : > { %v13657_v5 = vpop.f32.mrf.mxu1 }
0x1702   : > { %9284 = vmatpush1.bf16.msra.mxu0 %v9238_v6 }
0x1703   : > { %v9192_v46 = vpop.f32.mrf.mxu1  ;;  %9285 = vmatprep.subr.bf16.mxu0 %v18330_v39 }
0x1705   : > { %v13658_v26 = vpop.f32.mrf.mxu1 }
0x1706   : > { %9286 = vmatpush1.bf16.msra.mxu0 %v9237_v51 }
0x1707   : > { %v9197_v44 = vpop.f32.mrf.mxu1  ;;  %9287 = vmatprep.subr.bf16.mxu0 %v18330_v39 }
0x1709   : > { %v13661_v49 = vpop.f32.mrf.mxu1 }
0x170a   : > { %9288 = vmatpush1.bf16.msra.mxu0 %v9236_v17 }
0x170b   : > { %v9200_v59 = vpop.f32.mrf.mxu1  ;;  %9289 = vmatprep.subr.bf16.mxu0 %v18330_v39 }
0x170c   : > { %v9241_v20 = vpack.c.bf16 %v9200_v59, %v9197_v44 }
0x170d   : > { %v13662_v57 = vpop.f32.mrf.mxu1 }
0x170e   : > { %9290 = vmatpush1.bf16.msra.mxu0 %v9235_v22 }
0x170f   : > { %v9205_v11 = vpop.f32.mrf.mxu1  ;;  %9291 = vmatprep.subr.bf16.mxu0 %v18330_v39 }
0x1711   : > { %v13665_v29 = vpop.f32.mrf.mxu1 }
0x1712   : > { %9292 = vmatpush1.bf16.msra.mxu0 %v9234_v3 }
0x1713   : > { %v9208_v23 = vpop.f32.mrf.mxu1  ;;  %9293 = vmatprep.subr.bf16.mxu0 %v18330_v39 }
0x1714   : > { %v9242_v0 = vpack.c.bf16 %v9208_v23, %v9205_v11 }
0x1715   : > { %v13666_v2 = vpop.f32.mrf.mxu1 }
0x1716   : > { %9294 = vmatpush1.bf16.msra.mxu0 %v9233_v34 }
0x1717   : > { %v9213_v7 = vpop.f32.mrf.mxu1  ;;  %9295 = vmatprep.subr.bf16.mxu0 %v18330_v39 }
0x1719   : > { %v13669_v56 = vpop.f32.mrf.mxu1 }
0x171a   : > { %9296 = vmatpush1.bf16.msra.mxu0 %v9232_v35  ;;  %v9240_v35 = vpack.c.bf16 %v9192_v46, %v9189_v63 }
0x171b   : > { %v9216_v14 = vpop.f32.mrf.mxu1  ;;  %9303 = vmatprep.subr.bf16.mxu0 %v18330_v39 }
0x171c   : > { %v9243_v31 = vpack.c.bf16 %v9216_v14, %v9213_v7 }
0x171d   : > { %v13670_v33 = vpop.f32.mrf.mxu1 }
0x171f   : > { %v9221_v52 = vpop.f32.mrf.mxu1 }
0x1720   : > { %v9244_v9 = vpack.c.bf16 %v9221_v52, %v9221_v52 }
0x1721   : > { %v13673_v32 = vpop.f32.mrf.mxu1 }
0x1722   : > { %v9279_v48 = vand.u32 %v9244_v9, %v18331_v27 }
0x1723   : > { %v9224_v40 = vpop.f32.mrf.mxu1 }
0x1724   : > { %9304 = vmatpush2.bf16.msra.mxu0 %v9279_v48 }
0x1725   : > { %v13674_v34 = vpop.f32.mrf.mxu1  ;;  %9305 = vmatprep.subr.bf16.mxu0 %v18330_v39 }
0x1728   : > { %9306 = vmatpush2.bf16.msra.mxu0 %v9243_v31 }
0x1729   : > { %9307 = vmatprep.subr.bf16.mxu0 %v18330_v39 }
0x172c   : > { %9308 = vmatpush2.bf16.msra.mxu0 %v9242_v0 }
0x172d   : > { %9309 = vmatprep.subr.bf16.mxu0 %v18330_v39 }
0x1730   : > { %9310 = vmatpush2.bf16.msra.mxu0 %v9241_v20 }
0x1731   : > { %9311 = vmatprep.subr.bf16.mxu0 %v18330_v39 }
0x1734   : > { %9312 = vmatpush2.bf16.msra.mxu0 %v9240_v35 }
0x1735   : > { %13675 = vmatprep.subr.bf16.mxu0 %v18211_v53 }
0x1737   : > { %9314 = vmatmul.mubr.bf16.vlgmr.msra.gmra.mxu0 %v14198_v55 }
0x1738   : > { %11164 = vmatprep.mubr.msk.bf16.mxu0 %vm3335_vm2, %v14201_v42  ;;  %13676 = vmatpush3.bf16.msra.mxu0 %v14204_v10 }
0x1739   : > { %13677 = vmatprep.subr.bf16.mxu0 %v18211_v53 }
0x173c   : > { %13678 = vmatpush3.bf16.msra.mxu0 %v14205_v50 }
0x173d   : > { %13679 = vmatprep.subr.bf16.mxu0 %v18211_v53 }
0x173f   : > { %9322 = vmatmul.mubr.bf16.gmra.mxu0 %v14203_v8 }
0x1740   : > { %11165 = vmatprep.mubr.msk.bf16.mxu0 %vm3335_vm2, %v11162_v24  ;;  %13680 = vmatpush3.bf16.msra.mxu0 %v14208_v61 }
0x1741   : > { %13681 = vmatprep.subr.bf16.mxu0 %v18211_v53 }
0x1744   : > { %13682 = vmatpush3.bf16.msra.mxu0 %v14209_v47 }
0x1745   : > { %9847 = vmatprep.subr.bf16.mxu0 %v18330_v39 }
0x1747   : > { %9330 = vmatmul.mubr.bf16.gmra.mxu0 %v11161_v4 }
0x1748   : > { %13683 = vmatprep.mubr.msk.bf16.mxu0 %vm14245_vm0, %v18211_v53 }
0x174f   : > { %13684 = vmatmul.mubr.msk.bf16.vlgmr.msra.gmra.mxu0 %vm2929_vm1, %v16929_v41 }
0x1750   : > { %13687 = vmatprep.mubr.msk.bf16.mxu0 %vm14245_vm0, %v18211_v53 }
0x1757   : > { %13688 = vmatmul.mubr.msk.bf16.gmra.mxu0 %vm2929_vm1, %v16946_v38 }
0x1758   : > { %13691 = vmatprep.mubr.msk.bf16.mxu0 %vm14245_vm0, %v18211_v53 }
0x175f   : > { %13692 = vmatmul.mubr.msk.bf16.gmra.mxu0 %vm2929_vm1, %v16964_v15 }
0x1760   : > { %13695 = vmatprep.mubr.msk.bf16.mxu0 %vm14245_vm0, %v18211_v53 }
0x1767   : > { %13696 = vmatmul.mubr.msk.bf16.gmra.mxu0 %vm2929_vm1, %v16979_v37 }
0x1768   : > { %13699 = vmatprep.mubr.msk.bf16.mxu0 %vm14245_vm0, %v18211_v53 }
0x176f   : > { %13700 = vmatmul.mubr.msk.bf16.gmra.mxu0 %vm2929_vm1, %v16993_v62 }
0x1770   : > { %13703 = vmatprep.mubr.msk.bf16.mxu0 %vm14245_vm0, %v18211_v53 }
0x1777   : > { %13704 = vmatmul.mubr.msk.bf16.gmra.mxu0 %vm2929_vm1, %v17007_v19 }
0x1778   : > { %13707 = vmatprep.mubr.msk.bf16.mxu0 %vm14245_vm0, %v18211_v53 }
0x177f   : > { %13708 = vmatmul.mubr.msk.bf16.gmra.mxu0 %vm2929_vm1, %v17021_v12 }
0x1780   : > { %13711 = vmatprep.mubr.msk.bf16.mxu0 %vm14245_vm0, %v18211_v53 }
0x1787   : > { %13712 = vmatmul.mubr.msk.bf16.gmra.mxu0 %vm2929_vm1, %v17035_v43 }
0x1788   : > { %13715 = vmatprep.mubr.msk.bf16.mxu0 %vm14245_vm0, %v18211_v53 }
0x178f   : > { %13716 = vmatmul.mubr.msk.bf16.gmra.mxu0 %vm2929_vm1, %v17049_v16 }
0x1790   : > { %13719 = vmatprep.mubr.msk.bf16.mxu0 %vm14245_vm0, %v18211_v53 }
0x1797   : > { %13720 = vmatmul.mubr.msk.bf16.gmra.mxu0 %vm2929_vm1, %v17063_v36 }
0x1798   : > { %13723 = vmatprep.mubr.msk.bf16.mxu0 %vm14245_vm0, %v18211_v53 }
0x179f   : > { %13724 = vmatmul.mubr.msk.bf16.gmra.mxu0 %vm2929_vm1, %v17077_v25 }
0x17a0   : > { %13727 = vmatprep.mubr.msk.bf16.mxu0 %vm14245_vm0, %v18211_v53 }
0x17a7   : > { %13728 = vmatmul.mubr.msk.bf16.gmra.mxu0 %vm2929_vm1, %v17091_v28 }
0x17a8   : > { %13731 = vmatprep.mubr.msk.bf16.mxu0 %vm14245_vm0, %v18211_v53 }
0x17af   : > { %13732 = vmatmul.mubr.msk.bf16.gmra.mxu0 %vm2929_vm1, %v17102_v58 }
0x17f7   : > { %v9315_v21 = vpop.f32.mrf.mxu0 }
0x17f8   : > { %v17963_v30 = vadd.f32 %v9315_v21, %v17847_v54  ;;  %v14212_v54 = vld [vmem:[%s18177_s6 + $0x11c] ss:$8 sps:$4 sm:$0xff]  }
0x17f9   : > { %v9317_v63 = vpop.f32.mrf.mxu0  ;;  %11202 = vmatprep.mubr.msk.bf16.mxu1 %vm3335_vm2, %v14212_v54 }
0x17fb   : > { %v9318_v6 = vpop.f32.mrf.mxu0 }
0x17fc   : > { %v17966_v5 = vadd.f32 %v9318_v6, %v17850_v18 }
0x17fd   : > { %v9320_v46 = vpop.f32.mrf.mxu0 }
0x17ff   : > { %v9323_v51 = vpop.f32.mrf.mxu0 }
0x1800   : > { %v17969_v26 = vadd.f32 %v9323_v51, %v17853_v45 }
0x1801   : > { %v9325_v44 = vpop.f32.mrf.mxu0 }
0x1803   : > { %v9326_v17 = vpop.f32.mrf.mxu0 }
0x1804   : > { %v17972_v49 = vadd.f32 %v9326_v17, %v17856_v60 }
0x1805   : > { %v9328_v59 = vpop.f32.mrf.mxu0 }
0x1807   : > { %v9331_v22 = vpop.f32.mrf.mxu0 }
0x1808   : > { %v17979_v18 = vadd.f32 %v9331_v22, %v17863_v1 }
0x1809   : > { %v9333_v57 = vpop.f32.mrf.mxu0 }
0x180b   : > { %v9334_v11 = vpop.f32.mrf.mxu0 }
0x180d   : > { %v9335_v45 = vpop.f32.mrf.mxu0 }
0x180f   : > { %v17981_v3 = vpop.f32.mrf.mxu0 }
0x1811   : > { %v13685_v29 = vpop.f32.mrf.mxu0 }
0x1813   : > { %v17983_v23 = vpop.f32.mrf.mxu0 }
0x1814   : > { %v9515_v60 = vpack.c.bf16 %v17983_v23, %v17981_v3 }
0x1815   : > { %v13686_v2 = vpop.f32.mrf.mxu0 }
0x1817   : > { %v9416_v7 = vpop.f32.mrf.mxu0 }
0x1819   : > { %v13689_v56 = vpop.f32.mrf.mxu0 }
0x181b   : > { %v9419_v14 = vpop.f32.mrf.mxu0 }
0x181c   : > { %v9516_v33 = vpack.c.bf16 %v9419_v14, %v9416_v7 }
0x181d   : > { %v13690_v52 = vpop.f32.mrf.mxu0 }
0x181f   : > { %v9424_v9 = vpop.f32.mrf.mxu0 }
0x1821   : > { %v13693_v1 = vpop.f32.mrf.mxu0 }
0x1823   : > { %v9427_v32 = vpop.f32.mrf.mxu0 }
0x1824   : > { %v9517_v52 = vpack.c.bf16 %v9427_v32, %v9424_v9 }
0x1825   : > { %v13694_v48 = vpop.f32.mrf.mxu0 }
0x1827   : > { %v9432_v40 = vpop.f32.mrf.mxu0 }
0x1829   : > { %v13697_v34 = vpop.f32.mrf.mxu0 }
0x182b   : > { %v9435_v31 = vpop.f32.mrf.mxu0 }
0x182c   : > { %v9518_v7 = vpack.c.bf16 %v9435_v31, %v9432_v40 }
0x182d   : > { %v13698_v0 = vpop.f32.mrf.mxu0 }
0x182f   : > { %v9440_v20 = vpop.f32.mrf.mxu0 }
0x1831   : > { %v13701_v35 = vpop.f32.mrf.mxu0 }
0x1833   : > { %v9443_v55 = vpop.f32.mrf.mxu0 }
0x1834   : > { %v9519_v45 = vpack.c.bf16 %v9443_v55, %v9440_v20 }
0x1835   : > { %v13702_v42 = vpop.f32.mrf.mxu0 }
0x1837   : > { %v9448_v10 = vpop.f32.mrf.mxu0 }
0x1839   : > { %v13705_v50 = vpop.f32.mrf.mxu0 }
0x183a   : > { %v14210_v50 = vld [vmem:[%s18177_s6 + $0x118] ss:$8 sps:$4 sm:$0xff]  }
0x183b   : > { %v9451_v13 = vpop.f32.mrf.mxu0 }
0x183c   : > { %v9520_v22 = vpack.c.bf16 %v9451_v13, %v9448_v10  ;;  %v14213_v13 = vld [vmem:[%s18177_s6 + $0x12c] ss:$8 sps:$4 sm:$0xff]  }
0x183d   : > { %v13706_v8 = vpop.f32.mrf.mxu0 }
0x183e   : > { %v14216_v8 = vld [vmem:[%s14369_s9 + $0x118] sm:$0xff]  }
0x183f   : > { %v9456_v24 = vpop.f32.mrf.mxu0 }
0x1841   : > { %v13709_v61 = vpop.f32.mrf.mxu0 }
0x1842   : > { %v11195_v61 = vld [vmem:[%s18177_s6 + $0x138] sm:$0x33] }
0x1843   : > { %v9459_v47 = vpop.f32.mrf.mxu0 }
0x1844   : > { %v9521_v17 = vpack.c.bf16 %v9459_v47, %v9456_v24  ;;  %v14217_v24 = vld [vmem:[%s14369_s9 + $0x110] sm:$0xff]  }
0x1845   : > { %v13710_v4 = vpop.f32.mrf.mxu0  ;;  %v14215_v47 = vld [vmem:[%s18177_s6 + $0x128] ss:$8 sps:$4 sm:$0xff]  }
0x1846   : > { %v11201_v4 = vcombine.high %v11195_v61, %v11195_v61 }
0x1847   : > { %v9464_v21 = vpop.f32.mrf.mxu0 }
0x1849   : > { %v13713_v63 = vpop.f32.mrf.mxu0 }
0x184a   : > { %v14221_v63 = vld [vmem:[%s14369_s9 + $0x100] sm:$0xff]  }
0x184b   : > { %v9467_v6 = vpop.f32.mrf.mxu0 }
0x184c   : > { %v9522_v46 = vpack.c.bf16 %v9467_v6, %v9464_v21  ;;  %v14220_v21 = vld [vmem:[%s14369_s9 + $0x108] sm:$0xff]   ;;  %v11200_v6 = vcombine.low %v11195_v61, %v11195_v61 }
0x184d   : > { %v13714_v51 = vpop.f32.mrf.mxu0 }
0x184e   : > { %9565 = vmatpush1.bf16.msra.mxu1 %v9522_v46 }
0x184f   : > { %v9472_v44 = vpop.f32.mrf.mxu0  ;;  %9566 = vmatprep.subr.bf16.mxu1 %v18330_v39 }
0x1851   : > { %v13717_v54 = vpop.f32.mrf.mxu0 }
0x1852   : > { %9567 = vmatpush1.bf16.msra.mxu1 %v9521_v17 }
0x1853   : > { %v9475_v59 = vpop.f32.mrf.mxu0  ;;  %9568 = vmatprep.subr.bf16.mxu1 %v18330_v39 }
0x1855   : > { %v13718_v57 = vpop.f32.mrf.mxu0 }
0x1856   : > { %9569 = vmatpush1.bf16.msra.mxu1 %v9520_v22 }
0x1857   : > { %v9480_v11 = vpop.f32.mrf.mxu0  ;;  %9570 = vmatprep.subr.bf16.mxu1 %v18330_v39 }
0x1859   : > { %v13721_v29 = vpop.f32.mrf.mxu0 }
0x185a   : > { %9571 = vmatpush1.bf16.msra.mxu1 %v9519_v45 }
0x185b   : > { %v9483_v2 = vpop.f32.mrf.mxu0  ;;  %9572 = vmatprep.subr.bf16.mxu1 %v18330_v39 }
0x185c   : > { %v9524_v23 = vpack.c.bf16 %v9483_v2, %v9480_v11 }
0x185d   : > { %v13722_v56 = vpop.f32.mrf.mxu0 }
0x185e   : > { %9573 = vmatpush1.bf16.msra.mxu1 %v9518_v7 }
0x185f   : > { %v9488_v14 = vpop.f32.mrf.mxu0  ;;  %9574 = vmatprep.subr.bf16.mxu1 %v18330_v39 }
0x1861   : > { %v13725_v1 = vpop.f32.mrf.mxu0 }
0x1862   : > { %9575 = vmatpush1.bf16.msra.mxu1 %v9517_v52 }
0x1863   : > { %v9491_v48 = vpop.f32.mrf.mxu0  ;;  %9576 = vmatprep.subr.bf16.mxu1 %v18330_v39 }
0x1864   : > { %v9525_v3 = vpack.c.bf16 %v9491_v48, %v9488_v14 }
0x1865   : > { %v13726_v34 = vpop.f32.mrf.mxu0 }
0x1866   : > { %9577 = vmatpush1.bf16.msra.mxu1 %v9516_v33 }
0x1867   : > { %v9496_v0 = vpop.f32.mrf.mxu0  ;;  %9578 = vmatprep.subr.bf16.mxu1 %v18330_v39 }
0x1869   : > { %v13729_v20 = vpop.f32.mrf.mxu0 }
0x186a   : > { %9579 = vmatpush1.bf16.msra.mxu1 %v9515_v60  ;;  %v9523_v60 = vpack.c.bf16 %v9475_v59, %v9472_v44 }
0x186b   : > { %v9499_v40 = vpop.f32.mrf.mxu0  ;;  %9586 = vmatprep.subr.bf16.mxu1 %v18330_v39 }
0x186c   : > { %v9526_v10 = vpack.c.bf16 %v9499_v40, %v9496_v0 }
0x186d   : > { %v13730_v31 = vpop.f32.mrf.mxu0 }
0x186f   : > { %v9504_v9 = vpop.f32.mrf.mxu0 }
0x1870   : > { %v9527_v32 = vpack.c.bf16 %v9504_v9, %v9504_v9 }
0x1871   : > { %v13733_v35 = vpop.f32.mrf.mxu0 }
0x1872   : > { %v9562_v55 = vand.u32 %v9527_v32, %v18331_v27 }
0x1873   : > { %v9507_v42 = vpop.f32.mrf.mxu0 }
0x1874   : > { %9587 = vmatpush2.bf16.msra.mxu1 %v9562_v55 }
0x1875   : > { %v13734_v33 = vpop.f32.mrf.mxu0  ;;  %9588 = vmatprep.subr.bf16.mxu1 %v18330_v39 }
0x1878   : > { %9589 = vmatpush2.bf16.msra.mxu1 %v9526_v10 }
0x1879   : > { %9590 = vmatprep.subr.bf16.mxu1 %v18330_v39 }
0x187c   : > { %9591 = vmatpush2.bf16.msra.mxu1 %v9525_v3 }
0x187d   : > { %9592 = vmatprep.subr.bf16.mxu1 %v18330_v39 }
0x1880   : > { %9593 = vmatpush2.bf16.msra.mxu1 %v9524_v23 }
0x1881   : > { %9594 = vmatprep.subr.bf16.mxu1 %v18330_v39 }
0x1884   : > { %9595 = vmatpush2.bf16.msra.mxu1 %v9523_v60 }
0x1885   : > { %13735 = vmatprep.subr.bf16.mxu1 %v18211_v53 }
0x1887   : > { %9597 = vmatmul.mubr.bf16.vlgmr.msra.gmra.mxu1 %v14210_v50 }
0x1888   : > { %11203 = vmatprep.mubr.msk.bf16.mxu1 %vm3335_vm2, %v14213_v13  ;;  %13736 = vmatpush3.bf16.msra.mxu1 %v14216_v8 }
0x1889   : > { %13737 = vmatprep.subr.bf16.mxu1 %v18211_v53 }
0x188c   : > { %13738 = vmatpush3.bf16.msra.mxu1 %v14217_v24 }
0x188d   : > { %13739 = vmatprep.subr.bf16.mxu1 %v18211_v53 }
0x188f   : > { %9605 = vmatmul.mubr.bf16.gmra.mxu1 %v14215_v47 }
0x1890   : > { %11204 = vmatprep.mubr.msk.bf16.mxu1 %vm3335_vm2, %v11201_v4  ;;  %13740 = vmatpush3.bf16.msra.mxu1 %v14220_v21 }
0x1891   : > { %13741 = vmatprep.subr.bf16.mxu1 %v18211_v53 }
0x1894   : > { %13742 = vmatpush3.bf16.msra.mxu1 %v14221_v63 }
0x1897   : > { %9613 = vmatmul.mubr.bf16.gmra.mxu1 %v11200_v6 }
0x1898   : > { %13743 = vmatprep.mubr.msk.bf16.mxu1 %vm14245_vm0, %v18211_v53 }
0x189f   : > { %13744 = vmatmul.mubr.msk.bf16.vlgmr.msra.gmra.mxu1 %vm2929_vm1, %v16929_v41 }
0x18a0   : > { %13747 = vmatprep.mubr.msk.bf16.mxu1 %vm14245_vm0, %v18211_v53 }
0x18a7   : > { %13748 = vmatmul.mubr.msk.bf16.gmra.mxu1 %vm2929_vm1, %v16946_v38 }
0x18a8   : > { %13751 = vmatprep.mubr.msk.bf16.mxu1 %vm14245_vm0, %v18211_v53 }
0x18af   : > { %13752 = vmatmul.mubr.msk.bf16.gmra.mxu1 %vm2929_vm1, %v16964_v15 }
0x18b0   : > { %13755 = vmatprep.mubr.msk.bf16.mxu1 %vm14245_vm0, %v18211_v53 }
0x18b7   : > { %13756 = vmatmul.mubr.msk.bf16.gmra.mxu1 %vm2929_vm1, %v16979_v37 }
0x18b8   : > { %13759 = vmatprep.mubr.msk.bf16.mxu1 %vm14245_vm0, %v18211_v53 }
0x18bf   : > { %13760 = vmatmul.mubr.msk.bf16.gmra.mxu1 %vm2929_vm1, %v16993_v62 }
0x18c0   : > { %13763 = vmatprep.mubr.msk.bf16.mxu1 %vm14245_vm0, %v18211_v53 }
0x18c7   : > { %13764 = vmatmul.mubr.msk.bf16.gmra.mxu1 %vm2929_vm1, %v17007_v19 }
0x18c8   : > { %13767 = vmatprep.mubr.msk.bf16.mxu1 %vm14245_vm0, %v18211_v53 }
0x18cf   : > { %13768 = vmatmul.mubr.msk.bf16.gmra.mxu1 %vm2929_vm1, %v17021_v12 }
0x18d0   : > { %13771 = vmatprep.mubr.msk.bf16.mxu1 %vm14245_vm0, %v18211_v53 }
0x18d7   : > { %13772 = vmatmul.mubr.msk.bf16.gmra.mxu1 %vm2929_vm1, %v17035_v43 }
0x18d8   : > { %13775 = vmatprep.mubr.msk.bf16.mxu1 %vm14245_vm0, %v18211_v53 }
0x18df   : > { %13776 = vmatmul.mubr.msk.bf16.gmra.mxu1 %vm2929_vm1, %v17049_v16 }
0x18e0   : > { %13779 = vmatprep.mubr.msk.bf16.mxu1 %vm14245_vm0, %v18211_v53 }
0x18e7   : > { %13780 = vmatmul.mubr.msk.bf16.gmra.mxu1 %vm2929_vm1, %v17063_v36 }
0x18e8   : > { %13783 = vmatprep.mubr.msk.bf16.mxu1 %vm14245_vm0, %v18211_v53 }
0x18ef   : > { %13784 = vmatmul.mubr.msk.bf16.gmra.mxu1 %vm2929_vm1, %v17077_v25 }
0x18f0   : > { %13787 = vmatprep.mubr.msk.bf16.mxu1 %vm14245_vm0, %v18211_v53 }
0x18f7   : > { %13788 = vmatmul.mubr.msk.bf16.gmra.mxu1 %vm2929_vm1, %v17091_v28  ;;  %v14224_v28 = vld [vmem:[%s18177_s6 + $0x144] ss:$8 sps:$4 sm:$0xff]  }
0x18f8   : > { %13791 = vmatprep.mubr.msk.bf16.mxu1 %vm14245_vm0, %v18211_v53  ;;  %11241 = vmatprep.mubr.msk.bf16.mxu0 %vm3335_vm2, %v14224_v28 }
0x18ff   : > { %13792 = vmatmul.mubr.msk.bf16.gmra.mxu1 %vm2929_vm1, %v17102_v58 }
0x1947   : > { %v9598_v41 = vpop.f32.mrf.mxu1 }
0x1948   : > { %v18078_v38 = vadd.f32 %v9598_v41, %v17963_v30 }
0x1949   : > { %v9600_v15 = vpop.f32.mrf.mxu1 }
0x194b   : > { %v9601_v37 = vpop.f32.mrf.mxu1 }
0x194c   : > { %v18081_v62 = vadd.f32 %v9601_v37, %v17966_v5 }
0x194d   : > { %v9603_v19 = vpop.f32.mrf.mxu1 }
0x194f   : > { %v9606_v12 = vpop.f32.mrf.mxu1 }
0x1950   : > { %v18084_v43 = vadd.f32 %v9606_v12, %v17969_v26 }
0x1951   : > { %v9608_v16 = vpop.f32.mrf.mxu1 }
0x1953   : > { %v9609_v36 = vpop.f32.mrf.mxu1 }
0x1954   : > { %v18087_v25 = vadd.f32 %v9609_v36, %v17972_v49 }
0x1955   : > { %v9611_v58 = vpop.f32.mrf.mxu1 }
0x1957   : > { %v9614_v30 = vpop.f32.mrf.mxu1 }
0x1958   : > { %v18094_v5 = vadd.f32 %v9614_v30, %v17979_v18 }
0x1959   : > { %v9616_v46 = vpop.f32.mrf.mxu1 }
0x195b   : > { %v9617_v51 = vpop.f32.mrf.mxu1 }
0x195d   : > { %v9618_v26 = vpop.f32.mrf.mxu1 }
0x195f   : > { %v18096_v44 = vpop.f32.mrf.mxu1 }
0x1961   : > { %v13745_v17 = vpop.f32.mrf.mxu1 }
0x1963   : > { %v18098_v54 = vpop.f32.mrf.mxu1 }
0x1964   : > { %v9798_v49 = vpack.c.bf16 %v18098_v54, %v18096_v44 }
0x1965   : > { %v13746_v59 = vpop.f32.mrf.mxu1 }
0x1967   : > { %v9699_v22 = vpop.f32.mrf.mxu1 }
0x1969   : > { %v13749_v57 = vpop.f32.mrf.mxu1 }
0x196b   : > { %v9702_v11 = vpop.f32.mrf.mxu1 }
0x196c   : > { %v9799_v45 = vpack.c.bf16 %v9702_v11, %v9699_v22 }
0x196d   : > { %v13750_v29 = vpop.f32.mrf.mxu1 }
0x196f   : > { %v9707_v2 = vpop.f32.mrf.mxu1 }
0x1971   : > { %v13753_v18 = vpop.f32.mrf.mxu1 }
0x1972   : > { %v11234_v18 = vld [vmem:[%s18177_s6 + $0x160] sm:$0x33] }
0x1973   : > { %v9710_v7 = vpop.f32.mrf.mxu1 }
0x1974   : > { %v9800_v16 = vpack.c.bf16 %v9710_v7, %v9707_v2  ;;  %v14225_v2 = vld [vmem:[%s18177_s6 + $0x154] ss:$8 sps:$4 sm:$0xff]   ;;  %v11240_v7 = vcombine.high %v11234_v18, %v11234_v18 }
0x1975   : > { %v13754_v56 = vpop.f32.mrf.mxu1 }
0x1976   : > { %v11239_v56 = vcombine.low %v11234_v18, %v11234_v18 }
0x1977   : > { %v9715_v14 = vpop.f32.mrf.mxu1 }
0x1979   : > { %v13757_v52 = vpop.f32.mrf.mxu1 }
0x197b   : > { %v9718_v1 = vpop.f32.mrf.mxu1 }
0x197c   : > { %v9801_v37 = vpack.c.bf16 %v9718_v1, %v9715_v14 }
0x197d   : > { %v13758_v48 = vpop.f32.mrf.mxu1 }
0x197f   : > { %v9723_v34 = vpop.f32.mrf.mxu1 }
0x1981   : > { %v13761_v0 = vpop.f32.mrf.mxu1 }
0x1983   : > { %v9726_v20 = vpop.f32.mrf.mxu1 }
0x1984   : > { %v9802_v6 = vpack.c.bf16 %v9726_v20, %v9723_v34  ;;  %v18340_v34 = vld [vmem:[#allocation46_spill] sm:$0xff] }
0x1985   : > { %v13762_v40 = vpop.f32.mrf.mxu1 }
0x1987   : > { %v9731_v31 = vpop.f32.mrf.mxu1 }
0x1989   : > { %v13765_v9 = vpop.f32.mrf.mxu1 }
0x198b   : > { %v9734_v32 = vpop.f32.mrf.mxu1 }
0x198c   : > { %v9803_v4 = vpack.c.bf16 %v9734_v32, %v9731_v31 }
0x198d   : > { %v13766_v35 = vpop.f32.mrf.mxu1 }
0x198f   : > { %v9739_v55 = vpop.f32.mrf.mxu1 }
0x1991   : > { %v13769_v42 = vpop.f32.mrf.mxu1 }
0x1993   : > { %v9742_v33 = vpop.f32.mrf.mxu1 }
0x1994   : > { %v9804_v24 = vpack.c.bf16 %v9742_v33, %v9739_v55 }
0x1995   : > { %v13770_v10 = vpop.f32.mrf.mxu1 }
0x1997   : > { %v9747_v3 = vpop.f32.mrf.mxu1 }
0x1999   : > { %v13773_v23 = vpop.f32.mrf.mxu1 }
0x199b   : > { %v9750_v60 = vpop.f32.mrf.mxu1 }
0x199c   : > { %v9805_v50 = vpack.c.bf16 %v9750_v60, %v9747_v3 }
0x199d   : > { %v13774_v13 = vpop.f32.mrf.mxu1 }
0x199e   : > { %9848 = vmatpush1.bf16.msra.mxu0 %v9805_v50 }
0x199f   : > { %v9755_v8 = vpop.f32.mrf.mxu1  ;;  %9849 = vmatprep.subr.bf16.mxu0 %v18330_v39 }
0x19a1   : > { %v13777_v61 = vpop.f32.mrf.mxu1 }
0x19a2   : > { %9850 = vmatpush1.bf16.msra.mxu0 %v9804_v24 }
0x19a3   : > { %v9758_v47 = vpop.f32.mrf.mxu1  ;;  %9851 = vmatprep.subr.bf16.mxu0 %v18330_v39 }
0x19a5   : > { %v13778_v21 = vpop.f32.mrf.mxu1 }
0x19a6   : > { %9852 = vmatpush1.bf16.msra.mxu0 %v9803_v4 }
0x19a7   : > { %v9763_v63 = vpop.f32.mrf.mxu1  ;;  %9853 = vmatprep.subr.bf16.mxu0 %v18330_v39 }
0x19a9   : > { %v13781_v41 = vpop.f32.mrf.mxu1 }
0x19aa   : > { %9854 = vmatpush1.bf16.msra.mxu0 %v9802_v6  ;;  %v14231_v6 = vld [vmem:[%s16491_s16 + $0x1c] sm:$0xff]   ;;  %v14232_v41 = vld [vmem:[%s16491_s16 + $0x24] ss:$0 sps:$4 sm:$0x33]  }
0x19ab   : > { %v9766_v15 = vpop.f32.mrf.mxu1  ;;  %9855 = vmatprep.subr.bf16.mxu0 %v18330_v39 }
0x19ac   : > { %v9807_v54 = vpack.c.bf16 %v9766_v15, %v9763_v63 }
0x19ad   : > { %v13782_v19 = vpop.f32.mrf.mxu1 }
0x19ae   : > { %9856 = vmatpush1.bf16.msra.mxu0 %v9801_v37 }
0x19af   : > { %v9771_v12 = vpop.f32.mrf.mxu1  ;;  %9857 = vmatprep.subr.bf16.mxu0 %v18330_v39 }
0x19b1   : > { %v13785_v36 = vpop.f32.mrf.mxu1 }
0x19b2   : > { %9858 = vmatpush1.bf16.msra.mxu0 %v9800_v16 }
0x19b3   : > { %v9774_v28 = vpop.f32.mrf.mxu1  ;;  %9859 = vmatprep.subr.bf16.mxu0 %v18330_v39 }
0x19b4   : > { %v9808_v44 = vpack.c.bf16 %v9774_v28, %v9771_v12 }
0x19b5   : > { %v13786_v58 = vpop.f32.mrf.mxu1 }
0x19b6   : > { %9860 = vmatpush1.bf16.msra.mxu0 %v9799_v45 }
0x19b7   : > { %v9779_v30 = vpop.f32.mrf.mxu1  ;;  %9861 = vmatprep.subr.bf16.mxu0 %v18330_v39 }
0x19b9   : > { %v13789_v46 = vpop.f32.mrf.mxu1 }
0x19ba   : > { %9862 = vmatpush1.bf16.msra.mxu0 %v9798_v49  ;;  %v9806_v49 = vpack.c.bf16 %v9758_v47, %v9755_v8 }
0x19bb   : > { %v9782_v51 = vpop.f32.mrf.mxu1  ;;  %9869 = vmatprep.subr.bf16.mxu0 %v18330_v39 }
0x19bc   : > { %v9809_v29 = vpack.c.bf16 %v9782_v51, %v9779_v30 }
0x19bd   : > { %v13790_v26 = vpop.f32.mrf.mxu1 }
0x19bf   : > { %v9787_v17 = vpop.f32.mrf.mxu1 }
0x19c0   : > { %v9810_v59 = vpack.c.bf16 %v9787_v17, %v9787_v17 }
0x19c1   : > { %v13793_v22 = vpop.f32.mrf.mxu1 }
0x19c2   : > { %v9845_v57 = vand.u32 %v9810_v59, %v18331_v27  ;;  %v14222_v27 = vld [vmem:[%s18177_s6 + $0x140] ss:$8 sps:$4 sm:$0xff]  }
0x19c3   : > { %v9790_v11 = vpop.f32.mrf.mxu1 }
0x19c4   : > { %9870 = vmatpush2.bf16.msra.mxu0 %v9845_v57 }
0x19c5   : > { %v13794_v45 = vpop.f32.mrf.mxu1  ;;  %9871 = vmatprep.subr.bf16.mxu0 %v18330_v39 }
0x19c8   : > { %9872 = vmatpush2.bf16.msra.mxu0 %v9809_v29 }
0x19c9   : > { %9873 = vmatprep.subr.bf16.mxu0 %v18330_v39 }
0x19cc   : > { %9874 = vmatpush2.bf16.msra.mxu0 %v9808_v44 }
0x19cd   : > { %9875 = vmatprep.subr.bf16.mxu0 %v18330_v39 }
0x19d0   : > { %9876 = vmatpush2.bf16.msra.mxu0 %v9807_v54 }
0x19d1   : > { %9877 = vmatprep.subr.bf16.mxu0 %v18330_v39  ;;  %v14227_v39 = vld [vmem:[%s18177_s6 + $0x150] ss:$8 sps:$4 sm:$0xff]  }
0x19d4   : > { %9878 = vmatpush2.bf16.msra.mxu0 %v9806_v49 }
0x19d5   : > { %13795 = vmatprep.subr.bf16.mxu0 %v18211_v53 }
0x19d7   : > { %9880 = vmatmul.mubr.bf16.vlgmr.msra.gmra.mxu0 %v14222_v27 }
0x19d8   : > { %11242 = vmatprep.mubr.msk.bf16.mxu0 %vm3335_vm2, %v14225_v2 }
0x19df   : > { %9888 = vmatmul.mubr.bf16.gmra.mxu0 %v14227_v39 }
0x19e0   : > { %11243 = vmatprep.mubr.msk.bf16.mxu0 %vm3335_vm2, %v11240_v7 }
0x19e7   : > { %9896 = vmatmul.mubr.bf16.gmra.mxu0 %v11239_v56 }
0x19e8   : > { %13801 = vmatprep.mubr.msk.bf16.mxu0 %vm14245_vm0, %v18211_v53 }
0x1a97   : > { %v9881_v14 = vpop.f32.mrf.mxu0 }
0x1a98   : > { %v9903_v52 = vadd.f32 %v9881_v14, %v18078_v38 }
0x1a99   : > { %v9883_v1 = vpop.f32.mrf.mxu0 }
0x1a9a   : > { %v9908_v0 = vadd.f32 %v9903_v52, %v18340_v34 }
0x1a9b   : > { %v9884_v48 = vpop.f32.mrf.mxu0 }
0x1a9c   : > { %v9904_v20 = vadd.f32 %v9884_v48, %v18081_v62  ;;  %v9913_v32 = vmax.f32 %v9908_v0, 0.0 }
0x1a9d   : > { %v9886_v40 = vpop.f32.mrf.mxu0 }
0x1a9e   : > { %v9909_v31 = vadd.f32 %v9904_v20, %v18340_v34 }
0x1a9f   : > { %v9889_v9 = vpop.f32.mrf.mxu0 }
0x1aa0   : > { %v9914_v35 = vmax.f32 %v9909_v31, 0.0  ;;  %v9905_v55 = vadd.f32 %v9889_v9, %v18084_v43 }
0x1aa1   : > { %v9891_v42 = vpop.f32.mrf.mxu0 }
0x1aa2   : > { %v9918_v33 = vpack.c.bf16 %v9914_v35, %v9913_v32  ;;  %v9910_v3 = vadd.f32 %v9905_v55, %v18340_v34 }
0x1aa3   : > { %v9892_v10 = vpop.f32.mrf.mxu0 }
0x1aa4   : > { %v9906_v38 = vadd.f32 %v9892_v10, %v18087_v25  ;;  %v9915_v62 = vmax.f32 %v9910_v3, 0.0 }
0x1aa5   : > { %v9894_v23 = vpop.f32.mrf.mxu0 }
0x1aa6   : > { %v9911_v60 = vadd.f32 %v9906_v38, %v18340_v34 }
0x1aa7   : > { %v9897_v50 = vpop.f32.mrf.mxu0 }
0x1aa8   : > { %v9916_v13 = vmax.f32 %v9911_v60, 0.0  ;;  %v9907_v8 = vadd.f32 %v9897_v50, %v18094_v5  ;;  %v14230_v5 = vld [vmem:[%s16491_s16 + $0x14] sm:$0xff]  }
0x1aa9   : > { %v9899_v24 = vpop.f32.mrf.mxu0 }
0x1aaa   : > { %v9919_v61 = vpack.c.bf16 %v9916_v13, %v9915_v62  ;;  %v9912_v43 = vadd.f32 %v9907_v8, %v18340_v34 }
0x1aab   : > { %v9900_v47 = vpop.f32.mrf.mxu0 }
0x1aac   : > { %v9917_v4 = vmax.f32 %v9912_v43, 0.0 }
0x1aad   : > { %v9901_v21 = vpop.f32.mrf.mxu0 }
0x1aae   : > { %v9920_v63 = vpack.c.bf16 %v9917_v4, %v9917_v4 }
0x1ab0   : > { %v9950_v25 = vsel %vm3346_vm4, %v9920_v63, 0 }
0x1ab1   : > { %13796 = vmatpush3.bf16.msra.mxu0 %v9950_v25 }
0x1ab2   : > { %13797 = vmatprep.subr.bf16.mxu0 %v18211_v53 }
0x1ab5   : > { %13798 = vmatpush3.bf16.msra.mxu0 %v9919_v61 }
0x1ab6   : > { %13799 = vmatprep.subr.bf16.mxu0 %v18211_v53 }
0x1ab9   : > { %13800 = vmatpush3.bf16.msra.mxu0 %v9918_v33 }
0x1abc   : > { %13802 = vmatmul.mubr.msk.bf16.vlgmr.msra.gmra.mxu0 %vm5529_vm5, %v14230_v5 }
0x1abd   : > { %13805 = vmatprep.mubr.msk.bf16.mxu0 %vm14245_vm0, %v18211_v53 }
0x1ac4   : > { %13806 = vmatmul.mubr.msk.bf16.gmra.mxu0 %vm5529_vm5, %v14231_v6 }
0x1ac5   : > { %13809 = vmatprep.mubr.msk.bf16.mxu0 %vm14245_vm0, %v18211_v53 }
0x1acc   : > { %13810 = vmatmul.mubr.msk.bf16.gmra.mxu0 %vm5529_vm5, %v14232_v41 }
0x1b7c   : > { %v9986_v15 = vpop.f32.mrf.mxu0 }
0x1b7d   : > { %v11275_v37 = vpack.c.bf16 %v9986_v15, %v9986_v15 }
0x1b7e   : > { %v13803_v19 = vpop.f32.mrf.mxu0 }
0x1b7f   : > { %11260 = vst.msk [vmem:[%s16680_s23 + $0x14] sm:$0xf] %vm5619_vm6, %v11275_v37 }
0x1b80   : > { %v9989_v12 = vpop.f32.mrf.mxu0 }
0x1b81   : > { %v11276_v16 = vpack.c.bf16 %v9989_v12, %v9989_v12 }
0x1b82   : > { %v13804_v36 = vpop.f32.mrf.mxu0 }
0x1b83   : > { %11261 = vst.msk [vmem:[%s16680_s23 + $0x18] sm:$0xf] %vm5619_vm6, %v11276_v16 }
0x1b84   : > { %v9994_v28 = vpop.f32.mrf.mxu0 }
0x1b85   : > { %v11277_v58 = vpack.c.bf16 %v9994_v28, %v9994_v28 }
0x1b86   : > { %v13807_v30 = vpop.f32.mrf.mxu0 }
0x1b87   : > { %11262 = vst.msk [vmem:[%s16680_s23 + $0x1c] sm:$0xf] %vm5619_vm6, %v11277_v58 }
0x1b88   : > { %v9997_v53 = vpop.f32.mrf.mxu0 }
0x1b89   : > { %v11278_v46 = vpack.c.bf16 %v9997_v53, %v9997_v53 }
0x1b8a   : > { %v13808_v51 = vpop.f32.mrf.mxu0 }
0x1b8b   : > { %11263 = vst.msk [vmem:[%s16680_s23 + $0x20] sm:$0xf] %vm5619_vm6, %v11278_v46 }
0x1b8c   : > { %v10002_v26 = vpop.f32.mrf.mxu0 }
0x1b8d   : > { %v11279_v17 = vpack.c.bf16 %v10002_v26, %v10002_v26 }
0x1b8e   : > { %v13811_v59 = vpop.f32.mrf.mxu0 }
0x1b8f   : > { %11264 = vst.msk [vmem:[%s16680_s23 + $0x24] sm:$0x3] %vm5624_vm7, %v11279_v17 }
0x1b90   : > { %v10005_v22 = vpop.f32.mrf.mxu0 }
0x1b92   : > { %v13812_v57 = vpop.f32.mrf.mxu0 }
0x1b93 PF: > { %s18_s27 = sadd.s32 1, %s14242_s27  }
0x1b94   : > { %p15_p7 = scmp.ge.s32.totalorder %s18_s27, 6  }
0x1b96   :  { %17 = sbr.rel (!%p15_p7) target bundleno = 1 (0x1), region = 121 }

</bundles_post_ra>
